<compile_context>
chip_gen: v5e
topology: v5e:2x2
jax: 0.10.0
libtpu: 0.0.40
codegen_flags: <defaults>
</compile_context>

<pallas_src>
import functools

import jax
import jax.numpy as jnp
from jax.experimental import pallas as pl
from jax.experimental.pallas import tpu as pltpu


KSIZE = 5  # Conv2d(kernel_size=5, stride=1, padding=2)


# ---------------------------------------------------------------------------
# Fused kernel: one grid step == one batch element.
# ---------------------------------------------------------------------------
def _fused_cnn_kernel(x_ref, w1_ref, b1_ref, w2_ref, b2_ref,
                      wfc_ref, bfc_ref, wout_ref, bout_ref,
                      o_ref,
                      xpad1_ref, col1_ref, xpad2_ref, col2_ref,
                      *, H, W, Cin, C1, C2):
    P = KSIZE // 2
    H2, W2 = H // 2, W // 2
    H4, W4 = H2 // 2, W2 // 2
    Ofc = wfc_ref.shape[2]

    # ---- conv block 1: pad (VMEM) -> im2col -> one MXU matmul -> bias+ReLU -> 2x2 maxpool
    xpad1_ref[...] = jnp.zeros_like(xpad1_ref)
    xpad1_ref[P:P + H, P:P + W, :] = x_ref[0]                      # (H, W, Cin)
    for kh in range(KSIZE):                                        # static 5x5 unroll
        for kw in range(KSIZE):
            c0 = (kh * KSIZE + kw) * Cin
            col1_ref[:, c0:c0 + Cin] = (
                xpad1_ref[kh:kh + H, kw:kw + W, :].reshape(H * W, Cin))
    y1 = jnp.dot(col1_ref[...], w1_ref[...],
                 preferred_element_type=jnp.float32)               # (H*W, C1)
    y1 = jnp.maximum(y1 + b1_ref[...], 0.0)
    y1 = jnp.max(y1.reshape(H, W2, 2, C1), axis=2)                 # (H, W2, C1)
    y1 = jnp.max(y1.reshape(H2, 2, W2, C1), axis=1)                # (H2, W2, C1)

    # ---- conv block 2
    xpad2_ref[...] = jnp.zeros_like(xpad2_ref)
    xpad2_ref[P:P + H2, P:P + W2, :] = y1
    for kh in range(KSIZE):
        for kw in range(KSIZE):
            c0 = (kh * KSIZE + kw) * C1
            col2_ref[:, c0:c0 + C1] = (
                xpad2_ref[kh:kh + H2, kw:kw + W2, :].reshape(H2 * W2, C1))
    y2 = jnp.dot(col2_ref[...], w2_ref[...],
                 preferred_element_type=jnp.float32)               # (H2*W2, C2)
    y2 = jnp.maximum(y2 + b2_ref[...], 0.0)
    y2 = jnp.max(y2.reshape(H2, W4, 2, C2), axis=2)                # (H2, W4, C2)
    y2 = jnp.max(y2.reshape(H4, 2, W4, C2), axis=1)                # (H4, W4, C2)

    # ---- fc + output.  The flatten-order permutation lives in the packed
    # fc weights (shape (spatial, C2, fc_out)); a batched matmul over the
    # 16 spatial positions avoids any lane-crossing reshape/transpose.
    feat = y2.reshape(H4 * W4, 1, C2)                              # (P, 1, C2)
    partial = jnp.einsum("pqc,pco->pqo", feat, wfc_ref[...],
                         preferred_element_type=jnp.float32)       # (P, 1, Ofc)
    hidden = (jnp.sum(partial.reshape(H4 * W4, Ofc), axis=0, keepdims=True)
              + bfc_ref[...])                                      # (1, Ofc)
    out = jnp.dot(hidden, wout_ref[...],
                  preferred_element_type=jnp.float32) + bout_ref[...]
    o_ref[0] = out.astype(o_ref.dtype)                             # (1, n_classes)


def _cnn_pallas(x_nhwc, pk, n_classes):
    N, H, W, Cin = x_nhwc.shape
    C1 = pk["w1"].shape[1]
    C2 = pk["w2"].shape[1]
    H2, W2 = H // 2, W // 2
    P = KSIZE // 2

    kern = functools.partial(_fused_cnn_kernel, H=H, W=W, Cin=Cin, C1=C1, C2=C2)
    full2d = lambda n: (0, 0)
    out = pl.pallas_call(
        kern,
        out_shape=jax.ShapeDtypeStruct((N, 1, n_classes), x_nhwc.dtype),
        grid=(N,),
        in_specs=[
            pl.BlockSpec((1, H, W, Cin), lambda n: (n, 0, 0, 0)),
            pl.BlockSpec(pk["w1"].shape, full2d),        # (25*Cin, C1)
            pl.BlockSpec(pk["b1"].shape, full2d),        # (1, C1)
            pl.BlockSpec(pk["w2"].shape, full2d),        # (25*C1, C2)
            pl.BlockSpec(pk["b2"].shape, full2d),        # (1, C2)
            pl.BlockSpec(pk["wfc"].shape, lambda n: (0, 0, 0)),   # (P, C2, Ofc)
            pl.BlockSpec(pk["bfc"].shape, full2d),       # (1, Ofc)
            pl.BlockSpec(pk["wout"].shape, full2d),      # (Ofc, n_classes)
            pl.BlockSpec(pk["bout"].shape, full2d),      # (1, n_classes)
        ],
        out_specs=pl.BlockSpec((1, 1, n_classes), lambda n: (n, 0, 0)),
        scratch_shapes=[
            pltpu.VMEM((H + 2 * P, W + 2 * P, Cin), jnp.float32),      # padded input
            pltpu.VMEM((H * W, KSIZE * KSIZE * Cin), jnp.float32),     # im2col layer 1
            pltpu.VMEM((H2 + 2 * P, W2 + 2 * P, C1), jnp.float32),     # padded pooled-1
            pltpu.VMEM((H2 * W2, KSIZE * KSIZE * C1), jnp.float32),    # im2col layer 2
        ],
        compiler_params=pltpu.CompilerParams(dimension_semantics=("parallel",)),
    )(x_nhwc, pk["w1"], pk["b1"], pk["w2"], pk["b2"],
      pk["wfc"], pk["bfc"], pk["wout"], pk["bout"])
    return out.reshape(N, n_classes)


# ---------------------------------------------------------------------------
# Parameters: generated in PyTorch layouts, then packed for the kernel.
# ---------------------------------------------------------------------------
def init_params(key, n_in=3, n_classes=10, n_filters=8, size=16):
    ks = jax.random.split(key, 8)
    c1, c2 = n_filters, 2 * n_filters
    d_fc_in = c2 * (size // 4) * (size // 4)
    s = 0.05
    return {
        # PyTorch layouts: Conv2d OIHW, Linear (out, in)
        "w1": jax.random.normal(ks[0], (c1, n_in, KSIZE, KSIZE), jnp.float32) * s,
        "b1": jax.random.normal(ks[1], (c1,), jnp.float32) * s,
        "w2": jax.random.normal(ks[2], (c2, c1, KSIZE, KSIZE), jnp.float32) * s,
        "b2": jax.random.normal(ks[3], (c2,), jnp.float32) * s,
        "wfc": jax.random.normal(ks[4], (c2, d_fc_in), jnp.float32) * s,
        "bfc": jax.random.normal(ks[5], (c2,), jnp.float32) * s,
        "wout": jax.random.normal(ks[6], (n_classes, c2), jnp.float32) * s,
        "bout": jax.random.normal(ks[7], (n_classes,), jnp.float32) * s,
    }


def pack_params(p, size=16):
    c1, n_in = p["w1"].shape[0], p["w1"].shape[1]
    c2 = p["w2"].shape[0]
    n_classes = p["wout"].shape[0]
    fc_out = p["wfc"].shape[0]
    h4 = size // 4
    # conv OIHW -> (KH*KW*Cin, Cout), row index = (kh*KW + kw)*Cin + cin
    w1 = jnp.transpose(p["w1"], (2, 3, 1, 0)).reshape(KSIZE * KSIZE * n_in, c1)
    w2 = jnp.transpose(p["w2"], (2, 3, 1, 0)).reshape(KSIZE * KSIZE * c1, c2)
    # fc weight (out, C2*H4*W4) -> (spatial, C2, out); absorbs the PyTorch NCHW
    # flatten order (c*16 + h*W4 + w) vs the kernel's HWC order.
    wfc = jnp.transpose(p["wfc"].reshape(fc_out, c2, h4 * h4), (2, 1, 0))
    return {
        "w1": w1, "b1": p["b1"].reshape(1, c1),
        "w2": w2, "b2": p["b2"].reshape(1, c2),
        "wfc": wfc, "bfc": p["bfc"].reshape(1, fc_out),
        "wout": p["wout"].T, "bout": p["bout"].reshape(1, n_classes),
    }


@jax.jit
def test_cnn_forward(x_nchw, packed):
    x_nhwc = jnp.transpose(x_nchw, (0, 2, 3, 1))     # NCHW -> NHWC (tiny, one XLA op)
    n_classes = packed["wout"].shape[1]
    return _cnn_pallas(x_nhwc, packed, n_classes)


# ---------------------------------------------------------------------------
# Pure-JAX reference (mirrors the PyTorch module) for a correctness check.
# ---------------------------------------------------------------------------
def reference_forward(x, p):
    dn = ("NCHW", "OIHW", "NCHW")
    pad = ((KSIZE // 2, KSIZE // 2), (KSIZE // 2, KSIZE // 2))
    y = jax.lax.conv_general_dilated(x, p["w1"], (1, 1), pad, dimension_numbers=dn)
    y = jax.nn.relu(y + p["b1"][None, :, None, None])
    y = jax.lax.reduce_window(y, -jnp.inf, jax.lax.max, (1, 1, 2, 2), (1, 1, 2, 2), "VALID")
    y = jax.lax.conv_general_dilated(y, p["w2"], (1, 1), pad, dimension_numbers=dn)
    y = jax.nn.relu(y + p["b2"][None, :, None, None])
    y = jax.lax.reduce_window(y, -jnp.inf, jax.lax.max, (1, 1, 2, 2), (1, 1, 2, 2), "VALID")
    y = y.reshape(y.shape[0], -1)
    y = y @ p["wfc"].T + p["bfc"]
    return y @ p["wout"].T + p["bout"]


if __name__ == "__main__":
    key = jax.random.PRNGKey(0)
    kx, kp = jax.random.split(key)

    # test_cnn(n_in=3, n_classes=10, n_filters=8, size=16), batch 2
    N, n_in, size = 2, 3, 16
    n_filters, n_classes = 8, 10

    x = jax.random.normal(kx, (N, n_in, size, size), jnp.float32)
    params = init_params(kp, n_in=n_in, n_classes=n_classes,
                         n_filters=n_filters, size=size)
    packed = pack_params(params, size=size)

    out = test_cnn_forward(x, packed)
    jax.block_until_ready(out)
    assert out.shape == (N, n_classes), out.shape

    ref = reference_forward(x, params)
    max_err = float(jnp.max(jnp.abs(out - ref)))
    assert bool(jnp.allclose(out, ref, atol=2e-2, rtol=2e-2)), max_err

    print("KERNEL_OK")
</pallas_src>

<mosaic_0001>
module attributes {stable_mosaic.version = 11 : i64} {
  func.func @_fused_cnn_kernel(%arg0: i32, %arg1: memref<1x16x16x3xf32, #tpu.memory_space<vmem>>, %arg2: memref<75x8xf32, #tpu.memory_space<vmem>>, %arg3: memref<1x8xf32, #tpu.memory_space<vmem>>, %arg4: memref<200x16xf32, #tpu.memory_space<vmem>>, %arg5: memref<1x16xf32, #tpu.memory_space<vmem>>, %arg6: memref<16x16x16xf32, #tpu.memory_space<vmem>>, %arg7: memref<1x16xf32, #tpu.memory_space<vmem>>, %arg8: memref<16x10xf32, #tpu.memory_space<vmem>>, %arg9: memref<1x10xf32, #tpu.memory_space<vmem>>, %arg10: memref<1x1x10xf32, #tpu.memory_space<vmem>>, %arg11: memref<20x20x3xf32, #tpu.memory_space<vmem>>, %arg12: memref<256x75xf32, #tpu.memory_space<vmem>>, %arg13: memref<12x12x8xf32, #tpu.memory_space<vmem>>, %arg14: memref<64x200xf32, #tpu.memory_space<vmem>>) attributes {dimension_semantics = [#tpu.dimension_semantics<parallel>], iteration_bounds = array<i64: 2>, scalar_prefetch = 0 : i64, scratch_operands = 4 : i64, tpu.core_type = #tpu.core_type<tc>, window_params = [{transform_indices = @transform_0, window_bounds = array<i64: 1, 16, 16, 3>}, {pipeline_mode = #tpu.pipeline_mode<synchronous>, transform_indices = @transform_1, window_bounds = array<i64: 75, 8>}, {pipeline_mode = #tpu.pipeline_mode<synchronous>, transform_indices = @transform_2, window_bounds = array<i64: 1, 8>}, {pipeline_mode = #tpu.pipeline_mode<synchronous>, transform_indices = @transform_3, window_bounds = array<i64: 200, 16>}, {pipeline_mode = #tpu.pipeline_mode<synchronous>, transform_indices = @transform_4, window_bounds = array<i64: 1, 16>}, {pipeline_mode = #tpu.pipeline_mode<synchronous>, transform_indices = @transform_5, window_bounds = array<i64: 16, 16, 16>}, {pipeline_mode = #tpu.pipeline_mode<synchronous>, transform_indices = @transform_6, window_bounds = array<i64: 1, 16>}, {pipeline_mode = #tpu.pipeline_mode<synchronous>, transform_indices = @transform_7, window_bounds = array<i64: 16, 10>}, {pipeline_mode = #tpu.pipeline_mode<synchronous>, transform_indices = @transform_8, window_bounds = array<i64: 1, 10>}, {transform_indices = @transform_9, window_bounds = array<i64: 1, 1, 10>}]} {
    %cst = arith.constant 0.000000e+00 : f32
    %0 = vector.broadcast %cst : f32 to vector<20x20x3xf32>
    %c0 = arith.constant 0 : index
    %c0_0 = arith.constant 0 : index
    %c0_1 = arith.constant 0 : index
    %1 = vector.load %arg11[%c0, %c0_0, %c0_1] : memref<20x20x3xf32, #tpu.memory_space<vmem>>, vector<20x20x3xf32>
    tpu.vector_store %arg11[%c0, %c0_0, %c0_1], %0 {strides = array<i32>} : memref<20x20x3xf32, #tpu.memory_space<vmem>>, vector<20x20x3xf32>,
    %c0_2 = arith.constant 0 : index
    %c0_3 = arith.constant 0 : index
    %c0_4 = arith.constant 0 : index
    %c0_5 = arith.constant 0 : index
    %2 = vector.load %arg1[%c0_2, %c0_3, %c0_4, %c0_5] : memref<1x16x16x3xf32, #tpu.memory_space<vmem>>, vector<1x16x16x3xf32>
    %3 = vector.shape_cast %2 : vector<1x16x16x3xf32> to vector<16x16x3xf32>
    %c2 = arith.constant 2 : index
    %c2_6 = arith.constant 2 : index
    %c0_7 = arith.constant 0 : index
    %4 = vector.load %arg11[%c2, %c2_6, %c0_7] : memref<20x20x3xf32, #tpu.memory_space<vmem>>, vector<16x16x3xf32>
    tpu.vector_store %arg11[%c2, %c2_6, %c0_7], %3 {strides = array<i32>} : memref<20x20x3xf32, #tpu.memory_space<vmem>>, vector<16x16x3xf32>,
    %c0_8 = arith.constant 0 : index
    %c0_9 = arith.constant 0 : index
    %c0_10 = arith.constant 0 : index
    %5 = vector.load %arg11[%c0_8, %c0_9, %c0_10] : memref<20x20x3xf32, #tpu.memory_space<vmem>>, vector<16x16x3xf32>
    %6 = vector.shape_cast %5 : vector<16x16x3xf32> to vector<256x3xf32>
    %c0_11 = arith.constant 0 : index
    %c0_12 = arith.constant 0 : index
    %7 = vector.load %arg12[%c0_11, %c0_12] : memref<256x75xf32, #tpu.memory_space<vmem>>, vector<256x3xf32>
    tpu.vector_store %arg12[%c0_11, %c0_12], %6 {strides = array<i32>} : memref<256x75xf32, #tpu.memory_space<vmem>>, vector<256x3xf32>,
    %c0_13 = arith.constant 0 : index
    %c1 = arith.constant 1 : index
    %c0_14 = arith.constant 0 : index
    %8 = vector.load %arg11[%c0_13, %c1, %c0_14] : memref<20x20x3xf32, #tpu.memory_space<vmem>>, vector<16x16x3xf32>
    %9 = vector.shape_cast %8 : vector<16x16x3xf32> to vector<256x3xf32>
    %c0_15 = arith.constant 0 : index
    %c3 = arith.constant 3 : index
    %10 = vector.load %arg12[%c0_15, %c3] : memref<256x75xf32, #tpu.memory_space<vmem>>, vector<256x3xf32>
    tpu.vector_store %arg12[%c0_15, %c3], %9 {strides = array<i32>} : memref<256x75xf32, #tpu.memory_space<vmem>>, vector<256x3xf32>,
    %c0_16 = arith.constant 0 : index
    %c2_17 = arith.constant 2 : index
    %c0_18 = arith.constant 0 : index
    %11 = vector.load %arg11[%c0_16, %c2_17, %c0_18] : memref<20x20x3xf32, #tpu.memory_space<vmem>>, vector<16x16x3xf32>
    %12 = vector.shape_cast %11 : vector<16x16x3xf32> to vector<256x3xf32>
    %c0_19 = arith.constant 0 : index
    %c6 = arith.constant 6 : index
    %13 = vector.load %arg12[%c0_19, %c6] : memref<256x75xf32, #tpu.memory_space<vmem>>, vector<256x3xf32>
    tpu.vector_store %arg12[%c0_19, %c6], %12 {strides = array<i32>} : memref<256x75xf32, #tpu.memory_space<vmem>>, vector<256x3xf32>,
    %c0_20 = arith.constant 0 : index
    %c3_21 = arith.constant 3 : index
    %c0_22 = arith.constant 0 : index
    %14 = vector.load %arg11[%c0_20, %c3_21, %c0_22] : memref<20x20x3xf32, #tpu.memory_space<vmem>>, vector<16x16x3xf32>
    %15 = vector.shape_cast %14 : vector<16x16x3xf32> to vector<256x3xf32>
    %c0_23 = arith.constant 0 : index
    %c9 = arith.constant 9 : index
    %16 = vector.load %arg12[%c0_23, %c9] : memref<256x75xf32, #tpu.memory_space<vmem>>, vector<256x3xf32>
    tpu.vector_store %arg12[%c0_23, %c9], %15 {strides = array<i32>} : memref<256x75xf32, #tpu.memory_space<vmem>>, vector<256x3xf32>,
    %c0_24 = arith.constant 0 : index
    %c4 = arith.constant 4 : index
    %c0_25 = arith.constant 0 : index
    %17 = vector.load %arg11[%c0_24, %c4, %c0_25] : memref<20x20x3xf32, #tpu.memory_space<vmem>>, vector<16x16x3xf32>
    %18 = vector.shape_cast %17 : vector<16x16x3xf32> to vector<256x3xf32>
    %c0_26 = arith.constant 0 : index
    %c12 = arith.constant 12 : index
    %19 = vector.load %arg12[%c0_26, %c12] : memref<256x75xf32, #tpu.memory_space<vmem>>, vector<256x3xf32>
    tpu.vector_store %arg12[%c0_26, %c12], %18 {strides = array<i32>} : memref<256x75xf32, #tpu.memory_space<vmem>>, vector<256x3xf32>,
    %c1_27 = arith.constant 1 : index
    %c0_28 = arith.constant 0 : index
    %c0_29 = arith.constant 0 : index
    %20 = vector.load %arg11[%c1_27, %c0_28, %c0_29] : memref<20x20x3xf32, #tpu.memory_space<vmem>>, vector<16x16x3xf32>
    %21 = vector.shape_cast %20 : vector<16x16x3xf32> to vector<256x3xf32>
    %c0_30 = arith.constant 0 : index
    %c15 = arith.constant 15 : index
    %22 = vector.load %arg12[%c0_30, %c15] : memref<256x75xf32, #tpu.memory_space<vmem>>, vector<256x3xf32>
    tpu.vector_store %arg12[%c0_30, %c15], %21 {strides = array<i32>} : memref<256x75xf32, #tpu.memory_space<vmem>>, vector<256x3xf32>,
    %c1_31 = arith.constant 1 : index
    %c1_32 = arith.constant 1 : index
    %c0_33 = arith.constant 0 : index
    %23 = vector.load %arg11[%c1_31, %c1_32, %c0_33] : memref<20x20x3xf32, #tpu.memory_space<vmem>>, vector<16x16x3xf32>
    %24 = vector.shape_cast %23 : vector<16x16x3xf32> to vector<256x3xf32>
    %c0_34 = arith.constant 0 : index
    %c18 = arith.constant 18 : index
    %25 = vector.load %arg12[%c0_34, %c18] : memref<256x75xf32, #tpu.memory_space<vmem>>, vector<256x3xf32>
    tpu.vector_store %arg12[%c0_34, %c18], %24 {strides = array<i32>} : memref<256x75xf32, #tpu.memory_space<vmem>>, vector<256x3xf32>,
    %c1_35 = arith.constant 1 : index
    %c2_36 = arith.constant 2 : index
    %c0_37 = arith.constant 0 : index
    %26 = vector.load %arg11[%c1_35, %c2_36, %c0_37] : memref<20x20x3xf32, #tpu.memory_space<vmem>>, vector<16x16x3xf32>
    %27 = vector.shape_cast %26 : vector<16x16x3xf32> to vector<256x3xf32>
    %c0_38 = arith.constant 0 : index
    %c21 = arith.constant 21 : index
    %28 = vector.load %arg12[%c0_38, %c21] : memref<256x75xf32, #tpu.memory_space<vmem>>, vector<256x3xf32>
    tpu.vector_store %arg12[%c0_38, %c21], %27 {strides = array<i32>} : memref<256x75xf32, #tpu.memory_space<vmem>>, vector<256x3xf32>,
    %c1_39 = arith.constant 1 : index
    %c3_40 = arith.constant 3 : index
    %c0_41 = arith.constant 0 : index
    %29 = vector.load %arg11[%c1_39, %c3_40, %c0_41] : memref<20x20x3xf32, #tpu.memory_space<vmem>>, vector<16x16x3xf32>
    %30 = vector.shape_cast %29 : vector<16x16x3xf32> to vector<256x3xf32>
    %c0_42 = arith.constant 0 : index
    %c24 = arith.constant 24 : index
    %31 = vector.load %arg12[%c0_42, %c24] : memref<256x75xf32, #tpu.memory_space<vmem>>, vector<256x3xf32>
    tpu.vector_store %arg12[%c0_42, %c24], %30 {strides = array<i32>} : memref<256x75xf32, #tpu.memory_space<vmem>>, vector<256x3xf32>,
    %c1_43 = arith.constant 1 : index
    %c4_44 = arith.constant 4 : index
    %c0_45 = arith.constant 0 : index
    %32 = vector.load %arg11[%c1_43, %c4_44, %c0_45] : memref<20x20x3xf32, #tpu.memory_space<vmem>>, vector<16x16x3xf32>
    %33 = vector.shape_cast %32 : vector<16x16x3xf32> to vector<256x3xf32>
    %c0_46 = arith.constant 0 : index
    %c27 = arith.constant 27 : index
    %34 = vector.load %arg12[%c0_46, %c27] : memref<256x75xf32, #tpu.memory_space<vmem>>, vector<256x3xf32>
    tpu.vector_store %arg12[%c0_46, %c27], %33 {strides = array<i32>} : memref<256x75xf32, #tpu.memory_space<vmem>>, vector<256x3xf32>,
    %c2_47 = arith.constant 2 : index
    %c0_48 = arith.constant 0 : index
    %c0_49 = arith.constant 0 : index
    %35 = vector.load %arg11[%c2_47, %c0_48, %c0_49] : memref<20x20x3xf32, #tpu.memory_space<vmem>>, vector<16x16x3xf32>
    %36 = vector.shape_cast %35 : vector<16x16x3xf32> to vector<256x3xf32>
    %c0_50 = arith.constant 0 : index
    %c30 = arith.constant 30 : index
    %37 = vector.load %arg12[%c0_50, %c30] : memref<256x75xf32, #tpu.memory_space<vmem>>, vector<256x3xf32>
    tpu.vector_store %arg12[%c0_50, %c30], %36 {strides = array<i32>} : memref<256x75xf32, #tpu.memory_space<vmem>>, vector<256x3xf32>,
    %c2_51 = arith.constant 2 : index
    %c1_52 = arith.constant 1 : index
    %c0_53 = arith.constant 0 : index
    %38 = vector.load %arg11[%c2_51, %c1_52, %c0_53] : memref<20x20x3xf32, #tpu.memory_space<vmem>>, vector<16x16x3xf32>
    %39 = vector.shape_cast %38 : vector<16x16x3xf32> to vector<256x3xf32>
    %c0_54 = arith.constant 0 : index
    %c33 = arith.constant 33 : index
    %40 = vector.load %arg12[%c0_54, %c33] : memref<256x75xf32, #tpu.memory_space<vmem>>, vector<256x3xf32>
    tpu.vector_store %arg12[%c0_54, %c33], %39 {strides = array<i32>} : memref<256x75xf32, #tpu.memory_space<vmem>>, vector<256x3xf32>,
    %c2_55 = arith.constant 2 : index
    %c2_56 = arith.constant 2 : index
    %c0_57 = arith.constant 0 : index
    %41 = vector.load %arg11[%c2_55, %c2_56, %c0_57] : memref<20x20x3xf32, #tpu.memory_space<vmem>>, vector<16x16x3xf32>
    %42 = vector.shape_cast %41 : vector<16x16x3xf32> to vector<256x3xf32>
    %c0_58 = arith.constant 0 : index
    %c36 = arith.constant 36 : index
    %43 = vector.load %arg12[%c0_58, %c36] : memref<256x75xf32, #tpu.memory_space<vmem>>, vector<256x3xf32>
    tpu.vector_store %arg12[%c0_58, %c36], %42 {strides = array<i32>} : memref<256x75xf32, #tpu.memory_space<vmem>>, vector<256x3xf32>,
    %c2_59 = arith.constant 2 : index
    %c3_60 = arith.constant 3 : index
    %c0_61 = arith.constant 0 : index
    %44 = vector.load %arg11[%c2_59, %c3_60, %c0_61] : memref<20x20x3xf32, #tpu.memory_space<vmem>>, vector<16x16x3xf32>
    %45 = vector.shape_cast %44 : vector<16x16x3xf32> to vector<256x3xf32>
    %c0_62 = arith.constant 0 : index
    %c39 = arith.constant 39 : index
    %46 = vector.load %arg12[%c0_62, %c39] : memref<256x75xf32, #tpu.memory_space<vmem>>, vector<256x3xf32>
    tpu.vector_store %arg12[%c0_62, %c39], %45 {strides = array<i32>} : memref<256x75xf32, #tpu.memory_space<vmem>>, vector<256x3xf32>,
    %c2_63 = arith.constant 2 : index
    %c4_64 = arith.constant 4 : index
    %c0_65 = arith.constant 0 : index
    %47 = vector.load %arg11[%c2_63, %c4_64, %c0_65] : memref<20x20x3xf32, #tpu.memory_space<vmem>>, vector<16x16x3xf32>
    %48 = vector.shape_cast %47 : vector<16x16x3xf32> to vector<256x3xf32>
    %c0_66 = arith.constant 0 : index
    %c42 = arith.constant 42 : index
    %49 = vector.load %arg12[%c0_66, %c42] : memref<256x75xf32, #tpu.memory_space<vmem>>, vector<256x3xf32>
    tpu.vector_store %arg12[%c0_66, %c42], %48 {strides = array<i32>} : memref<256x75xf32, #tpu.memory_space<vmem>>, vector<256x3xf32>,
    %c3_67 = arith.constant 3 : index
    %c0_68 = arith.constant 0 : index
    %c0_69 = arith.constant 0 : index
    %50 = vector.load %arg11[%c3_67, %c0_68, %c0_69] : memref<20x20x3xf32, #tpu.memory_space<vmem>>, vector<16x16x3xf32>
    %51 = vector.shape_cast %50 : vector<16x16x3xf32> to vector<256x3xf32>
    %c0_70 = arith.constant 0 : index
    %c45 = arith.constant 45 : index
    %52 = vector.load %arg12[%c0_70, %c45] : memref<256x75xf32, #tpu.memory_space<vmem>>, vector<256x3xf32>
    tpu.vector_store %arg12[%c0_70, %c45], %51 {strides = array<i32>} : memref<256x75xf32, #tpu.memory_space<vmem>>, vector<256x3xf32>,
    %c3_71 = arith.constant 3 : index
    %c1_72 = arith.constant 1 : index
    %c0_73 = arith.constant 0 : index
    %53 = vector.load %arg11[%c3_71, %c1_72, %c0_73] : memref<20x20x3xf32, #tpu.memory_space<vmem>>, vector<16x16x3xf32>
    %54 = vector.shape_cast %53 : vector<16x16x3xf32> to vector<256x3xf32>
    %c0_74 = arith.constant 0 : index
    %c48 = arith.constant 48 : index
    %55 = vector.load %arg12[%c0_74, %c48] : memref<256x75xf32, #tpu.memory_space<vmem>>, vector<256x3xf32>
    tpu.vector_store %arg12[%c0_74, %c48], %54 {strides = array<i32>} : memref<256x75xf32, #tpu.memory_space<vmem>>, vector<256x3xf32>,
    %c3_75 = arith.constant 3 : index
    %c2_76 = arith.constant 2 : index
    %c0_77 = arith.constant 0 : index
    %56 = vector.load %arg11[%c3_75, %c2_76, %c0_77] : memref<20x20x3xf32, #tpu.memory_space<vmem>>, vector<16x16x3xf32>
    %57 = vector.shape_cast %56 : vector<16x16x3xf32> to vector<256x3xf32>
    %c0_78 = arith.constant 0 : index
    %c51 = arith.constant 51 : index
    %58 = vector.load %arg12[%c0_78, %c51] : memref<256x75xf32, #tpu.memory_space<vmem>>, vector<256x3xf32>
    tpu.vector_store %arg12[%c0_78, %c51], %57 {strides = array<i32>} : memref<256x75xf32, #tpu.memory_space<vmem>>, vector<256x3xf32>,
    %c3_79 = arith.constant 3 : index
    %c3_80 = arith.constant 3 : index
    %c0_81 = arith.constant 0 : index
    %59 = vector.load %arg11[%c3_79, %c3_80, %c0_81] : memref<20x20x3xf32, #tpu.memory_space<vmem>>, vector<16x16x3xf32>
    %60 = vector.shape_cast %59 : vector<16x16x3xf32> to vector<256x3xf32>
    %c0_82 = arith.constant 0 : index
    %c54 = arith.constant 54 : index
    %61 = vector.load %arg12[%c0_82, %c54] : memref<256x75xf32, #tpu.memory_space<vmem>>, vector<256x3xf32>
    tpu.vector_store %arg12[%c0_82, %c54], %60 {strides = array<i32>} : memref<256x75xf32, #tpu.memory_space<vmem>>, vector<256x3xf32>,
    %c3_83 = arith.constant 3 : index
    %c4_84 = arith.constant 4 : index
    %c0_85 = arith.constant 0 : index
    %62 = vector.load %arg11[%c3_83, %c4_84, %c0_85] : memref<20x20x3xf32, #tpu.memory_space<vmem>>, vector<16x16x3xf32>
    %63 = vector.shape_cast %62 : vector<16x16x3xf32> to vector<256x3xf32>
    %c0_86 = arith.constant 0 : index
    %c57 = arith.constant 57 : index
    %64 = vector.load %arg12[%c0_86, %c57] : memref<256x75xf32, #tpu.memory_space<vmem>>, vector<256x3xf32>
    tpu.vector_store %arg12[%c0_86, %c57], %63 {strides = array<i32>} : memref<256x75xf32, #tpu.memory_space<vmem>>, vector<256x3xf32>,
    %c4_87 = arith.constant 4 : index
    %c0_88 = arith.constant 0 : index
    %c0_89 = arith.constant 0 : index
    %65 = vector.load %arg11[%c4_87, %c0_88, %c0_89] : memref<20x20x3xf32, #tpu.memory_space<vmem>>, vector<16x16x3xf32>
    %66 = vector.shape_cast %65 : vector<16x16x3xf32> to vector<256x3xf32>
    %c0_90 = arith.constant 0 : index
    %c60 = arith.constant 60 : index
    %67 = vector.load %arg12[%c0_90, %c60] : memref<256x75xf32, #tpu.memory_space<vmem>>, vector<256x3xf32>
    tpu.vector_store %arg12[%c0_90, %c60], %66 {strides = array<i32>} : memref<256x75xf32, #tpu.memory_space<vmem>>, vector<256x3xf32>,
    %c4_91 = arith.constant 4 : index
    %c1_92 = arith.constant 1 : index
    %c0_93 = arith.constant 0 : index
    %68 = vector.load %arg11[%c4_91, %c1_92, %c0_93] : memref<20x20x3xf32, #tpu.memory_space<vmem>>, vector<16x16x3xf32>
    %69 = vector.shape_cast %68 : vector<16x16x3xf32> to vector<256x3xf32>
    %c0_94 = arith.constant 0 : index
    %c63 = arith.constant 63 : index
    %70 = vector.load %arg12[%c0_94, %c63] : memref<256x75xf32, #tpu.memory_space<vmem>>, vector<256x3xf32>
    tpu.vector_store %arg12[%c0_94, %c63], %69 {strides = array<i32>} : memref<256x75xf32, #tpu.memory_space<vmem>>, vector<256x3xf32>,
    %c4_95 = arith.constant 4 : index
    %c2_96 = arith.constant 2 : index
    %c0_97 = arith.constant 0 : index
    %71 = vector.load %arg11[%c4_95, %c2_96, %c0_97] : memref<20x20x3xf32, #tpu.memory_space<vmem>>, vector<16x16x3xf32>
    %72 = vector.shape_cast %71 : vector<16x16x3xf32> to vector<256x3xf32>
    %c0_98 = arith.constant 0 : index
    %c66 = arith.constant 66 : index
    %73 = vector.load %arg12[%c0_98, %c66] : memref<256x75xf32, #tpu.memory_space<vmem>>, vector<256x3xf32>
    tpu.vector_store %arg12[%c0_98, %c66], %72 {strides = array<i32>} : memref<256x75xf32, #tpu.memory_space<vmem>>, vector<256x3xf32>,
    %c4_99 = arith.constant 4 : index
    %c3_100 = arith.constant 3 : index
    %c0_101 = arith.constant 0 : index
    %74 = vector.load %arg11[%c4_99, %c3_100, %c0_101] : memref<20x20x3xf32, #tpu.memory_space<vmem>>, vector<16x16x3xf32>
    %75 = vector.shape_cast %74 : vector<16x16x3xf32> to vector<256x3xf32>
    %c0_102 = arith.constant 0 : index
    %c69 = arith.constant 69 : index
    %76 = vector.load %arg12[%c0_102, %c69] : memref<256x75xf32, #tpu.memory_space<vmem>>, vector<256x3xf32>
    tpu.vector_store %arg12[%c0_102, %c69], %75 {strides = array<i32>} : memref<256x75xf32, #tpu.memory_space<vmem>>, vector<256x3xf32>,
    %c4_103 = arith.constant 4 : index
    %c4_104 = arith.constant 4 : index
    %c0_105 = arith.constant 0 : index
    %77 = vector.load %arg11[%c4_103, %c4_104, %c0_105] : memref<20x20x3xf32, #tpu.memory_space<vmem>>, vector<16x16x3xf32>
    %78 = vector.shape_cast %77 : vector<16x16x3xf32> to vector<256x3xf32>
    %c0_106 = arith.constant 0 : index
    %c72 = arith.constant 72 : index
    %79 = vector.load %arg12[%c0_106, %c72] : memref<256x75xf32, #tpu.memory_space<vmem>>, vector<256x3xf32>
    tpu.vector_store %arg12[%c0_106, %c72], %78 {strides = array<i32>} : memref<256x75xf32, #tpu.memory_space<vmem>>, vector<256x3xf32>,
    %c0_107 = arith.constant 0 : index
    %c0_108 = arith.constant 0 : index
    %80 = vector.load %arg12[%c0_107, %c0_108] : memref<256x75xf32, #tpu.memory_space<vmem>>, vector<256x75xf32>
    %c0_109 = arith.constant 0 : index
    %c0_110 = arith.constant 0 : index
    %81 = vector.load %arg2[%c0_109, %c0_110] : memref<75x8xf32, #tpu.memory_space<vmem>>, vector<75x8xf32>
    %cst_111 = arith.constant dense<0.000000e+00> : vector<256x8xf32>
    %82 = tpu.matmul %80, %81, %cst_111 {dimension_numbers = #tpu.dot_dimension_numbers<[1], [0], [0], [1], [0, 0, 1, 1], [], []>} : vector<256x75xf32>, vector<75x8xf32>, vector<256x8xf32> -> vector<256x8xf32>
    %c0_112 = arith.constant 0 : index
    %c0_113 = arith.constant 0 : index
    %83 = vector.load %arg3[%c0_112, %c0_113] : memref<1x8xf32, #tpu.memory_space<vmem>>, vector<1x8xf32>
    %84 = vector.broadcast %83 : vector<1x8xf32> to vector<256x8xf32>
    %85 = arith.addf %82, %84 : vector<256x8xf32>
    %cst_114 = arith.constant 0.000000e+00 : f32
    %86 = vector.broadcast %cst_114 : f32 to vector<256x8xf32>
    %87 = arith.maximumf %85, %86 : vector<256x8xf32>
    %88 = vector.shape_cast %87 : vector<256x8xf32> to vector<16x8x2x8xf32>
    %cst_115 = arith.constant dense<0xFF800000> : vector<16x8x8xf32>
    %89 = vector.multi_reduction <maximumf>, %88, %cst_115 [2] : vector<16x8x2x8xf32> to vector<16x8x8xf32>
    %90 = vector.shape_cast %89 : vector<16x8x8xf32> to vector<8x2x8x8xf32>
    %cst_116 = arith.constant dense<0xFF800000> : vector<8x8x8xf32>
    %91 = vector.multi_reduction <maximumf>, %90, %cst_116 [1] : vector<8x2x8x8xf32> to vector<8x8x8xf32>
    %cst_117 = arith.constant 0.000000e+00 : f32
    %92 = vector.broadcast %cst_117 : f32 to vector<12x12x8xf32>
    %c0_118 = arith.constant 0 : index
    %c0_119 = arith.constant 0 : index
    %c0_120 = arith.constant 0 : index
    %93 = vector.load %arg13[%c0_118, %c0_119, %c0_120] : memref<12x12x8xf32, #tpu.memory_space<vmem>>, vector<12x12x8xf32>
    tpu.vector_store %arg13[%c0_118, %c0_119, %c0_120], %92 {strides = array<i32>} : memref<12x12x8xf32, #tpu.memory_space<vmem>>, vector<12x12x8xf32>,
    %c2_121 = arith.constant 2 : index
    %c2_122 = arith.constant 2 : index
    %c0_123 = arith.constant 0 : index
    %94 = vector.load %arg13[%c2_121, %c2_122, %c0_123] : memref<12x12x8xf32, #tpu.memory_space<vmem>>, vector<8x8x8xf32>
    tpu.vector_store %arg13[%c2_121, %c2_122, %c0_123], %91 {strides = array<i32>} : memref<12x12x8xf32, #tpu.memory_space<vmem>>, vector<8x8x8xf32>,
    %c0_124 = arith.constant 0 : index
    %c0_125 = arith.constant 0 : index
    %c0_126 = arith.constant 0 : index
    %95 = vector.load %arg13[%c0_124, %c0_125, %c0_126] : memref<12x12x8xf32, #tpu.memory_space<vmem>>, vector<8x8x8xf32>
    %96 = vector.shape_cast %95 : vector<8x8x8xf32> to vector<64x8xf32>
    %c0_127 = arith.constant 0 : index
    %c0_128 = arith.constant 0 : index
    %97 = vector.load %arg14[%c0_127, %c0_128] : memref<64x200xf32, #tpu.memory_space<vmem>>, vector<64x8xf32>
    tpu.vector_store %arg14[%c0_127, %c0_128], %96 {strides = array<i32>} : memref<64x200xf32, #tpu.memory_space<vmem>>, vector<64x8xf32>,
    %c0_129 = arith.constant 0 : index
    %c1_130 = arith.constant 1 : index
    %c0_131 = arith.constant 0 : index
    %98 = vector.load %arg13[%c0_129, %c1_130, %c0_131] : memref<12x12x8xf32, #tpu.memory_space<vmem>>, vector<8x8x8xf32>
    %99 = vector.shape_cast %98 : vector<8x8x8xf32> to vector<64x8xf32>
    %c0_132 = arith.constant 0 : index
    %c8 = arith.constant 8 : index
    %100 = vector.load %arg14[%c0_132, %c8] : memref<64x200xf32, #tpu.memory_space<vmem>>, vector<64x8xf32>
    tpu.vector_store %arg14[%c0_132, %c8], %99 {strides = array<i32>} : memref<64x200xf32, #tpu.memory_space<vmem>>, vector<64x8xf32>,
    %c0_133 = arith.constant 0 : index
    %c2_134 = arith.constant 2 : index
    %c0_135 = arith.constant 0 : index
    %101 = vector.load %arg13[%c0_133, %c2_134, %c0_135] : memref<12x12x8xf32, #tpu.memory_space<vmem>>, vector<8x8x8xf32>
    %102 = vector.shape_cast %101 : vector<8x8x8xf32> to vector<64x8xf32>
    %c0_136 = arith.constant 0 : index
    %c16 = arith.constant 16 : index
    %103 = vector.load %arg14[%c0_136, %c16] : memref<64x200xf32, #tpu.memory_space<vmem>>, vector<64x8xf32>
    tpu.vector_store %arg14[%c0_136, %c16], %102 {strides = array<i32>} : memref<64x200xf32, #tpu.memory_space<vmem>>, vector<64x8xf32>,
    %c0_137 = arith.constant 0 : index
    %c3_138 = arith.constant 3 : index
    %c0_139 = arith.constant 0 : index
    %104 = vector.load %arg13[%c0_137, %c3_138, %c0_139] : memref<12x12x8xf32, #tpu.memory_space<vmem>>, vector<8x8x8xf32>
    %105 = vector.shape_cast %104 : vector<8x8x8xf32> to vector<64x8xf32>
    %c0_140 = arith.constant 0 : index
    %c24_141 = arith.constant 24 : index
    %106 = vector.load %arg14[%c0_140, %c24_141] : memref<64x200xf32, #tpu.memory_space<vmem>>, vector<64x8xf32>
    tpu.vector_store %arg14[%c0_140, %c24_141], %105 {strides = array<i32>} : memref<64x200xf32, #tpu.memory_space<vmem>>, vector<64x8xf32>,
    %c0_142 = arith.constant 0 : index
    %c4_143 = arith.constant 4 : index
    %c0_144 = arith.constant 0 : index
    %107 = vector.load %arg13[%c0_142, %c4_143, %c0_144] : memref<12x12x8xf32, #tpu.memory_space<vmem>>, vector<8x8x8xf32>
    %108 = vector.shape_cast %107 : vector<8x8x8xf32> to vector<64x8xf32>
    %c0_145 = arith.constant 0 : index
    %c32 = arith.constant 32 : index
    %109 = vector.load %arg14[%c0_145, %c32] : memref<64x200xf32, #tpu.memory_space<vmem>>, vector<64x8xf32>
    tpu.vector_store %arg14[%c0_145, %c32], %108 {strides = array<i32>} : memref<64x200xf32, #tpu.memory_space<vmem>>, vector<64x8xf32>,
    %c1_146 = arith.constant 1 : index
    %c0_147 = arith.constant 0 : index
    %c0_148 = arith.constant 0 : index
    %110 = vector.load %arg13[%c1_146, %c0_147, %c0_148] : memref<12x12x8xf32, #tpu.memory_space<vmem>>, vector<8x8x8xf32>
    %111 = vector.shape_cast %110 : vector<8x8x8xf32> to vector<64x8xf32>
    %c0_149 = arith.constant 0 : index
    %c40 = arith.constant 40 : index
    %112 = vector.load %arg14[%c0_149, %c40] : memref<64x200xf32, #tpu.memory_space<vmem>>, vector<64x8xf32>
    tpu.vector_store %arg14[%c0_149, %c40], %111 {strides = array<i32>} : memref<64x200xf32, #tpu.memory_space<vmem>>, vector<64x8xf32>,
    %c1_150 = arith.constant 1 : index
    %c1_151 = arith.constant 1 : index
    %c0_152 = arith.constant 0 : index
    %113 = vector.load %arg13[%c1_150, %c1_151, %c0_152] : memref<12x12x8xf32, #tpu.memory_space<vmem>>, vector<8x8x8xf32>
    %114 = vector.shape_cast %113 : vector<8x8x8xf32> to vector<64x8xf32>
    %c0_153 = arith.constant 0 : index
    %c48_154 = arith.constant 48 : index
    %115 = vector.load %arg14[%c0_153, %c48_154] : memref<64x200xf32, #tpu.memory_space<vmem>>, vector<64x8xf32>
    tpu.vector_store %arg14[%c0_153, %c48_154], %114 {strides = array<i32>} : memref<64x200xf32, #tpu.memory_space<vmem>>, vector<64x8xf32>,
    %c1_155 = arith.constant 1 : index
    %c2_156 = arith.constant 2 : index
    %c0_157 = arith.constant 0 : index
    %116 = vector.load %arg13[%c1_155, %c2_156, %c0_157] : memref<12x12x8xf32, #tpu.memory_space<vmem>>, vector<8x8x8xf32>
    %117 = vector.shape_cast %116 : vector<8x8x8xf32> to vector<64x8xf32>
    %c0_158 = arith.constant 0 : index
    %c56 = arith.constant 56 : index
    %118 = vector.load %arg14[%c0_158, %c56] : memref<64x200xf32, #tpu.memory_space<vmem>>, vector<64x8xf32>
    tpu.vector_store %arg14[%c0_158, %c56], %117 {strides = array<i32>} : memref<64x200xf32, #tpu.memory_space<vmem>>, vector<64x8xf32>,
    %c1_159 = arith.constant 1 : index
    %c3_160 = arith.constant 3 : index
    %c0_161 = arith.constant 0 : index
    %119 = vector.load %arg13[%c1_159, %c3_160, %c0_161] : memref<12x12x8xf32, #tpu.memory_space<vmem>>, vector<8x8x8xf32>
    %120 = vector.shape_cast %119 : vector<8x8x8xf32> to vector<64x8xf32>
    %c0_162 = arith.constant 0 : index
    %c64 = arith.constant 64 : index
    %121 = vector.load %arg14[%c0_162, %c64] : memref<64x200xf32, #tpu.memory_space<vmem>>, vector<64x8xf32>
    tpu.vector_store %arg14[%c0_162, %c64], %120 {strides = array<i32>} : memref<64x200xf32, #tpu.memory_space<vmem>>, vector<64x8xf32>,
    %c1_163 = arith.constant 1 : index
    %c4_164 = arith.constant 4 : index
    %c0_165 = arith.constant 0 : index
    %122 = vector.load %arg13[%c1_163, %c4_164, %c0_165] : memref<12x12x8xf32, #tpu.memory_space<vmem>>, vector<8x8x8xf32>
    %123 = vector.shape_cast %122 : vector<8x8x8xf32> to vector<64x8xf32>
    %c0_166 = arith.constant 0 : index
    %c72_167 = arith.constant 72 : index
    %124 = vector.load %arg14[%c0_166, %c72_167] : memref<64x200xf32, #tpu.memory_space<vmem>>, vector<64x8xf32>
    tpu.vector_store %arg14[%c0_166, %c72_167], %123 {strides = array<i32>} : memref<64x200xf32, #tpu.memory_space<vmem>>, vector<64x8xf32>,
    %c2_168 = arith.constant 2 : index
    %c0_169 = arith.constant 0 : index
    %c0_170 = arith.constant 0 : index
    %125 = vector.load %arg13[%c2_168, %c0_169, %c0_170] : memref<12x12x8xf32, #tpu.memory_space<vmem>>, vector<8x8x8xf32>
    %126 = vector.shape_cast %125 : vector<8x8x8xf32> to vector<64x8xf32>
    %c0_171 = arith.constant 0 : index
    %c80 = arith.constant 80 : index
    %127 = vector.load %arg14[%c0_171, %c80] : memref<64x200xf32, #tpu.memory_space<vmem>>, vector<64x8xf32>
    tpu.vector_store %arg14[%c0_171, %c80], %126 {strides = array<i32>} : memref<64x200xf32, #tpu.memory_space<vmem>>, vector<64x8xf32>,
    %c2_172 = arith.constant 2 : index
    %c1_173 = arith.constant 1 : index
    %c0_174 = arith.constant 0 : index
    %128 = vector.load %arg13[%c2_172, %c1_173, %c0_174] : memref<12x12x8xf32, #tpu.memory_space<vmem>>, vector<8x8x8xf32>
    %129 = vector.shape_cast %128 : vector<8x8x8xf32> to vector<64x8xf32>
    %c0_175 = arith.constant 0 : index
    %c88 = arith.constant 88 : index
    %130 = vector.load %arg14[%c0_175, %c88] : memref<64x200xf32, #tpu.memory_space<vmem>>, vector<64x8xf32>
    tpu.vector_store %arg14[%c0_175, %c88], %129 {strides = array<i32>} : memref<64x200xf32, #tpu.memory_space<vmem>>, vector<64x8xf32>,
    %c2_176 = arith.constant 2 : index
    %c2_177 = arith.constant 2 : index
    %c0_178 = arith.constant 0 : index
    %131 = vector.load %arg13[%c2_176, %c2_177, %c0_178] : memref<12x12x8xf32, #tpu.memory_space<vmem>>, vector<8x8x8xf32>
    %132 = vector.shape_cast %131 : vector<8x8x8xf32> to vector<64x8xf32>
    %c0_179 = arith.constant 0 : index
    %c96 = arith.constant 96 : index
    %133 = vector.load %arg14[%c0_179, %c96] : memref<64x200xf32, #tpu.memory_space<vmem>>, vector<64x8xf32>
    tpu.vector_store %arg14[%c0_179, %c96], %132 {strides = array<i32>} : memref<64x200xf32, #tpu.memory_space<vmem>>, vector<64x8xf32>,
    %c2_180 = arith.constant 2 : index
    %c3_181 = arith.constant 3 : index
    %c0_182 = arith.constant 0 : index
    %134 = vector.load %arg13[%c2_180, %c3_181, %c0_182] : memref<12x12x8xf32, #tpu.memory_space<vmem>>, vector<8x8x8xf32>
    %135 = vector.shape_cast %134 : vector<8x8x8xf32> to vector<64x8xf32>
    %c0_183 = arith.constant 0 : index
    %c104 = arith.constant 104 : index
    %136 = vector.load %arg14[%c0_183, %c104] : memref<64x200xf32, #tpu.memory_space<vmem>>, vector<64x8xf32>
    tpu.vector_store %arg14[%c0_183, %c104], %135 {strides = array<i32>} : memref<64x200xf32, #tpu.memory_space<vmem>>, vector<64x8xf32>,
    %c2_184 = arith.constant 2 : index
    %c4_185 = arith.constant 4 : index
    %c0_186 = arith.constant 0 : index
    %137 = vector.load %arg13[%c2_184, %c4_185, %c0_186] : memref<12x12x8xf32, #tpu.memory_space<vmem>>, vector<8x8x8xf32>
    %138 = vector.shape_cast %137 : vector<8x8x8xf32> to vector<64x8xf32>
    %c0_187 = arith.constant 0 : index
    %c112 = arith.constant 112 : index
    %139 = vector.load %arg14[%c0_187, %c112] : memref<64x200xf32, #tpu.memory_space<vmem>>, vector<64x8xf32>
    tpu.vector_store %arg14[%c0_187, %c112], %138 {strides = array<i32>} : memref<64x200xf32, #tpu.memory_space<vmem>>, vector<64x8xf32>,
    %c3_188 = arith.constant 3 : index
    %c0_189 = arith.constant 0 : index
    %c0_190 = arith.constant 0 : index
    %140 = vector.load %arg13[%c3_188, %c0_189, %c0_190] : memref<12x12x8xf32, #tpu.memory_space<vmem>>, vector<8x8x8xf32>
    %141 = vector.shape_cast %140 : vector<8x8x8xf32> to vector<64x8xf32>
    %c0_191 = arith.constant 0 : index
    %c120 = arith.constant 120 : index
    %142 = vector.load %arg14[%c0_191, %c120] : memref<64x200xf32, #tpu.memory_space<vmem>>, vector<64x8xf32>
    tpu.vector_store %arg14[%c0_191, %c120], %141 {strides = array<i32>} : memref<64x200xf32, #tpu.memory_space<vmem>>, vector<64x8xf32>,
    %c3_192 = arith.constant 3 : index
    %c1_193 = arith.constant 1 : index
    %c0_194 = arith.constant 0 : index
    %143 = vector.load %arg13[%c3_192, %c1_193, %c0_194] : memref<12x12x8xf32, #tpu.memory_space<vmem>>, vector<8x8x8xf32>
    %144 = vector.shape_cast %143 : vector<8x8x8xf32> to vector<64x8xf32>
    %c0_195 = arith.constant 0 : index
    %c128 = arith.constant 128 : index
    %145 = vector.load %arg14[%c0_195, %c128] : memref<64x200xf32, #tpu.memory_space<vmem>>, vector<64x8xf32>
    tpu.vector_store %arg14[%c0_195, %c128], %144 {strides = array<i32>} : memref<64x200xf32, #tpu.memory_space<vmem>>, vector<64x8xf32>,
    %c3_196 = arith.constant 3 : index
    %c2_197 = arith.constant 2 : index
    %c0_198 = arith.constant 0 : index
    %146 = vector.load %arg13[%c3_196, %c2_197, %c0_198] : memref<12x12x8xf32, #tpu.memory_space<vmem>>, vector<8x8x8xf32>
    %147 = vector.shape_cast %146 : vector<8x8x8xf32> to vector<64x8xf32>
    %c0_199 = arith.constant 0 : index
    %c136 = arith.constant 136 : index
    %148 = vector.load %arg14[%c0_199, %c136] : memref<64x200xf32, #tpu.memory_space<vmem>>, vector<64x8xf32>
    tpu.vector_store %arg14[%c0_199, %c136], %147 {strides = array<i32>} : memref<64x200xf32, #tpu.memory_space<vmem>>, vector<64x8xf32>,
    %c3_200 = arith.constant 3 : index
    %c3_201 = arith.constant 3 : index
    %c0_202 = arith.constant 0 : index
    %149 = vector.load %arg13[%c3_200, %c3_201, %c0_202] : memref<12x12x8xf32, #tpu.memory_space<vmem>>, vector<8x8x8xf32>
    %150 = vector.shape_cast %149 : vector<8x8x8xf32> to vector<64x8xf32>
    %c0_203 = arith.constant 0 : index
    %c144 = arith.constant 144 : index
    %151 = vector.load %arg14[%c0_203, %c144] : memref<64x200xf32, #tpu.memory_space<vmem>>, vector<64x8xf32>
    tpu.vector_store %arg14[%c0_203, %c144], %150 {strides = array<i32>} : memref<64x200xf32, #tpu.memory_space<vmem>>, vector<64x8xf32>,
    %c3_204 = arith.constant 3 : index
    %c4_205 = arith.constant 4 : index
    %c0_206 = arith.constant 0 : index
    %152 = vector.load %arg13[%c3_204, %c4_205, %c0_206] : memref<12x12x8xf32, #tpu.memory_space<vmem>>, vector<8x8x8xf32>
    %153 = vector.shape_cast %152 : vector<8x8x8xf32> to vector<64x8xf32>
    %c0_207 = arith.constant 0 : index
    %c152 = arith.constant 152 : index
    %154 = vector.load %arg14[%c0_207, %c152] : memref<64x200xf32, #tpu.memory_space<vmem>>, vector<64x8xf32>
    tpu.vector_store %arg14[%c0_207, %c152], %153 {strides = array<i32>} : memref<64x200xf32, #tpu.memory_space<vmem>>, vector<64x8xf32>,
    %c4_208 = arith.constant 4 : index
    %c0_209 = arith.constant 0 : index
    %c0_210 = arith.constant 0 : index
    %155 = vector.load %arg13[%c4_208, %c0_209, %c0_210] : memref<12x12x8xf32, #tpu.memory_space<vmem>>, vector<8x8x8xf32>
    %156 = vector.shape_cast %155 : vector<8x8x8xf32> to vector<64x8xf32>
    %c0_211 = arith.constant 0 : index
    %c160 = arith.constant 160 : index
    %157 = vector.load %arg14[%c0_211, %c160] : memref<64x200xf32, #tpu.memory_space<vmem>>, vector<64x8xf32>
    tpu.vector_store %arg14[%c0_211, %c160], %156 {strides = array<i32>} : memref<64x200xf32, #tpu.memory_space<vmem>>, vector<64x8xf32>,
    %c4_212 = arith.constant 4 : index
    %c1_213 = arith.constant 1 : index
    %c0_214 = arith.constant 0 : index
    %158 = vector.load %arg13[%c4_212, %c1_213, %c0_214] : memref<12x12x8xf32, #tpu.memory_space<vmem>>, vector<8x8x8xf32>
    %159 = vector.shape_cast %158 : vector<8x8x8xf32> to vector<64x8xf32>
    %c0_215 = arith.constant 0 : index
    %c168 = arith.constant 168 : index
    %160 = vector.load %arg14[%c0_215, %c168] : memref<64x200xf32, #tpu.memory_space<vmem>>, vector<64x8xf32>
    tpu.vector_store %arg14[%c0_215, %c168], %159 {strides = array<i32>} : memref<64x200xf32, #tpu.memory_space<vmem>>, vector<64x8xf32>,
    %c4_216 = arith.constant 4 : index
    %c2_217 = arith.constant 2 : index
    %c0_218 = arith.constant 0 : index
    %161 = vector.load %arg13[%c4_216, %c2_217, %c0_218] : memref<12x12x8xf32, #tpu.memory_space<vmem>>, vector<8x8x8xf32>
    %162 = vector.shape_cast %161 : vector<8x8x8xf32> to vector<64x8xf32>
    %c0_219 = arith.constant 0 : index
    %c176 = arith.constant 176 : index
    %163 = vector.load %arg14[%c0_219, %c176] : memref<64x200xf32, #tpu.memory_space<vmem>>, vector<64x8xf32>
    tpu.vector_store %arg14[%c0_219, %c176], %162 {strides = array<i32>} : memref<64x200xf32, #tpu.memory_space<vmem>>, vector<64x8xf32>,
    %c4_220 = arith.constant 4 : index
    %c3_221 = arith.constant 3 : index
    %c0_222 = arith.constant 0 : index
    %164 = vector.load %arg13[%c4_220, %c3_221, %c0_222] : memref<12x12x8xf32, #tpu.memory_space<vmem>>, vector<8x8x8xf32>
    %165 = vector.shape_cast %164 : vector<8x8x8xf32> to vector<64x8xf32>
    %c0_223 = arith.constant 0 : index
    %c184 = arith.constant 184 : index
    %166 = vector.load %arg14[%c0_223, %c184] : memref<64x200xf32, #tpu.memory_space<vmem>>, vector<64x8xf32>
    tpu.vector_store %arg14[%c0_223, %c184], %165 {strides = array<i32>} : memref<64x200xf32, #tpu.memory_space<vmem>>, vector<64x8xf32>,
    %c4_224 = arith.constant 4 : index
    %c4_225 = arith.constant 4 : index
    %c0_226 = arith.constant 0 : index
    %167 = vector.load %arg13[%c4_224, %c4_225, %c0_226] : memref<12x12x8xf32, #tpu.memory_space<vmem>>, vector<8x8x8xf32>
    %168 = vector.shape_cast %167 : vector<8x8x8xf32> to vector<64x8xf32>
    %c0_227 = arith.constant 0 : index
    %c192 = arith.constant 192 : index
    %169 = vector.load %arg14[%c0_227, %c192] : memref<64x200xf32, #tpu.memory_space<vmem>>, vector<64x8xf32>
    tpu.vector_store %arg14[%c0_227, %c192], %168 {strides = array<i32>} : memref<64x200xf32, #tpu.memory_space<vmem>>, vector<64x8xf32>,
    %c0_228 = arith.constant 0 : index
    %c0_229 = arith.constant 0 : index
    %170 = vector.load %arg14[%c0_228, %c0_229] : memref<64x200xf32, #tpu.memory_space<vmem>>, vector<64x200xf32>
    %c0_230 = arith.constant 0 : index
    %c0_231 = arith.constant 0 : index
    %171 = vector.load %arg4[%c0_230, %c0_231] : memref<200x16xf32, #tpu.memory_space<vmem>>, vector<200x16xf32>
    %cst_232 = arith.constant dense<0.000000e+00> : vector<64x16xf32>
    %172 = tpu.matmul %170, %171, %cst_232 {dimension_numbers = #tpu.dot_dimension_numbers<[1], [0], [0], [1], [0, 0, 1, 1], [], []>} : vector<64x200xf32>, vector<200x16xf32>, vector<64x16xf32> -> vector<64x16xf32>
    %c0_233 = arith.constant 0 : index
    %c0_234 = arith.constant 0 : index
    %173 = vector.load %arg5[%c0_233, %c0_234] : memref<1x16xf32, #tpu.memory_space<vmem>>, vector<1x16xf32>
    %174 = vector.broadcast %173 : vector<1x16xf32> to vector<64x16xf32>
    %175 = arith.addf %172, %174 : vector<64x16xf32>
    %cst_235 = arith.constant 0.000000e+00 : f32
    %176 = vector.broadcast %cst_235 : f32 to vector<64x16xf32>
    %177 = arith.maximumf %175, %176 : vector<64x16xf32>
    %178 = vector.shape_cast %177 : vector<64x16xf32> to vector<8x4x2x16xf32>
    %cst_236 = arith.constant dense<0xFF800000> : vector<8x4x16xf32>
    %179 = vector.multi_reduction <maximumf>, %178, %cst_236 [2] : vector<8x4x2x16xf32> to vector<8x4x16xf32>
    %180 = vector.shape_cast %179 : vector<8x4x16xf32> to vector<4x2x4x16xf32>
    %cst_237 = arith.constant dense<0xFF800000> : vector<4x4x16xf32>
    %181 = vector.multi_reduction <maximumf>, %180, %cst_237 [1] : vector<4x2x4x16xf32> to vector<4x4x16xf32>
    %182 = vector.shape_cast %181 : vector<4x4x16xf32> to vector<16x1x16xf32>
    %c0_238 = arith.constant 0 : index
    %c0_239 = arith.constant 0 : index
    %c0_240 = arith.constant 0 : index
    %183 = vector.load %arg6[%c0_238, %c0_239, %c0_240] : memref<16x16x16xf32, #tpu.memory_space<vmem>>, vector<16x16x16xf32>
    "tpu.trace_start"() <{level = 10 : i32, message = "pqc,pco->pqo"}> : () -> ()
    %cst_241 = arith.constant dense<0.000000e+00> : vector<16x1x16xf32>
    %184 = tpu.matmul %182, %183, %cst_241 {dimension_numbers = #tpu.dot_dimension_numbers<[2], [1], [1], [2], [0, 0, 0, 1, 1, 2], [0], [0]>} : vector<16x1x16xf32>, vector<16x16x16xf32>, vector<16x1x16xf32> -> vector<16x1x16xf32>
    "tpu.trace_stop"() : () -> ()
    %185 = vector.shape_cast %184 : vector<16x1x16xf32> to vector<16x16xf32>
    %cst_242 = arith.constant dense<0.000000e+00> : vector<16xf32>
    %186 = vector.multi_reduction <add>, %185, %cst_242 [0] : vector<16x16xf32> to vector<16xf32>
    %187 = vector.shape_cast %186 : vector<16xf32> to vector<1x16xf32>
    %c0_243 = arith.constant 0 : index
    %c0_244 = arith.constant 0 : index
    %188 = vector.load %arg7[%c0_243, %c0_244] : memref<1x16xf32, #tpu.memory_space<vmem>>, vector<1x16xf32>
    %189 = arith.addf %187, %188 : vector<1x16xf32>
    %c0_245 = arith.constant 0 : index
    %c0_246 = arith.constant 0 : index
    %190 = vector.load %arg8[%c0_245, %c0_246] : memref<16x10xf32, #tpu.memory_space<vmem>>, vector<16x10xf32>
    %cst_247 = arith.constant dense<0.000000e+00> : vector<1x10xf32>
    %191 = tpu.matmul %189, %190, %cst_247 {dimension_numbers = #tpu.dot_dimension_numbers<[1], [0], [0], [1], [0, 0, 1, 1], [], []>} : vector<1x16xf32>, vector<16x10xf32>, vector<1x10xf32> -> vector<1x10xf32>
    %c0_248 = arith.constant 0 : index
    %c0_249 = arith.constant 0 : index
    %192 = vector.load %arg9[%c0_248, %c0_249] : memref<1x10xf32, #tpu.memory_space<vmem>>, vector<1x10xf32>
    %193 = arith.addf %191, %192 : vector<1x10xf32>
    %c0_250 = arith.constant 0 : index
    %c0_251 = arith.constant 0 : index
    %c0_252 = arith.constant 0 : index
    %194 = vector.load %arg10[%c0_250, %c0_251, %c0_252] : memref<1x1x10xf32, #tpu.memory_space<vmem>>, vector<1x1x10xf32>
    %195 = vector.shape_cast %194 : vector<1x1x10xf32> to vector<1x10xf32>
    %196 = vector.shape_cast %193 : vector<1x10xf32> to vector<1x1x10xf32>
    tpu.vector_store %arg10[%c0_250, %c0_251, %c0_252], %196 {strides = array<i32>} : memref<1x1x10xf32, #tpu.memory_space<vmem>>, vector<1x1x10xf32>,
    return
  }
  func.func @transform_0(%arg0: i32) -> (i32, i32, i32, i32) {
    %c0_i32 = arith.constant 0 : i32
    %c0_i32_0 = arith.constant 0 : i32
    %c0_i32_1 = arith.constant 0 : i32
    %c0_i32_2 = arith.constant 0 : i32
    return %arg0, %c0_i32, %c0_i32_0, %c0_i32_1 : i32, i32, i32, i32
  }
  func.func @transform_1(%arg0: i32) -> (i32, i32) {
    %c0_i32 = arith.constant 0 : i32
    %c0_i32_0 = arith.constant 0 : i32
    %c0_i32_1 = arith.constant 0 : i32
    return %c0_i32, %c0_i32_0 : i32, i32
  }
  func.func @transform_2(%arg0: i32) -> (i32, i32) {
    %c0_i32 = arith.constant 0 : i32
    %c0_i32_0 = arith.constant 0 : i32
    %c0_i32_1 = arith.constant 0 : i32
    return %c0_i32, %c0_i32_0 : i32, i32
  }
  func.func @transform_3(%arg0: i32) -> (i32, i32) {
    %c0_i32 = arith.constant 0 : i32
    %c0_i32_0 = arith.constant 0 : i32
    %c0_i32_1 = arith.constant 0 : i32
    return %c0_i32, %c0_i32_0 : i32, i32
  }
  func.func @transform_4(%arg0: i32) -> (i32, i32) {
    %c0_i32 = arith.constant 0 : i32
    %c0_i32_0 = arith.constant 0 : i32
    %c0_i32_1 = arith.constant 0 : i32
    return %c0_i32, %c0_i32_0 : i32, i32
  }
  func.func @transform_5(%arg0: i32) -> (i32, i32, i32) {
    %c0_i32 = arith.constant 0 : i32
    %c0_i32_0 = arith.constant 0 : i32
    %c0_i32_1 = arith.constant 0 : i32
    %c0_i32_2 = arith.constant 0 : i32
    return %c0_i32, %c0_i32_0, %c0_i32_1 : i32, i32, i32
  }
  func.func @transform_6(%arg0: i32) -> (i32, i32) {
    %c0_i32 = arith.constant 0 : i32
    %c0_i32_0 = arith.constant 0 : i32
    %c0_i32_1 = arith.constant 0 : i32
    return %c0_i32, %c0_i32_0 : i32, i32
  }
  func.func @transform_7(%arg0: i32) -> (i32, i32) {
    %c0_i32 = arith.constant 0 : i32
    %c0_i32_0 = arith.constant 0 : i32
    %c0_i32_1 = arith.constant 0 : i32
    return %c0_i32, %c0_i32_0 : i32, i32
  }
  func.func @transform_8(%arg0: i32) -> (i32, i32) {
    %c0_i32 = arith.constant 0 : i32
    %c0_i32_0 = arith.constant 0 : i32
    %c0_i32_1 = arith.constant 0 : i32
    return %c0_i32, %c0_i32_0 : i32, i32
  }
  func.func @transform_9(%arg0: i32) -> (i32, i32, i32) {
    %c0_i32 = arith.constant 0 : i32
    %c0_i32_0 = arith.constant 0 : i32
    %c0_i32_1 = arith.constant 0 : i32
    return %arg0, %c0_i32, %c0_i32_0 : i32, i32, i32
  }
}

</mosaic_0001>

<bundles_post_ra>
// kernel: test_cnn_forward.1
= control target key start
LH: loop header
LB: loop body
LE: loop exit
PB: predicated region body
PF: predicated region fallthrough
CT: control target
= control target key end

     0   :  { %s13450_s0 = inlined_call_operand.vmem [shape: f32[2,16,16,3], index: 0, kind: input, shape index: {}]   ;;  %s13451_s1 = inlined_call_operand.vmem [shape: f32[75,8], index: 1, kind: input, shape index: {}]   ;;  %s13452_s2 = inlined_call_operand.vmem [shape: f32[1,8], index: 2, kind: input, shape index: {}]   ;;  %s13453_s3 = inlined_call_operand.vmem [shape: f32[200,16], index: 3, kind: input, shape index: {}]   ;;  %s13454_s4 = inlined_call_operand.vmem [shape: f32[1,16], index: 4, kind: input, shape index: {}]   ;;  %s13455_s5 = inlined_call_operand.vmem [shape: f32[16,16,16], index: 5, kind: input, shape index: {}]   ;;  %s13456_s6 = inlined_call_operand.vmem [shape: f32[1,16], index: 6, kind: input, shape index: {}]   ;;  %s13457_s7 = inlined_call_operand.vmem [shape: f32[16,10], index: 7, kind: input, shape index: {}]   ;;  %s13458_s8 = inlined_call_operand.vmem [shape: f32[1,10], index: 8, kind: input, shape index: {}]   ;;  %s13459_s9 = inlined_call_operand.hbm [shape: f32[2,1,10], index: 9, kind: output, shape index: {}]  }
   0x1   :  { %13502 = sst [smem:[#allocation11_spill]] %s13450_s0 }
   0x2   :  { %13503 = sst [smem:[#allocation12_spill]] %s13451_s1 }
   0x3   :  { %14 = vsyncpa [#allocation7], 0 }
   0x4   :  { %16 = vsyncpa [#allocation7 + $0x1], 0  ;;  %s9462_s30 = smov 0   ;;  %s9464_s10 = smov 0  }
   0x5   :  { %s9466_s11 = smov 0   ;;  %s9468_s12 = smov 0  }
   0x6 LB: > { %13504 = sst [smem:[#allocation9_spill]] %s9369_s11  ;;  %s9483_s13 = sadd.s32 4294967295, %s9373_s12   ;;  %s9373_s12 = sphi %s9468_s12, %s13614_s12   ;;  %s9369_s11 = sphi %s9466_s11, %s13611_s11   ;;  %s9365_s10 = sphi %s9464_s10, %s13613_s10   ;;  %s9361_s30 = sphi %s9462_s30, %s13612_s30  }
   0x7   : > { %s9128_s14 = sadd.s32 4294967294, %s9373_s12   ;;  %s9487_s15 = sadd.s32 1, %s9373_s12  }
   0x8   : > { %s223_s16 = sadd.s32 1, %s9369_s11  ;;  %s220_s17 = ssub.s32 %s9373_s12, %s9487_s15 }
   0x9   : > { %p233_p0 = scmp.ne.s32.totalorder %s9369_s11, %s9365_s10  ;;  %p221_p1 = scmp.eq.s32.totalorder %s220_s17, 0 }
   0xa   : > { %p234_p2 = scmp.eq.s32.totalorder %s9483_s13, 1  ;;  %p239_p3 = scmp.ne.s32.totalorder %s9365_s10, %s9361_s30 }
   0xb   : > { %p240_p4 = scmp.eq.s32.totalorder %s9128_s14, 1  ;;  %p9131_p7 = scmp.ge.s32.totalorder %s9373_s12, 1 }
   0xc   : > { %s9498_s18 = scalar_select %p221_p1, %s9369_s11, %s223_s16  }
   0xd   : > { %p9500_p5 = por %p234_p2, %p233_p0  ;;  %p9504_p6 = por %p240_p4, %p239_p3 }
   0xe   : > { %13505 = sst [smem:[#allocation10_spill]] %s9498_s18  ;;  %p290_p8 = scmp.lt.s32.totalorder %s9373_s12, 3 }
  0x10   : > { %p291_p9 = pnand %p9131_p7, %p290_p8 }
  0x11   : > { %s9376_s21 = smov (!%p291_p9), 3   ;;  %p325_p10 = scmp.lt.s32.totalorder (!%p291_p9), %s9483_s13, 1 }
  0x12   : > { %294 = sbr.rel (%p291_p9) target bundleno = 3314 (0xcf2), region = 56  ;;  %s13508_s0 = sld [smem:[#allocation11_spill]] (!%p291_p9) }
  0x13   : > { %s9377_s27 = smov (!%p291_p9), 6   ;;  %s9378_s28 = smov (!%p291_p9), 9  }
  0x14   : > { %s9379_s29 = smov (!%p291_p9), 12   ;;  %s9380_s14 = smov (!%p291_p9), 15  }
  0x15   : > { %s9381_s16 = smov (!%p291_p9), 18   ;;  %s9382_s17 = smov (!%p291_p9), 21  }
  0x16   : > { %s9386_s24 = smov (!%p291_p9), 33   ;;  %s9387_s25 = smov (!%p291_p9), 36  }
  0x17   : > { %vm330_vm0 = vcmask 23552   ;;  %v9375_v0 = vmov 0.0   ;;  %s326_s22 = scalar_select %p325_p10, %s9483_s13, 1  ;;  %vm333_vm1 = vcmask 19456   ;;  %vm681_vm2 = vcmask 48152  }
  0x18   : > { %335 = vst.msk [vmem:[#allocation2 + $0x18] sm:$0xff] %vm330_vm0, %v9375_v0  ;;  %vm874_vm3 = vcmask 72752   ;;  %vm1067_vm4 = vcmask 97352   ;;  %vm1260_vm5 = vcmask 121952   ;;  %vm1454_vm6 = vcmask 146552   ;;  %s13509_s1 = sld [smem:[#allocation12_spill]] }
  0x19   : > { %336 = vst.msk [vmem:[#allocation2 + $0x20] sm:$0xff] %vm330_vm0, %v9375_v0  ;;  %s9194_s23 = sshll.u32 %s326_s22, 8  ;;  %vm1647_vm7 = vcmask 171152   ;;  %vm1840_vm8 = vcmask 195752   ;;  %s9384_s22 = smov 27   ;;  %vm2033_vm9 = vcmask 220352  }
  0x1a   : > { %331 = vst.msk [vmem:[#allocation2] sm:$0xff] %vm330_vm0, %v9375_v0  ;;  %s9587_s26 = scalar_lea.vmem %s13508_s0, %s9194_s23  ;;  %s9385_s23 = smov 30   ;;  %vm2226_vm10 = vcmask 244952   ;;  %vm2419_vm11 = vcmask 269552   ;;  %vm2612_vm12 = vcmask 294152   ;;  %vm2805_vm13 = vcmask 318752  }
  0x1b   : > { %332 = vst.msk [vmem:[#allocation2 + $0x8] sm:$0xff] %vm330_vm0, %v9375_v0  ;;  %v392_v3 = vld [vmem:[%s9587_s26] sm:$0xff]  ;;  %v393_v7 = vld [vmem:[%s9587_s26 + $0x8] sm:$0xff]  ;;  %v394_v8 = vld [vmem:[%s9587_s26 + $0x10] sm:$0xff]  ;;  %vm2998_vm14 = vcmask 343352   ;;  %vm3191_vm15 = vcmask 367952  }
  0x1c   : > { %338 = vst.msk [vmem:[#allocation2 + $0x30] sm:$0xff] %vm330_vm0, %v9375_v0  ;;  %v395_v9 = vld [vmem:[%s9587_s26 + $0x18] sm:$0xff]  ;;  %v396_v10 = vld [vmem:[%s9587_s26 + $0x20] sm:$0xff]  ;;  %v398_v11 = vld [vmem:[%s9587_s26 + $0x30] sm:$0xff]  ;;  %s13533_s18 = smov 120   ;;  %s13534_s11 = smov 88  }
  0x1d   : > { %339 = vst.msk [vmem:[#allocation2 + $0x38] sm:$0xff] %vm330_vm0, %v9375_v0  ;;  %v397_v12 = vld [vmem:[%s9587_s26 + $0x28] sm:$0xff]  ;;  %v399_v13 = vld [vmem:[%s9587_s26 + $0x38] sm:$0xff]  ;;  %v400_v14 = vld [vmem:[%s9587_s26 + $0x40] sm:$0xff]  ;;  %s13535_s0 = smov 80  }
  0x1e   : > { %341 = vst.msk [vmem:[#allocation2 + $0x48] sm:$0xff] %vm330_vm0, %v9375_v0  ;;  %v401_v15 = vld [vmem:[%s9587_s26 + $0x48] sm:$0xff]  ;;  %v402_v16 = vld [vmem:[%s9587_s26 + $0x50] sm:$0xff]  ;;  %v404_v18 = vld [vmem:[%s9587_s26 + $0x60] sm:$0xff] }
  0x1f   : > { %342 = vst.msk [vmem:[#allocation2 + $0x50] sm:$0xff] %vm330_vm0, %v9375_v0  ;;  %v403_v20 = vld [vmem:[%s9587_s26 + $0x58] sm:$0xff]  ;;  %v405_v22 = vld [vmem:[%s9587_s26 + $0x68] sm:$0xff]  ;;  %v406_v23 = vld [vmem:[%s9587_s26 + $0x70] sm:$0xff] }
  0x20   : > { %v523_v1 = vld [vmem:[#allocation2 + $0x19] sm:$0xff]  ;;  %344 = vst.msk [vmem:[#allocation2 + $0x60] sm:$0xff] %vm330_vm0, %v9375_v0  ;;  %v410_v27 = vld [vmem:[%s9587_s26 + $0x90] sm:$0xff]  ;;  %v409_v29 = vld [vmem:[%s9587_s26 + $0x88] sm:$0xff] }
  0x21   : > { %589 = vrot.lane.b32.xlu1 %v523_v1, %s9376_s21  ;;  %345 = vst.msk [vmem:[#allocation2 + $0x68] sm:$0xff] %vm330_vm0, %v9375_v0  ;;  %v407_v24 = vld [vmem:[%s9587_s26 + $0x78] sm:$0xff]  ;;  %v408_v25 = vld [vmem:[%s9587_s26 + $0x80] sm:$0xff]  ;;  %v413_v33 = vld [vmem:[%s9587_s26 + $0xa8] sm:$0xff] }
  0x22   : > { %347 = vst.msk [vmem:[#allocation2 + $0x78] sm:$0xff] %vm330_vm0, %v9375_v0  ;;  %v521_v2 = vld [vmem:[#allocation2 + $0x1] sm:$0xff]  ;;  %v411_v31 = vld [vmem:[%s9587_s26 + $0x98] sm:$0xff]  ;;  %v414_v37 = vld [vmem:[%s9587_s26 + $0xb0] sm:$0xff] }
  0x23   : > { %348 = vst.msk [vmem:[#allocation2 + $0x80] sm:$0xff] %vm330_vm0, %v9375_v0  ;;  %585 = vrot.lane.b32.xlu0 %v521_v2, %s9376_s21  ;;  %v412_v32 = vld [vmem:[%s9587_s26 + $0xa0] sm:$0xff]  ;;  %v415_v39 = vld [vmem:[%s9587_s26 + $0xb8] sm:$0xff]  ;;  %v417_v43 = vld [vmem:[%s9587_s26 + $0xc8] sm:$0xff] }
  0x24   : > { %350 = vst.msk [vmem:[#allocation2 + $0x90] sm:$0xff] %vm330_vm0, %v9375_v0  ;;  %v416_v38 = vld [vmem:[%s9587_s26 + $0xc0] sm:$0xff]  ;;  %v418_v44 = vld [vmem:[%s9587_s26 + $0xd0] sm:$0xff]  ;;  %v419_v45 = vld [vmem:[%s9587_s26 + $0xd8] sm:$0xff] }
  0x25   : > { %351 = vst.msk [vmem:[#allocation2 + $0x98] sm:$0xff] %vm330_vm0, %v9375_v0  ;;  %v9737_v1 = vld [vmem:[#allocation2 + $0x18] sm:$0xff] }
  0x26   : > { %353 = vst.msk [vmem:[#allocation2 + $0xa8] sm:$0xff] %vm330_vm0, %v9375_v0 }
  0x27   : > { %354 = vst.msk [vmem:[#allocation2 + $0xb0] sm:$0xff] %vm330_vm0, %v9375_v0 }
  0x28   : > { %356 = vst.msk [vmem:[#allocation2 + $0xc0] sm:$0xff] %vm330_vm0, %v9375_v0 }
  0x29   : > { %357 = vst.msk [vmem:[#allocation2 + $0xc8] sm:$0xff] %vm330_vm0, %v9375_v0 }
  0x2a   : > { %359 = vst.msk [vmem:[#allocation2 + $0xd8] sm:$0xff] %vm330_vm0, %v9375_v0 }
  0x2b   : > { %360 = vst.msk [vmem:[#allocation2 + $0xe0] sm:$0xff] %vm330_vm0, %v9375_v0 }
  0x2c   : > { %362 = vst.msk [vmem:[#allocation2 + $0xf0] sm:$0xff] %vm330_vm0, %v9375_v0 }
  0x2d   : > { %363 = vst.msk [vmem:[#allocation2 + $0xf8] sm:$0xff] %vm330_vm0, %v9375_v0 }
  0x2e   : > { %365 = vst.msk [vmem:[#allocation2 + $0x108] sm:$0xff] %vm330_vm0, %v9375_v0 }
  0x2f   : > { %366 = vst.msk [vmem:[#allocation2 + $0x110] sm:$0xff] %vm330_vm0, %v9375_v0 }
  0x30   : > { %368 = vst.msk [vmem:[#allocation2 + $0x120] sm:$0xff] %vm330_vm0, %v9375_v0 }
  0x31   : > { %369 = vst.msk [vmem:[#allocation2 + $0x128] sm:$0xff] %vm330_vm0, %v9375_v0 }
  0x32   : > { %371 = vst.msk [vmem:[#allocation2 + $0x138] sm:$0xff] %vm330_vm0, %v9375_v0 }
  0x33   : > { %372 = vst.msk [vmem:[#allocation2 + $0x140] sm:$0xff] %vm330_vm0, %v9375_v0 }
  0x34   : > { %374 = vst.msk [vmem:[#allocation2 + $0x150] sm:$0xff] %vm330_vm0, %v9375_v0 }
  0x35   : > { %375 = vst.msk [vmem:[#allocation2 + $0x158] sm:$0xff] %vm330_vm0, %v9375_v0 }
  0x36   : > { %377 = vst.msk [vmem:[#allocation2 + $0x168] sm:$0xff] %vm330_vm0, %v9375_v0 }
  0x37   : > { %378 = vst.msk [vmem:[#allocation2 + $0x170] sm:$0xff] %vm330_vm0, %v9375_v0 }
  0x38   : > { %380 = vst.msk [vmem:[#allocation2 + $0x180] sm:$0xff] %vm330_vm0, %v9375_v0 }
  0x39   : > { %381 = vst.msk [vmem:[#allocation2 + $0x188] sm:$0xff] %vm330_vm0, %v9375_v0 }
  0x3a   : > { %383 = vst.msk [vmem:[#allocation2 + $0x198] sm:$0xff] %vm330_vm0, %v9375_v0 }
  0x3b   : > { %384 = vst.msk [vmem:[#allocation2 + $0x1a0] sm:$0xff] %vm330_vm0, %v9375_v0 }
  0x3c   : > { %386 = vst.msk [vmem:[#allocation2 + $0x1b0] sm:$0xff] %vm330_vm0, %v9375_v0 }
  0x3d   : > { %387 = vst.msk [vmem:[#allocation2 + $0x1b8] sm:$0xff] %vm330_vm0, %v9375_v0 }
  0x3e   : > { %389 = vst.msk [vmem:[#allocation2 + $0x1c8] sm:$0xff] %vm330_vm0, %v9375_v0 }
  0x3f   : > { %390 = vst.msk [vmem:[#allocation2 + $0x1d0] sm:$0xff] %vm330_vm0, %v9375_v0 }
  0x40   : > { %425 = vst.msk [vmem:[#allocation2 + $0x32] sm:$0xff] %vm330_vm0, %v392_v3  ;;  %v457_v3 = vld [vmem:[#allocation2] sm:$0xff] }
  0x41   : > { %337 = vst.msk [vmem:[#allocation2 + $0x28] sm:$0xf] %vm333_vm1, %v9375_v0 }
  0x42   : > { %334 = vst.msk [vmem:[#allocation2 + $0x10] sm:$0xf] %vm333_vm1, %v9375_v0 }
  0x43   : > { %340 = vst.msk [vmem:[#allocation2 + $0x40] sm:$0xf] %vm333_vm1, %v9375_v0 }
  0x44   : > { %343 = vst.msk [vmem:[#allocation2 + $0x58] sm:$0xf] %vm333_vm1, %v9375_v0 }
  0x45   : > { %346 = vst.msk [vmem:[#allocation2 + $0x70] sm:$0xf] %vm333_vm1, %v9375_v0 }
  0x46   : > { %349 = vst.msk [vmem:[#allocation2 + $0x88] sm:$0xf] %vm333_vm1, %v9375_v0 }
  0x47   : > { %v525_v4 = vld [vmem:[#allocation2 + $0x31] sm:$0xff]  ;;  %352 = vst.msk [vmem:[#allocation2 + $0xa0] sm:$0xf] %vm333_vm1, %v9375_v0 }
  0x48   : > { %593 = vrot.lane.b32.xlu2 %v525_v4, %s9376_s21  ;;  %v524_v5 = vld [vmem:[#allocation2 + $0x21] sm:$0xff]  ;;  %355 = vst.msk [vmem:[#allocation2 + $0xb8] sm:$0xf] %vm333_vm1, %v9375_v0  ;;  %v9719_v55 = vld [vmem:[#allocation2 + $0x30] sm:$0xff] }
  0x49   : > { %591 = vrot.lane.b32.xlu1 %v524_v5, %s9376_s21  ;;  %358 = vst.msk [vmem:[#allocation2 + $0xd0] sm:$0xf] %vm333_vm1, %v9375_v0  ;;  %v522_v6 = vld [vmem:[#allocation2 + $0x9] sm:$0xff] }
  0x4a   : > { %361 = vst.msk [vmem:[#allocation2 + $0xe8] sm:$0xf] %vm333_vm1, %v9375_v0  ;;  %587 = vrot.lane.b32.xlu0 %v522_v6, %s9376_s21  ;;  %v714_v4 = vld [vmem:[#allocation2 + $0x2] sm:$0xff] }
  0x4b   : > { %364 = vst.msk [vmem:[#allocation2 + $0x100] sm:$0xf] %vm333_vm1, %v9375_v0 }
  0x4c   : > { %367 = vst.msk [vmem:[#allocation2 + $0x118] sm:$0xf] %vm333_vm1, %v9375_v0 }
  0x4d   : > { %370 = vst.msk [vmem:[#allocation2 + $0x130] sm:$0xf] %vm333_vm1, %v9375_v0 }
  0x4e   : > { %373 = vst.msk [vmem:[#allocation2 + $0x148] sm:$0xf] %vm333_vm1, %v9375_v0 }
  0x4f   : > { %376 = vst.msk [vmem:[#allocation2 + $0x160] sm:$0xf] %vm333_vm1, %v9375_v0 }
  0x50   : > { %379 = vst.msk [vmem:[#allocation2 + $0x178] sm:$0xf] %vm333_vm1, %v9375_v0 }
  0x51   : > { %382 = vst.msk [vmem:[#allocation2 + $0x190] sm:$0xf] %vm333_vm1, %v9375_v0 }
  0x52   : > { %385 = vst.msk [vmem:[#allocation2 + $0x1a8] sm:$0xf] %vm333_vm1, %v9375_v0 }
  0x53   : > { %388 = vst.msk [vmem:[#allocation2 + $0x1c0] sm:$0xf] %vm333_vm1, %v9375_v0 }
  0x54   : > { %391 = vst.msk [vmem:[#allocation2 + $0x1d8] sm:$0xf] %vm333_vm1, %v9375_v0  ;;  %vm3578_vm1 = vcmask 417152  }
  0x55   : > { %426 = vst.msk [vmem:[#allocation2 + $0x3a] sm:$0xff] %vm330_vm0, %v393_v7  ;;  %v715_v7 = vld [vmem:[#allocation2 + $0xa] sm:$0xff] }
  0x56   : > { %427 = vst.msk [vmem:[#allocation2 + $0x4a] sm:$0xff] %vm330_vm0, %v394_v8  ;;  %v716_v8 = vld [vmem:[#allocation2 + $0x1a] sm:$0xff] }
  0x57   : > { %428 = vst.msk [vmem:[#allocation2 + $0x52] sm:$0xff] %vm330_vm0, %v395_v9 }
  0x58   : > { %429 = vst.msk [vmem:[#allocation2 + $0x62] sm:$0xff] %vm330_vm0, %v396_v10  ;;  %v9752_v10 = vld [vmem:[#allocation2 + $0x20] sm:$0xff] }
  0x59   : > { %431 = vst.msk [vmem:[#allocation2 + $0x7a] sm:$0xff] %vm330_vm0, %v398_v11  ;;  %v458_v11 = vld [vmem:[#allocation2 + $0x8] sm:$0xff] }
  0x5a   : > { %430 = vst.msk [vmem:[#allocation2 + $0x6a] sm:$0xff] %vm330_vm0, %v397_v12  ;;  %v717_v12 = vld [vmem:[#allocation2 + $0x22] sm:$0xff] }
  0x5b   : > { %432 = vst.msk [vmem:[#allocation2 + $0x82] sm:$0xff] %vm330_vm0, %v399_v13  ;;  %v718_v13 = vld [vmem:[#allocation2 + $0x32] sm:$0xff] }
  0x5c   : > { %v526_v17 = vld [vmem:[#allocation2 + $0x39] sm:$0xff]  ;;  %433 = vst.msk [vmem:[#allocation2 + $0x92] sm:$0xff] %vm330_vm0, %v400_v14 }
  0x5d   : > { %595 = vrot.lane.b32.xlu2 %v526_v17, %s9376_s21  ;;  %v527_v19 = vld [vmem:[#allocation2 + $0x49] sm:$0xff]  ;;  %434 = vst.msk [vmem:[#allocation2 + $0x9a] sm:$0xff] %vm330_vm0, %v401_v15  ;;  %v9726_v59 = vld [vmem:[#allocation2 + $0x38] sm:$0xff] }
  0x5e   : > { %v528_v21 = vld [vmem:[#allocation2 + $0x51] sm:$0xff]  ;;  %597 = vrot.lane.b32.xlu0 %v527_v19, %s9376_s21  ;;  %435 = vst.msk [vmem:[#allocation2 + $0xaa] sm:$0xff] %vm330_vm0, %v402_v16  ;;  %v719_v14 = vld [vmem:[#allocation2 + $0x3a] sm:$0xff]  ;;  %v9764_v16 = vld [vmem:[#allocation2 + $0x48] sm:$0xff] }
  0x5f   : > { %599 = vrot.lane.b32.xlu1 %v528_v21, %s9376_s21  ;;  %437 = vst.msk [vmem:[#allocation2 + $0xc2] sm:$0xff] %vm330_vm0, %v404_v18  ;;  %v529_v26 = vld [vmem:[#allocation2 + $0x61] sm:$0xff]  ;;  %v9766_v17 = vld [vmem:[#allocation2 + $0x50] sm:$0xff] }
  0x60   : > { %436 = vst.msk [vmem:[#allocation2 + $0xb2] sm:$0xff] %vm330_vm0, %v403_v20  ;;  %v531_v30 = vld [vmem:[#allocation2 + $0x79] sm:$0xff]  ;;  %v720_v18 = vld [vmem:[#allocation2 + $0x4a] sm:$0xff]  ;;  %v722_v20 = vld [vmem:[#allocation2 + $0x62] sm:$0xff] }
  0x61   : > { %438 = vst.msk [vmem:[#allocation2 + $0xca] sm:$0xff] %vm330_vm0, %v405_v22  ;;  %v530_v28 = vld [vmem:[#allocation2 + $0x69] sm:$0xff]  ;;  %v9733_v63 = vld [vmem:[#allocation2 + $0x60] sm:$0xff]  ;;  %v721_v19 = vld [vmem:[#allocation2 + $0x52] sm:$0xff] }
  0x62   : > { %439 = vst.msk [vmem:[#allocation2 + $0xda] sm:$0xff] %vm330_vm0, %v406_v23  ;;  %v532_v34 = vld [vmem:[#allocation2 + $0x81] sm:$0xff]  ;;  %v9778_v23 = vld [vmem:[#allocation2 + $0x78] sm:$0xff] }
  0x63   : > { %440 = vst.msk [vmem:[#allocation2 + $0xe2] sm:$0xff] %vm330_vm0, %v407_v24  ;;  %v533_v35 = vld [vmem:[#allocation2 + $0x91] sm:$0xff]  ;;  %v9748_v9 = vld [vmem:[#allocation2 + $0x80] sm:$0xff]  ;;  %v9780_v24 = vld [vmem:[#allocation2 + $0x68] sm:$0xff] }
  0x64   : > { %441 = vst.msk [vmem:[#allocation2 + $0xf2] sm:$0xff] %vm330_vm0, %v408_v25  ;;  %v534_v36 = vld [vmem:[#allocation2 + $0x99] sm:$0xff]  ;;  %v723_v25 = vld [vmem:[#allocation2 + $0x6a] sm:$0xff] }
  0x65   : > { %601 = vrot.lane.b32.xlu2 %v529_v26, %s9376_s21  ;;  %443 = vst.msk [vmem:[#allocation2 + $0x10a] sm:$0xff] %vm330_vm0, %v410_v27  ;;  %v535_v40 = vld [vmem:[#allocation2 + $0xa9] sm:$0xff]  ;;  %v724_v26 = vld [vmem:[#allocation2 + $0x7a] sm:$0xff] }
  0x66   : > { %603 = vrot.lane.b32.xlu0 %v530_v28, %s9376_s21  ;;  %442 = vst.msk [vmem:[#allocation2 + $0xfa] sm:$0xff] %vm330_vm0, %v409_v29  ;;  %v537_v42 = vld [vmem:[#allocation2 + $0xc1] sm:$0xff] }
  0x67   : > { %605 = vrot.lane.b32.xlu1 %v531_v30, %s9376_s21  ;;  %444 = vst.msk [vmem:[#allocation2 + $0x112] sm:$0xff] %vm330_vm0, %v411_v31  ;;  %v536_v41 = vld [vmem:[#allocation2 + $0xb1] sm:$0xff]  ;;  %v9760_v15 = vld [vmem:[#allocation2 + $0xa8] sm:$0xff] }
  0x68   : > { %445 = vst.msk [vmem:[#allocation2 + $0x122] sm:$0xff] %vm330_vm0, %v412_v32  ;;  %v538_v46 = vld [vmem:[#allocation2 + $0xc9] sm:$0xff]  ;;  %v9796_v32 = vld [vmem:[#allocation2 + $0x98] sm:$0xff] }
  0x69   : > { %446 = vst.msk [vmem:[#allocation2 + $0x12a] sm:$0xff] %vm330_vm0, %v413_v33  ;;  %v539_v47 = vld [vmem:[#allocation2 + $0xd9] sm:$0xff]  ;;  %v9775_v22 = vld [vmem:[#allocation2 + $0xc8] sm:$0xff]  ;;  %v9798_v33 = vld [vmem:[#allocation2 + $0x90] sm:$0xff] }
  0x6a   : > { %447 = vst.msk [vmem:[#allocation2 + $0x13a] sm:$0xff] %vm330_vm0, %v414_v37  ;;  %v540_v48 = vld [vmem:[#allocation2 + $0xe1] sm:$0xff] }
  0x6b   : > { %449 = vst.msk [vmem:[#allocation2 + $0x152] sm:$0xff] %vm330_vm0, %v416_v38  ;;  %v541_v49 = vld [vmem:[#allocation2 + $0xf1] sm:$0xff]  ;;  %v725_v28 = vld [vmem:[#allocation2 + $0x82] sm:$0xff] }
  0x6c   : > { %448 = vst.msk [vmem:[#allocation2 + $0x142] sm:$0xff] %vm330_vm0, %v415_v39  ;;  %v543_v51 = vld [vmem:[#allocation2 + $0x109] sm:$0xff]  ;;  %v9812_v39 = vld [vmem:[#allocation2 + $0xc0] sm:$0xff] }
  0x6d   : > { %607 = vrot.lane.b32.xlu2 %v532_v34, %s9376_s21  ;;  %450 = vst.msk [vmem:[#allocation2 + $0x15a] sm:$0xff] %vm330_vm0, %v417_v43  ;;  %v542_v50 = vld [vmem:[#allocation2 + $0xf9] sm:$0xff]  ;;  %v9793_v31 = vld [vmem:[#allocation2 + $0xf0] sm:$0xff] }
  0x6e   : > { %609 = vrot.lane.b32.xlu0 %v533_v35, %s9376_s21  ;;  %451 = vst.msk [vmem:[#allocation2 + $0x16a] sm:$0xff] %vm330_vm0, %v418_v44  ;;  %v544_v52 = vld [vmem:[#allocation2 + $0x111] sm:$0xff]  ;;  %v727_v35 = vld [vmem:[#allocation2 + $0x9a] sm:$0xff] }
  0x6f   : > { %611 = vrot.lane.b32.xlu1 %v534_v36, %s9376_s21  ;;  %452 = vst.msk [vmem:[#allocation2 + $0x172] sm:$0xff] %vm330_vm0, %v419_v45  ;;  %v545_v53 = vld [vmem:[#allocation2 + $0x121] sm:$0xff]  ;;  %v726_v34 = vld [vmem:[#allocation2 + $0x92] sm:$0xff]  ;;  %v728_v36 = vld [vmem:[#allocation2 + $0xaa] sm:$0xff] }
  0x70   : > { %v546_v54 = vld [vmem:[#allocation2 + $0x129] sm:$0xff]  ;;  %493 = vst.msk [vmem:[#allocation3 + $0x20] sm:$0xff] %vm330_vm0, %v9719_v55 }
  0x71   : > { %v547_v56 = vld [vmem:[#allocation2 + $0x139] sm:$0xff]  ;;  %494 = vst.msk [vmem:[#allocation3 + $0x28] sm:$0xff] %vm330_vm0, %v9726_v59  ;;  %v9809_v38 = vld [vmem:[#allocation2 + $0x110] sm:$0xff] }
  0x72   : > { %v549_v58 = vld [vmem:[#allocation2 + $0x151] sm:$0xff]  ;;  %497 = vst.msk [vmem:[#allocation3 + $0x40] sm:$0xff] %vm330_vm0, %v9733_v63 }
  0x73   : > { %v548_v57 = vld [vmem:[#allocation2 + $0x141] sm:$0xff]  ;;  %491 = vst.msk [vmem:[#allocation3 + $0x10] sm:$0xff] %vm330_vm0, %v9737_v1  ;;  %v731_v43 = vld [vmem:[#allocation2 + $0xca] sm:$0xff] }
  0x74   : > { %v550_v60 = vld [vmem:[#allocation2 + $0x159] sm:$0xff]  ;;  %489 = vst.msk [vmem:[#allocation3] sm:$0xff] %vm330_vm0, %v457_v3 }
  0x75   : > { %613 = vrot.lane.b32.xlu2 %v535_v40, %s9376_s21  ;;  %v551_v61 = vld [vmem:[#allocation2 + $0x169] sm:$0xff]  ;;  %500 = vst.msk [vmem:[#allocation3 + $0x58] sm:$0xff] %vm330_vm0, %v9748_v9 }
  0x76   : > { %615 = vrot.lane.b32.xlu0 %v536_v41, %s9376_s21  ;;  %v552_v62 = vld [vmem:[#allocation2 + $0x171] sm:$0xff]  ;;  %492 = vst.msk [vmem:[#allocation3 + $0x18] sm:$0xff] %vm330_vm0, %v9752_v10 }
  0x77   : > { %617 = vrot.lane.b32.xlu1 %v537_v42, %s9376_s21  ;;  %490 = vst.msk [vmem:[#allocation3 + $0x8] sm:$0xff] %vm330_vm0, %v458_v11  ;;  %v9814_v40 = vld [vmem:[#allocation2 + $0xb0] sm:$0xff]  ;;  %v730_v42 = vld [vmem:[#allocation2 + $0xc2] sm:$0xff] }
  0x78   : > { %503 = vst.msk [vmem:[#allocation3 + $0x70] sm:$0xff] %vm330_vm0, %v9760_v15  ;;  %v729_v41 = vld [vmem:[#allocation2 + $0xb2] sm:$0xff]  ;;  %v739_v11 = vld [vmem:[#allocation2 + $0x12a] sm:$0xff] }
  0x79   : > { %495 = vst.msk [vmem:[#allocation3 + $0x30] sm:$0xff] %vm330_vm0, %v9764_v16 }
  0x7a   : > { %496 = vst.msk [vmem:[#allocation3 + $0x38] sm:$0xff] %vm330_vm0, %v9766_v17 }
  0x7b   : > { %506 = vst.msk [vmem:[#allocation3 + $0x88] sm:$0xff] %vm330_vm0, %v9775_v22 }
  0x7c   : > { %499 = vst.msk [vmem:[#allocation3 + $0x50] sm:$0xff] %vm330_vm0, %v9778_v23 }
  0x7d   : > { %619 = vrot.lane.b32.xlu2 %v538_v46, %s9376_s21  ;;  %498 = vst.msk [vmem:[#allocation3 + $0x48] sm:$0xff] %vm330_vm0, %v9780_v24  ;;  %v9826_v46 = vld [vmem:[#allocation2 + $0x138] sm:$0xff] }
  0x7e   : > { %621 = vrot.lane.b32.xlu0 %v539_v47, %s9376_s21  ;;  %509 = vst.msk [vmem:[#allocation3 + $0xa0] sm:$0xff] %vm330_vm0, %v9793_v31 }
  0x7f   : > { %623 = vrot.lane.b32.xlu1 %v540_v48, %s9376_s21  ;;  %502 = vst.msk [vmem:[#allocation3 + $0x68] sm:$0xff] %vm330_vm0, %v9796_v32  ;;  %v9829_v48 = vld [vmem:[#allocation2 + $0xe0] sm:$0xff] }
  0x80   : > { %501 = vst.msk [vmem:[#allocation3 + $0x60] sm:$0xff] %vm330_vm0, %v9798_v33 }
  0x81   : > { %512 = vst.msk [vmem:[#allocation3 + $0xb8] sm:$0xff] %vm330_vm0, %v9809_v38 }
  0x82   : > { %505 = vst.msk [vmem:[#allocation3 + $0x80] sm:$0xff] %vm330_vm0, %v9812_v39 }
  0x83   : > { %504 = vst.msk [vmem:[#allocation3 + $0x78] sm:$0xff] %vm330_vm0, %v9814_v40 }
  0x84   : > { %515 = vst.msk [vmem:[#allocation3 + $0xd0] sm:$0xff] %vm330_vm0, %v9826_v46 }
  0x85   : > { %625 = vrot.lane.b32.xlu2 %v541_v49, %s9376_s21  ;;  %v732_v49 = vld [vmem:[#allocation2 + $0xda] sm:$0xff]  ;;  %508 = vst.msk [vmem:[#allocation3 + $0x98] sm:$0xff] %vm330_vm0, %v9829_v48 }
  0x86   : > { %627 = vrot.lane.b32.xlu0 %v542_v50, %s9376_s21  ;;  %v9832_v50 = vld [vmem:[#allocation2 + $0xd8] sm:$0xff] }
  0x87   : > { %629 = vrot.lane.b32.xlu1 %v543_v51, %s9376_s21  ;;  %v733_v51 = vld [vmem:[#allocation2 + $0xe2] sm:$0xff]  ;;  %507 = vst.msk [vmem:[#allocation3 + $0x90] sm:$0xff] %vm330_vm0, %v9832_v50 }
  0x8d   : > { %631 = vrot.lane.b32.xlu2 %v544_v52, %s9376_s21  ;;  %v734_v52 = vld [vmem:[#allocation2 + $0xf2] sm:$0xff] }
  0x8e   : > { %633 = vrot.lane.b32.xlu0 %v545_v53, %s9376_s21 }
  0x8f   : > { %635 = vrot.lane.b32.xlu1 %v546_v54, %s9376_s21 }
  0x93   : > { %v590_v2 = vpop.permute.xlu1 %589 }
  0x94   : > { %684 = vst.msk [vmem:[#allocation3 + $0x10] sm:$0xff] %vm681_vm2, %v590_v2  ;;  %v737_v2 = vld [vmem:[#allocation2 + $0x112] sm:$0xff] }
  0x95   : > { %637 = vrot.lane.b32.xlu2 %v547_v56, %s9376_s21  ;;  %v586_v6 = vpop.permute.xlu0 %585  ;;  %v9844_v56 = vld [vmem:[#allocation2 + $0x158] sm:$0xff] }
  0x96   : > { %639 = vrot.lane.b32.xlu0 %v548_v57, %s9376_s21  ;;  %682 = vst.msk [vmem:[#allocation3] sm:$0xff] %vm681_vm2, %v586_v6 }
  0x97   : > { %641 = vrot.lane.b32.xlu1 %v549_v58, %s9376_s21  ;;  %v9847_v58 = vld [vmem:[#allocation2 + $0x108] sm:$0xff]  ;;  %518 = vst.msk [vmem:[#allocation3 + $0xe8] sm:$0xff] %vm330_vm0, %v9844_v56 }
  0x98   : > { %511 = vst.msk [vmem:[#allocation3 + $0xb0] sm:$0xff] %vm330_vm0, %v9847_v58 }
  0x9d   : > { %643 = vrot.lane.b32.xlu2 %v550_v60, %s9376_s21  ;;  %v735_v60 = vld [vmem:[#allocation2 + $0xfa] sm:$0xff] }
  0x9e   : > { %645 = vrot.lane.b32.xlu0 %v551_v61, %s9376_s21  ;;  %v9850_v61 = vld [vmem:[#allocation2 + $0xf8] sm:$0xff] }
  0x9f   : > { %647 = vrot.lane.b32.xlu1 %v552_v62, %s9376_s21  ;;  %v736_v62 = vld [vmem:[#allocation2 + $0x10a] sm:$0xff]  ;;  %510 = vst.msk [vmem:[#allocation3 + $0xa8] sm:$0xff] %vm330_vm0, %v9850_v61  ;;  %s13464_s21 = smov 24  }
  0xa2   : > { %v594_v5 = vpop.permute.xlu2 %593 }
  0xa3   : > { %686 = vst.msk [vmem:[#allocation3 + $0x20] sm:$0xff] %vm681_vm2, %v594_v5  ;;  %v9862_v5 = vld [vmem:[#allocation2 + $0x128] sm:$0xff] }
  0xa4   : > { %514 = vst.msk [vmem:[#allocation3 + $0xc8] sm:$0xff] %vm330_vm0, %v9862_v5 }
  0xa5   : > { %778 = vrot.lane.b32.xlu2 %v714_v4, %s9377_s27 }
  0xa6   : > { %780 = vrot.lane.b32.xlu0 %v715_v7, %s9377_s27  ;;  %v9865_v7 = vld [vmem:[#allocation2 + $0x120] sm:$0xff] }
  0xa7   : > { %782 = vrot.lane.b32.xlu1 %v716_v8, %s9377_s27  ;;  %v738_v8 = vld [vmem:[#allocation2 + $0x122] sm:$0xff]  ;;  %513 = vst.msk [vmem:[#allocation3 + $0xc0] sm:$0xff] %vm330_vm0, %v9865_v7 }
  0xad   : > { %784 = vrot.lane.b32.xlu2 %v717_v12, %s9377_s27  ;;  %v740_v12 = vld [vmem:[#allocation2 + $0x13a] sm:$0xff] }
  0xae   : > { %786 = vrot.lane.b32.xlu0 %v718_v13, %s9377_s27 }
  0xaf   : > { %788 = vrot.lane.b32.xlu1 %v719_v14, %s9377_s27 }
  0xb5   : > { %790 = vrot.lane.b32.xlu2 %v720_v18, %s9377_s27  ;;  %v9876_v18 = vld [vmem:[#allocation2 + $0x150] sm:$0xff] }
  0xb6   : > { %792 = vrot.lane.b32.xlu0 %v721_v19, %s9377_s27  ;;  %517 = vst.msk [vmem:[#allocation3 + $0xe0] sm:$0xff] %vm330_vm0, %v9876_v18 }
  0xb7   : > { %794 = vrot.lane.b32.xlu1 %v722_v20, %s9377_s27  ;;  %v596_v21 = vpop.permute.xlu2 %595  ;;  %v9879_v20 = vld [vmem:[#allocation2 + $0x140] sm:$0xff] }
  0xb8   : > { %687 = vst.msk [vmem:[#allocation3 + $0x28] sm:$0xff] %vm681_vm2, %v596_v21  ;;  %v741_v21 = vld [vmem:[#allocation2 + $0x142] sm:$0xff] }
  0xb9   : > { %516 = vst.msk [vmem:[#allocation3 + $0xd8] sm:$0xff] %vm330_vm0, %v9879_v20 }
  0xbb   : > { %v592_v27 = vpop.permute.xlu1 %591 }
  0xbc   : > { %685 = vst.msk [vmem:[#allocation3 + $0x18] sm:$0xff] %vm681_vm2, %v592_v27  ;;  %v588_v29 = vpop.permute.xlu0 %587 }
  0xbd   : > { %796 = vrot.lane.b32.xlu2 %v723_v25, %s9377_s27  ;;  %683 = vst.msk [vmem:[#allocation3 + $0x8] sm:$0xff] %vm681_vm2, %v588_v29  ;;  %v742_v25 = vld [vmem:[#allocation2 + $0x152] sm:$0xff] }
  0xbe   : > { %798 = vrot.lane.b32.xlu0 %v724_v26, %s9377_s27  ;;  %v743_v26 = vld [vmem:[#allocation2 + $0x15a] sm:$0xff]  ;;  %v9890_v29 = vld [vmem:[#allocation2 + $0x170] sm:$0xff] }
  0xbf   : > { %800 = vrot.lane.b32.xlu1 %v725_v28, %s9377_s27  ;;  %v602_v30 = vpop.permute.xlu2 %601  ;;  %520 = vst.msk [vmem:[#allocation3 + $0xf8] sm:$0xff] %vm330_vm0, %v9890_v29 }
  0xc0   : > { %690 = vst.msk [vmem:[#allocation3 + $0x40] sm:$0xff] %vm681_vm2, %v602_v30 }
  0xc5   : > { %802 = vrot.lane.b32.xlu2 %v726_v34, %s9377_s27  ;;  %v9893_v34 = vld [vmem:[#allocation2 + $0x168] sm:$0xff] }
  0xc6   : > { %804 = vrot.lane.b32.xlu0 %v727_v35, %s9377_s27  ;;  %v744_v35 = vld [vmem:[#allocation2 + $0x16a] sm:$0xff]  ;;  %519 = vst.msk [vmem:[#allocation3 + $0xf0] sm:$0xff] %vm330_vm0, %v9893_v34 }
  0xc7   : > { %806 = vrot.lane.b32.xlu1 %v728_v36, %s9377_s27  ;;  %v608_v37 = vpop.permute.xlu2 %607  ;;  %v745_v36 = vld [vmem:[#allocation2 + $0x172] sm:$0xff] }
  0xc8   : > { %693 = vst.msk [vmem:[#allocation3 + $0x58] sm:$0xff] %vm681_vm2, %v608_v37  ;;  %v907_v37 = vld [vmem:[#allocation2 + $0x3] sm:$0xff] }
  0xcd   : > { %808 = vrot.lane.b32.xlu2 %v729_v41, %s9377_s27 }
  0xce   : > { %810 = vrot.lane.b32.xlu0 %v730_v42, %s9377_s27 }
  0xcf   : > { %812 = vrot.lane.b32.xlu1 %v731_v43, %s9377_s27  ;;  %v614_v44 = vpop.permute.xlu2 %613 }
  0xd0   : > { %696 = vst.msk [vmem:[#allocation3 + $0x70] sm:$0xff] %vm681_vm2, %v614_v44  ;;  %v598_v45 = vpop.permute.xlu0 %597  ;;  %v908_v44 = vld [vmem:[#allocation2 + $0xb] sm:$0xff] }
  0xd1   : > { %v600_v47 = vpop.permute.xlu1 %599  ;;  %688 = vst.msk [vmem:[#allocation3 + $0x30] sm:$0xff] %vm681_vm2, %v598_v45  ;;  %v909_v45 = vld [vmem:[#allocation2 + $0x1b] sm:$0xff] }
  0xd2   : > { %689 = vst.msk [vmem:[#allocation3 + $0x38] sm:$0xff] %vm681_vm2, %v600_v47  ;;  %v910_v47 = vld [vmem:[#allocation2 + $0x23] sm:$0xff] }
  0xd5   : > { %814 = vrot.lane.b32.xlu2 %v732_v49, %s9377_s27 }
  0xd6   : > { %816 = vrot.lane.b32.xlu0 %v733_v51, %s9377_s27 }
  0xd7   : > { %818 = vrot.lane.b32.xlu1 %v734_v52, %s9377_s27  ;;  %v620_v53 = vpop.permute.xlu2 %619 }
  0xd8   : > { %699 = vst.msk [vmem:[#allocation3 + $0x88] sm:$0xff] %vm681_vm2, %v620_v53  ;;  %v604_v54 = vpop.permute.xlu0 %603  ;;  %v911_v53 = vld [vmem:[#allocation2 + $0x33] sm:$0xff] }
  0xd9   : > { %v606_v57 = vpop.permute.xlu1 %605  ;;  %691 = vst.msk [vmem:[#allocation3 + $0x48] sm:$0xff] %vm681_vm2, %v604_v54  ;;  %v912_v54 = vld [vmem:[#allocation2 + $0x3b] sm:$0xff] }
  0xda   : > { %692 = vst.msk [vmem:[#allocation3 + $0x50] sm:$0xff] %vm681_vm2, %v606_v57  ;;  %v913_v57 = vld [vmem:[#allocation2 + $0x4b] sm:$0xff] }
  0xdd   : > { %820 = vrot.lane.b32.xlu2 %v735_v60, %s9377_s27 }
  0xde   : > { %822 = vrot.lane.b32.xlu0 %v736_v62, %s9377_s27 }
  0xdf   : > { %824 = vrot.lane.b32.xlu1 %v737_v2, %s9377_s27  ;;  %v626_v3 = vpop.permute.xlu2 %625 }
  0xe0   : > { %702 = vst.msk [vmem:[#allocation3 + $0xa0] sm:$0xff] %vm681_vm2, %v626_v3  ;;  %v610_v4 = vpop.permute.xlu0 %609  ;;  %v914_v3 = vld [vmem:[#allocation2 + $0x53] sm:$0xff] }
  0xe1   : > { %v612_v6 = vpop.permute.xlu1 %611  ;;  %694 = vst.msk [vmem:[#allocation3 + $0x60] sm:$0xff] %vm681_vm2, %v610_v4  ;;  %v915_v4 = vld [vmem:[#allocation2 + $0x63] sm:$0xff] }
  0xe2   : > { %695 = vst.msk [vmem:[#allocation3 + $0x68] sm:$0xff] %vm681_vm2, %v612_v6  ;;  %v916_v6 = vld [vmem:[#allocation2 + $0x6b] sm:$0xff] }
  0xe5   : > { %826 = vrot.lane.b32.xlu2 %v738_v8, %s9377_s27 }
  0xe6   : > { %828 = vrot.lane.b32.xlu0 %v739_v11, %s9377_s27 }
  0xe7   : > { %830 = vrot.lane.b32.xlu1 %v740_v12, %s9377_s27  ;;  %v632_v13 = vpop.permute.xlu2 %631 }
  0xe8   : > { %705 = vst.msk [vmem:[#allocation3 + $0xb8] sm:$0xff] %vm681_vm2, %v632_v13  ;;  %v616_v14 = vpop.permute.xlu0 %615  ;;  %v917_v13 = vld [vmem:[#allocation2 + $0x7b] sm:$0xff] }
  0xe9   : > { %v618_v19 = vpop.permute.xlu1 %617  ;;  %697 = vst.msk [vmem:[#allocation3 + $0x78] sm:$0xff] %vm681_vm2, %v616_v14  ;;  %v918_v14 = vld [vmem:[#allocation2 + $0x83] sm:$0xff] }
  0xea   : > { %698 = vst.msk [vmem:[#allocation3 + $0x80] sm:$0xff] %vm681_vm2, %v618_v19  ;;  %v919_v19 = vld [vmem:[#allocation2 + $0x93] sm:$0xff] }
  0xed   : > { %832 = vrot.lane.b32.xlu2 %v741_v21, %s9377_s27 }
  0xee   : > { %834 = vrot.lane.b32.xlu0 %v742_v25, %s9377_s27 }
  0xef   : > { %836 = vrot.lane.b32.xlu1 %v743_v26, %s9377_s27  ;;  %v638_v27 = vpop.permute.xlu2 %637 }
  0xf0   : > { %708 = vst.msk [vmem:[#allocation3 + $0xd0] sm:$0xff] %vm681_vm2, %v638_v27  ;;  %v622_v28 = vpop.permute.xlu0 %621  ;;  %v920_v27 = vld [vmem:[#allocation2 + $0x9b] sm:$0xff] }
  0xf1   : > { %v624_v30 = vpop.permute.xlu1 %623  ;;  %700 = vst.msk [vmem:[#allocation3 + $0x90] sm:$0xff] %vm681_vm2, %v622_v28  ;;  %v921_v28 = vld [vmem:[#allocation2 + $0xab] sm:$0xff] }
  0xf2   : > { %701 = vst.msk [vmem:[#allocation3 + $0x98] sm:$0xff] %vm681_vm2, %v624_v30  ;;  %v922_v30 = vld [vmem:[#allocation2 + $0xb3] sm:$0xff] }
  0xf5   : > { %838 = vrot.lane.b32.xlu2 %v744_v35, %s9377_s27 }
  0xf6   : > { %840 = vrot.lane.b32.xlu0 %v745_v36, %s9377_s27  ;;  %s9389_s27 = smov 42  }
  0xf7   : > { %971 = vrot.lane.b32.xlu1 %v907_v37, %s9378_s28  ;;  %v644_v41 = vpop.permute.xlu2 %643 }
  0xf8   : > { %711 = vst.msk [vmem:[#allocation3 + $0xe8] sm:$0xff] %vm681_vm2, %v644_v41  ;;  %v628_v42 = vpop.permute.xlu0 %627  ;;  %v923_v41 = vld [vmem:[#allocation2 + $0xc3] sm:$0xff] }
  0xf9   : > { %v630_v43 = vpop.permute.xlu1 %629  ;;  %703 = vst.msk [vmem:[#allocation3 + $0xa8] sm:$0xff] %vm681_vm2, %v628_v42  ;;  %v924_v42 = vld [vmem:[#allocation2 + $0xcb] sm:$0xff] }
  0xfa   : > { %704 = vst.msk [vmem:[#allocation3 + $0xb0] sm:$0xff] %vm681_vm2, %v630_v43  ;;  %v925_v43 = vld [vmem:[#allocation2 + $0xdb] sm:$0xff] }
  0xfd   : > { %973 = vrot.lane.b32.xlu2 %v908_v44, %s9378_s28 }
  0xfe   : > { %975 = vrot.lane.b32.xlu0 %v909_v45, %s9378_s28 }
  0xff   : > { %977 = vrot.lane.b32.xlu1 %v910_v47, %s9378_s28  ;;  %v779_v49 = vpop.permute.xlu2 %778 }
 0x100   : > { %875 = vst.msk [vmem:[#allocation3] sm:$0xff] %vm874_vm3, %v779_v49  ;;  %v634_v51 = vpop.permute.xlu0 %633  ;;  %v926_v49 = vld [vmem:[#allocation2 + $0xe3] sm:$0xff] }
 0x101   : > { %v636_v52 = vpop.permute.xlu1 %635  ;;  %706 = vst.msk [vmem:[#allocation3 + $0xc0] sm:$0xff] %vm681_vm2, %v634_v51  ;;  %v927_v51 = vld [vmem:[#allocation2 + $0xf3] sm:$0xff] }
 0x102   : > { %707 = vst.msk [vmem:[#allocation3 + $0xc8] sm:$0xff] %vm681_vm2, %v636_v52  ;;  %v928_v52 = vld [vmem:[#allocation2 + $0xfb] sm:$0xff] }
 0x105   : > { %979 = vrot.lane.b32.xlu2 %v911_v53, %s9378_s28 }
 0x106   : > { %981 = vrot.lane.b32.xlu0 %v912_v54, %s9378_s28 }
 0x107   : > { %983 = vrot.lane.b32.xlu1 %v913_v57, %s9378_s28  ;;  %v785_v60 = vpop.permute.xlu2 %784 }
 0x108   : > { %878 = vst.msk [vmem:[#allocation3 + $0x18] sm:$0xff] %vm874_vm3, %v785_v60  ;;  %v640_v62 = vpop.permute.xlu0 %639  ;;  %v929_v60 = vld [vmem:[#allocation2 + $0x10b] sm:$0xff] }
 0x109   : > { %v642_v2 = vpop.permute.xlu1 %641  ;;  %709 = vst.msk [vmem:[#allocation3 + $0xd8] sm:$0xff] %vm681_vm2, %v640_v62  ;;  %v930_v62 = vld [vmem:[#allocation2 + $0x113] sm:$0xff] }
 0x10a   : > { %710 = vst.msk [vmem:[#allocation3 + $0xe0] sm:$0xff] %vm681_vm2, %v642_v2  ;;  %v931_v2 = vld [vmem:[#allocation2 + $0x123] sm:$0xff] }
 0x10d   : > { %985 = vrot.lane.b32.xlu2 %v914_v3, %s9378_s28 }
 0x10e   : > { %987 = vrot.lane.b32.xlu0 %v915_v4, %s9378_s28 }
 0x10f   : > { %989 = vrot.lane.b32.xlu1 %v916_v6, %s9378_s28  ;;  %v791_v8 = vpop.permute.xlu2 %790 }
 0x110   : > { %881 = vst.msk [vmem:[#allocation3 + $0x30] sm:$0xff] %vm874_vm3, %v791_v8  ;;  %v646_v11 = vpop.permute.xlu0 %645  ;;  %v932_v8 = vld [vmem:[#allocation2 + $0x12b] sm:$0xff] }
 0x111   : > { %v648_v12 = vpop.permute.xlu1 %647  ;;  %712 = vst.msk [vmem:[#allocation3 + $0xf0] sm:$0xff] %vm681_vm2, %v646_v11  ;;  %v933_v11 = vld [vmem:[#allocation2 + $0x13b] sm:$0xff] }
 0x112   : > { %713 = vst.msk [vmem:[#allocation3 + $0xf8] sm:$0xff] %vm681_vm2, %v648_v12  ;;  %v934_v12 = vld [vmem:[#allocation2 + $0x143] sm:$0xff]  ;;  %vm3771_vm2 = vcmask 441752  }
 0x115   : > { %991 = vrot.lane.b32.xlu2 %v917_v13, %s9378_s28 }
 0x116   : > { %993 = vrot.lane.b32.xlu0 %v918_v14, %s9378_s28 }
 0x117   : > { %995 = vrot.lane.b32.xlu1 %v919_v19, %s9378_s28  ;;  %v797_v21 = vpop.permute.xlu2 %796 }
 0x118   : > { %884 = vst.msk [vmem:[#allocation3 + $0x48] sm:$0xff] %vm874_vm3, %v797_v21  ;;  %v781_v25 = vpop.permute.xlu0 %780  ;;  %v935_v21 = vld [vmem:[#allocation2 + $0x153] sm:$0xff] }
 0x119   : > { %v783_v26 = vpop.permute.xlu1 %782  ;;  %876 = vst.msk [vmem:[#allocation3 + $0x8] sm:$0xff] %vm874_vm3, %v781_v25  ;;  %v936_v25 = vld [vmem:[#allocation2 + $0x15b] sm:$0xff] }
 0x11a   : > { %877 = vst.msk [vmem:[#allocation3 + $0x10] sm:$0xff] %vm874_vm3, %v783_v26  ;;  %v937_v26 = vld [vmem:[#allocation2 + $0x16b] sm:$0xff] }
 0x11d   : > { %997 = vrot.lane.b32.xlu2 %v920_v27, %s9378_s28 }
 0x11e   : > { %999 = vrot.lane.b32.xlu0 %v921_v28, %s9378_s28 }
 0x11f   : > { %1001 = vrot.lane.b32.xlu1 %v922_v30, %s9378_s28  ;;  %v803_v35 = vpop.permute.xlu2 %802 }
 0x120   : > { %887 = vst.msk [vmem:[#allocation3 + $0x60] sm:$0xff] %vm874_vm3, %v803_v35  ;;  %v787_v36 = vpop.permute.xlu0 %786  ;;  %v938_v35 = vld [vmem:[#allocation2 + $0x173] sm:$0xff] }
 0x121   : > { %v789_v37 = vpop.permute.xlu1 %788  ;;  %879 = vst.msk [vmem:[#allocation3 + $0x20] sm:$0xff] %vm874_vm3, %v787_v36  ;;  %v1100_v36 = vld [vmem:[#allocation2 + $0x4] sm:$0xff] }
 0x122   : > { %880 = vst.msk [vmem:[#allocation3 + $0x28] sm:$0xff] %vm874_vm3, %v789_v37  ;;  %v1101_v37 = vld [vmem:[#allocation2 + $0xc] sm:$0xff] }
 0x125   : > { %1003 = vrot.lane.b32.xlu2 %v923_v41, %s9378_s28 }
 0x126   : > { %1005 = vrot.lane.b32.xlu0 %v924_v42, %s9378_s28 }
 0x127   : > { %1007 = vrot.lane.b32.xlu1 %v925_v43, %s9378_s28  ;;  %v809_v44 = vpop.permute.xlu2 %808 }
 0x128   : > { %890 = vst.msk [vmem:[#allocation3 + $0x78] sm:$0xff] %vm874_vm3, %v809_v44  ;;  %v793_v45 = vpop.permute.xlu0 %792  ;;  %v1102_v44 = vld [vmem:[#allocation2 + $0x1c] sm:$0xff] }
 0x129   : > { %v795_v47 = vpop.permute.xlu1 %794  ;;  %882 = vst.msk [vmem:[#allocation3 + $0x38] sm:$0xff] %vm874_vm3, %v793_v45  ;;  %v1103_v45 = vld [vmem:[#allocation2 + $0x24] sm:$0xff] }
 0x12a   : > { %883 = vst.msk [vmem:[#allocation3 + $0x40] sm:$0xff] %vm874_vm3, %v795_v47  ;;  %v1104_v47 = vld [vmem:[#allocation2 + $0x34] sm:$0xff] }
 0x12d   : > { %1009 = vrot.lane.b32.xlu2 %v926_v49, %s9378_s28 }
 0x12e   : > { %1011 = vrot.lane.b32.xlu0 %v927_v51, %s9378_s28 }
 0x12f   : > { %1013 = vrot.lane.b32.xlu1 %v928_v52, %s9378_s28  ;;  %v815_v53 = vpop.permute.xlu2 %814 }
 0x130   : > { %893 = vst.msk [vmem:[#allocation3 + $0x90] sm:$0xff] %vm874_vm3, %v815_v53  ;;  %v799_v54 = vpop.permute.xlu0 %798  ;;  %v1105_v53 = vld [vmem:[#allocation2 + $0x3c] sm:$0xff] }
 0x131   : > { %v801_v57 = vpop.permute.xlu1 %800  ;;  %885 = vst.msk [vmem:[#allocation3 + $0x50] sm:$0xff] %vm874_vm3, %v799_v54  ;;  %v1106_v54 = vld [vmem:[#allocation2 + $0x4c] sm:$0xff] }
 0x132   : > { %886 = vst.msk [vmem:[#allocation3 + $0x58] sm:$0xff] %vm874_vm3, %v801_v57  ;;  %v1107_v57 = vld [vmem:[#allocation2 + $0x54] sm:$0xff] }
 0x135   : > { %1015 = vrot.lane.b32.xlu2 %v929_v60, %s9378_s28 }
 0x136   : > { %1017 = vrot.lane.b32.xlu0 %v930_v62, %s9378_s28 }
 0x137   : > { %1019 = vrot.lane.b32.xlu1 %v931_v2, %s9378_s28  ;;  %v821_v3 = vpop.permute.xlu2 %820 }
 0x138   : > { %896 = vst.msk [vmem:[#allocation3 + $0xa8] sm:$0xff] %vm874_vm3, %v821_v3  ;;  %v805_v4 = vpop.permute.xlu0 %804  ;;  %v1108_v3 = vld [vmem:[#allocation2 + $0x64] sm:$0xff] }
 0x139   : > { %v807_v6 = vpop.permute.xlu1 %806  ;;  %888 = vst.msk [vmem:[#allocation3 + $0x68] sm:$0xff] %vm874_vm3, %v805_v4  ;;  %v1109_v4 = vld [vmem:[#allocation2 + $0x6c] sm:$0xff] }
 0x13a   : > { %889 = vst.msk [vmem:[#allocation3 + $0x70] sm:$0xff] %vm874_vm3, %v807_v6  ;;  %v1110_v6 = vld [vmem:[#allocation2 + $0x7c] sm:$0xff] }
 0x13d   : > { %1021 = vrot.lane.b32.xlu2 %v932_v8, %s9378_s28 }
 0x13e   : > { %1023 = vrot.lane.b32.xlu0 %v933_v11, %s9378_s28 }
 0x13f   : > { %1025 = vrot.lane.b32.xlu1 %v934_v12, %s9378_s28  ;;  %v827_v13 = vpop.permute.xlu2 %826 }
 0x140   : > { %899 = vst.msk [vmem:[#allocation3 + $0xc0] sm:$0xff] %vm874_vm3, %v827_v13  ;;  %v811_v14 = vpop.permute.xlu0 %810  ;;  %v1111_v13 = vld [vmem:[#allocation2 + $0x84] sm:$0xff] }
 0x141   : > { %v813_v19 = vpop.permute.xlu1 %812  ;;  %891 = vst.msk [vmem:[#allocation3 + $0x80] sm:$0xff] %vm874_vm3, %v811_v14  ;;  %v1112_v14 = vld [vmem:[#allocation2 + $0x94] sm:$0xff] }
 0x142   : > { %892 = vst.msk [vmem:[#allocation3 + $0x88] sm:$0xff] %vm874_vm3, %v813_v19  ;;  %v1113_v19 = vld [vmem:[#allocation2 + $0x9c] sm:$0xff] }
 0x145   : > { %1027 = vrot.lane.b32.xlu2 %v935_v21, %s9378_s28 }
 0x146   : > { %1029 = vrot.lane.b32.xlu0 %v936_v25, %s9378_s28 }
 0x147   : > { %1031 = vrot.lane.b32.xlu1 %v937_v26, %s9378_s28  ;;  %v833_v27 = vpop.permute.xlu2 %832 }
 0x148   : > { %902 = vst.msk [vmem:[#allocation3 + $0xd8] sm:$0xff] %vm874_vm3, %v833_v27  ;;  %v817_v28 = vpop.permute.xlu0 %816  ;;  %v1114_v27 = vld [vmem:[#allocation2 + $0xac] sm:$0xff] }
 0x149   : > { %v819_v30 = vpop.permute.xlu1 %818  ;;  %894 = vst.msk [vmem:[#allocation3 + $0x98] sm:$0xff] %vm874_vm3, %v817_v28  ;;  %v1115_v28 = vld [vmem:[#allocation2 + $0xb4] sm:$0xff] }
 0x14a   : > { %895 = vst.msk [vmem:[#allocation3 + $0xa0] sm:$0xff] %vm874_vm3, %v819_v30  ;;  %v1116_v30 = vld [vmem:[#allocation2 + $0xc4] sm:$0xff] }
 0x14d   : > { %1033 = vrot.lane.b32.xlu2 %v938_v35, %s9378_s28  ;;  %s9390_s28 = smov 45  }
 0x14e   : > { %1164 = vrot.lane.b32.xlu0 %v1100_v36, %s9379_s29 }
 0x14f   : > { %1166 = vrot.lane.b32.xlu1 %v1101_v37, %s9379_s29  ;;  %v839_v41 = vpop.permute.xlu2 %838 }
 0x150   : > { %905 = vst.msk [vmem:[#allocation3 + $0xf0] sm:$0xff] %vm874_vm3, %v839_v41  ;;  %v823_v42 = vpop.permute.xlu0 %822  ;;  %v1117_v41 = vld [vmem:[#allocation2 + $0xcc] sm:$0xff] }
 0x151   : > { %v825_v43 = vpop.permute.xlu1 %824  ;;  %897 = vst.msk [vmem:[#allocation3 + $0xb0] sm:$0xff] %vm874_vm3, %v823_v42  ;;  %v1118_v42 = vld [vmem:[#allocation2 + $0xdc] sm:$0xff] }
 0x152   : > { %898 = vst.msk [vmem:[#allocation3 + $0xb8] sm:$0xff] %vm874_vm3, %v825_v43  ;;  %v1119_v43 = vld [vmem:[#allocation2 + $0xe4] sm:$0xff] }
 0x155   : > { %1168 = vrot.lane.b32.xlu2 %v1102_v44, %s9379_s29 }
 0x156   : > { %1170 = vrot.lane.b32.xlu0 %v1103_v45, %s9379_s29 }
 0x157   : > { %1172 = vrot.lane.b32.xlu1 %v1104_v47, %s9379_s29  ;;  %v974_v49 = vpop.permute.xlu2 %973 }
 0x158   : > { %1069 = vst.msk [vmem:[#allocation3 + $0x8] sm:$0xff] %vm1067_vm4, %v974_v49  ;;  %v829_v51 = vpop.permute.xlu0 %828  ;;  %v1120_v49 = vld [vmem:[#allocation2 + $0xf4] sm:$0xff] }
 0x159   : > { %v831_v52 = vpop.permute.xlu1 %830  ;;  %900 = vst.msk [vmem:[#allocation3 + $0xc8] sm:$0xff] %vm874_vm3, %v829_v51  ;;  %v1121_v51 = vld [vmem:[#allocation2 + $0xfc] sm:$0xff] }
 0x15a   : > { %901 = vst.msk [vmem:[#allocation3 + $0xd0] sm:$0xff] %vm874_vm3, %v831_v52  ;;  %v1122_v52 = vld [vmem:[#allocation2 + $0x10c] sm:$0xff] }
 0x15d   : > { %1174 = vrot.lane.b32.xlu2 %v1105_v53, %s9379_s29 }
 0x15e   : > { %1176 = vrot.lane.b32.xlu0 %v1106_v54, %s9379_s29 }
 0x15f   : > { %1178 = vrot.lane.b32.xlu1 %v1107_v57, %s9379_s29  ;;  %v980_v60 = vpop.permute.xlu2 %979 }
 0x160   : > { %1072 = vst.msk [vmem:[#allocation3 + $0x20] sm:$0xff] %vm1067_vm4, %v980_v60  ;;  %v835_v62 = vpop.permute.xlu0 %834  ;;  %v1123_v60 = vld [vmem:[#allocation2 + $0x114] sm:$0xff] }
 0x161   : > { %v837_v2 = vpop.permute.xlu1 %836  ;;  %903 = vst.msk [vmem:[#allocation3 + $0xe0] sm:$0xff] %vm874_vm3, %v835_v62  ;;  %v1124_v62 = vld [vmem:[#allocation2 + $0x124] sm:$0xff] }
 0x162   : > { %904 = vst.msk [vmem:[#allocation3 + $0xe8] sm:$0xff] %vm874_vm3, %v837_v2  ;;  %v1125_v2 = vld [vmem:[#allocation2 + $0x12c] sm:$0xff] }
 0x165   : > { %1180 = vrot.lane.b32.xlu2 %v1108_v3, %s9379_s29 }
 0x166   : > { %1182 = vrot.lane.b32.xlu0 %v1109_v4, %s9379_s29 }
 0x167   : > { %1184 = vrot.lane.b32.xlu1 %v1110_v6, %s9379_s29  ;;  %v986_v8 = vpop.permute.xlu2 %985 }
 0x168   : > { %1075 = vst.msk [vmem:[#allocation3 + $0x38] sm:$0xff] %vm1067_vm4, %v986_v8  ;;  %v841_v11 = vpop.permute.xlu0 %840  ;;  %v1126_v8 = vld [vmem:[#allocation2 + $0x13c] sm:$0xff] }
 0x169   : > { %v972_v12 = vpop.permute.xlu1 %971  ;;  %906 = vst.msk [vmem:[#allocation3 + $0xf8] sm:$0xff] %vm874_vm3, %v841_v11  ;;  %v1127_v11 = vld [vmem:[#allocation2 + $0x144] sm:$0xff]  ;;  %vm3964_vm3 = vcmask 466352  }
 0x16a   : > { %1068 = vst.msk [vmem:[#allocation3] sm:$0xff] %vm1067_vm4, %v972_v12  ;;  %v1128_v12 = vld [vmem:[#allocation2 + $0x154] sm:$0xff] }
 0x16d   : > { %1186 = vrot.lane.b32.xlu2 %v1111_v13, %s9379_s29 }
 0x16e   : > { %1188 = vrot.lane.b32.xlu0 %v1112_v14, %s9379_s29 }
 0x16f   : > { %1190 = vrot.lane.b32.xlu1 %v1113_v19, %s9379_s29  ;;  %v992_v21 = vpop.permute.xlu2 %991 }
 0x170   : > { %1078 = vst.msk [vmem:[#allocation3 + $0x50] sm:$0xff] %vm1067_vm4, %v992_v21  ;;  %v976_v25 = vpop.permute.xlu0 %975  ;;  %v1129_v21 = vld [vmem:[#allocation2 + $0x15c] sm:$0xff] }
 0x171   : > { %v978_v26 = vpop.permute.xlu1 %977  ;;  %1070 = vst.msk [vmem:[#allocation3 + $0x10] sm:$0xff] %vm1067_vm4, %v976_v25  ;;  %v1130_v25 = vld [vmem:[#allocation2 + $0x16c] sm:$0xff] }
 0x172   : > { %1071 = vst.msk [vmem:[#allocation3 + $0x18] sm:$0xff] %vm1067_vm4, %v978_v26  ;;  %v1131_v26 = vld [vmem:[#allocation2 + $0x174] sm:$0xff] }
 0x175   : > { %1192 = vrot.lane.b32.xlu2 %v1114_v27, %s9379_s29 }
 0x176   : > { %1194 = vrot.lane.b32.xlu0 %v1115_v28, %s9379_s29 }
 0x177   : > { %1196 = vrot.lane.b32.xlu1 %v1116_v30, %s9379_s29  ;;  %v998_v35 = vpop.permute.xlu2 %997 }
 0x178   : > { %1081 = vst.msk [vmem:[#allocation3 + $0x68] sm:$0xff] %vm1067_vm4, %v998_v35  ;;  %v982_v36 = vpop.permute.xlu0 %981 }
 0x179   : > { %v984_v37 = vpop.permute.xlu1 %983  ;;  %1073 = vst.msk [vmem:[#allocation3 + $0x28] sm:$0xff] %vm1067_vm4, %v982_v36 }
 0x17a   : > { %1074 = vst.msk [vmem:[#allocation3 + $0x30] sm:$0xff] %vm1067_vm4, %v984_v37 }
 0x17d   : > { %1198 = vrot.lane.b32.xlu2 %v1117_v41, %s9379_s29  ;;  %v420_v41 = vld [vmem:[%s9587_s26 + $0xe0] sm:$0xff] }
 0x17e   : > { %1200 = vrot.lane.b32.xlu0 %v1118_v42, %s9379_s29  ;;  %453 = vst.msk [vmem:[#allocation2 + $0x182] sm:$0xff] %vm330_vm0, %v420_v41 }
 0x17f   : > { %1202 = vrot.lane.b32.xlu1 %v1119_v43, %s9379_s29  ;;  %v1004_v44 = vpop.permute.xlu2 %1003 }
 0x180   : > { %1084 = vst.msk [vmem:[#allocation3 + $0x80] sm:$0xff] %vm1067_vm4, %v1004_v44  ;;  %v988_v45 = vpop.permute.xlu0 %987 }
 0x181   : > { %v990_v47 = vpop.permute.xlu1 %989  ;;  %1076 = vst.msk [vmem:[#allocation3 + $0x40] sm:$0xff] %vm1067_vm4, %v988_v45  ;;  %v1487_v45 = vld [vmem:[#allocation2 + $0x19] sm:$0xff] }
 0x182   : > { %1077 = vst.msk [vmem:[#allocation3 + $0x48] sm:$0xff] %vm1067_vm4, %v990_v47  ;;  %v1488_v47 = vld [vmem:[#allocation2 + $0x21] sm:$0xff] }
 0x185   : > { %1204 = vrot.lane.b32.xlu2 %v1120_v49, %s9379_s29  ;;  %v1324_v43 = vld [vmem:[#allocation2 + $0x180] sm:$0xff]  ;;  %v1489_v49 = vld [vmem:[#allocation2 + $0x31] sm:$0xff] }
 0x186   : > { %1206 = vrot.lane.b32.xlu0 %v1121_v51, %s9379_s29  ;;  %v1490_v51 = vld [vmem:[#allocation2 + $0x39] sm:$0xff] }
 0x187   : > { %1208 = vrot.lane.b32.xlu1 %v1122_v52, %s9379_s29  ;;  %v1010_v53 = vpop.permute.xlu2 %1009 }
 0x188   : > { %1087 = vst.msk [vmem:[#allocation3 + $0x98] sm:$0xff] %vm1067_vm4, %v1010_v53  ;;  %v994_v54 = vpop.permute.xlu0 %993 }
 0x189   : > { %v996_v57 = vpop.permute.xlu1 %995  ;;  %1079 = vst.msk [vmem:[#allocation3 + $0x58] sm:$0xff] %vm1067_vm4, %v994_v54 }
 0x18a   : > { %1080 = vst.msk [vmem:[#allocation3 + $0x60] sm:$0xff] %vm1067_vm4, %v996_v57  ;;  %v1491_v57 = vld [vmem:[#allocation2 + $0x49] sm:$0xff] }
 0x18d   : > { %1210 = vrot.lane.b32.xlu2 %v1123_v60, %s9379_s29  ;;  %v1492_v60 = vld [vmem:[#allocation2 + $0x51] sm:$0xff] }
 0x18e   : > { %1212 = vrot.lane.b32.xlu0 %v1124_v62, %s9379_s29  ;;  %v1493_v62 = vld [vmem:[#allocation2 + $0x61] sm:$0xff] }
 0x18f   : > { %1214 = vrot.lane.b32.xlu1 %v1125_v2, %s9379_s29  ;;  %v1016_v3 = vpop.permute.xlu2 %1015 }
 0x190   : > { %1090 = vst.msk [vmem:[#allocation3 + $0xb0] sm:$0xff] %vm1067_vm4, %v1016_v3  ;;  %v1000_v4 = vpop.permute.xlu0 %999 }
 0x191   : > { %v1002_v6 = vpop.permute.xlu1 %1001  ;;  %1082 = vst.msk [vmem:[#allocation3 + $0x70] sm:$0xff] %vm1067_vm4, %v1000_v4 }
 0x192   : > { %1083 = vst.msk [vmem:[#allocation3 + $0x78] sm:$0xff] %vm1067_vm4, %v1002_v6  ;;  %v1494_v6 = vld [vmem:[#allocation2 + $0x69] sm:$0xff] }
 0x195   : > { %1216 = vrot.lane.b32.xlu2 %v1126_v8, %s9379_s29  ;;  %v1495_v8 = vld [vmem:[#allocation2 + $0x79] sm:$0xff] }
 0x196   : > { %1218 = vrot.lane.b32.xlu0 %v1127_v11, %s9379_s29  ;;  %v1496_v11 = vld [vmem:[#allocation2 + $0x81] sm:$0xff] }
 0x197   : > { %1220 = vrot.lane.b32.xlu1 %v1128_v12, %s9379_s29  ;;  %v1022_v13 = vpop.permute.xlu2 %1021 }
 0x198   : > { %1093 = vst.msk [vmem:[#allocation3 + $0xc8] sm:$0xff] %vm1067_vm4, %v1022_v13  ;;  %v1006_v14 = vpop.permute.xlu0 %1005 }
 0x199   : > { %v1008_v19 = vpop.permute.xlu1 %1007  ;;  %1085 = vst.msk [vmem:[#allocation3 + $0x88] sm:$0xff] %vm1067_vm4, %v1006_v14 }
 0x19a   : > { %1086 = vst.msk [vmem:[#allocation3 + $0x90] sm:$0xff] %vm1067_vm4, %v1008_v19  ;;  %v1497_v19 = vld [vmem:[#allocation2 + $0x91] sm:$0xff] }
 0x19d   : > { %1222 = vrot.lane.b32.xlu2 %v1129_v21, %s9379_s29  ;;  %v1498_v21 = vld [vmem:[#allocation2 + $0x99] sm:$0xff] }
 0x19e   : > { %1224 = vrot.lane.b32.xlu0 %v1130_v25, %s9379_s29  ;;  %v1499_v25 = vld [vmem:[#allocation2 + $0xa9] sm:$0xff] }
 0x19f   : > { %1226 = vrot.lane.b32.xlu1 %v1131_v26, %s9379_s29  ;;  %v1028_v27 = vpop.permute.xlu2 %1027  ;;  %s13460_s29 = smov 48  }
 0x1a0   : > { %1096 = vst.msk [vmem:[#allocation3 + $0xe0] sm:$0xff] %vm1067_vm4, %v1028_v27  ;;  %v1012_v28 = vpop.permute.xlu0 %1011 }
 0x1a1   : > { %v1014_v30 = vpop.permute.xlu1 %1013  ;;  %1088 = vst.msk [vmem:[#allocation3 + $0xa0] sm:$0xff] %vm1067_vm4, %v1012_v28 }
 0x1a2   : > { %1089 = vst.msk [vmem:[#allocation3 + $0xa8] sm:$0xff] %vm1067_vm4, %v1014_v30  ;;  %v1500_v30 = vld [vmem:[#allocation2 + $0xb1] sm:$0xff] }
 0x1a5   : > { %1358 = vrot.lane.b32.xlu2 %v9737_v1, %s9380_s14 }
 0x1a6   : > { %1360 = vrot.lane.b32.xlu0 %v9752_v10, %s9380_s14 }
 0x1a7   : > { %1362 = vrot.lane.b32.xlu1 %v9719_v55, %s9380_s14  ;;  %v1034_v35 = vpop.permute.xlu2 %1033 }
 0x1a8   : > { %1099 = vst.msk [vmem:[#allocation3 + $0xf8] sm:$0xff] %vm1067_vm4, %v1034_v35  ;;  %v1018_v36 = vpop.permute.xlu0 %1017  ;;  %v1501_v35 = vld [vmem:[#allocation2 + $0xc1] sm:$0xff] }
 0x1a9   : > { %v1020_v37 = vpop.permute.xlu1 %1019  ;;  %1091 = vst.msk [vmem:[#allocation3 + $0xb8] sm:$0xff] %vm1067_vm4, %v1018_v36  ;;  %v1502_v36 = vld [vmem:[#allocation2 + $0xc9] sm:$0xff] }
 0x1aa   : > { %1092 = vst.msk [vmem:[#allocation3 + $0xc0] sm:$0xff] %vm1067_vm4, %v1020_v37 }
 0x1ad   : > { %1364 = vrot.lane.b32.xlu2 %v9726_v59, %s9380_s14 }
 0x1ae   : > { %1366 = vrot.lane.b32.xlu0 %v9764_v16, %s9380_s14 }
 0x1af   : > { %1368 = vrot.lane.b32.xlu1 %v9766_v17, %s9380_s14  ;;  %v1169_v55 = vpop.permute.xlu2 %1168 }
 0x1b0   : > { %1263 = vst.msk [vmem:[#allocation3 + $0x10] sm:$0xff] %vm1260_vm5, %v1169_v55  ;;  %v1024_v1 = vpop.permute.xlu0 %1023 }
 0x1b1   : > { %v1026_v10 = vpop.permute.xlu1 %1025  ;;  %1094 = vst.msk [vmem:[#allocation3 + $0xd0] sm:$0xff] %vm1067_vm4, %v1024_v1 }
 0x1b2   : > { %1095 = vst.msk [vmem:[#allocation3 + $0xd8] sm:$0xff] %vm1067_vm4, %v1026_v10  ;;  %v1503_v10 = vld [vmem:[#allocation2 + $0xd9] sm:$0xff] }
 0x1b5   : > { %1370 = vrot.lane.b32.xlu2 %v9733_v63, %s9380_s14 }
 0x1b6   : > { %1372 = vrot.lane.b32.xlu0 %v9780_v24, %s9380_s14 }
 0x1b7   : > { %1374 = vrot.lane.b32.xlu1 %v9778_v23, %s9380_s14  ;;  %v1175_v59 = vpop.permute.xlu2 %1174 }
 0x1b8   : > { %1266 = vst.msk [vmem:[#allocation3 + $0x28] sm:$0xff] %vm1260_vm5, %v1175_v59  ;;  %v1030_v16 = vpop.permute.xlu0 %1029  ;;  %v1504_v59 = vld [vmem:[#allocation2 + $0xe1] sm:$0xff] }
 0x1b9   : > { %v1032_v17 = vpop.permute.xlu1 %1031  ;;  %1097 = vst.msk [vmem:[#allocation3 + $0xe8] sm:$0xff] %vm1067_vm4, %v1030_v16  ;;  %v1505_v16 = vld [vmem:[#allocation2 + $0xf1] sm:$0xff] }
 0x1ba   : > { %1098 = vst.msk [vmem:[#allocation3 + $0xf0] sm:$0xff] %vm1067_vm4, %v1032_v17  ;;  %vm4157_vm4 = vcmask 490952  }
 0x1bd   : > { %1376 = vrot.lane.b32.xlu2 %v9748_v9, %s9380_s14 }
 0x1be   : > { %1378 = vrot.lane.b32.xlu0 %v9798_v33, %s9380_s14 }
 0x1bf   : > { %1380 = vrot.lane.b32.xlu1 %v9796_v32, %s9380_s14  ;;  %v1181_v63 = vpop.permute.xlu2 %1180 }
 0x1c0   : > { %1269 = vst.msk [vmem:[#allocation3 + $0x40] sm:$0xff] %vm1260_vm5, %v1181_v63  ;;  %v1165_v23 = vpop.permute.xlu0 %1164 }
 0x1c1   : > { %v1167_v24 = vpop.permute.xlu1 %1166  ;;  %1261 = vst.msk [vmem:[#allocation3] sm:$0xff] %vm1260_vm5, %v1165_v23 }
 0x1c2   : > { %1262 = vst.msk [vmem:[#allocation3 + $0x8] sm:$0xff] %vm1260_vm5, %v1167_v24  ;;  %v1506_v24 = vld [vmem:[#allocation2 + $0xf9] sm:$0xff] }
 0x1c5   : > { %1382 = vrot.lane.b32.xlu2 %v9760_v15, %s9380_s14  ;;  %v421_v15 = vld [vmem:[%s9587_s26 + $0xe8] sm:$0xff] }
 0x1c6   : > { %1384 = vrot.lane.b32.xlu0 %v9814_v40, %s9380_s14  ;;  %454 = vst.msk [vmem:[#allocation2 + $0x18a] sm:$0xff] %vm330_vm0, %v421_v15 }
 0x1c7   : > { %1386 = vrot.lane.b32.xlu1 %v9812_v39, %s9380_s14  ;;  %v1187_v9 = vpop.permute.xlu2 %1186 }
 0x1c8   : > { %1272 = vst.msk [vmem:[#allocation3 + $0x58] sm:$0xff] %vm1260_vm5, %v1187_v9  ;;  %v1171_v32 = vpop.permute.xlu0 %1170  ;;  %v1507_v9 = vld [vmem:[#allocation2 + $0x109] sm:$0xff] }
 0x1c9   : > { %v1173_v33 = vpop.permute.xlu1 %1172  ;;  %1264 = vst.msk [vmem:[#allocation3 + $0x18] sm:$0xff] %vm1260_vm5, %v1171_v32  ;;  %v1508_v32 = vld [vmem:[#allocation2 + $0x111] sm:$0xff] }
 0x1ca   : > { %1265 = vst.msk [vmem:[#allocation3 + $0x20] sm:$0xff] %vm1260_vm5, %v1173_v33 }
 0x1cd   : > { %1388 = vrot.lane.b32.xlu2 %v9775_v22, %s9380_s14  ;;  %v1325_v44 = vld [vmem:[#allocation2 + $0x188] sm:$0xff] }
 0x1ce   : > { %1390 = vrot.lane.b32.xlu0 %v9832_v50, %s9380_s14 }
 0x1cf   : > { %1392 = vrot.lane.b32.xlu1 %v9829_v48, %s9380_s14  ;;  %v1193_v39 = vpop.permute.xlu2 %1192 }
 0x1d0   : > { %1275 = vst.msk [vmem:[#allocation3 + $0x70] sm:$0xff] %vm1260_vm5, %v1193_v39  ;;  %v1177_v40 = vpop.permute.xlu0 %1176  ;;  %v1509_v39 = vld [vmem:[#allocation2 + $0x121] sm:$0xff] }
 0x1d1   : > { %v1179_v42 = vpop.permute.xlu1 %1178  ;;  %1267 = vst.msk [vmem:[#allocation3 + $0x30] sm:$0xff] %vm1260_vm5, %v1177_v40  ;;  %v1510_v40 = vld [vmem:[#allocation2 + $0x129] sm:$0xff] }
 0x1d2   : > { %1268 = vst.msk [vmem:[#allocation3 + $0x38] sm:$0xff] %vm1260_vm5, %v1179_v42  ;;  %v1511_v42 = vld [vmem:[#allocation2 + $0x139] sm:$0xff] }
 0x1d5   : > { %1394 = vrot.lane.b32.xlu2 %v9793_v31, %s9380_s14 }
 0x1d6   : > { %1396 = vrot.lane.b32.xlu0 %v9850_v61, %s9380_s14 }
 0x1d7   : > { %1398 = vrot.lane.b32.xlu1 %v9847_v58, %s9380_s14  ;;  %v1199_v22 = vpop.permute.xlu2 %1198 }
 0x1d8   : > { %1278 = vst.msk [vmem:[#allocation3 + $0x88] sm:$0xff] %vm1260_vm5, %v1199_v22  ;;  %v1183_v48 = vpop.permute.xlu0 %1182 }
 0x1d9   : > { %v1185_v50 = vpop.permute.xlu1 %1184  ;;  %1270 = vst.msk [vmem:[#allocation3 + $0x48] sm:$0xff] %vm1260_vm5, %v1183_v48 }
 0x1da   : > { %1271 = vst.msk [vmem:[#allocation3 + $0x50] sm:$0xff] %vm1260_vm5, %v1185_v50 }
 0x1dd   : > { %1400 = vrot.lane.b32.xlu2 %v9809_v38, %s9380_s14 }
 0x1de   : > { %1402 = vrot.lane.b32.xlu0 %v9865_v7, %s9380_s14 }
 0x1df   : > { %1404 = vrot.lane.b32.xlu1 %v9862_v5, %s9380_s14  ;;  %v1205_v31 = vpop.permute.xlu2 %1204 }
 0x1e0   : > { %1281 = vst.msk [vmem:[#allocation3 + $0xa0] sm:$0xff] %vm1260_vm5, %v1205_v31  ;;  %v1189_v58 = vpop.permute.xlu0 %1188  ;;  %v1512_v31 = vld [vmem:[#allocation2 + $0x141] sm:$0xff] }
 0x1e1   : > { %v1191_v61 = vpop.permute.xlu1 %1190  ;;  %1273 = vst.msk [vmem:[#allocation3 + $0x60] sm:$0xff] %vm1260_vm5, %v1189_v58  ;;  %v1513_v58 = vld [vmem:[#allocation2 + $0x151] sm:$0xff] }
 0x1e2   : > { %1274 = vst.msk [vmem:[#allocation3 + $0x68] sm:$0xff] %vm1260_vm5, %v1191_v61  ;;  %v1514_v61 = vld [vmem:[#allocation2 + $0x159] sm:$0xff] }
 0x1e5   : > { %1406 = vrot.lane.b32.xlu2 %v9826_v46, %s9380_s14 }
 0x1e6   : > { %1408 = vrot.lane.b32.xlu0 %v9879_v20, %s9380_s14 }
 0x1e7   : > { %1410 = vrot.lane.b32.xlu1 %v9876_v18, %s9380_s14  ;;  %v1211_v38 = vpop.permute.xlu2 %1210 }
 0x1e8   : > { %1284 = vst.msk [vmem:[#allocation3 + $0xb8] sm:$0xff] %vm1260_vm5, %v1211_v38  ;;  %v1195_v5 = vpop.permute.xlu0 %1194 }
 0x1e9   : > { %v1197_v7 = vpop.permute.xlu1 %1196  ;;  %1276 = vst.msk [vmem:[#allocation3 + $0x78] sm:$0xff] %vm1260_vm5, %v1195_v5 }
 0x1ea   : > { %1277 = vst.msk [vmem:[#allocation3 + $0x80] sm:$0xff] %vm1260_vm5, %v1197_v7 }
 0x1ed   : > { %1412 = vrot.lane.b32.xlu2 %v9844_v56, %s9380_s14 }
 0x1ee   : > { %1414 = vrot.lane.b32.xlu0 %v9893_v34, %s9380_s14 }
 0x1ef   : > { %1416 = vrot.lane.b32.xlu1 %v9890_v29, %s9380_s14  ;;  %v1217_v46 = vpop.permute.xlu2 %1216 }
 0x1f0   : > { %1287 = vst.msk [vmem:[#allocation3 + $0xd0] sm:$0xff] %vm1260_vm5, %v1217_v46  ;;  %v1201_v18 = vpop.permute.xlu0 %1200  ;;  %v1515_v46 = vld [vmem:[#allocation2 + $0x169] sm:$0xff] }
 0x1f1   : > { %v1203_v20 = vpop.permute.xlu1 %1202  ;;  %1279 = vst.msk [vmem:[#allocation3 + $0x90] sm:$0xff] %vm1260_vm5, %v1201_v18  ;;  %v1516_v18 = vld [vmem:[#allocation2 + $0x171] sm:$0xff] }
 0x1f2   : > { %1280 = vst.msk [vmem:[#allocation3 + $0x98] sm:$0xff] %vm1260_vm5, %v1203_v20  ;;  %v1517_v20 = vld [vmem:[#allocation2 + $0x181] sm:$0xff] }
 0x1f5   : > { %1418 = vrot.lane.b32.xlu2 %v1324_v43, %s9380_s14 }
 0x1f6   : > { %1420 = vrot.lane.b32.xlu0 %v1325_v44, %s9380_s14  ;;  %s9392_s14 = smov 51  }
 0x1f7   : > { %1551 = vrot.lane.b32.xlu1 %v1487_v45, %s9381_s16  ;;  %v1223_v56 = vpop.permute.xlu2 %1222 }
 0x1f8   : > { %1290 = vst.msk [vmem:[#allocation3 + $0xe8] sm:$0xff] %vm1260_vm5, %v1223_v56  ;;  %v1207_v29 = vpop.permute.xlu0 %1206  ;;  %v1518_v56 = vld [vmem:[#allocation2 + $0x189] sm:$0xff] }
 0x1f9   : > { %v1209_v34 = vpop.permute.xlu1 %1208  ;;  %1282 = vst.msk [vmem:[#allocation3 + $0xa8] sm:$0xff] %vm1260_vm5, %v1207_v29  ;;  %v1680_v29 = vld [vmem:[#allocation2 + $0x1a] sm:$0xff] }
 0x1fa   : > { %1283 = vst.msk [vmem:[#allocation3 + $0xb0] sm:$0xff] %vm1260_vm5, %v1209_v34  ;;  %v1681_v34 = vld [vmem:[#allocation2 + $0x22] sm:$0xff] }
 0x1fd   : > { %1553 = vrot.lane.b32.xlu2 %v1488_v47, %s9381_s16 }
 0x1fe   : > { %1555 = vrot.lane.b32.xlu0 %v1489_v49, %s9381_s16 }
 0x1ff   : > { %1557 = vrot.lane.b32.xlu1 %v1490_v51, %s9381_s16  ;;  %v1359_v52 = vpop.permute.xlu2 %1358 }
 0x200   : > { %1455 = vst.msk [vmem:[#allocation3] sm:$0xff] %vm1454_vm6, %v1359_v52  ;;  %v1213_v53 = vpop.permute.xlu0 %1212  ;;  %v1682_v52 = vld [vmem:[#allocation2 + $0x32] sm:$0xff] }
 0x201   : > { %v1215_v54 = vpop.permute.xlu1 %1214  ;;  %1285 = vst.msk [vmem:[#allocation3 + $0xc0] sm:$0xff] %vm1260_vm5, %v1213_v53  ;;  %v1683_v53 = vld [vmem:[#allocation2 + $0x3a] sm:$0xff] }
 0x202   : > { %1286 = vst.msk [vmem:[#allocation3 + $0xc8] sm:$0xff] %vm1260_vm5, %v1215_v54  ;;  %v1684_v54 = vld [vmem:[#allocation2 + $0x4a] sm:$0xff] }
 0x205   : > { %1559 = vrot.lane.b32.xlu2 %v1491_v57, %s9381_s16 }
 0x206   : > { %1561 = vrot.lane.b32.xlu0 %v1492_v60, %s9381_s16 }
 0x207   : > { %1563 = vrot.lane.b32.xlu1 %v1493_v62, %s9381_s16  ;;  %v1365_v2 = vpop.permute.xlu2 %1364 }
 0x208   : > { %1458 = vst.msk [vmem:[#allocation3 + $0x18] sm:$0xff] %vm1454_vm6, %v1365_v2  ;;  %v1219_v3 = vpop.permute.xlu0 %1218  ;;  %v1685_v2 = vld [vmem:[#allocation2 + $0x52] sm:$0xff] }
 0x209   : > { %v1221_v4 = vpop.permute.xlu1 %1220  ;;  %1288 = vst.msk [vmem:[#allocation3 + $0xd8] sm:$0xff] %vm1260_vm5, %v1219_v3  ;;  %v1686_v3 = vld [vmem:[#allocation2 + $0x62] sm:$0xff] }
 0x20a   : > { %1289 = vst.msk [vmem:[#allocation3 + $0xe0] sm:$0xff] %vm1260_vm5, %v1221_v4  ;;  %v1687_v4 = vld [vmem:[#allocation2 + $0x6a] sm:$0xff] }
 0x20d   : > { %1565 = vrot.lane.b32.xlu2 %v1494_v6, %s9381_s16 }
 0x20e   : > { %1567 = vrot.lane.b32.xlu0 %v1495_v8, %s9381_s16 }
 0x20f   : > { %1569 = vrot.lane.b32.xlu1 %v1496_v11, %s9381_s16  ;;  %v1371_v12 = vpop.permute.xlu2 %1370 }
 0x210   : > { %1461 = vst.msk [vmem:[#allocation3 + $0x30] sm:$0xff] %vm1454_vm6, %v1371_v12  ;;  %v1225_v13 = vpop.permute.xlu0 %1224  ;;  %v1688_v12 = vld [vmem:[#allocation2 + $0x7a] sm:$0xff] }
 0x211   : > { %v1227_v14 = vpop.permute.xlu1 %1226  ;;  %1291 = vst.msk [vmem:[#allocation3 + $0xf0] sm:$0xff] %vm1260_vm5, %v1225_v13  ;;  %v1689_v13 = vld [vmem:[#allocation2 + $0x82] sm:$0xff] }
 0x212   : > { %1292 = vst.msk [vmem:[#allocation3 + $0xf8] sm:$0xff] %vm1260_vm5, %v1227_v14  ;;  %v1690_v14 = vld [vmem:[#allocation2 + $0x92] sm:$0xff]  ;;  %vm4351_vm5 = vcmask 515552  }
 0x215   : > { %1571 = vrot.lane.b32.xlu2 %v1497_v19, %s9381_s16 }
 0x216   : > { %1573 = vrot.lane.b32.xlu0 %v1498_v21, %s9381_s16 }
 0x217   : > { %1575 = vrot.lane.b32.xlu1 %v1499_v25, %s9381_s16  ;;  %v1377_v26 = vpop.permute.xlu2 %1376 }
 0x218   : > { %1464 = vst.msk [vmem:[#allocation3 + $0x48] sm:$0xff] %vm1454_vm6, %v1377_v26  ;;  %v1361_v27 = vpop.permute.xlu0 %1360  ;;  %v1691_v26 = vld [vmem:[#allocation2 + $0x9a] sm:$0xff] }
 0x219   : > { %v1363_v28 = vpop.permute.xlu1 %1362  ;;  %1456 = vst.msk [vmem:[#allocation3 + $0x8] sm:$0xff] %vm1454_vm6, %v1361_v27  ;;  %v1692_v27 = vld [vmem:[#allocation2 + $0xaa] sm:$0xff] }
 0x21a   : > { %1457 = vst.msk [vmem:[#allocation3 + $0x10] sm:$0xff] %vm1454_vm6, %v1363_v28  ;;  %v1693_v28 = vld [vmem:[#allocation2 + $0xb2] sm:$0xff] }
 0x21d   : > { %1577 = vrot.lane.b32.xlu2 %v1500_v30, %s9381_s16 }
 0x21e   : > { %1579 = vrot.lane.b32.xlu0 %v1501_v35, %s9381_s16 }
 0x21f   : > { %1581 = vrot.lane.b32.xlu1 %v1502_v36, %s9381_s16  ;;  %v1383_v37 = vpop.permute.xlu2 %1382 }
 0x220   : > { %1467 = vst.msk [vmem:[#allocation3 + $0x60] sm:$0xff] %vm1454_vm6, %v1383_v37  ;;  %v1367_v55 = vpop.permute.xlu0 %1366  ;;  %v1694_v37 = vld [vmem:[#allocation2 + $0xc2] sm:$0xff] }
 0x221   : > { %v1369_v1 = vpop.permute.xlu1 %1368  ;;  %1459 = vst.msk [vmem:[#allocation3 + $0x20] sm:$0xff] %vm1454_vm6, %v1367_v55  ;;  %v1695_v55 = vld [vmem:[#allocation2 + $0xca] sm:$0xff] }
 0x222   : > { %1460 = vst.msk [vmem:[#allocation3 + $0x28] sm:$0xff] %vm1454_vm6, %v1369_v1  ;;  %v1696_v1 = vld [vmem:[#allocation2 + $0xda] sm:$0xff] }
 0x225   : > { %1583 = vrot.lane.b32.xlu2 %v1503_v10, %s9381_s16 }
 0x226   : > { %1585 = vrot.lane.b32.xlu0 %v1504_v59, %s9381_s16 }
 0x227   : > { %1587 = vrot.lane.b32.xlu1 %v1505_v16, %s9381_s16  ;;  %v1389_v17 = vpop.permute.xlu2 %1388 }
 0x228   : > { %1470 = vst.msk [vmem:[#allocation3 + $0x78] sm:$0xff] %vm1454_vm6, %v1389_v17  ;;  %v1373_v63 = vpop.permute.xlu0 %1372  ;;  %v1697_v17 = vld [vmem:[#allocation2 + $0xe2] sm:$0xff] }
 0x229   : > { %v1375_v23 = vpop.permute.xlu1 %1374  ;;  %1462 = vst.msk [vmem:[#allocation3 + $0x38] sm:$0xff] %vm1454_vm6, %v1373_v63  ;;  %v1698_v63 = vld [vmem:[#allocation2 + $0xf2] sm:$0xff] }
 0x22a   : > { %1463 = vst.msk [vmem:[#allocation3 + $0x40] sm:$0xff] %vm1454_vm6, %v1375_v23  ;;  %v1699_v23 = vld [vmem:[#allocation2 + $0xfa] sm:$0xff] }
 0x22d   : > { %1589 = vrot.lane.b32.xlu2 %v1506_v24, %s9381_s16 }
 0x22e   : > { %1591 = vrot.lane.b32.xlu0 %v1507_v9, %s9381_s16 }
 0x22f   : > { %1593 = vrot.lane.b32.xlu1 %v1508_v32, %s9381_s16  ;;  %v1395_v33 = vpop.permute.xlu2 %1394 }
 0x230   : > { %1473 = vst.msk [vmem:[#allocation3 + $0x90] sm:$0xff] %vm1454_vm6, %v1395_v33  ;;  %v1379_v41 = vpop.permute.xlu0 %1378  ;;  %v1700_v33 = vld [vmem:[#allocation2 + $0x10a] sm:$0xff] }
 0x231   : > { %v1381_v15 = vpop.permute.xlu1 %1380  ;;  %1465 = vst.msk [vmem:[#allocation3 + $0x50] sm:$0xff] %vm1454_vm6, %v1379_v41  ;;  %v1701_v41 = vld [vmem:[#allocation2 + $0x112] sm:$0xff] }
 0x232   : > { %1466 = vst.msk [vmem:[#allocation3 + $0x58] sm:$0xff] %vm1454_vm6, %v1381_v15  ;;  %v1702_v15 = vld [vmem:[#allocation2 + $0x122] sm:$0xff] }
 0x235   : > { %1595 = vrot.lane.b32.xlu2 %v1509_v39, %s9381_s16 }
 0x236   : > { %1597 = vrot.lane.b32.xlu0 %v1510_v40, %s9381_s16 }
 0x237   : > { %1599 = vrot.lane.b32.xlu1 %v1511_v42, %s9381_s16  ;;  %v1401_v22 = vpop.permute.xlu2 %1400 }
 0x238   : > { %1476 = vst.msk [vmem:[#allocation3 + $0xa8] sm:$0xff] %vm1454_vm6, %v1401_v22  ;;  %v1385_v48 = vpop.permute.xlu0 %1384  ;;  %v1703_v22 = vld [vmem:[#allocation2 + $0x12a] sm:$0xff] }
 0x239   : > { %v1387_v50 = vpop.permute.xlu1 %1386  ;;  %1468 = vst.msk [vmem:[#allocation3 + $0x68] sm:$0xff] %vm1454_vm6, %v1385_v48  ;;  %v1704_v48 = vld [vmem:[#allocation2 + $0x13a] sm:$0xff] }
 0x23a   : > { %1469 = vst.msk [vmem:[#allocation3 + $0x70] sm:$0xff] %vm1454_vm6, %v1387_v50  ;;  %v1705_v50 = vld [vmem:[#allocation2 + $0x142] sm:$0xff] }
 0x23d   : > { %1601 = vrot.lane.b32.xlu2 %v1512_v31, %s9381_s16 }
 0x23e   : > { %1603 = vrot.lane.b32.xlu0 %v1513_v58, %s9381_s16 }
 0x23f   : > { %1605 = vrot.lane.b32.xlu1 %v1514_v61, %s9381_s16  ;;  %v1407_v38 = vpop.permute.xlu2 %1406 }
 0x240   : > { %1479 = vst.msk [vmem:[#allocation3 + $0xc0] sm:$0xff] %vm1454_vm6, %v1407_v38  ;;  %v1391_v5 = vpop.permute.xlu0 %1390  ;;  %v1706_v38 = vld [vmem:[#allocation2 + $0x152] sm:$0xff] }
 0x241   : > { %v1393_v7 = vpop.permute.xlu1 %1392  ;;  %1471 = vst.msk [vmem:[#allocation3 + $0x80] sm:$0xff] %vm1454_vm6, %v1391_v5  ;;  %v1707_v5 = vld [vmem:[#allocation2 + $0x15a] sm:$0xff] }
 0x242   : > { %1472 = vst.msk [vmem:[#allocation3 + $0x88] sm:$0xff] %vm1454_vm6, %v1393_v7  ;;  %v1708_v7 = vld [vmem:[#allocation2 + $0x16a] sm:$0xff] }
 0x245   : > { %1607 = vrot.lane.b32.xlu2 %v1515_v46, %s9381_s16 }
 0x246   : > { %1609 = vrot.lane.b32.xlu0 %v1516_v18, %s9381_s16 }
 0x247   : > { %1611 = vrot.lane.b32.xlu1 %v1517_v20, %s9381_s16  ;;  %v1413_v43 = vpop.permute.xlu2 %1412 }
 0x248   : > { %1482 = vst.msk [vmem:[#allocation3 + $0xd8] sm:$0xff] %vm1454_vm6, %v1413_v43  ;;  %v1397_v44 = vpop.permute.xlu0 %1396  ;;  %v1709_v43 = vld [vmem:[#allocation2 + $0x172] sm:$0xff] }
 0x249   : > { %v1399_v45 = vpop.permute.xlu1 %1398  ;;  %1474 = vst.msk [vmem:[#allocation3 + $0x98] sm:$0xff] %vm1454_vm6, %v1397_v44  ;;  %v1710_v44 = vld [vmem:[#allocation2 + $0x182] sm:$0xff] }
 0x24a   : > { %1475 = vst.msk [vmem:[#allocation3 + $0xa0] sm:$0xff] %vm1454_vm6, %v1399_v45  ;;  %v1711_v45 = vld [vmem:[#allocation2 + $0x18a] sm:$0xff] }
 0x24d   : > { %1613 = vrot.lane.b32.xlu2 %v1518_v56, %s9381_s16  ;;  %s9393_s16 = smov 54  }
 0x24e   : > { %1744 = vrot.lane.b32.xlu0 %v1680_v29, %s9382_s17 }
 0x24f   : > { %1746 = vrot.lane.b32.xlu1 %v1681_v34, %s9382_s17  ;;  %v1419_v47 = vpop.permute.xlu2 %1418 }
 0x250   : > { %1485 = vst.msk [vmem:[#allocation3 + $0xf0] sm:$0xff] %vm1454_vm6, %v1419_v47  ;;  %v1403_v49 = vpop.permute.xlu0 %1402  ;;  %v1873_v47 = vld [vmem:[#allocation2 + $0x1b] sm:$0xff] }
 0x251   : > { %v1405_v51 = vpop.permute.xlu1 %1404  ;;  %1477 = vst.msk [vmem:[#allocation3 + $0xb0] sm:$0xff] %vm1454_vm6, %v1403_v49  ;;  %v1874_v49 = vld [vmem:[#allocation2 + $0x23] sm:$0xff] }
 0x252   : > { %1478 = vst.msk [vmem:[#allocation3 + $0xb8] sm:$0xff] %vm1454_vm6, %v1405_v51  ;;  %v1875_v51 = vld [vmem:[#allocation2 + $0x33] sm:$0xff] }
 0x255   : > { %1748 = vrot.lane.b32.xlu2 %v1682_v52, %s9382_s17 }
 0x256   : > { %1750 = vrot.lane.b32.xlu0 %v1683_v53, %s9382_s17 }
 0x257   : > { %1752 = vrot.lane.b32.xlu1 %v1684_v54, %s9382_s17  ;;  %v1554_v57 = vpop.permute.xlu2 %1553 }
 0x258   : > { %1649 = vst.msk [vmem:[#allocation3 + $0x8] sm:$0xff] %vm1647_vm7, %v1554_v57  ;;  %v1409_v60 = vpop.permute.xlu0 %1408  ;;  %v1876_v57 = vld [vmem:[#allocation2 + $0x3b] sm:$0xff] }
 0x259   : > { %v1411_v62 = vpop.permute.xlu1 %1410  ;;  %1480 = vst.msk [vmem:[#allocation3 + $0xc8] sm:$0xff] %vm1454_vm6, %v1409_v60  ;;  %v1877_v60 = vld [vmem:[#allocation2 + $0x4b] sm:$0xff] }
 0x25a   : > { %1481 = vst.msk [vmem:[#allocation3 + $0xd0] sm:$0xff] %vm1454_vm6, %v1411_v62  ;;  %v1878_v62 = vld [vmem:[#allocation2 + $0x53] sm:$0xff] }
 0x25d   : > { %1754 = vrot.lane.b32.xlu2 %v1685_v2, %s9382_s17 }
 0x25e   : > { %1756 = vrot.lane.b32.xlu0 %v1686_v3, %s9382_s17 }
 0x25f   : > { %1758 = vrot.lane.b32.xlu1 %v1687_v4, %s9382_s17  ;;  %v1560_v6 = vpop.permute.xlu2 %1559 }
 0x260   : > { %1652 = vst.msk [vmem:[#allocation3 + $0x20] sm:$0xff] %vm1647_vm7, %v1560_v6  ;;  %v1415_v8 = vpop.permute.xlu0 %1414  ;;  %v1879_v6 = vld [vmem:[#allocation2 + $0x63] sm:$0xff] }
 0x261   : > { %v1417_v11 = vpop.permute.xlu1 %1416  ;;  %1483 = vst.msk [vmem:[#allocation3 + $0xe0] sm:$0xff] %vm1454_vm6, %v1415_v8  ;;  %v1880_v8 = vld [vmem:[#allocation2 + $0x6b] sm:$0xff] }
 0x262   : > { %1484 = vst.msk [vmem:[#allocation3 + $0xe8] sm:$0xff] %vm1454_vm6, %v1417_v11  ;;  %v1881_v11 = vld [vmem:[#allocation2 + $0x7b] sm:$0xff] }
 0x265   : > { %1760 = vrot.lane.b32.xlu2 %v1688_v12, %s9382_s17 }
 0x266   : > { %1762 = vrot.lane.b32.xlu0 %v1689_v13, %s9382_s17 }
 0x267   : > { %1764 = vrot.lane.b32.xlu1 %v1690_v14, %s9382_s17  ;;  %v1566_v19 = vpop.permute.xlu2 %1565 }
 0x268   : > { %1655 = vst.msk [vmem:[#allocation3 + $0x38] sm:$0xff] %vm1647_vm7, %v1566_v19  ;;  %v1421_v21 = vpop.permute.xlu0 %1420  ;;  %v1882_v19 = vld [vmem:[#allocation2 + $0x83] sm:$0xff] }
 0x269   : > { %v1552_v25 = vpop.permute.xlu1 %1551  ;;  %1486 = vst.msk [vmem:[#allocation3 + $0xf8] sm:$0xff] %vm1454_vm6, %v1421_v21  ;;  %v1883_v21 = vld [vmem:[#allocation2 + $0x93] sm:$0xff]  ;;  %vm5299_vm6 = vcmask 1042432  }
 0x26a   : > { %1648 = vst.msk [vmem:[#allocation3] sm:$0xff] %vm1647_vm7, %v1552_v25  ;;  %v1884_v25 = vld [vmem:[#allocation2 + $0x9b] sm:$0xff] }
 0x26d   : > { %1766 = vrot.lane.b32.xlu2 %v1691_v26, %s9382_s17 }
 0x26e   : > { %1768 = vrot.lane.b32.xlu0 %v1692_v27, %s9382_s17 }
 0x26f   : > { %1770 = vrot.lane.b32.xlu1 %v1693_v28, %s9382_s17  ;;  %v1572_v30 = vpop.permute.xlu2 %1571 }
 0x270   : > { %1658 = vst.msk [vmem:[#allocation3 + $0x50] sm:$0xff] %vm1647_vm7, %v1572_v30  ;;  %v1556_v35 = vpop.permute.xlu0 %1555  ;;  %v1885_v30 = vld [vmem:[#allocation2 + $0xab] sm:$0xff] }
 0x271   : > { %v1558_v36 = vpop.permute.xlu1 %1557  ;;  %1650 = vst.msk [vmem:[#allocation3 + $0x10] sm:$0xff] %vm1647_vm7, %v1556_v35  ;;  %v1886_v35 = vld [vmem:[#allocation2 + $0xb3] sm:$0xff] }
 0x272   : > { %1651 = vst.msk [vmem:[#allocation3 + $0x18] sm:$0xff] %vm1647_vm7, %v1558_v36  ;;  %v1887_v36 = vld [vmem:[#allocation2 + $0xc3] sm:$0xff] }
 0x275   : > { %1772 = vrot.lane.b32.xlu2 %v1694_v37, %s9382_s17 }
 0x276   : > { %1774 = vrot.lane.b32.xlu0 %v1695_v55, %s9382_s17 }
 0x277   : > { %1776 = vrot.lane.b32.xlu1 %v1696_v1, %s9382_s17  ;;  %v1578_v10 = vpop.permute.xlu2 %1577 }
 0x278   : > { %1661 = vst.msk [vmem:[#allocation3 + $0x68] sm:$0xff] %vm1647_vm7, %v1578_v10  ;;  %v1562_v59 = vpop.permute.xlu0 %1561  ;;  %v1888_v10 = vld [vmem:[#allocation2 + $0xcb] sm:$0xff] }
 0x279   : > { %v1564_v16 = vpop.permute.xlu1 %1563  ;;  %1653 = vst.msk [vmem:[#allocation3 + $0x28] sm:$0xff] %vm1647_vm7, %v1562_v59  ;;  %v1889_v59 = vld [vmem:[#allocation2 + $0xdb] sm:$0xff] }
 0x27a   : > { %1654 = vst.msk [vmem:[#allocation3 + $0x30] sm:$0xff] %vm1647_vm7, %v1564_v16  ;;  %v1890_v16 = vld [vmem:[#allocation2 + $0xe3] sm:$0xff] }
 0x27d   : > { %1778 = vrot.lane.b32.xlu2 %v1697_v17, %s9382_s17 }
 0x27e   : > { %1780 = vrot.lane.b32.xlu0 %v1698_v63, %s9382_s17 }
 0x27f   : > { %1782 = vrot.lane.b32.xlu1 %v1699_v23, %s9382_s17  ;;  %v1584_v24 = vpop.permute.xlu2 %1583 }
 0x280   : > { %1664 = vst.msk [vmem:[#allocation3 + $0x80] sm:$0xff] %vm1647_vm7, %v1584_v24  ;;  %v1568_v9 = vpop.permute.xlu0 %1567  ;;  %v1891_v24 = vld [vmem:[#allocation2 + $0xf3] sm:$0xff] }
 0x281   : > { %v1570_v32 = vpop.permute.xlu1 %1569  ;;  %1656 = vst.msk [vmem:[#allocation3 + $0x40] sm:$0xff] %vm1647_vm7, %v1568_v9  ;;  %v1892_v9 = vld [vmem:[#allocation2 + $0xfb] sm:$0xff] }
 0x282   : > { %1657 = vst.msk [vmem:[#allocation3 + $0x48] sm:$0xff] %vm1647_vm7, %v1570_v32  ;;  %v1893_v32 = vld [vmem:[#allocation2 + $0x10b] sm:$0xff] }
 0x285   : > { %1784 = vrot.lane.b32.xlu2 %v1700_v33, %s9382_s17 }
 0x286   : > { %1786 = vrot.lane.b32.xlu0 %v1701_v41, %s9382_s17 }
 0x287   : > { %1788 = vrot.lane.b32.xlu1 %v1702_v15, %s9382_s17  ;;  %v1590_v39 = vpop.permute.xlu2 %1589 }
 0x288   : > { %1667 = vst.msk [vmem:[#allocation3 + $0x98] sm:$0xff] %vm1647_vm7, %v1590_v39  ;;  %v1574_v40 = vpop.permute.xlu0 %1573  ;;  %v1894_v39 = vld [vmem:[#allocation2 + $0x113] sm:$0xff] }
 0x289   : > { %v1576_v42 = vpop.permute.xlu1 %1575  ;;  %1659 = vst.msk [vmem:[#allocation3 + $0x58] sm:$0xff] %vm1647_vm7, %v1574_v40  ;;  %v1895_v40 = vld [vmem:[#allocation2 + $0x123] sm:$0xff] }
 0x28a   : > { %1660 = vst.msk [vmem:[#allocation3 + $0x60] sm:$0xff] %vm1647_vm7, %v1576_v42  ;;  %v1896_v42 = vld [vmem:[#allocation2 + $0x12b] sm:$0xff] }
 0x28d   : > { %1790 = vrot.lane.b32.xlu2 %v1703_v22, %s9382_s17 }
 0x28e   : > { %1792 = vrot.lane.b32.xlu0 %v1704_v48, %s9382_s17 }
 0x28f   : > { %1794 = vrot.lane.b32.xlu1 %v1705_v50, %s9382_s17  ;;  %v1596_v31 = vpop.permute.xlu2 %1595 }
 0x290   : > { %1670 = vst.msk [vmem:[#allocation3 + $0xb0] sm:$0xff] %vm1647_vm7, %v1596_v31  ;;  %v1580_v58 = vpop.permute.xlu0 %1579  ;;  %v1897_v31 = vld [vmem:[#allocation2 + $0x13b] sm:$0xff] }
 0x291   : > { %v1582_v61 = vpop.permute.xlu1 %1581  ;;  %1662 = vst.msk [vmem:[#allocation3 + $0x70] sm:$0xff] %vm1647_vm7, %v1580_v58  ;;  %v1898_v58 = vld [vmem:[#allocation2 + $0x143] sm:$0xff] }
 0x292   : > { %1663 = vst.msk [vmem:[#allocation3 + $0x78] sm:$0xff] %vm1647_vm7, %v1582_v61  ;;  %v1899_v61 = vld [vmem:[#allocation2 + $0x153] sm:$0xff] }
 0x295   : > { %1796 = vrot.lane.b32.xlu2 %v1706_v38, %s9382_s17 }
 0x296   : > { %1798 = vrot.lane.b32.xlu0 %v1707_v5, %s9382_s17 }
 0x297   : > { %1800 = vrot.lane.b32.xlu1 %v1708_v7, %s9382_s17  ;;  %v1602_v46 = vpop.permute.xlu2 %1601 }
 0x298   : > { %1673 = vst.msk [vmem:[#allocation3 + $0xc8] sm:$0xff] %vm1647_vm7, %v1602_v46  ;;  %v1586_v18 = vpop.permute.xlu0 %1585  ;;  %v1900_v46 = vld [vmem:[#allocation2 + $0x15b] sm:$0xff] }
 0x299   : > { %v1588_v20 = vpop.permute.xlu1 %1587  ;;  %1665 = vst.msk [vmem:[#allocation3 + $0x88] sm:$0xff] %vm1647_vm7, %v1586_v18  ;;  %v1901_v18 = vld [vmem:[#allocation2 + $0x16b] sm:$0xff] }
 0x29a   : > { %1666 = vst.msk [vmem:[#allocation3 + $0x90] sm:$0xff] %vm1647_vm7, %v1588_v20  ;;  %v1902_v20 = vld [vmem:[#allocation2 + $0x173] sm:$0xff] }
 0x29d   : > { %1802 = vrot.lane.b32.xlu2 %v1709_v43, %s9382_s17 }
 0x29e   : > { %1804 = vrot.lane.b32.xlu0 %v1710_v44, %s9382_s17 }
 0x29f   : > { %1806 = vrot.lane.b32.xlu1 %v1711_v45, %s9382_s17  ;;  %v1608_v56 = vpop.permute.xlu2 %1607  ;;  %s9394_s17 = smov 57  }
 0x2a0   : > { %1676 = vst.msk [vmem:[#allocation3 + $0xe0] sm:$0xff] %vm1647_vm7, %v1608_v56  ;;  %v1592_v29 = vpop.permute.xlu0 %1591  ;;  %v1903_v56 = vld [vmem:[#allocation2 + $0x183] sm:$0xff] }
 0x2a1   : > { %v1594_v34 = vpop.permute.xlu1 %1593  ;;  %1668 = vst.msk [vmem:[#allocation3 + $0xa0] sm:$0xff] %vm1647_vm7, %v1592_v29  ;;  %v1904_v29 = vld [vmem:[#allocation2 + $0x18b] sm:$0xff] }
 0x2a2   : > { %1669 = vst.msk [vmem:[#allocation3 + $0xa8] sm:$0xff] %vm1647_vm7, %v1594_v34  ;;  %v2066_v34 = vld [vmem:[#allocation2 + $0x1c] sm:$0xff] }
 0x2a5   : > { %1937 = vrot.lane.b32.xlu2 %v1873_v47, %s13464_s21 }
 0x2a6   : > { %1939 = vrot.lane.b32.xlu0 %v1874_v49, %s13464_s21 }
 0x2a7   : > { %1941 = vrot.lane.b32.xlu1 %v1875_v51, %s13464_s21  ;;  %v1614_v52 = vpop.permute.xlu2 %1613 }
 0x2a8   : > { %1679 = vst.msk [vmem:[#allocation3 + $0xf8] sm:$0xff] %vm1647_vm7, %v1614_v52  ;;  %v1598_v53 = vpop.permute.xlu0 %1597  ;;  %v2067_v52 = vld [vmem:[#allocation2 + $0x24] sm:$0xff] }
 0x2a9   : > { %v1600_v54 = vpop.permute.xlu1 %1599  ;;  %1671 = vst.msk [vmem:[#allocation3 + $0xb8] sm:$0xff] %vm1647_vm7, %v1598_v53  ;;  %v2068_v53 = vld [vmem:[#allocation2 + $0x34] sm:$0xff] }
 0x2aa   : > { %1672 = vst.msk [vmem:[#allocation3 + $0xc0] sm:$0xff] %vm1647_vm7, %v1600_v54  ;;  %v2069_v54 = vld [vmem:[#allocation2 + $0x3c] sm:$0xff] }
 0x2ad   : > { %1943 = vrot.lane.b32.xlu2 %v1876_v57, %s13464_s21 }
 0x2ae   : > { %1945 = vrot.lane.b32.xlu0 %v1877_v60, %s13464_s21 }
 0x2af   : > { %1947 = vrot.lane.b32.xlu1 %v1878_v62, %s13464_s21  ;;  %v1749_v2 = vpop.permute.xlu2 %1748 }
 0x2b0   : > { %1843 = vst.msk [vmem:[#allocation3 + $0x10] sm:$0xff] %vm1840_vm8, %v1749_v2  ;;  %v1604_v3 = vpop.permute.xlu0 %1603  ;;  %v2070_v2 = vld [vmem:[#allocation2 + $0x4c] sm:$0xff] }
 0x2b1   : > { %v1606_v4 = vpop.permute.xlu1 %1605  ;;  %1674 = vst.msk [vmem:[#allocation3 + $0xd0] sm:$0xff] %vm1647_vm7, %v1604_v3  ;;  %v2071_v3 = vld [vmem:[#allocation2 + $0x54] sm:$0xff] }
 0x2b2   : > { %1675 = vst.msk [vmem:[#allocation3 + $0xd8] sm:$0xff] %vm1647_vm7, %v1606_v4  ;;  %v2072_v4 = vld [vmem:[#allocation2 + $0x64] sm:$0xff] }
 0x2b5   : > { %1949 = vrot.lane.b32.xlu2 %v1879_v6, %s13464_s21 }
 0x2b6   : > { %1951 = vrot.lane.b32.xlu0 %v1880_v8, %s13464_s21 }
 0x2b7   : > { %1953 = vrot.lane.b32.xlu1 %v1881_v11, %s13464_s21  ;;  %v1755_v12 = vpop.permute.xlu2 %1754 }
 0x2b8   : > { %1846 = vst.msk [vmem:[#allocation3 + $0x28] sm:$0xff] %vm1840_vm8, %v1755_v12  ;;  %v1610_v13 = vpop.permute.xlu0 %1609  ;;  %v2073_v12 = vld [vmem:[#allocation2 + $0x6c] sm:$0xff] }
 0x2b9   : > { %v1612_v14 = vpop.permute.xlu1 %1611  ;;  %1677 = vst.msk [vmem:[#allocation3 + $0xe8] sm:$0xff] %vm1647_vm7, %v1610_v13  ;;  %v2074_v13 = vld [vmem:[#allocation2 + $0x7c] sm:$0xff] }
 0x2ba   : > { %1678 = vst.msk [vmem:[#allocation3 + $0xf0] sm:$0xff] %vm1647_vm7, %v1612_v14  ;;  %v2075_v14 = vld [vmem:[#allocation2 + $0x84] sm:$0xff]  ;;  %vm4544_vm7 = vcmask 540152  }
 0x2bd   : > { %1955 = vrot.lane.b32.xlu2 %v1882_v19, %s13464_s21 }
 0x2be   : > { %1957 = vrot.lane.b32.xlu0 %v1883_v21, %s13464_s21 }
 0x2bf   : > { %1959 = vrot.lane.b32.xlu1 %v1884_v25, %s13464_s21  ;;  %v1761_v26 = vpop.permute.xlu2 %1760 }
 0x2c0   : > { %1849 = vst.msk [vmem:[#allocation3 + $0x40] sm:$0xff] %vm1840_vm8, %v1761_v26  ;;  %v1745_v27 = vpop.permute.xlu0 %1744  ;;  %v2076_v26 = vld [vmem:[#allocation2 + $0x94] sm:$0xff] }
 0x2c1   : > { %v1747_v28 = vpop.permute.xlu1 %1746  ;;  %1841 = vst.msk [vmem:[#allocation3] sm:$0xff] %vm1840_vm8, %v1745_v27  ;;  %v2077_v27 = vld [vmem:[#allocation2 + $0x9c] sm:$0xff] }
 0x2c2   : > { %1842 = vst.msk [vmem:[#allocation3 + $0x8] sm:$0xff] %vm1840_vm8, %v1747_v28  ;;  %v2078_v28 = vld [vmem:[#allocation2 + $0xac] sm:$0xff] }
 0x2c5   : > { %1961 = vrot.lane.b32.xlu2 %v1885_v30, %s13464_s21 }
 0x2c6   : > { %1963 = vrot.lane.b32.xlu0 %v1886_v35, %s13464_s21 }
 0x2c7   : > { %1965 = vrot.lane.b32.xlu1 %v1887_v36, %s13464_s21  ;;  %v1767_v37 = vpop.permute.xlu2 %1766 }
 0x2c8   : > { %1852 = vst.msk [vmem:[#allocation3 + $0x58] sm:$0xff] %vm1840_vm8, %v1767_v37  ;;  %v1751_v55 = vpop.permute.xlu0 %1750  ;;  %v2079_v37 = vld [vmem:[#allocation2 + $0xb4] sm:$0xff] }
 0x2c9   : > { %v1753_v1 = vpop.permute.xlu1 %1752  ;;  %1844 = vst.msk [vmem:[#allocation3 + $0x18] sm:$0xff] %vm1840_vm8, %v1751_v55  ;;  %v2080_v55 = vld [vmem:[#allocation2 + $0xc4] sm:$0xff] }
 0x2ca   : > { %1845 = vst.msk [vmem:[#allocation3 + $0x20] sm:$0xff] %vm1840_vm8, %v1753_v1  ;;  %v2081_v1 = vld [vmem:[#allocation2 + $0xcc] sm:$0xff] }
 0x2cd   : > { %1967 = vrot.lane.b32.xlu2 %v1888_v10, %s13464_s21 }
 0x2ce   : > { %1969 = vrot.lane.b32.xlu0 %v1889_v59, %s13464_s21 }
 0x2cf   : > { %1971 = vrot.lane.b32.xlu1 %v1890_v16, %s13464_s21  ;;  %v1773_v17 = vpop.permute.xlu2 %1772 }
 0x2d0   : > { %1855 = vst.msk [vmem:[#allocation3 + $0x70] sm:$0xff] %vm1840_vm8, %v1773_v17  ;;  %v1757_v63 = vpop.permute.xlu0 %1756  ;;  %v2082_v17 = vld [vmem:[#allocation2 + $0xdc] sm:$0xff] }
 0x2d1   : > { %v1759_v23 = vpop.permute.xlu1 %1758  ;;  %1847 = vst.msk [vmem:[#allocation3 + $0x30] sm:$0xff] %vm1840_vm8, %v1757_v63  ;;  %v2083_v63 = vld [vmem:[#allocation2 + $0xe4] sm:$0xff] }
 0x2d2   : > { %1848 = vst.msk [vmem:[#allocation3 + $0x38] sm:$0xff] %vm1840_vm8, %v1759_v23  ;;  %v2084_v23 = vld [vmem:[#allocation2 + $0xf4] sm:$0xff] }
 0x2d5   : > { %1973 = vrot.lane.b32.xlu2 %v1891_v24, %s13464_s21 }
 0x2d6   : > { %1975 = vrot.lane.b32.xlu0 %v1892_v9, %s13464_s21 }
 0x2d7   : > { %1977 = vrot.lane.b32.xlu1 %v1893_v32, %s13464_s21  ;;  %v1779_v33 = vpop.permute.xlu2 %1778 }
 0x2d8   : > { %1858 = vst.msk [vmem:[#allocation3 + $0x88] sm:$0xff] %vm1840_vm8, %v1779_v33  ;;  %v1763_v41 = vpop.permute.xlu0 %1762  ;;  %v2085_v33 = vld [vmem:[#allocation2 + $0xfc] sm:$0xff] }
 0x2d9   : > { %v1765_v15 = vpop.permute.xlu1 %1764  ;;  %1850 = vst.msk [vmem:[#allocation3 + $0x48] sm:$0xff] %vm1840_vm8, %v1763_v41  ;;  %v2086_v41 = vld [vmem:[#allocation2 + $0x10c] sm:$0xff] }
 0x2da   : > { %1851 = vst.msk [vmem:[#allocation3 + $0x50] sm:$0xff] %vm1840_vm8, %v1765_v15  ;;  %v2087_v15 = vld [vmem:[#allocation2 + $0x114] sm:$0xff] }
 0x2dd   : > { %1979 = vrot.lane.b32.xlu2 %v1894_v39, %s13464_s21 }
 0x2de   : > { %1981 = vrot.lane.b32.xlu0 %v1895_v40, %s13464_s21 }
 0x2df   : > { %1983 = vrot.lane.b32.xlu1 %v1896_v42, %s13464_s21  ;;  %v1785_v22 = vpop.permute.xlu2 %1784 }
 0x2e0   : > { %1861 = vst.msk [vmem:[#allocation3 + $0xa0] sm:$0xff] %vm1840_vm8, %v1785_v22  ;;  %v1769_v48 = vpop.permute.xlu0 %1768  ;;  %v2088_v22 = vld [vmem:[#allocation2 + $0x124] sm:$0xff] }
 0x2e1   : > { %v1771_v50 = vpop.permute.xlu1 %1770  ;;  %1853 = vst.msk [vmem:[#allocation3 + $0x60] sm:$0xff] %vm1840_vm8, %v1769_v48  ;;  %v2089_v48 = vld [vmem:[#allocation2 + $0x12c] sm:$0xff] }
 0x2e2   : > { %1854 = vst.msk [vmem:[#allocation3 + $0x68] sm:$0xff] %vm1840_vm8, %v1771_v50  ;;  %v2090_v50 = vld [vmem:[#allocation2 + $0x13c] sm:$0xff] }
 0x2e5   : > { %1985 = vrot.lane.b32.xlu2 %v1897_v31, %s13464_s21 }
 0x2e6   : > { %1987 = vrot.lane.b32.xlu0 %v1898_v58, %s13464_s21 }
 0x2e7   : > { %1989 = vrot.lane.b32.xlu1 %v1899_v61, %s13464_s21  ;;  %v1791_v38 = vpop.permute.xlu2 %1790 }
 0x2e8   : > { %1864 = vst.msk [vmem:[#allocation3 + $0xb8] sm:$0xff] %vm1840_vm8, %v1791_v38  ;;  %v1775_v5 = vpop.permute.xlu0 %1774  ;;  %v2091_v38 = vld [vmem:[#allocation2 + $0x144] sm:$0xff] }
 0x2e9   : > { %v1777_v7 = vpop.permute.xlu1 %1776  ;;  %1856 = vst.msk [vmem:[#allocation3 + $0x78] sm:$0xff] %vm1840_vm8, %v1775_v5  ;;  %v2092_v5 = vld [vmem:[#allocation2 + $0x154] sm:$0xff] }
 0x2ea   : > { %1857 = vst.msk [vmem:[#allocation3 + $0x80] sm:$0xff] %vm1840_vm8, %v1777_v7  ;;  %v2093_v7 = vld [vmem:[#allocation2 + $0x15c] sm:$0xff] }
 0x2ed   : > { %1991 = vrot.lane.b32.xlu2 %v1900_v46, %s13464_s21 }
 0x2ee   : > { %1993 = vrot.lane.b32.xlu0 %v1901_v18, %s13464_s21 }
 0x2ef   : > { %1995 = vrot.lane.b32.xlu1 %v1902_v20, %s13464_s21  ;;  %v1797_v43 = vpop.permute.xlu2 %1796 }
 0x2f0   : > { %1867 = vst.msk [vmem:[#allocation3 + $0xd0] sm:$0xff] %vm1840_vm8, %v1797_v43  ;;  %v1781_v44 = vpop.permute.xlu0 %1780  ;;  %v2094_v43 = vld [vmem:[#allocation2 + $0x16c] sm:$0xff] }
 0x2f1   : > { %v1783_v45 = vpop.permute.xlu1 %1782  ;;  %1859 = vst.msk [vmem:[#allocation3 + $0x90] sm:$0xff] %vm1840_vm8, %v1781_v44  ;;  %v2095_v44 = vld [vmem:[#allocation2 + $0x174] sm:$0xff] }
 0x2f2   : > { %1860 = vst.msk [vmem:[#allocation3 + $0x98] sm:$0xff] %vm1840_vm8, %v1783_v45  ;;  %v2096_v45 = vld [vmem:[#allocation2 + $0x184] sm:$0xff] }
 0x2f5   : > { %1997 = vrot.lane.b32.xlu2 %v1903_v56, %s13464_s21 }
 0x2f6   : > { %1999 = vrot.lane.b32.xlu0 %v1904_v29, %s13464_s21 }
 0x2f7   : > { %2130 = vrot.lane.b32.xlu1 %v2066_v34, %s9384_s22  ;;  %v1803_v47 = vpop.permute.xlu2 %1802 }
 0x2f8   : > { %1870 = vst.msk [vmem:[#allocation3 + $0xe8] sm:$0xff] %vm1840_vm8, %v1803_v47  ;;  %v1787_v49 = vpop.permute.xlu0 %1786  ;;  %v2097_v47 = vld [vmem:[#allocation2 + $0x18c] sm:$0xff] }
 0x2f9   : > { %v1789_v51 = vpop.permute.xlu1 %1788  ;;  %1862 = vst.msk [vmem:[#allocation3 + $0xa8] sm:$0xff] %vm1840_vm8, %v1787_v49  ;;  %v2259_v49 = vld [vmem:[#allocation2 + $0x30] sm:$0xff] }
 0x2fa   : > { %1863 = vst.msk [vmem:[#allocation3 + $0xb0] sm:$0xff] %vm1840_vm8, %v1789_v51  ;;  %v2260_v51 = vld [vmem:[#allocation2 + $0x38] sm:$0xff] }
 0x2fd   : > { %2132 = vrot.lane.b32.xlu2 %v2067_v52, %s9384_s22 }
 0x2fe   : > { %2134 = vrot.lane.b32.xlu0 %v2068_v53, %s9384_s22 }
 0x2ff   : > { %2136 = vrot.lane.b32.xlu1 %v2069_v54, %s9384_s22  ;;  %v1938_v57 = vpop.permute.xlu2 %1937 }
 0x300   : > { %2034 = vst.msk [vmem:[#allocation3] sm:$0xff] %vm2033_vm9, %v1938_v57  ;;  %v1793_v60 = vpop.permute.xlu0 %1792  ;;  %v2261_v57 = vld [vmem:[#allocation2 + $0x48] sm:$0xff] }
 0x301   : > { %v1795_v62 = vpop.permute.xlu1 %1794  ;;  %1865 = vst.msk [vmem:[#allocation3 + $0xc0] sm:$0xff] %vm1840_vm8, %v1793_v60  ;;  %v2262_v60 = vld [vmem:[#allocation2 + $0x50] sm:$0xff] }
 0x302   : > { %1866 = vst.msk [vmem:[#allocation3 + $0xc8] sm:$0xff] %vm1840_vm8, %v1795_v62  ;;  %v2263_v62 = vld [vmem:[#allocation2 + $0x60] sm:$0xff] }
 0x305   : > { %2138 = vrot.lane.b32.xlu2 %v2070_v2, %s9384_s22 }
 0x306   : > { %2140 = vrot.lane.b32.xlu0 %v2071_v3, %s9384_s22 }
 0x307   : > { %2142 = vrot.lane.b32.xlu1 %v2072_v4, %s9384_s22  ;;  %v1944_v6 = vpop.permute.xlu2 %1943 }
 0x308   : > { %2037 = vst.msk [vmem:[#allocation3 + $0x18] sm:$0xff] %vm2033_vm9, %v1944_v6  ;;  %v1799_v8 = vpop.permute.xlu0 %1798  ;;  %v2264_v6 = vld [vmem:[#allocation2 + $0x68] sm:$0xff] }
 0x309   : > { %v1801_v11 = vpop.permute.xlu1 %1800  ;;  %1868 = vst.msk [vmem:[#allocation3 + $0xd8] sm:$0xff] %vm1840_vm8, %v1799_v8  ;;  %v2265_v8 = vld [vmem:[#allocation2 + $0x78] sm:$0xff] }
 0x30a   : > { %1869 = vst.msk [vmem:[#allocation3 + $0xe0] sm:$0xff] %vm1840_vm8, %v1801_v11  ;;  %v2266_v11 = vld [vmem:[#allocation2 + $0x80] sm:$0xff] }
 0x30d   : > { %2144 = vrot.lane.b32.xlu2 %v2073_v12, %s9384_s22 }
 0x30e   : > { %2146 = vrot.lane.b32.xlu0 %v2074_v13, %s9384_s22 }
 0x30f   : > { %2148 = vrot.lane.b32.xlu1 %v2075_v14, %s9384_s22  ;;  %v1950_v19 = vpop.permute.xlu2 %1949 }
 0x310   : > { %2040 = vst.msk [vmem:[#allocation3 + $0x30] sm:$0xff] %vm2033_vm9, %v1950_v19  ;;  %v1805_v21 = vpop.permute.xlu0 %1804  ;;  %v2267_v19 = vld [vmem:[#allocation2 + $0x90] sm:$0xff] }
 0x311   : > { %v1807_v25 = vpop.permute.xlu1 %1806  ;;  %1871 = vst.msk [vmem:[#allocation3 + $0xf0] sm:$0xff] %vm1840_vm8, %v1805_v21  ;;  %v2268_v21 = vld [vmem:[#allocation2 + $0x98] sm:$0xff] }
 0x312   : > { %1872 = vst.msk [vmem:[#allocation3 + $0xf8] sm:$0xff] %vm1840_vm8, %v1807_v25  ;;  %v2269_v25 = vld [vmem:[#allocation2 + $0xa8] sm:$0xff]  ;;  %vm4737_vm8 = vcmask 564752  }
 0x315   : > { %2150 = vrot.lane.b32.xlu2 %v2076_v26, %s9384_s22 }
 0x316   : > { %2152 = vrot.lane.b32.xlu0 %v2077_v27, %s9384_s22 }
 0x317   : > { %2154 = vrot.lane.b32.xlu1 %v2078_v28, %s9384_s22  ;;  %v1956_v30 = vpop.permute.xlu2 %1955 }
 0x318   : > { %2043 = vst.msk [vmem:[#allocation3 + $0x48] sm:$0xff] %vm2033_vm9, %v1956_v30  ;;  %v1940_v35 = vpop.permute.xlu0 %1939  ;;  %v2270_v30 = vld [vmem:[#allocation2 + $0xb0] sm:$0xff] }
 0x319   : > { %v1942_v36 = vpop.permute.xlu1 %1941  ;;  %2035 = vst.msk [vmem:[#allocation3 + $0x8] sm:$0xff] %vm2033_vm9, %v1940_v35  ;;  %v2271_v35 = vld [vmem:[#allocation2 + $0xc0] sm:$0xff] }
 0x31a   : > { %2036 = vst.msk [vmem:[#allocation3 + $0x10] sm:$0xff] %vm2033_vm9, %v1942_v36  ;;  %v2272_v36 = vld [vmem:[#allocation2 + $0xc8] sm:$0xff] }
 0x31d   : > { %2156 = vrot.lane.b32.xlu2 %v2079_v37, %s9384_s22 }
 0x31e   : > { %2158 = vrot.lane.b32.xlu0 %v2080_v55, %s9384_s22 }
 0x31f   : > { %2160 = vrot.lane.b32.xlu1 %v2081_v1, %s9384_s22  ;;  %v1962_v10 = vpop.permute.xlu2 %1961 }
 0x320   : > { %2046 = vst.msk [vmem:[#allocation3 + $0x60] sm:$0xff] %vm2033_vm9, %v1962_v10  ;;  %v1946_v59 = vpop.permute.xlu0 %1945  ;;  %v2273_v10 = vld [vmem:[#allocation2 + $0xd8] sm:$0xff] }
 0x321   : > { %v1948_v16 = vpop.permute.xlu1 %1947  ;;  %2038 = vst.msk [vmem:[#allocation3 + $0x20] sm:$0xff] %vm2033_vm9, %v1946_v59  ;;  %v2274_v59 = vld [vmem:[#allocation2 + $0xe0] sm:$0xff] }
 0x322   : > { %2039 = vst.msk [vmem:[#allocation3 + $0x28] sm:$0xff] %vm2033_vm9, %v1948_v16  ;;  %v2275_v16 = vld [vmem:[#allocation2 + $0xf0] sm:$0xff] }
 0x325   : > { %2162 = vrot.lane.b32.xlu2 %v2082_v17, %s9384_s22  ;;  %v422_v17 = vld [vmem:[%s9587_s26 + $0xf0] sm:$0xff] }
 0x326   : > { %2164 = vrot.lane.b32.xlu0 %v2083_v63, %s9384_s22  ;;  %455 = vst.msk [vmem:[#allocation2 + $0x19a] sm:$0xff] %vm330_vm0, %v422_v17 }
 0x327   : > { %2166 = vrot.lane.b32.xlu1 %v2084_v23, %s9384_s22  ;;  %v1968_v24 = vpop.permute.xlu2 %1967 }
 0x328   : > { %2049 = vst.msk [vmem:[#allocation3 + $0x78] sm:$0xff] %vm2033_vm9, %v1968_v24  ;;  %v1952_v9 = vpop.permute.xlu0 %1951  ;;  %v423_v24 = vld [vmem:[%s9587_s26 + $0xf8] sm:$0xff]  ;;  %s9388_s26 = smov 39  }
 0x329   : > { %v1954_v32 = vpop.permute.xlu1 %1953  ;;  %2041 = vst.msk [vmem:[#allocation3 + $0x38] sm:$0xff] %vm2033_vm9, %v1952_v9 }
 0x32a   : > { %2042 = vst.msk [vmem:[#allocation3 + $0x40] sm:$0xff] %vm2033_vm9, %v1954_v32  ;;  %v2276_v32 = vld [vmem:[#allocation2 + $0xf8] sm:$0xff] }
 0x32b   : > { %456 = vst.msk [vmem:[#allocation2 + $0x1a2] sm:$0xff] %vm330_vm0, %v423_v24  ;;  %v2468_v24 = vld [vmem:[#allocation2 + $0xf1] sm:$0xff]  ;;  %vm3385_vm0 = vcmask 392552  }
 0x32d   : > { %2168 = vrot.lane.b32.xlu2 %v2085_v33, %s9384_s22  ;;  %v2277_v33 = vld [vmem:[#allocation2 + $0x108] sm:$0xff] }
 0x32e   : > { %2170 = vrot.lane.b32.xlu0 %v2086_v41, %s9384_s22  ;;  %v2278_v41 = vld [vmem:[#allocation2 + $0x110] sm:$0xff] }
 0x32f   : > { %2172 = vrot.lane.b32.xlu1 %v2087_v15, %s9384_s22  ;;  %v1974_v39 = vpop.permute.xlu2 %1973 }
 0x330   : > { %2052 = vst.msk [vmem:[#allocation3 + $0x90] sm:$0xff] %vm2033_vm9, %v1974_v39  ;;  %v1958_v40 = vpop.permute.xlu0 %1957 }
 0x331   : > { %v1960_v42 = vpop.permute.xlu1 %1959  ;;  %2044 = vst.msk [vmem:[#allocation3 + $0x50] sm:$0xff] %vm2033_vm9, %v1958_v40 }
 0x332   : > { %2045 = vst.msk [vmem:[#allocation3 + $0x58] sm:$0xff] %vm2033_vm9, %v1960_v42  ;;  %v2279_v42 = vld [vmem:[#allocation2 + $0x120] sm:$0xff] }
 0x335   : > { %2174 = vrot.lane.b32.xlu2 %v2088_v22, %s9384_s22  ;;  %v2280_v22 = vld [vmem:[#allocation2 + $0x128] sm:$0xff] }
 0x336   : > { %2176 = vrot.lane.b32.xlu0 %v2089_v48, %s9384_s22  ;;  %v2281_v48 = vld [vmem:[#allocation2 + $0x138] sm:$0xff] }
 0x337   : > { %2178 = vrot.lane.b32.xlu1 %v2090_v50, %s9384_s22  ;;  %v1980_v31 = vpop.permute.xlu2 %1979 }
 0x338   : > { %2055 = vst.msk [vmem:[#allocation3 + $0xa8] sm:$0xff] %vm2033_vm9, %v1980_v31  ;;  %v1964_v58 = vpop.permute.xlu0 %1963 }
 0x339   : > { %v1966_v61 = vpop.permute.xlu1 %1965  ;;  %2047 = vst.msk [vmem:[#allocation3 + $0x68] sm:$0xff] %vm2033_vm9, %v1964_v58 }
 0x33a   : > { %2048 = vst.msk [vmem:[#allocation3 + $0x70] sm:$0xff] %vm2033_vm9, %v1966_v61  ;;  %v2282_v61 = vld [vmem:[#allocation2 + $0x140] sm:$0xff] }
 0x33d   : > { %2180 = vrot.lane.b32.xlu2 %v2091_v38, %s9384_s22  ;;  %v2283_v38 = vld [vmem:[#allocation2 + $0x150] sm:$0xff] }
 0x33e   : > { %2182 = vrot.lane.b32.xlu0 %v2092_v5, %s9384_s22  ;;  %v2284_v5 = vld [vmem:[#allocation2 + $0x158] sm:$0xff] }
 0x33f   : > { %2184 = vrot.lane.b32.xlu1 %v2093_v7, %s9384_s22  ;;  %v1986_v46 = vpop.permute.xlu2 %1985 }
 0x340   : > { %2058 = vst.msk [vmem:[#allocation3 + $0xc0] sm:$0xff] %vm2033_vm9, %v1986_v46  ;;  %v1970_v18 = vpop.permute.xlu0 %1969 }
 0x341   : > { %v1972_v20 = vpop.permute.xlu1 %1971  ;;  %2050 = vst.msk [vmem:[#allocation3 + $0x80] sm:$0xff] %vm2033_vm9, %v1970_v18 }
 0x342   : > { %2051 = vst.msk [vmem:[#allocation3 + $0x88] sm:$0xff] %vm2033_vm9, %v1972_v20  ;;  %v2285_v20 = vld [vmem:[#allocation2 + $0x168] sm:$0xff] }
 0x345   : > { %2186 = vrot.lane.b32.xlu2 %v2094_v43, %s9384_s22  ;;  %v2286_v43 = vld [vmem:[#allocation2 + $0x170] sm:$0xff] }
 0x346   : > { %2188 = vrot.lane.b32.xlu0 %v2095_v44, %s9384_s22  ;;  %v2287_v44 = vld [vmem:[#allocation2 + $0x180] sm:$0xff] }
 0x347   : > { %2190 = vrot.lane.b32.xlu1 %v2096_v45, %s9384_s22  ;;  %v1992_v56 = vpop.permute.xlu2 %1991 }
 0x348   : > { %2061 = vst.msk [vmem:[#allocation3 + $0xd8] sm:$0xff] %vm2033_vm9, %v1992_v56  ;;  %v1976_v29 = vpop.permute.xlu0 %1975 }
 0x349   : > { %v1978_v34 = vpop.permute.xlu1 %1977  ;;  %2053 = vst.msk [vmem:[#allocation3 + $0x98] sm:$0xff] %vm2033_vm9, %v1976_v29 }
 0x34a   : > { %2054 = vst.msk [vmem:[#allocation3 + $0xa0] sm:$0xff] %vm2033_vm9, %v1978_v34  ;;  %v2288_v34 = vld [vmem:[#allocation2 + $0x188] sm:$0xff] }
 0x34d   : > { %2192 = vrot.lane.b32.xlu2 %v2097_v47, %s9384_s22  ;;  %v2289_v47 = vld [vmem:[#allocation2 + $0x198] sm:$0xff]  ;;  %s9395_s22 = smov 60  }
 0x34e   : > { %2323 = vrot.lane.b32.xlu0 %v2259_v49, %s9385_s23  ;;  %v2290_v49 = vld [vmem:[#allocation2 + $0x1a0] sm:$0xff] }
 0x34f   : > { %2325 = vrot.lane.b32.xlu1 %v2260_v51, %s9385_s23  ;;  %v1998_v52 = vpop.permute.xlu2 %1997 }
 0x350   : > { %2064 = vst.msk [vmem:[#allocation3 + $0xf0] sm:$0xff] %vm2033_vm9, %v1998_v52  ;;  %v1982_v53 = vpop.permute.xlu0 %1981 }
 0x351   : > { %v1984_v54 = vpop.permute.xlu1 %1983  ;;  %2056 = vst.msk [vmem:[#allocation3 + $0xb0] sm:$0xff] %vm2033_vm9, %v1982_v53 }
 0x352   : > { %2057 = vst.msk [vmem:[#allocation3 + $0xb8] sm:$0xff] %vm2033_vm9, %v1984_v54  ;;  %v2452_v54 = vld [vmem:[#allocation2 + $0x31] sm:$0xff] }
 0x355   : > { %2327 = vrot.lane.b32.xlu2 %v2261_v57, %s9385_s23  ;;  %v2453_v57 = vld [vmem:[#allocation2 + $0x39] sm:$0xff] }
 0x356   : > { %2329 = vrot.lane.b32.xlu0 %v2262_v60, %s9385_s23  ;;  %v2454_v60 = vld [vmem:[#allocation2 + $0x49] sm:$0xff] }
 0x357   : > { %2331 = vrot.lane.b32.xlu1 %v2263_v62, %s9385_s23  ;;  %v2133_v2 = vpop.permute.xlu2 %2132 }
 0x358   : > { %2228 = vst.msk [vmem:[#allocation3 + $0x8] sm:$0xff] %vm2226_vm10, %v2133_v2  ;;  %v1988_v3 = vpop.permute.xlu0 %1987 }
 0x359   : > { %v1990_v4 = vpop.permute.xlu1 %1989  ;;  %2059 = vst.msk [vmem:[#allocation3 + $0xc8] sm:$0xff] %vm2033_vm9, %v1988_v3 }
 0x35a   : > { %2060 = vst.msk [vmem:[#allocation3 + $0xd0] sm:$0xff] %vm2033_vm9, %v1990_v4  ;;  %v2455_v4 = vld [vmem:[#allocation2 + $0x51] sm:$0xff] }
 0x35d   : > { %2333 = vrot.lane.b32.xlu2 %v2264_v6, %s9385_s23  ;;  %v2456_v6 = vld [vmem:[#allocation2 + $0x61] sm:$0xff] }
 0x35e   : > { %2335 = vrot.lane.b32.xlu0 %v2265_v8, %s9385_s23  ;;  %v2457_v8 = vld [vmem:[#allocation2 + $0x69] sm:$0xff] }
 0x35f   : > { %2337 = vrot.lane.b32.xlu1 %v2266_v11, %s9385_s23  ;;  %v2139_v12 = vpop.permute.xlu2 %2138 }
 0x360   : > { %2231 = vst.msk [vmem:[#allocation3 + $0x20] sm:$0xff] %vm2226_vm10, %v2139_v12  ;;  %v1994_v13 = vpop.permute.xlu0 %1993 }
 0x361   : > { %v1996_v14 = vpop.permute.xlu1 %1995  ;;  %2062 = vst.msk [vmem:[#allocation3 + $0xe0] sm:$0xff] %vm2033_vm9, %v1994_v13 }
 0x362   : > { %2063 = vst.msk [vmem:[#allocation3 + $0xe8] sm:$0xff] %vm2033_vm9, %v1996_v14  ;;  %v2458_v14 = vld [vmem:[#allocation2 + $0x79] sm:$0xff] }
 0x365   : > { %2339 = vrot.lane.b32.xlu2 %v2267_v19, %s9385_s23  ;;  %v2459_v19 = vld [vmem:[#allocation2 + $0x81] sm:$0xff] }
 0x366   : > { %2341 = vrot.lane.b32.xlu0 %v2268_v21, %s9385_s23  ;;  %v2460_v21 = vld [vmem:[#allocation2 + $0x91] sm:$0xff] }
 0x367   : > { %2343 = vrot.lane.b32.xlu1 %v2269_v25, %s9385_s23  ;;  %v2145_v26 = vpop.permute.xlu2 %2144 }
 0x368   : > { %2234 = vst.msk [vmem:[#allocation3 + $0x38] sm:$0xff] %vm2226_vm10, %v2145_v26  ;;  %v2000_v27 = vpop.permute.xlu0 %1999 }
 0x369   : > { %v2131_v28 = vpop.permute.xlu1 %2130  ;;  %2065 = vst.msk [vmem:[#allocation3 + $0xf8] sm:$0xff] %vm2033_vm9, %v2000_v27  ;;  %vm4930_vm9 = vcmask 589352  }
 0x36a   : > { %2227 = vst.msk [vmem:[#allocation3] sm:$0xff] %vm2226_vm10, %v2131_v28  ;;  %v2461_v28 = vld [vmem:[#allocation2 + $0x99] sm:$0xff] }
 0x36d   : > { %2345 = vrot.lane.b32.xlu2 %v2270_v30, %s9385_s23  ;;  %v2462_v30 = vld [vmem:[#allocation2 + $0xa9] sm:$0xff] }
 0x36e   : > { %2347 = vrot.lane.b32.xlu0 %v2271_v35, %s9385_s23  ;;  %v2463_v35 = vld [vmem:[#allocation2 + $0xb1] sm:$0xff] }
 0x36f   : > { %2349 = vrot.lane.b32.xlu1 %v2272_v36, %s9385_s23  ;;  %v2151_v37 = vpop.permute.xlu2 %2150 }
 0x370   : > { %2237 = vst.msk [vmem:[#allocation3 + $0x50] sm:$0xff] %vm2226_vm10, %v2151_v37  ;;  %v2135_v55 = vpop.permute.xlu0 %2134 }
 0x371   : > { %v2137_v1 = vpop.permute.xlu1 %2136  ;;  %2229 = vst.msk [vmem:[#allocation3 + $0x10] sm:$0xff] %vm2226_vm10, %v2135_v55 }
 0x372   : > { %2230 = vst.msk [vmem:[#allocation3 + $0x18] sm:$0xff] %vm2226_vm10, %v2137_v1  ;;  %v2464_v1 = vld [vmem:[#allocation2 + $0xc1] sm:$0xff] }
 0x375   : > { %2351 = vrot.lane.b32.xlu2 %v2273_v10, %s9385_s23  ;;  %v2465_v10 = vld [vmem:[#allocation2 + $0xc9] sm:$0xff] }
 0x376   : > { %2353 = vrot.lane.b32.xlu0 %v2274_v59, %s9385_s23  ;;  %v2466_v59 = vld [vmem:[#allocation2 + $0xd9] sm:$0xff] }
 0x377   : > { %2355 = vrot.lane.b32.xlu1 %v2275_v16, %s9385_s23  ;;  %v2157_v63 = vpop.permute.xlu2 %2156 }
 0x378   : > { %2240 = vst.msk [vmem:[#allocation3 + $0x68] sm:$0xff] %vm2226_vm10, %v2157_v63  ;;  %v2141_v23 = vpop.permute.xlu0 %2140 }
 0x379   : > { %v2143_v9 = vpop.permute.xlu1 %2142  ;;  %2232 = vst.msk [vmem:[#allocation3 + $0x28] sm:$0xff] %vm2226_vm10, %v2141_v23  ;;  %v2467_v23 = vld [vmem:[#allocation2 + $0xe1] sm:$0xff] }
 0x37a   : > { %2233 = vst.msk [vmem:[#allocation3 + $0x30] sm:$0xff] %vm2226_vm10, %v2143_v9  ;;  %v2469_v9 = vld [vmem:[#allocation2 + $0xf9] sm:$0xff] }
 0x37d   : > { %2357 = vrot.lane.b32.xlu2 %v2276_v32, %s9385_s23 }
 0x37e   : > { %2359 = vrot.lane.b32.xlu0 %v2277_v33, %s9385_s23 }
 0x37f   : > { %2361 = vrot.lane.b32.xlu1 %v2278_v41, %s9385_s23  ;;  %v2163_v15 = vpop.permute.xlu2 %2162 }
 0x380   : > { %2243 = vst.msk [vmem:[#allocation3 + $0x80] sm:$0xff] %vm2226_vm10, %v2163_v15  ;;  %v2147_v39 = vpop.permute.xlu0 %2146  ;;  %v2470_v15 = vld [vmem:[#allocation2 + $0x109] sm:$0xff] }
 0x381   : > { %v2149_v40 = vpop.permute.xlu1 %2148  ;;  %2235 = vst.msk [vmem:[#allocation3 + $0x40] sm:$0xff] %vm2226_vm10, %v2147_v39  ;;  %v2471_v39 = vld [vmem:[#allocation2 + $0x111] sm:$0xff] }
 0x382   : > { %2236 = vst.msk [vmem:[#allocation3 + $0x48] sm:$0xff] %vm2226_vm10, %v2149_v40  ;;  %v2472_v40 = vld [vmem:[#allocation2 + $0x121] sm:$0xff] }
 0x385   : > { %2363 = vrot.lane.b32.xlu2 %v2279_v42, %s9385_s23 }
 0x386   : > { %2365 = vrot.lane.b32.xlu0 %v2280_v22, %s9385_s23 }
 0x387   : > { %2367 = vrot.lane.b32.xlu1 %v2281_v48, %s9385_s23  ;;  %v2169_v50 = vpop.permute.xlu2 %2168 }
 0x388   : > { %2246 = vst.msk [vmem:[#allocation3 + $0x98] sm:$0xff] %vm2226_vm10, %v2169_v50  ;;  %v2153_v31 = vpop.permute.xlu0 %2152  ;;  %v2473_v50 = vld [vmem:[#allocation2 + $0x129] sm:$0xff] }
 0x389   : > { %v2155_v58 = vpop.permute.xlu1 %2154  ;;  %2238 = vst.msk [vmem:[#allocation3 + $0x58] sm:$0xff] %vm2226_vm10, %v2153_v31  ;;  %v2474_v31 = vld [vmem:[#allocation2 + $0x139] sm:$0xff] }
 0x38a   : > { %2239 = vst.msk [vmem:[#allocation3 + $0x60] sm:$0xff] %vm2226_vm10, %v2155_v58  ;;  %v2475_v58 = vld [vmem:[#allocation2 + $0x141] sm:$0xff] }
 0x38d   : > { %2369 = vrot.lane.b32.xlu2 %v2282_v61, %s9385_s23 }
 0x38e   : > { %2371 = vrot.lane.b32.xlu0 %v2283_v38, %s9385_s23 }
 0x38f   : > { %2373 = vrot.lane.b32.xlu1 %v2284_v5, %s9385_s23  ;;  %v2175_v7 = vpop.permute.xlu2 %2174 }
 0x390   : > { %2249 = vst.msk [vmem:[#allocation3 + $0xb0] sm:$0xff] %vm2226_vm10, %v2175_v7  ;;  %v2159_v46 = vpop.permute.xlu0 %2158  ;;  %v2476_v7 = vld [vmem:[#allocation2 + $0x151] sm:$0xff] }
 0x391   : > { %v2161_v18 = vpop.permute.xlu1 %2160  ;;  %2241 = vst.msk [vmem:[#allocation3 + $0x70] sm:$0xff] %vm2226_vm10, %v2159_v46  ;;  %v2477_v46 = vld [vmem:[#allocation2 + $0x159] sm:$0xff] }
 0x392   : > { %2242 = vst.msk [vmem:[#allocation3 + $0x78] sm:$0xff] %vm2226_vm10, %v2161_v18  ;;  %v2478_v18 = vld [vmem:[#allocation2 + $0x169] sm:$0xff] }
 0x395   : > { %2375 = vrot.lane.b32.xlu2 %v2285_v20, %s9385_s23 }
 0x396   : > { %2377 = vrot.lane.b32.xlu0 %v2286_v43, %s9385_s23 }
 0x397   : > { %2379 = vrot.lane.b32.xlu1 %v2287_v44, %s9385_s23  ;;  %v2181_v45 = vpop.permute.xlu2 %2180 }
 0x398   : > { %2252 = vst.msk [vmem:[#allocation3 + $0xc8] sm:$0xff] %vm2226_vm10, %v2181_v45  ;;  %v2165_v56 = vpop.permute.xlu0 %2164  ;;  %v2479_v45 = vld [vmem:[#allocation2 + $0x171] sm:$0xff] }
 0x399   : > { %v2167_v29 = vpop.permute.xlu1 %2166  ;;  %2244 = vst.msk [vmem:[#allocation3 + $0x88] sm:$0xff] %vm2226_vm10, %v2165_v56  ;;  %v2480_v56 = vld [vmem:[#allocation2 + $0x181] sm:$0xff] }
 0x39a   : > { %2245 = vst.msk [vmem:[#allocation3 + $0x90] sm:$0xff] %vm2226_vm10, %v2167_v29  ;;  %v2481_v29 = vld [vmem:[#allocation2 + $0x189] sm:$0xff] }
 0x39d   : > { %2381 = vrot.lane.b32.xlu2 %v2288_v34, %s9385_s23 }
 0x39e   : > { %2383 = vrot.lane.b32.xlu0 %v2289_v47, %s9385_s23 }
 0x39f   : > { %2385 = vrot.lane.b32.xlu1 %v2290_v49, %s9385_s23  ;;  %v2187_v51 = vpop.permute.xlu2 %2186  ;;  %s9396_s23 = smov 63  }
 0x3a0   : > { %2255 = vst.msk [vmem:[#allocation3 + $0xe0] sm:$0xff] %vm2226_vm10, %v2187_v51  ;;  %v2171_v52 = vpop.permute.xlu0 %2170  ;;  %v2482_v51 = vld [vmem:[#allocation2 + $0x199] sm:$0xff] }
 0x3a1   : > { %v2173_v53 = vpop.permute.xlu1 %2172  ;;  %2247 = vst.msk [vmem:[#allocation3 + $0xa0] sm:$0xff] %vm2226_vm10, %v2171_v52  ;;  %v2483_v52 = vld [vmem:[#allocation2 + $0x1a1] sm:$0xff] }
 0x3a2   : > { %2248 = vst.msk [vmem:[#allocation3 + $0xa8] sm:$0xff] %vm2226_vm10, %v2173_v53  ;;  %v2645_v53 = vld [vmem:[#allocation2 + $0x32] sm:$0xff] }
 0x3a5   : > { %2516 = vrot.lane.b32.xlu2 %v2452_v54, %s9386_s24 }
 0x3a6   : > { %2518 = vrot.lane.b32.xlu0 %v2453_v57, %s9386_s24 }
 0x3a7   : > { %2520 = vrot.lane.b32.xlu1 %v2454_v60, %s9386_s24  ;;  %v2193_v62 = vpop.permute.xlu2 %2192 }
 0x3a8   : > { %2258 = vst.msk [vmem:[#allocation3 + $0xf8] sm:$0xff] %vm2226_vm10, %v2193_v62  ;;  %v2177_v2 = vpop.permute.xlu0 %2176  ;;  %v2646_v62 = vld [vmem:[#allocation2 + $0x3a] sm:$0xff] }
 0x3a9   : > { %v2179_v3 = vpop.permute.xlu1 %2178  ;;  %2250 = vst.msk [vmem:[#allocation3 + $0xb8] sm:$0xff] %vm2226_vm10, %v2177_v2  ;;  %v2647_v2 = vld [vmem:[#allocation2 + $0x4a] sm:$0xff] }
 0x3aa   : > { %2251 = vst.msk [vmem:[#allocation3 + $0xc0] sm:$0xff] %vm2226_vm10, %v2179_v3  ;;  %v2648_v3 = vld [vmem:[#allocation2 + $0x52] sm:$0xff] }
 0x3ad   : > { %2522 = vrot.lane.b32.xlu2 %v2455_v4, %s9386_s24 }
 0x3ae   : > { %2524 = vrot.lane.b32.xlu0 %v2456_v6, %s9386_s24 }
 0x3af   : > { %2526 = vrot.lane.b32.xlu1 %v2457_v8, %s9386_s24  ;;  %v2328_v11 = vpop.permute.xlu2 %2327 }
 0x3b0   : > { %2422 = vst.msk [vmem:[#allocation3 + $0x10] sm:$0xff] %vm2419_vm11, %v2328_v11  ;;  %v2183_v12 = vpop.permute.xlu0 %2182  ;;  %v2649_v11 = vld [vmem:[#allocation2 + $0x62] sm:$0xff] }
 0x3b1   : > { %v2185_v13 = vpop.permute.xlu1 %2184  ;;  %2253 = vst.msk [vmem:[#allocation3 + $0xd0] sm:$0xff] %vm2226_vm10, %v2183_v12  ;;  %v2650_v12 = vld [vmem:[#allocation2 + $0x6a] sm:$0xff] }
 0x3b2   : > { %2254 = vst.msk [vmem:[#allocation3 + $0xd8] sm:$0xff] %vm2226_vm10, %v2185_v13  ;;  %v2651_v13 = vld [vmem:[#allocation2 + $0x7a] sm:$0xff] }
 0x3b5   : > { %2528 = vrot.lane.b32.xlu2 %v2458_v14, %s9386_s24 }
 0x3b6   : > { %2530 = vrot.lane.b32.xlu0 %v2459_v19, %s9386_s24 }
 0x3b7   : > { %2532 = vrot.lane.b32.xlu1 %v2460_v21, %s9386_s24  ;;  %v2334_v25 = vpop.permute.xlu2 %2333 }
 0x3b8   : > { %2425 = vst.msk [vmem:[#allocation3 + $0x28] sm:$0xff] %vm2419_vm11, %v2334_v25  ;;  %v2189_v26 = vpop.permute.xlu0 %2188  ;;  %v2652_v25 = vld [vmem:[#allocation2 + $0x82] sm:$0xff] }
 0x3b9   : > { %v2191_v27 = vpop.permute.xlu1 %2190  ;;  %2256 = vst.msk [vmem:[#allocation3 + $0xe8] sm:$0xff] %vm2226_vm10, %v2189_v26  ;;  %v2653_v26 = vld [vmem:[#allocation2 + $0x92] sm:$0xff] }
 0x3ba   : > { %2257 = vst.msk [vmem:[#allocation3 + $0xf0] sm:$0xff] %vm2226_vm10, %v2191_v27  ;;  %v2654_v27 = vld [vmem:[#allocation2 + $0x9a] sm:$0xff]  ;;  %vm5123_vm10 = vcmask 613952  }
 0x3bd   : > { %2534 = vrot.lane.b32.xlu2 %v2461_v28, %s9386_s24 }
 0x3be   : > { %2536 = vrot.lane.b32.xlu0 %v2462_v30, %s9386_s24 }
 0x3bf   : > { %2538 = vrot.lane.b32.xlu1 %v2463_v35, %s9386_s24  ;;  %v2340_v36 = vpop.permute.xlu2 %2339 }
 0x3c0   : > { %2428 = vst.msk [vmem:[#allocation3 + $0x40] sm:$0xff] %vm2419_vm11, %v2340_v36  ;;  %v2324_v37 = vpop.permute.xlu0 %2323  ;;  %v2655_v36 = vld [vmem:[#allocation2 + $0xaa] sm:$0xff] }
 0x3c1   : > { %v2326_v55 = vpop.permute.xlu1 %2325  ;;  %2420 = vst.msk [vmem:[#allocation3] sm:$0xff] %vm2419_vm11, %v2324_v37  ;;  %v2656_v37 = vld [vmem:[#allocation2 + $0xb2] sm:$0xff] }
 0x3c2   : > { %2421 = vst.msk [vmem:[#allocation3 + $0x8] sm:$0xff] %vm2419_vm11, %v2326_v55  ;;  %v2657_v55 = vld [vmem:[#allocation2 + $0xc2] sm:$0xff] }
 0x3c5   : > { %2540 = vrot.lane.b32.xlu2 %v2464_v1, %s9386_s24 }
 0x3c6   : > { %2542 = vrot.lane.b32.xlu0 %v2465_v10, %s9386_s24 }
 0x3c7   : > { %2544 = vrot.lane.b32.xlu1 %v2466_v59, %s9386_s24  ;;  %v2346_v16 = vpop.permute.xlu2 %2345 }
 0x3c8   : > { %2431 = vst.msk [vmem:[#allocation3 + $0x58] sm:$0xff] %vm2419_vm11, %v2346_v16  ;;  %v2330_v17 = vpop.permute.xlu0 %2329  ;;  %v2658_v16 = vld [vmem:[#allocation2 + $0xca] sm:$0xff] }
 0x3c9   : > { %v2332_v63 = vpop.permute.xlu1 %2331  ;;  %2423 = vst.msk [vmem:[#allocation3 + $0x18] sm:$0xff] %vm2419_vm11, %v2330_v17  ;;  %v2659_v17 = vld [vmem:[#allocation2 + $0xda] sm:$0xff] }
 0x3ca   : > { %2424 = vst.msk [vmem:[#allocation3 + $0x20] sm:$0xff] %vm2419_vm11, %v2332_v63  ;;  %v2660_v63 = vld [vmem:[#allocation2 + $0xe2] sm:$0xff] }
 0x3cd   : > { %2546 = vrot.lane.b32.xlu2 %v2467_v23, %s9386_s24 }
 0x3ce   : > { %2548 = vrot.lane.b32.xlu0 %v2468_v24, %s9386_s24 }
 0x3cf   : > { %2550 = vrot.lane.b32.xlu1 %v2469_v9, %s9386_s24  ;;  %v2352_v32 = vpop.permute.xlu2 %2351 }
 0x3d0   : > { %2434 = vst.msk [vmem:[#allocation3 + $0x70] sm:$0xff] %vm2419_vm11, %v2352_v32  ;;  %v2336_v33 = vpop.permute.xlu0 %2335  ;;  %v2661_v32 = vld [vmem:[#allocation2 + $0xf2] sm:$0xff] }
 0x3d1   : > { %v2338_v41 = vpop.permute.xlu1 %2337  ;;  %2426 = vst.msk [vmem:[#allocation3 + $0x30] sm:$0xff] %vm2419_vm11, %v2336_v33  ;;  %v2662_v33 = vld [vmem:[#allocation2 + $0xfa] sm:$0xff] }
 0x3d2   : > { %2427 = vst.msk [vmem:[#allocation3 + $0x38] sm:$0xff] %vm2419_vm11, %v2338_v41  ;;  %v2663_v41 = vld [vmem:[#allocation2 + $0x10a] sm:$0xff] }
 0x3d5   : > { %2552 = vrot.lane.b32.xlu2 %v2470_v15, %s9386_s24 }
 0x3d6   : > { %2554 = vrot.lane.b32.xlu0 %v2471_v39, %s9386_s24 }
 0x3d7   : > { %2556 = vrot.lane.b32.xlu1 %v2472_v40, %s9386_s24  ;;  %v2358_v42 = vpop.permute.xlu2 %2357 }
 0x3d8   : > { %2437 = vst.msk [vmem:[#allocation3 + $0x88] sm:$0xff] %vm2419_vm11, %v2358_v42  ;;  %v2342_v22 = vpop.permute.xlu0 %2341  ;;  %v2664_v42 = vld [vmem:[#allocation2 + $0x112] sm:$0xff] }
 0x3d9   : > { %v2344_v48 = vpop.permute.xlu1 %2343  ;;  %2429 = vst.msk [vmem:[#allocation3 + $0x48] sm:$0xff] %vm2419_vm11, %v2342_v22  ;;  %v2665_v22 = vld [vmem:[#allocation2 + $0x122] sm:$0xff] }
 0x3da   : > { %2430 = vst.msk [vmem:[#allocation3 + $0x50] sm:$0xff] %vm2419_vm11, %v2344_v48  ;;  %v2666_v48 = vld [vmem:[#allocation2 + $0x12a] sm:$0xff] }
 0x3dd   : > { %2558 = vrot.lane.b32.xlu2 %v2473_v50, %s9386_s24 }
 0x3de   : > { %2560 = vrot.lane.b32.xlu0 %v2474_v31, %s9386_s24 }
 0x3df   : > { %2562 = vrot.lane.b32.xlu1 %v2475_v58, %s9386_s24  ;;  %v2364_v61 = vpop.permute.xlu2 %2363 }
 0x3e0   : > { %2440 = vst.msk [vmem:[#allocation3 + $0xa0] sm:$0xff] %vm2419_vm11, %v2364_v61  ;;  %v2348_v38 = vpop.permute.xlu0 %2347  ;;  %v2667_v61 = vld [vmem:[#allocation2 + $0x13a] sm:$0xff] }
 0x3e1   : > { %v2350_v5 = vpop.permute.xlu1 %2349  ;;  %2432 = vst.msk [vmem:[#allocation3 + $0x60] sm:$0xff] %vm2419_vm11, %v2348_v38  ;;  %v2668_v38 = vld [vmem:[#allocation2 + $0x142] sm:$0xff] }
 0x3e2   : > { %2433 = vst.msk [vmem:[#allocation3 + $0x68] sm:$0xff] %vm2419_vm11, %v2350_v5  ;;  %v2669_v5 = vld [vmem:[#allocation2 + $0x152] sm:$0xff] }
 0x3e5   : > { %2564 = vrot.lane.b32.xlu2 %v2476_v7, %s9386_s24 }
 0x3e6   : > { %2566 = vrot.lane.b32.xlu0 %v2477_v46, %s9386_s24 }
 0x3e7   : > { %2568 = vrot.lane.b32.xlu1 %v2478_v18, %s9386_s24  ;;  %v2370_v20 = vpop.permute.xlu2 %2369 }
 0x3e8   : > { %2443 = vst.msk [vmem:[#allocation3 + $0xb8] sm:$0xff] %vm2419_vm11, %v2370_v20  ;;  %v2354_v43 = vpop.permute.xlu0 %2353  ;;  %v2670_v20 = vld [vmem:[#allocation2 + $0x15a] sm:$0xff] }
 0x3e9   : > { %v2356_v44 = vpop.permute.xlu1 %2355  ;;  %2435 = vst.msk [vmem:[#allocation3 + $0x78] sm:$0xff] %vm2419_vm11, %v2354_v43  ;;  %v2671_v43 = vld [vmem:[#allocation2 + $0x16a] sm:$0xff] }
 0x3ea   : > { %2436 = vst.msk [vmem:[#allocation3 + $0x80] sm:$0xff] %vm2419_vm11, %v2356_v44  ;;  %v2672_v44 = vld [vmem:[#allocation2 + $0x172] sm:$0xff] }
 0x3ed   : > { %2570 = vrot.lane.b32.xlu2 %v2479_v45, %s9386_s24 }
 0x3ee   : > { %2572 = vrot.lane.b32.xlu0 %v2480_v56, %s9386_s24 }
 0x3ef   : > { %2574 = vrot.lane.b32.xlu1 %v2481_v29, %s9386_s24  ;;  %v2376_v34 = vpop.permute.xlu2 %2375 }
 0x3f0   : > { %2446 = vst.msk [vmem:[#allocation3 + $0xd0] sm:$0xff] %vm2419_vm11, %v2376_v34  ;;  %v2360_v47 = vpop.permute.xlu0 %2359  ;;  %v2673_v34 = vld [vmem:[#allocation2 + $0x182] sm:$0xff] }
 0x3f1   : > { %v2362_v49 = vpop.permute.xlu1 %2361  ;;  %2438 = vst.msk [vmem:[#allocation3 + $0x90] sm:$0xff] %vm2419_vm11, %v2360_v47  ;;  %v2674_v47 = vld [vmem:[#allocation2 + $0x18a] sm:$0xff] }
 0x3f2   : > { %2439 = vst.msk [vmem:[#allocation3 + $0x98] sm:$0xff] %vm2419_vm11, %v2362_v49  ;;  %v2675_v49 = vld [vmem:[#allocation2 + $0x19a] sm:$0xff] }
 0x3f5   : > { %2576 = vrot.lane.b32.xlu2 %v2482_v51, %s9386_s24 }
 0x3f6   : > { %2578 = vrot.lane.b32.xlu0 %v2483_v52, %s9386_s24  ;;  %s9397_s24 = smov 66  }
 0x3f7   : > { %2709 = vrot.lane.b32.xlu1 %v2645_v53, %s9387_s25  ;;  %v2382_v54 = vpop.permute.xlu2 %2381 }
 0x3f8   : > { %2449 = vst.msk [vmem:[#allocation3 + $0xe8] sm:$0xff] %vm2419_vm11, %v2382_v54  ;;  %v2366_v57 = vpop.permute.xlu0 %2365  ;;  %v2676_v54 = vld [vmem:[#allocation2 + $0x1a2] sm:$0xff] }
 0x3f9   : > { %v2368_v60 = vpop.permute.xlu1 %2367  ;;  %2441 = vst.msk [vmem:[#allocation3 + $0xa8] sm:$0xff] %vm2419_vm11, %v2366_v57  ;;  %v2838_v57 = vld [vmem:[#allocation2 + $0x33] sm:$0xff] }
 0x3fa   : > { %2442 = vst.msk [vmem:[#allocation3 + $0xb0] sm:$0xff] %vm2419_vm11, %v2368_v60  ;;  %v2839_v60 = vld [vmem:[#allocation2 + $0x3b] sm:$0xff] }
 0x3fd   : > { %2711 = vrot.lane.b32.xlu2 %v2646_v62, %s9387_s25 }
 0x3fe   : > { %2713 = vrot.lane.b32.xlu0 %v2647_v2, %s9387_s25 }
 0x3ff   : > { %2715 = vrot.lane.b32.xlu1 %v2648_v3, %s9387_s25  ;;  %v2517_v4 = vpop.permute.xlu2 %2516 }
 0x400   : > { %2613 = vst.msk [vmem:[#allocation3] sm:$0xff] %vm2612_vm12, %v2517_v4  ;;  %v2372_v6 = vpop.permute.xlu0 %2371  ;;  %v2840_v4 = vld [vmem:[#allocation2 + $0x4b] sm:$0xff] }
 0x401   : > { %v2374_v8 = vpop.permute.xlu1 %2373  ;;  %2444 = vst.msk [vmem:[#allocation3 + $0xc0] sm:$0xff] %vm2419_vm11, %v2372_v6  ;;  %v2841_v6 = vld [vmem:[#allocation2 + $0x53] sm:$0xff] }
 0x402   : > { %2445 = vst.msk [vmem:[#allocation3 + $0xc8] sm:$0xff] %vm2419_vm11, %v2374_v8  ;;  %v2842_v8 = vld [vmem:[#allocation2 + $0x63] sm:$0xff] }
 0x405   : > { %2717 = vrot.lane.b32.xlu2 %v2649_v11, %s9387_s25 }
 0x406   : > { %2719 = vrot.lane.b32.xlu0 %v2650_v12, %s9387_s25 }
 0x407   : > { %2721 = vrot.lane.b32.xlu1 %v2651_v13, %s9387_s25  ;;  %v2523_v14 = vpop.permute.xlu2 %2522 }
 0x408   : > { %2616 = vst.msk [vmem:[#allocation3 + $0x18] sm:$0xff] %vm2612_vm12, %v2523_v14  ;;  %v2378_v19 = vpop.permute.xlu0 %2377  ;;  %v2843_v14 = vld [vmem:[#allocation2 + $0x6b] sm:$0xff] }
 0x409   : > { %v2380_v21 = vpop.permute.xlu1 %2379  ;;  %2447 = vst.msk [vmem:[#allocation3 + $0xd8] sm:$0xff] %vm2419_vm11, %v2378_v19  ;;  %v2844_v19 = vld [vmem:[#allocation2 + $0x7b] sm:$0xff] }
 0x40a   : > { %2448 = vst.msk [vmem:[#allocation3 + $0xe0] sm:$0xff] %vm2419_vm11, %v2380_v21  ;;  %v2845_v21 = vld [vmem:[#allocation2 + $0x83] sm:$0xff] }
 0x40d   : > { %2723 = vrot.lane.b32.xlu2 %v2652_v25, %s9387_s25 }
 0x40e   : > { %2725 = vrot.lane.b32.xlu0 %v2653_v26, %s9387_s25 }
 0x40f   : > { %2727 = vrot.lane.b32.xlu1 %v2654_v27, %s9387_s25  ;;  %v2529_v28 = vpop.permute.xlu2 %2528 }
 0x410   : > { %2619 = vst.msk [vmem:[#allocation3 + $0x30] sm:$0xff] %vm2612_vm12, %v2529_v28  ;;  %v2384_v30 = vpop.permute.xlu0 %2383  ;;  %v2846_v28 = vld [vmem:[#allocation2 + $0x93] sm:$0xff] }
 0x411   : > { %v2386_v35 = vpop.permute.xlu1 %2385  ;;  %2450 = vst.msk [vmem:[#allocation3 + $0xf0] sm:$0xff] %vm2419_vm11, %v2384_v30  ;;  %v2847_v30 = vld [vmem:[#allocation2 + $0x9b] sm:$0xff] }
 0x412   : > { %2451 = vst.msk [vmem:[#allocation3 + $0xf8] sm:$0xff] %vm2419_vm11, %v2386_v35  ;;  %v2848_v35 = vld [vmem:[#allocation2 + $0xab] sm:$0xff]  ;;  %vm5202_vm11 = vcmask 613376  }
 0x415   : > { %2729 = vrot.lane.b32.xlu2 %v2655_v36, %s9387_s25 }
 0x416   : > { %2731 = vrot.lane.b32.xlu0 %v2656_v37, %s9387_s25 }
 0x417   : > { %2733 = vrot.lane.b32.xlu1 %v2657_v55, %s9387_s25  ;;  %v2535_v1 = vpop.permute.xlu2 %2534 }
 0x418   : > { %2622 = vst.msk [vmem:[#allocation3 + $0x48] sm:$0xff] %vm2612_vm12, %v2535_v1  ;;  %v2519_v10 = vpop.permute.xlu0 %2518  ;;  %v2849_v1 = vld [vmem:[#allocation2 + $0xb3] sm:$0xff] }
 0x419   : > { %v2521_v59 = vpop.permute.xlu1 %2520  ;;  %2614 = vst.msk [vmem:[#allocation3 + $0x8] sm:$0xff] %vm2612_vm12, %v2519_v10  ;;  %v2850_v10 = vld [vmem:[#allocation2 + $0xc3] sm:$0xff] }
 0x41a   : > { %2615 = vst.msk [vmem:[#allocation3 + $0x10] sm:$0xff] %vm2612_vm12, %v2521_v59  ;;  %v2851_v59 = vld [vmem:[#allocation2 + $0xcb] sm:$0xff] }
 0x41d   : > { %2735 = vrot.lane.b32.xlu2 %v2658_v16, %s9387_s25 }
 0x41e   : > { %2737 = vrot.lane.b32.xlu0 %v2659_v17, %s9387_s25 }
 0x41f   : > { %2739 = vrot.lane.b32.xlu1 %v2660_v63, %s9387_s25  ;;  %v2541_v23 = vpop.permute.xlu2 %2540 }
 0x420   : > { %2625 = vst.msk [vmem:[#allocation3 + $0x60] sm:$0xff] %vm2612_vm12, %v2541_v23  ;;  %v2525_v24 = vpop.permute.xlu0 %2524  ;;  %v2852_v23 = vld [vmem:[#allocation2 + $0xdb] sm:$0xff] }
 0x421   : > { %v2527_v9 = vpop.permute.xlu1 %2526  ;;  %2617 = vst.msk [vmem:[#allocation3 + $0x20] sm:$0xff] %vm2612_vm12, %v2525_v24  ;;  %v2853_v24 = vld [vmem:[#allocation2 + $0xe3] sm:$0xff] }
 0x422   : > { %2618 = vst.msk [vmem:[#allocation3 + $0x28] sm:$0xff] %vm2612_vm12, %v2527_v9  ;;  %v2854_v9 = vld [vmem:[#allocation2 + $0xf3] sm:$0xff] }
 0x425   : > { %2741 = vrot.lane.b32.xlu2 %v2661_v32, %s9387_s25 }
 0x426   : > { %2743 = vrot.lane.b32.xlu0 %v2662_v33, %s9387_s25 }
 0x427   : > { %2745 = vrot.lane.b32.xlu1 %v2663_v41, %s9387_s25  ;;  %v2547_v15 = vpop.permute.xlu2 %2546 }
 0x428   : > { %2628 = vst.msk [vmem:[#allocation3 + $0x78] sm:$0xff] %vm2612_vm12, %v2547_v15  ;;  %v2531_v39 = vpop.permute.xlu0 %2530  ;;  %v2855_v15 = vld [vmem:[#allocation2 + $0xfb] sm:$0xff] }
 0x429   : > { %v2533_v40 = vpop.permute.xlu1 %2532  ;;  %2620 = vst.msk [vmem:[#allocation3 + $0x38] sm:$0xff] %vm2612_vm12, %v2531_v39  ;;  %v2856_v39 = vld [vmem:[#allocation2 + $0x10b] sm:$0xff] }
 0x42a   : > { %2621 = vst.msk [vmem:[#allocation3 + $0x40] sm:$0xff] %vm2612_vm12, %v2533_v40  ;;  %v2857_v40 = vld [vmem:[#allocation2 + $0x113] sm:$0xff] }
 0x42d   : > { %2747 = vrot.lane.b32.xlu2 %v2664_v42, %s9387_s25 }
 0x42e   : > { %2749 = vrot.lane.b32.xlu0 %v2665_v22, %s9387_s25 }
 0x42f   : > { %2751 = vrot.lane.b32.xlu1 %v2666_v48, %s9387_s25  ;;  %v2553_v50 = vpop.permute.xlu2 %2552 }
 0x430   : > { %2631 = vst.msk [vmem:[#allocation3 + $0x90] sm:$0xff] %vm2612_vm12, %v2553_v50  ;;  %v2537_v31 = vpop.permute.xlu0 %2536  ;;  %v2858_v50 = vld [vmem:[#allocation2 + $0x123] sm:$0xff] }
 0x431   : > { %v2539_v58 = vpop.permute.xlu1 %2538  ;;  %2623 = vst.msk [vmem:[#allocation3 + $0x50] sm:$0xff] %vm2612_vm12, %v2537_v31  ;;  %v2859_v31 = vld [vmem:[#allocation2 + $0x12b] sm:$0xff] }
 0x432   : > { %2624 = vst.msk [vmem:[#allocation3 + $0x58] sm:$0xff] %vm2612_vm12, %v2539_v58  ;;  %v2860_v58 = vld [vmem:[#allocation2 + $0x13b] sm:$0xff] }
 0x435   : > { %2753 = vrot.lane.b32.xlu2 %v2667_v61, %s9387_s25 }
 0x436   : > { %2755 = vrot.lane.b32.xlu0 %v2668_v38, %s9387_s25 }
 0x437   : > { %2757 = vrot.lane.b32.xlu1 %v2669_v5, %s9387_s25  ;;  %v2559_v7 = vpop.permute.xlu2 %2558 }
 0x438   : > { %2634 = vst.msk [vmem:[#allocation3 + $0xa8] sm:$0xff] %vm2612_vm12, %v2559_v7  ;;  %v2543_v46 = vpop.permute.xlu0 %2542  ;;  %v2861_v7 = vld [vmem:[#allocation2 + $0x143] sm:$0xff] }
 0x439   : > { %v2545_v18 = vpop.permute.xlu1 %2544  ;;  %2626 = vst.msk [vmem:[#allocation3 + $0x68] sm:$0xff] %vm2612_vm12, %v2543_v46  ;;  %v2862_v46 = vld [vmem:[#allocation2 + $0x153] sm:$0xff] }
 0x43a   : > { %2627 = vst.msk [vmem:[#allocation3 + $0x70] sm:$0xff] %vm2612_vm12, %v2545_v18  ;;  %v2863_v18 = vld [vmem:[#allocation2 + $0x15b] sm:$0xff] }
 0x43d   : > { %2759 = vrot.lane.b32.xlu2 %v2670_v20, %s9387_s25 }
 0x43e   : > { %2761 = vrot.lane.b32.xlu0 %v2671_v43, %s9387_s25 }
 0x43f   : > { %2763 = vrot.lane.b32.xlu1 %v2672_v44, %s9387_s25  ;;  %v2565_v45 = vpop.permute.xlu2 %2564 }
 0x440   : > { %2637 = vst.msk [vmem:[#allocation3 + $0xc0] sm:$0xff] %vm2612_vm12, %v2565_v45  ;;  %v2549_v56 = vpop.permute.xlu0 %2548  ;;  %v2864_v45 = vld [vmem:[#allocation2 + $0x16b] sm:$0xff] }
 0x441   : > { %v2551_v29 = vpop.permute.xlu1 %2550  ;;  %2629 = vst.msk [vmem:[#allocation3 + $0x80] sm:$0xff] %vm2612_vm12, %v2549_v56  ;;  %v2865_v56 = vld [vmem:[#allocation2 + $0x173] sm:$0xff] }
 0x442   : > { %2630 = vst.msk [vmem:[#allocation3 + $0x88] sm:$0xff] %vm2612_vm12, %v2551_v29  ;;  %v2866_v29 = vld [vmem:[#allocation2 + $0x183] sm:$0xff] }
 0x445   : > { %2765 = vrot.lane.b32.xlu2 %v2673_v34, %s9387_s25 }
 0x446   : > { %2767 = vrot.lane.b32.xlu0 %v2674_v47, %s9387_s25 }
 0x447   : > { %2769 = vrot.lane.b32.xlu1 %v2675_v49, %s9387_s25  ;;  %v2571_v51 = vpop.permute.xlu2 %2570 }
 0x448   : > { %2640 = vst.msk [vmem:[#allocation3 + $0xd8] sm:$0xff] %vm2612_vm12, %v2571_v51  ;;  %v2555_v52 = vpop.permute.xlu0 %2554  ;;  %v2867_v51 = vld [vmem:[#allocation2 + $0x18b] sm:$0xff] }
 0x449   : > { %v2557_v53 = vpop.permute.xlu1 %2556  ;;  %2632 = vst.msk [vmem:[#allocation3 + $0x98] sm:$0xff] %vm2612_vm12, %v2555_v52  ;;  %v2868_v52 = vld [vmem:[#allocation2 + $0x19b] sm:$0xff] }
 0x44a   : > { %2633 = vst.msk [vmem:[#allocation3 + $0xa0] sm:$0xff] %vm2612_vm12, %v2557_v53  ;;  %v2869_v53 = vld [vmem:[#allocation2 + $0x1a3] sm:$0xff] }
 0x44d   : > { %2771 = vrot.lane.b32.xlu2 %v2676_v54, %s9387_s25  ;;  %s9398_s25 = smov 69  }
 0x44e   : > { %2902 = vrot.lane.b32.xlu0 %v2838_v57, %s9388_s26 }
 0x44f   : > { %2904 = vrot.lane.b32.xlu1 %v2839_v60, %s9388_s26  ;;  %v2577_v62 = vpop.permute.xlu2 %2576 }
 0x450   : > { %2643 = vst.msk [vmem:[#allocation3 + $0xf0] sm:$0xff] %vm2612_vm12, %v2577_v62  ;;  %v2561_v2 = vpop.permute.xlu0 %2560  ;;  %v3031_v62 = vld [vmem:[#allocation2 + $0x34] sm:$0xff] }
 0x451   : > { %v2563_v3 = vpop.permute.xlu1 %2562  ;;  %2635 = vst.msk [vmem:[#allocation3 + $0xb0] sm:$0xff] %vm2612_vm12, %v2561_v2  ;;  %v3032_v2 = vld [vmem:[#allocation2 + $0x3c] sm:$0xff] }
 0x452   : > { %2636 = vst.msk [vmem:[#allocation3 + $0xb8] sm:$0xff] %vm2612_vm12, %v2563_v3  ;;  %v3033_v3 = vld [vmem:[#allocation2 + $0x4c] sm:$0xff] }
 0x455   : > { %2906 = vrot.lane.b32.xlu2 %v2840_v4, %s9388_s26 }
 0x456   : > { %2908 = vrot.lane.b32.xlu0 %v2841_v6, %s9388_s26 }
 0x457   : > { %2910 = vrot.lane.b32.xlu1 %v2842_v8, %s9388_s26  ;;  %v2712_v11 = vpop.permute.xlu2 %2711 }
 0x458   : > { %2807 = vst.msk [vmem:[#allocation3 + $0x8] sm:$0xff] %vm2805_vm13, %v2712_v11  ;;  %v2567_v12 = vpop.permute.xlu0 %2566  ;;  %v3034_v11 = vld [vmem:[#allocation2 + $0x54] sm:$0xff] }
 0x459   : > { %v2569_v13 = vpop.permute.xlu1 %2568  ;;  %2638 = vst.msk [vmem:[#allocation3 + $0xc8] sm:$0xff] %vm2612_vm12, %v2567_v12  ;;  %v3035_v12 = vld [vmem:[#allocation2 + $0x64] sm:$0xff] }
 0x45a   : > { %2639 = vst.msk [vmem:[#allocation3 + $0xd0] sm:$0xff] %vm2612_vm12, %v2569_v13  ;;  %v3036_v13 = vld [vmem:[#allocation2 + $0x6c] sm:$0xff] }
 0x45d   : > { %2912 = vrot.lane.b32.xlu2 %v2843_v14, %s9388_s26 }
 0x45e   : > { %2914 = vrot.lane.b32.xlu0 %v2844_v19, %s9388_s26 }
 0x45f   : > { %2916 = vrot.lane.b32.xlu1 %v2845_v21, %s9388_s26  ;;  %v2718_v25 = vpop.permute.xlu2 %2717 }
 0x460   : > { %2810 = vst.msk [vmem:[#allocation3 + $0x20] sm:$0xff] %vm2805_vm13, %v2718_v25  ;;  %v2573_v26 = vpop.permute.xlu0 %2572  ;;  %v3037_v25 = vld [vmem:[#allocation2 + $0x7c] sm:$0xff] }
 0x461   : > { %v2575_v27 = vpop.permute.xlu1 %2574  ;;  %2641 = vst.msk [vmem:[#allocation3 + $0xe0] sm:$0xff] %vm2612_vm12, %v2573_v26  ;;  %v3038_v26 = vld [vmem:[#allocation2 + $0x84] sm:$0xff] }
 0x462   : > { %2642 = vst.msk [vmem:[#allocation3 + $0xe8] sm:$0xff] %vm2612_vm12, %v2575_v27  ;;  %v3039_v27 = vld [vmem:[#allocation2 + $0x94] sm:$0xff] }
 0x465   : > { %2918 = vrot.lane.b32.xlu2 %v2846_v28, %s9388_s26 }
 0x466   : > { %2920 = vrot.lane.b32.xlu0 %v2847_v30, %s9388_s26 }
 0x467   : > { %2922 = vrot.lane.b32.xlu1 %v2848_v35, %s9388_s26  ;;  %v2724_v36 = vpop.permute.xlu2 %2723 }
 0x468   : > { %2813 = vst.msk [vmem:[#allocation3 + $0x38] sm:$0xff] %vm2805_vm13, %v2724_v36  ;;  %v2579_v37 = vpop.permute.xlu0 %2578  ;;  %v3040_v36 = vld [vmem:[#allocation2 + $0x9c] sm:$0xff] }
 0x469   : > { %v2710_v55 = vpop.permute.xlu1 %2709  ;;  %2644 = vst.msk [vmem:[#allocation3 + $0xf8] sm:$0xff] %vm2612_vm12, %v2579_v37  ;;  %v3041_v37 = vld [vmem:[#allocation2 + $0xac] sm:$0xff]  ;;  %vm6569_vm12 = vcmask 64512  }
 0x46a   : > { %2806 = vst.msk [vmem:[#allocation3] sm:$0xff] %vm2805_vm13, %v2710_v55  ;;  %v3042_v55 = vld [vmem:[#allocation2 + $0xb4] sm:$0xff] }
 0x46b   : > { %6762 = vst.msk [vmem:[#allocation4] sm:$0xff] %vm6569_vm12, %v9375_v0 }
 0x46c   : > { %6765 = vst.msk [vmem:[#allocation4 + $0x10] sm:$0xff] %vm6569_vm12, %v9375_v0 }
 0x46d   : > { %2924 = vrot.lane.b32.xlu2 %v2849_v1, %s9388_s26  ;;  %6767 = vst.msk [vmem:[#allocation4 + $0x20] sm:$0xff] %vm6569_vm12, %v9375_v0 }
 0x46e   : > { %2926 = vrot.lane.b32.xlu0 %v2850_v10, %s9388_s26  ;;  %6769 = vst.msk [vmem:[#allocation4 + $0x30] sm:$0xff] %vm6569_vm12, %v9375_v0 }
 0x46f   : > { %2928 = vrot.lane.b32.xlu1 %v2851_v59, %s9388_s26  ;;  %v2730_v16 = vpop.permute.xlu2 %2729  ;;  %6771 = vst.msk [vmem:[#allocation4 + $0x40] sm:$0xff] %vm6569_vm12, %v9375_v0 }
 0x470   : > { %2816 = vst.msk [vmem:[#allocation3 + $0x50] sm:$0xff] %vm2805_vm13, %v2730_v16  ;;  %v2714_v17 = vpop.permute.xlu0 %2713  ;;  %v3043_v16 = vld [vmem:[#allocation2 + $0xc4] sm:$0xff] }
 0x471   : > { %v2716_v63 = vpop.permute.xlu1 %2715  ;;  %2808 = vst.msk [vmem:[#allocation3 + $0x10] sm:$0xff] %vm2805_vm13, %v2714_v17  ;;  %v3044_v17 = vld [vmem:[#allocation2 + $0xcc] sm:$0xff] }
 0x472   : > { %2809 = vst.msk [vmem:[#allocation3 + $0x18] sm:$0xff] %vm2805_vm13, %v2716_v63  ;;  %v3045_v63 = vld [vmem:[#allocation2 + $0xdc] sm:$0xff] }
 0x473   : > { %6773 = vst.msk [vmem:[#allocation4 + $0x50] sm:$0xff] %vm6569_vm12, %v9375_v0 }
 0x474   : > { %6775 = vst.msk [vmem:[#allocation4 + $0x60] sm:$0xff] %vm6569_vm12, %v9375_v0 }
 0x475   : > { %2930 = vrot.lane.b32.xlu2 %v2852_v23, %s9388_s26  ;;  %6777 = vst.msk [vmem:[#allocation4 + $0x70] sm:$0xff] %vm6569_vm12, %v9375_v0 }
 0x476   : > { %2932 = vrot.lane.b32.xlu0 %v2853_v24, %s9388_s26  ;;  %6779 = vst.msk [vmem:[#allocation4 + $0x80] sm:$0xff] %vm6569_vm12, %v9375_v0 }
 0x477   : > { %2934 = vrot.lane.b32.xlu1 %v2854_v9, %s9388_s26  ;;  %v2736_v32 = vpop.permute.xlu2 %2735  ;;  %6781 = vst.msk [vmem:[#allocation4 + $0x90] sm:$0xff] %vm6569_vm12, %v9375_v0 }
 0x478   : > { %2819 = vst.msk [vmem:[#allocation3 + $0x68] sm:$0xff] %vm2805_vm13, %v2736_v32  ;;  %v2720_v33 = vpop.permute.xlu0 %2719  ;;  %v3046_v32 = vld [vmem:[#allocation2 + $0xe4] sm:$0xff] }
 0x479   : > { %v2722_v41 = vpop.permute.xlu1 %2721  ;;  %2811 = vst.msk [vmem:[#allocation3 + $0x28] sm:$0xff] %vm2805_vm13, %v2720_v33  ;;  %v3047_v33 = vld [vmem:[#allocation2 + $0xf4] sm:$0xff] }
 0x47a   : > { %2812 = vst.msk [vmem:[#allocation3 + $0x30] sm:$0xff] %vm2805_vm13, %v2722_v41  ;;  %v3048_v41 = vld [vmem:[#allocation2 + $0xfc] sm:$0xff] }
 0x47b   : > { %6783 = vst.msk [vmem:[#allocation4 + $0xa0] sm:$0xff] %vm6569_vm12, %v9375_v0 }
 0x47c   : > { %6785 = vst.msk [vmem:[#allocation4 + $0xb0] sm:$0xff] %vm6569_vm12, %v9375_v0 }
 0x47d   : > { %2936 = vrot.lane.b32.xlu2 %v2855_v15, %s9388_s26 }
 0x47e   : > { %2938 = vrot.lane.b32.xlu0 %v2856_v39, %s9388_s26 }
 0x47f   : > { %2940 = vrot.lane.b32.xlu1 %v2857_v40, %s9388_s26  ;;  %v2742_v42 = vpop.permute.xlu2 %2741 }
 0x480   : > { %2822 = vst.msk [vmem:[#allocation3 + $0x80] sm:$0xff] %vm2805_vm13, %v2742_v42  ;;  %v2726_v22 = vpop.permute.xlu0 %2725  ;;  %v3049_v42 = vld [vmem:[#allocation2 + $0x10c] sm:$0xff] }
 0x481   : > { %v2728_v48 = vpop.permute.xlu1 %2727  ;;  %2814 = vst.msk [vmem:[#allocation3 + $0x40] sm:$0xff] %vm2805_vm13, %v2726_v22  ;;  %v3050_v22 = vld [vmem:[#allocation2 + $0x114] sm:$0xff] }
 0x482   : > { %2815 = vst.msk [vmem:[#allocation3 + $0x48] sm:$0xff] %vm2805_vm13, %v2728_v48  ;;  %v3051_v48 = vld [vmem:[#allocation2 + $0x124] sm:$0xff] }
 0x485   : > { %2942 = vrot.lane.b32.xlu2 %v2858_v50, %s9388_s26 }
 0x486   : > { %2944 = vrot.lane.b32.xlu0 %v2859_v31, %s9388_s26 }
 0x487   : > { %2946 = vrot.lane.b32.xlu1 %v2860_v58, %s9388_s26  ;;  %v2748_v61 = vpop.permute.xlu2 %2747 }
 0x488   : > { %2825 = vst.msk [vmem:[#allocation3 + $0x98] sm:$0xff] %vm2805_vm13, %v2748_v61  ;;  %v2732_v38 = vpop.permute.xlu0 %2731  ;;  %v3052_v61 = vld [vmem:[#allocation2 + $0x12c] sm:$0xff] }
 0x489   : > { %v2734_v5 = vpop.permute.xlu1 %2733  ;;  %2817 = vst.msk [vmem:[#allocation3 + $0x58] sm:$0xff] %vm2805_vm13, %v2732_v38  ;;  %v3053_v38 = vld [vmem:[#allocation2 + $0x13c] sm:$0xff] }
 0x48a   : > { %2818 = vst.msk [vmem:[#allocation3 + $0x60] sm:$0xff] %vm2805_vm13, %v2734_v5  ;;  %v3054_v5 = vld [vmem:[#allocation2 + $0x144] sm:$0xff] }
 0x48d   : > { %2948 = vrot.lane.b32.xlu2 %v2861_v7, %s9388_s26 }
 0x48e   : > { %2950 = vrot.lane.b32.xlu0 %v2862_v46, %s9388_s26 }
 0x48f   : > { %2952 = vrot.lane.b32.xlu1 %v2863_v18, %s9388_s26  ;;  %v2754_v20 = vpop.permute.xlu2 %2753 }
 0x490   : > { %2828 = vst.msk [vmem:[#allocation3 + $0xb0] sm:$0xff] %vm2805_vm13, %v2754_v20  ;;  %v2738_v43 = vpop.permute.xlu0 %2737  ;;  %v3055_v20 = vld [vmem:[#allocation2 + $0x154] sm:$0xff] }
 0x491   : > { %v2740_v44 = vpop.permute.xlu1 %2739  ;;  %2820 = vst.msk [vmem:[#allocation3 + $0x70] sm:$0xff] %vm2805_vm13, %v2738_v43  ;;  %v3056_v43 = vld [vmem:[#allocation2 + $0x15c] sm:$0xff] }
 0x492   : > { %2821 = vst.msk [vmem:[#allocation3 + $0x78] sm:$0xff] %vm2805_vm13, %v2740_v44  ;;  %v3057_v44 = vld [vmem:[#allocation2 + $0x16c] sm:$0xff] }
 0x495   : > { %2954 = vrot.lane.b32.xlu2 %v2864_v45, %s9388_s26 }
 0x496   : > { %2956 = vrot.lane.b32.xlu0 %v2865_v56, %s9388_s26 }
 0x497   : > { %2958 = vrot.lane.b32.xlu1 %v2866_v29, %s9388_s26  ;;  %v2760_v34 = vpop.permute.xlu2 %2759 }
 0x498   : > { %2831 = vst.msk [vmem:[#allocation3 + $0xc8] sm:$0xff] %vm2805_vm13, %v2760_v34  ;;  %v2744_v47 = vpop.permute.xlu0 %2743  ;;  %v3058_v34 = vld [vmem:[#allocation2 + $0x174] sm:$0xff] }
 0x499   : > { %v2746_v49 = vpop.permute.xlu1 %2745  ;;  %2823 = vst.msk [vmem:[#allocation3 + $0x88] sm:$0xff] %vm2805_vm13, %v2744_v47  ;;  %v3059_v47 = vld [vmem:[#allocation2 + $0x184] sm:$0xff] }
 0x49a   : > { %2824 = vst.msk [vmem:[#allocation3 + $0x90] sm:$0xff] %vm2805_vm13, %v2746_v49  ;;  %v3060_v49 = vld [vmem:[#allocation2 + $0x18c] sm:$0xff] }
 0x49d   : > { %2960 = vrot.lane.b32.xlu2 %v2867_v51, %s9388_s26 }
 0x49e   : > { %2962 = vrot.lane.b32.xlu0 %v2868_v52, %s9388_s26 }
 0x49f   : > { %2964 = vrot.lane.b32.xlu1 %v2869_v53, %s9388_s26  ;;  %v2766_v54 = vpop.permute.xlu2 %2765  ;;  %s13489_s26 = smov 72  }
 0x4a0   : > { %2834 = vst.msk [vmem:[#allocation3 + $0xe0] sm:$0xff] %vm2805_vm13, %v2766_v54  ;;  %v2750_v57 = vpop.permute.xlu0 %2749  ;;  %v3061_v54 = vld [vmem:[#allocation2 + $0x19c] sm:$0xff] }
 0x4a1   : > { %v2752_v60 = vpop.permute.xlu1 %2751  ;;  %2826 = vst.msk [vmem:[#allocation3 + $0xa0] sm:$0xff] %vm2805_vm13, %v2750_v57  ;;  %v3062_v57 = vld [vmem:[#allocation2 + $0x1a4] sm:$0xff] }
 0x4a2   : > { %2827 = vst.msk [vmem:[#allocation3 + $0xa8] sm:$0xff] %vm2805_vm13, %v2752_v60  ;;  %v3225_v60 = vld [vmem:[#allocation2 + $0x48] sm:$0xff] }
 0x4a5   : > { %3095 = vrot.lane.b32.xlu2 %v3031_v62, %s9389_s27 }
 0x4a6   : > { %3097 = vrot.lane.b32.xlu0 %v3032_v2, %s9389_s27 }
 0x4a7   : > { %3099 = vrot.lane.b32.xlu1 %v3033_v3, %s9389_s27  ;;  %v2772_v4 = vpop.permute.xlu2 %2771 }
 0x4a8   : > { %2837 = vst.msk [vmem:[#allocation3 + $0xf8] sm:$0xff] %vm2805_vm13, %v2772_v4  ;;  %v2756_v6 = vpop.permute.xlu0 %2755  ;;  %v3226_v4 = vld [vmem:[#allocation2 + $0x50] sm:$0xff] }
 0x4a9   : > { %v2758_v8 = vpop.permute.xlu1 %2757  ;;  %2829 = vst.msk [vmem:[#allocation3 + $0xb8] sm:$0xff] %vm2805_vm13, %v2756_v6  ;;  %v3227_v6 = vld [vmem:[#allocation2 + $0x60] sm:$0xff] }
 0x4aa   : > { %2830 = vst.msk [vmem:[#allocation3 + $0xc0] sm:$0xff] %vm2805_vm13, %v2758_v8  ;;  %v3228_v8 = vld [vmem:[#allocation2 + $0x68] sm:$0xff] }
 0x4ad   : > { %3101 = vrot.lane.b32.xlu2 %v3034_v11, %s9389_s27 }
 0x4ae   : > { %3103 = vrot.lane.b32.xlu0 %v3035_v12, %s9389_s27 }
 0x4af   : > { %3105 = vrot.lane.b32.xlu1 %v3036_v13, %s9389_s27  ;;  %v2907_v14 = vpop.permute.xlu2 %2906 }
 0x4b0   : > { %3001 = vst.msk [vmem:[#allocation3 + $0x10] sm:$0xff] %vm2998_vm14, %v2907_v14  ;;  %v2762_v19 = vpop.permute.xlu0 %2761  ;;  %v3229_v14 = vld [vmem:[#allocation2 + $0x78] sm:$0xff] }
 0x4b1   : > { %v2764_v21 = vpop.permute.xlu1 %2763  ;;  %2832 = vst.msk [vmem:[#allocation3 + $0xd0] sm:$0xff] %vm2805_vm13, %v2762_v19  ;;  %v3230_v19 = vld [vmem:[#allocation2 + $0x80] sm:$0xff] }
 0x4b2   : > { %2833 = vst.msk [vmem:[#allocation3 + $0xd8] sm:$0xff] %vm2805_vm13, %v2764_v21  ;;  %v3231_v21 = vld [vmem:[#allocation2 + $0x90] sm:$0xff] }
 0x4b5   : > { %3107 = vrot.lane.b32.xlu2 %v3037_v25, %s9389_s27 }
 0x4b6   : > { %3109 = vrot.lane.b32.xlu0 %v3038_v26, %s9389_s27 }
 0x4b7   : > { %3111 = vrot.lane.b32.xlu1 %v3039_v27, %s9389_s27  ;;  %v2913_v28 = vpop.permute.xlu2 %2912 }
 0x4b8   : > { %3004 = vst.msk [vmem:[#allocation3 + $0x28] sm:$0xff] %vm2998_vm14, %v2913_v28  ;;  %v2768_v30 = vpop.permute.xlu0 %2767  ;;  %v3232_v28 = vld [vmem:[#allocation2 + $0x98] sm:$0xff] }
 0x4b9   : > { %v2770_v35 = vpop.permute.xlu1 %2769  ;;  %2835 = vst.msk [vmem:[#allocation3 + $0xe8] sm:$0xff] %vm2805_vm13, %v2768_v30  ;;  %v3233_v30 = vld [vmem:[#allocation2 + $0xa8] sm:$0xff] }
 0x4ba   : > { %2836 = vst.msk [vmem:[#allocation3 + $0xf0] sm:$0xff] %vm2805_vm13, %v2770_v35  ;;  %v3234_v35 = vld [vmem:[#allocation2 + $0xb0] sm:$0xff]  ;;  %vm5672_vm13 = vcmask 58368  }
 0x4bd   : > { %3113 = vrot.lane.b32.xlu2 %v3040_v36, %s9389_s27 }
 0x4be   : > { %3115 = vrot.lane.b32.xlu0 %v3041_v37, %s9389_s27 }
 0x4bf   : > { %3117 = vrot.lane.b32.xlu1 %v3042_v55, %s9389_s27  ;;  %v2919_v1 = vpop.permute.xlu2 %2918 }
 0x4c0   : > { %3007 = vst.msk [vmem:[#allocation3 + $0x40] sm:$0xff] %vm2998_vm14, %v2919_v1  ;;  %v2903_v10 = vpop.permute.xlu0 %2902  ;;  %v3235_v1 = vld [vmem:[#allocation2 + $0xc0] sm:$0xff] }
 0x4c1   : > { %v2905_v59 = vpop.permute.xlu1 %2904  ;;  %2999 = vst.msk [vmem:[#allocation3] sm:$0xff] %vm2998_vm14, %v2903_v10  ;;  %v3236_v10 = vld [vmem:[#allocation2 + $0xc8] sm:$0xff] }
 0x4c2   : > { %3000 = vst.msk [vmem:[#allocation3 + $0x8] sm:$0xff] %vm2998_vm14, %v2905_v59  ;;  %v3237_v59 = vld [vmem:[#allocation2 + $0xd8] sm:$0xff] }
 0x4c5   : > { %3119 = vrot.lane.b32.xlu2 %v3043_v16, %s9389_s27 }
 0x4c6   : > { %3121 = vrot.lane.b32.xlu0 %v3044_v17, %s9389_s27 }
 0x4c7   : > { %3123 = vrot.lane.b32.xlu1 %v3045_v63, %s9389_s27  ;;  %v2925_v23 = vpop.permute.xlu2 %2924 }
 0x4c8   : > { %3010 = vst.msk [vmem:[#allocation3 + $0x58] sm:$0xff] %vm2998_vm14, %v2925_v23  ;;  %v2909_v24 = vpop.permute.xlu0 %2908  ;;  %v3238_v23 = vld [vmem:[#allocation2 + $0xe0] sm:$0xff] }
 0x4c9   : > { %v2911_v9 = vpop.permute.xlu1 %2910  ;;  %3002 = vst.msk [vmem:[#allocation3 + $0x18] sm:$0xff] %vm2998_vm14, %v2909_v24  ;;  %v3239_v24 = vld [vmem:[#allocation2 + $0xf0] sm:$0xff] }
 0x4ca   : > { %3003 = vst.msk [vmem:[#allocation3 + $0x20] sm:$0xff] %vm2998_vm14, %v2911_v9  ;;  %v3240_v9 = vld [vmem:[#allocation2 + $0xf8] sm:$0xff] }
 0x4cd   : > { %3125 = vrot.lane.b32.xlu2 %v3046_v32, %s9389_s27 }
 0x4ce   : > { %3127 = vrot.lane.b32.xlu0 %v3047_v33, %s9389_s27 }
 0x4cf   : > { %3129 = vrot.lane.b32.xlu1 %v3048_v41, %s9389_s27  ;;  %v2931_v15 = vpop.permute.xlu2 %2930 }
 0x4d0   : > { %3013 = vst.msk [vmem:[#allocation3 + $0x70] sm:$0xff] %vm2998_vm14, %v2931_v15  ;;  %v2915_v39 = vpop.permute.xlu0 %2914  ;;  %v3241_v15 = vld [vmem:[#allocation2 + $0x108] sm:$0xff] }
 0x4d1   : > { %v2917_v40 = vpop.permute.xlu1 %2916  ;;  %3005 = vst.msk [vmem:[#allocation3 + $0x30] sm:$0xff] %vm2998_vm14, %v2915_v39  ;;  %v3242_v39 = vld [vmem:[#allocation2 + $0x110] sm:$0xff] }
 0x4d2   : > { %3006 = vst.msk [vmem:[#allocation3 + $0x38] sm:$0xff] %vm2998_vm14, %v2917_v40  ;;  %v3243_v40 = vld [vmem:[#allocation2 + $0x120] sm:$0xff] }
 0x4d5   : > { %3131 = vrot.lane.b32.xlu2 %v3049_v42, %s9389_s27 }
 0x4d6   : > { %3133 = vrot.lane.b32.xlu0 %v3050_v22, %s9389_s27 }
 0x4d7   : > { %3135 = vrot.lane.b32.xlu1 %v3051_v48, %s9389_s27  ;;  %v2937_v50 = vpop.permute.xlu2 %2936 }
 0x4d8   : > { %3016 = vst.msk [vmem:[#allocation3 + $0x88] sm:$0xff] %vm2998_vm14, %v2937_v50  ;;  %v2921_v31 = vpop.permute.xlu0 %2920  ;;  %v3244_v50 = vld [vmem:[#allocation2 + $0x128] sm:$0xff] }
 0x4d9   : > { %v2923_v58 = vpop.permute.xlu1 %2922  ;;  %3008 = vst.msk [vmem:[#allocation3 + $0x48] sm:$0xff] %vm2998_vm14, %v2921_v31  ;;  %v3245_v31 = vld [vmem:[#allocation2 + $0x138] sm:$0xff] }
 0x4da   : > { %3009 = vst.msk [vmem:[#allocation3 + $0x50] sm:$0xff] %vm2998_vm14, %v2923_v58  ;;  %v3246_v58 = vld [vmem:[#allocation2 + $0x140] sm:$0xff] }
 0x4dd   : > { %3137 = vrot.lane.b32.xlu2 %v3052_v61, %s9389_s27 }
 0x4de   : > { %3139 = vrot.lane.b32.xlu0 %v3053_v38, %s9389_s27 }
 0x4df   : > { %3141 = vrot.lane.b32.xlu1 %v3054_v5, %s9389_s27  ;;  %v2943_v7 = vpop.permute.xlu2 %2942 }
 0x4e0   : > { %3019 = vst.msk [vmem:[#allocation3 + $0xa0] sm:$0xff] %vm2998_vm14, %v2943_v7  ;;  %v2927_v46 = vpop.permute.xlu0 %2926  ;;  %v3247_v7 = vld [vmem:[#allocation2 + $0x150] sm:$0xff] }
 0x4e1   : > { %v2929_v18 = vpop.permute.xlu1 %2928  ;;  %3011 = vst.msk [vmem:[#allocation3 + $0x60] sm:$0xff] %vm2998_vm14, %v2927_v46  ;;  %v3248_v46 = vld [vmem:[#allocation2 + $0x158] sm:$0xff] }
 0x4e2   : > { %3012 = vst.msk [vmem:[#allocation3 + $0x68] sm:$0xff] %vm2998_vm14, %v2929_v18  ;;  %v3249_v18 = vld [vmem:[#allocation2 + $0x168] sm:$0xff] }
 0x4e5   : > { %3143 = vrot.lane.b32.xlu2 %v3055_v20, %s9389_s27 }
 0x4e6   : > { %3145 = vrot.lane.b32.xlu0 %v3056_v43, %s9389_s27 }
 0x4e7   : > { %3147 = vrot.lane.b32.xlu1 %v3057_v44, %s9389_s27  ;;  %v2949_v45 = vpop.permute.xlu2 %2948 }
 0x4e8   : > { %3022 = vst.msk [vmem:[#allocation3 + $0xb8] sm:$0xff] %vm2998_vm14, %v2949_v45  ;;  %v2933_v56 = vpop.permute.xlu0 %2932  ;;  %v3250_v45 = vld [vmem:[#allocation2 + $0x170] sm:$0xff] }
 0x4e9   : > { %v2935_v29 = vpop.permute.xlu1 %2934  ;;  %3014 = vst.msk [vmem:[#allocation3 + $0x78] sm:$0xff] %vm2998_vm14, %v2933_v56  ;;  %v3251_v56 = vld [vmem:[#allocation2 + $0x180] sm:$0xff] }
 0x4ea   : > { %3015 = vst.msk [vmem:[#allocation3 + $0x80] sm:$0xff] %vm2998_vm14, %v2935_v29  ;;  %v3252_v29 = vld [vmem:[#allocation2 + $0x188] sm:$0xff] }
 0x4ed   : > { %3149 = vrot.lane.b32.xlu2 %v3058_v34, %s9389_s27 }
 0x4ee   : > { %3151 = vrot.lane.b32.xlu0 %v3059_v47, %s9389_s27 }
 0x4ef   : > { %3153 = vrot.lane.b32.xlu1 %v3060_v49, %s9389_s27  ;;  %v2955_v51 = vpop.permute.xlu2 %2954 }
 0x4f0   : > { %3025 = vst.msk [vmem:[#allocation3 + $0xd0] sm:$0xff] %vm2998_vm14, %v2955_v51  ;;  %v2939_v52 = vpop.permute.xlu0 %2938  ;;  %v3253_v51 = vld [vmem:[#allocation2 + $0x198] sm:$0xff] }
 0x4f1   : > { %v2941_v53 = vpop.permute.xlu1 %2940  ;;  %3017 = vst.msk [vmem:[#allocation3 + $0x90] sm:$0xff] %vm2998_vm14, %v2939_v52  ;;  %v3254_v52 = vld [vmem:[#allocation2 + $0x1a0] sm:$0xff] }
 0x4f2   : > { %3018 = vst.msk [vmem:[#allocation3 + $0x98] sm:$0xff] %vm2998_vm14, %v2941_v53  ;;  %v3255_v53 = vld [vmem:[#allocation2 + $0x1b0] sm:$0xff] }
 0x4f5   : > { %3155 = vrot.lane.b32.xlu2 %v3061_v54, %s9389_s27 }
 0x4f6   : > { %3157 = vrot.lane.b32.xlu0 %v3062_v57, %s9389_s27  ;;  %s13510_s27 = smov 48  }
 0x4f7   : > { %3289 = vrot.lane.b32.xlu1 %v3225_v60, %s9390_s28  ;;  %v2961_v62 = vpop.permute.xlu2 %2960 }
 0x4f8   : > { %3028 = vst.msk [vmem:[#allocation3 + $0xe8] sm:$0xff] %vm2998_vm14, %v2961_v62  ;;  %v2945_v2 = vpop.permute.xlu0 %2944  ;;  %v3256_v62 = vld [vmem:[#allocation2 + $0x1b8] sm:$0xff] }
 0x4f9   : > { %v2947_v3 = vpop.permute.xlu1 %2946  ;;  %3020 = vst.msk [vmem:[#allocation3 + $0xa8] sm:$0xff] %vm2998_vm14, %v2945_v2  ;;  %v3418_v2 = vld [vmem:[#allocation2 + $0x49] sm:$0xff] }
 0x4fa   : > { %3021 = vst.msk [vmem:[#allocation3 + $0xb0] sm:$0xff] %vm2998_vm14, %v2947_v3  ;;  %v3419_v3 = vld [vmem:[#allocation2 + $0x51] sm:$0xff] }
 0x4fd   : > { %3291 = vrot.lane.b32.xlu2 %v3226_v4, %s9390_s28 }
 0x4fe   : > { %3293 = vrot.lane.b32.xlu0 %v3227_v6, %s9390_s28 }
 0x4ff   : > { %3295 = vrot.lane.b32.xlu1 %v3228_v8, %s9390_s28  ;;  %v3096_v11 = vpop.permute.xlu2 %3095 }
 0x500   : > { %3192 = vst.msk [vmem:[#allocation3] sm:$0xff] %vm3191_vm15, %v3096_v11  ;;  %v2951_v12 = vpop.permute.xlu0 %2950  ;;  %v3420_v11 = vld [vmem:[#allocation2 + $0x61] sm:$0xff] }
 0x501   : > { %v2953_v13 = vpop.permute.xlu1 %2952  ;;  %3023 = vst.msk [vmem:[#allocation3 + $0xc0] sm:$0xff] %vm2998_vm14, %v2951_v12  ;;  %v3421_v12 = vld [vmem:[#allocation2 + $0x69] sm:$0xff] }
 0x502   : > { %3024 = vst.msk [vmem:[#allocation3 + $0xc8] sm:$0xff] %vm2998_vm14, %v2953_v13  ;;  %v3422_v13 = vld [vmem:[#allocation2 + $0x79] sm:$0xff] }
 0x505   : > { %3297 = vrot.lane.b32.xlu2 %v3229_v14, %s9390_s28 }
 0x506   : > { %3299 = vrot.lane.b32.xlu0 %v3230_v19, %s9390_s28 }
 0x507   : > { %3301 = vrot.lane.b32.xlu1 %v3231_v21, %s9390_s28  ;;  %v3102_v25 = vpop.permute.xlu2 %3101 }
 0x508   : > { %3195 = vst.msk [vmem:[#allocation3 + $0x18] sm:$0xff] %vm3191_vm15, %v3102_v25  ;;  %v2957_v26 = vpop.permute.xlu0 %2956  ;;  %v3423_v25 = vld [vmem:[#allocation2 + $0x81] sm:$0xff] }
 0x509   : > { %v2959_v27 = vpop.permute.xlu1 %2958  ;;  %3026 = vst.msk [vmem:[#allocation3 + $0xd8] sm:$0xff] %vm2998_vm14, %v2957_v26  ;;  %v3424_v26 = vld [vmem:[#allocation2 + $0x91] sm:$0xff] }
 0x50a   : > { %3027 = vst.msk [vmem:[#allocation3 + $0xe0] sm:$0xff] %vm2998_vm14, %v2959_v27  ;;  %v3425_v27 = vld [vmem:[#allocation2 + $0x99] sm:$0xff] }
 0x50d   : > { %3303 = vrot.lane.b32.xlu2 %v3232_v28, %s9390_s28 }
 0x50e   : > { %3305 = vrot.lane.b32.xlu0 %v3233_v30, %s9390_s28 }
 0x50f   : > { %3307 = vrot.lane.b32.xlu1 %v3234_v35, %s9390_s28  ;;  %v3108_v36 = vpop.permute.xlu2 %3107 }
 0x510   : > { %3198 = vst.msk [vmem:[#allocation3 + $0x30] sm:$0xff] %vm3191_vm15, %v3108_v36  ;;  %v2963_v37 = vpop.permute.xlu0 %2962  ;;  %v3426_v36 = vld [vmem:[#allocation2 + $0xa9] sm:$0xff] }
 0x511   : > { %v2965_v55 = vpop.permute.xlu1 %2964  ;;  %3029 = vst.msk [vmem:[#allocation3 + $0xf0] sm:$0xff] %vm2998_vm14, %v2963_v37  ;;  %v3427_v37 = vld [vmem:[#allocation2 + $0xb1] sm:$0xff] }
 0x512   : > { %3030 = vst.msk [vmem:[#allocation3 + $0xf8] sm:$0xff] %vm2998_vm14, %v2965_v55  ;;  %v3428_v55 = vld [vmem:[#allocation2 + $0xc1] sm:$0xff]  ;;  %vm6763_vm14 = vcmask 60416  }
 0x513   : > { %6768 = vst.msk [vmem:[#allocation4 + $0x28] sm:$0xf] %vm6763_vm14, %v9375_v0 }
 0x514   : > { %6764 = vst.msk [vmem:[#allocation4 + $0x8] sm:$0xf] %vm6763_vm14, %v9375_v0 }
 0x515   : > { %3309 = vrot.lane.b32.xlu2 %v3235_v1, %s9390_s28  ;;  %6766 = vst.msk [vmem:[#allocation4 + $0x18] sm:$0xf] %vm6763_vm14, %v9375_v0 }
 0x516   : > { %3311 = vrot.lane.b32.xlu0 %v3236_v10, %s9390_s28  ;;  %6770 = vst.msk [vmem:[#allocation4 + $0x38] sm:$0xf] %vm6763_vm14, %v9375_v0 }
 0x517   : > { %3313 = vrot.lane.b32.xlu1 %v3237_v59, %s9390_s28  ;;  %v3114_v16 = vpop.permute.xlu2 %3113  ;;  %6772 = vst.msk [vmem:[#allocation4 + $0x48] sm:$0xf] %vm6763_vm14, %v9375_v0 }
 0x518   : > { %3201 = vst.msk [vmem:[#allocation3 + $0x48] sm:$0xff] %vm3191_vm15, %v3114_v16  ;;  %v3098_v17 = vpop.permute.xlu0 %3097  ;;  %v3429_v16 = vld [vmem:[#allocation2 + $0xc9] sm:$0xff] }
 0x519   : > { %v3100_v63 = vpop.permute.xlu1 %3099  ;;  %3193 = vst.msk [vmem:[#allocation3 + $0x8] sm:$0xff] %vm3191_vm15, %v3098_v17  ;;  %v3430_v17 = vld [vmem:[#allocation2 + $0xd9] sm:$0xff] }
 0x51a   : > { %3194 = vst.msk [vmem:[#allocation3 + $0x10] sm:$0xff] %vm3191_vm15, %v3100_v63  ;;  %v3431_v63 = vld [vmem:[#allocation2 + $0xe1] sm:$0xff] }
 0x51b   : > { %6774 = vst.msk [vmem:[#allocation4 + $0x58] sm:$0xf] %vm6763_vm14, %v9375_v0 }
 0x51c   : > { %6776 = vst.msk [vmem:[#allocation4 + $0x68] sm:$0xf] %vm6763_vm14, %v9375_v0 }
 0x51d   : > { %3315 = vrot.lane.b32.xlu2 %v3238_v23, %s9390_s28  ;;  %6778 = vst.msk [vmem:[#allocation4 + $0x78] sm:$0xf] %vm6763_vm14, %v9375_v0 }
 0x51e   : > { %3317 = vrot.lane.b32.xlu0 %v3239_v24, %s9390_s28  ;;  %6780 = vst.msk [vmem:[#allocation4 + $0x88] sm:$0xf] %vm6763_vm14, %v9375_v0 }
 0x51f   : > { %3319 = vrot.lane.b32.xlu1 %v3240_v9, %s9390_s28  ;;  %v3120_v32 = vpop.permute.xlu2 %3119  ;;  %6782 = vst.msk [vmem:[#allocation4 + $0x98] sm:$0xf] %vm6763_vm14, %v9375_v0 }
 0x520   : > { %3204 = vst.msk [vmem:[#allocation3 + $0x60] sm:$0xff] %vm3191_vm15, %v3120_v32  ;;  %v3104_v33 = vpop.permute.xlu0 %3103  ;;  %v3432_v32 = vld [vmem:[#allocation2 + $0xf1] sm:$0xff] }
 0x521   : > { %v3106_v41 = vpop.permute.xlu1 %3105  ;;  %3196 = vst.msk [vmem:[#allocation3 + $0x20] sm:$0xff] %vm3191_vm15, %v3104_v33  ;;  %v3433_v33 = vld [vmem:[#allocation2 + $0xf9] sm:$0xff] }
 0x522   : > { %3197 = vst.msk [vmem:[#allocation3 + $0x28] sm:$0xff] %vm3191_vm15, %v3106_v41  ;;  %v3434_v41 = vld [vmem:[#allocation2 + $0x109] sm:$0xff] }
 0x523   : > { %6784 = vst.msk [vmem:[#allocation4 + $0xa8] sm:$0xf] %vm6763_vm14, %v9375_v0 }
 0x524   : > { %6786 = vst.msk [vmem:[#allocation4 + $0xb8] sm:$0xf] %vm6763_vm14, %v9375_v0  ;;  %v4785_v0 = vld [vmem:[#allocation2 + $0x113] sm:$0xff]  ;;  %vm6987_vm14 = vcmask 130112  }
 0x525   : > { %3321 = vrot.lane.b32.xlu2 %v3241_v15, %s9390_s28 }
 0x526   : > { %3323 = vrot.lane.b32.xlu0 %v3242_v39, %s9390_s28 }
 0x527   : > { %3325 = vrot.lane.b32.xlu1 %v3243_v40, %s9390_s28  ;;  %v3126_v42 = vpop.permute.xlu2 %3125 }
 0x528   : > { %3207 = vst.msk [vmem:[#allocation3 + $0x78] sm:$0xff] %vm3191_vm15, %v3126_v42  ;;  %v3110_v22 = vpop.permute.xlu0 %3109  ;;  %v3435_v42 = vld [vmem:[#allocation2 + $0x111] sm:$0xff] }
 0x529   : > { %v3112_v48 = vpop.permute.xlu1 %3111  ;;  %3199 = vst.msk [vmem:[#allocation3 + $0x38] sm:$0xff] %vm3191_vm15, %v3110_v22  ;;  %v3436_v22 = vld [vmem:[#allocation2 + $0x121] sm:$0xff] }
 0x52a   : > { %3200 = vst.msk [vmem:[#allocation3 + $0x40] sm:$0xff] %vm3191_vm15, %v3112_v48  ;;  %v3437_v48 = vld [vmem:[#allocation2 + $0x129] sm:$0xff] }
 0x52d   : > { %3327 = vrot.lane.b32.xlu2 %v3244_v50, %s9390_s28 }
 0x52e   : > { %3329 = vrot.lane.b32.xlu0 %v3245_v31, %s9390_s28 }
 0x52f   : > { %3331 = vrot.lane.b32.xlu1 %v3246_v58, %s9390_s28  ;;  %v3132_v61 = vpop.permute.xlu2 %3131 }
 0x530   : > { %3210 = vst.msk [vmem:[#allocation3 + $0x90] sm:$0xff] %vm3191_vm15, %v3132_v61  ;;  %v3116_v38 = vpop.permute.xlu0 %3115  ;;  %v3438_v61 = vld [vmem:[#allocation2 + $0x139] sm:$0xff] }
 0x531   : > { %v3118_v5 = vpop.permute.xlu1 %3117  ;;  %3202 = vst.msk [vmem:[#allocation3 + $0x50] sm:$0xff] %vm3191_vm15, %v3116_v38  ;;  %v3439_v38 = vld [vmem:[#allocation2 + $0x141] sm:$0xff] }
 0x532   : > { %3203 = vst.msk [vmem:[#allocation3 + $0x58] sm:$0xff] %vm3191_vm15, %v3118_v5  ;;  %v3440_v5 = vld [vmem:[#allocation2 + $0x151] sm:$0xff] }
 0x535   : > { %3333 = vrot.lane.b32.xlu2 %v3247_v7, %s9390_s28 }
 0x536   : > { %3335 = vrot.lane.b32.xlu0 %v3248_v46, %s9390_s28 }
 0x537   : > { %3337 = vrot.lane.b32.xlu1 %v3249_v18, %s9390_s28  ;;  %v3138_v20 = vpop.permute.xlu2 %3137 }
 0x538   : > { %3213 = vst.msk [vmem:[#allocation3 + $0xa8] sm:$0xff] %vm3191_vm15, %v3138_v20  ;;  %v3122_v43 = vpop.permute.xlu0 %3121  ;;  %v3441_v20 = vld [vmem:[#allocation2 + $0x159] sm:$0xff] }
 0x539   : > { %v3124_v44 = vpop.permute.xlu1 %3123  ;;  %3205 = vst.msk [vmem:[#allocation3 + $0x68] sm:$0xff] %vm3191_vm15, %v3122_v43  ;;  %v3442_v43 = vld [vmem:[#allocation2 + $0x169] sm:$0xff] }
 0x53a   : > { %3206 = vst.msk [vmem:[#allocation3 + $0x70] sm:$0xff] %vm3191_vm15, %v3124_v44  ;;  %v3443_v44 = vld [vmem:[#allocation2 + $0x171] sm:$0xff] }
 0x53d   : > { %3339 = vrot.lane.b32.xlu2 %v3250_v45, %s9390_s28 }
 0x53e   : > { %3341 = vrot.lane.b32.xlu0 %v3251_v56, %s9390_s28 }
 0x53f   : > { %3343 = vrot.lane.b32.xlu1 %v3252_v29, %s9390_s28  ;;  %v3144_v34 = vpop.permute.xlu2 %3143 }
 0x540   : > { %3216 = vst.msk [vmem:[#allocation3 + $0xc0] sm:$0xff] %vm3191_vm15, %v3144_v34  ;;  %v3128_v47 = vpop.permute.xlu0 %3127  ;;  %v3444_v34 = vld [vmem:[#allocation2 + $0x181] sm:$0xff] }
 0x541   : > { %v3130_v49 = vpop.permute.xlu1 %3129  ;;  %3208 = vst.msk [vmem:[#allocation3 + $0x80] sm:$0xff] %vm3191_vm15, %v3128_v47  ;;  %v3445_v47 = vld [vmem:[#allocation2 + $0x189] sm:$0xff] }
 0x542   : > { %3209 = vst.msk [vmem:[#allocation3 + $0x88] sm:$0xff] %vm3191_vm15, %v3130_v49  ;;  %v3446_v49 = vld [vmem:[#allocation2 + $0x199] sm:$0xff] }
 0x545   : > { %3345 = vrot.lane.b32.xlu2 %v3253_v51, %s9390_s28 }
 0x546   : > { %3347 = vrot.lane.b32.xlu0 %v3254_v52, %s9390_s28 }
 0x547   : > { %3349 = vrot.lane.b32.xlu1 %v3255_v53, %s9390_s28  ;;  %v3150_v54 = vpop.permute.xlu2 %3149 }
 0x548   : > { %3219 = vst.msk [vmem:[#allocation3 + $0xd8] sm:$0xff] %vm3191_vm15, %v3150_v54  ;;  %v3134_v57 = vpop.permute.xlu0 %3133  ;;  %v3447_v54 = vld [vmem:[#allocation2 + $0x1a1] sm:$0xff] }
 0x549   : > { %v3136_v60 = vpop.permute.xlu1 %3135  ;;  %3211 = vst.msk [vmem:[#allocation3 + $0x98] sm:$0xff] %vm3191_vm15, %v3134_v57  ;;  %v3448_v57 = vld [vmem:[#allocation2 + $0x1b1] sm:$0xff] }
 0x54a   : > { %3212 = vst.msk [vmem:[#allocation3 + $0xa0] sm:$0xff] %vm3191_vm15, %v3136_v60  ;;  %v3449_v60 = vld [vmem:[#allocation2 + $0x1b9] sm:$0xff] }
 0x54d   : > { %3351 = vrot.lane.b32.xlu2 %v3256_v62, %s9390_s28  ;;  %s13479_s28 = smov 56  }
 0x54e   : > { %3482 = vrot.lane.b32.xlu0 %v3418_v2, %s13460_s29 }
 0x54f   : > { %3484 = vrot.lane.b32.xlu1 %v3419_v3, %s13460_s29  ;;  %v3156_v4 = vpop.permute.xlu2 %3155 }
 0x550   : > { %3222 = vst.msk [vmem:[#allocation3 + $0xf0] sm:$0xff] %vm3191_vm15, %v3156_v4  ;;  %v3140_v6 = vpop.permute.xlu0 %3139  ;;  %v3611_v4 = vld [vmem:[#allocation2 + $0x4a] sm:$0xff] }
 0x551   : > { %v3142_v8 = vpop.permute.xlu1 %3141  ;;  %3214 = vst.msk [vmem:[#allocation3 + $0xb0] sm:$0xff] %vm3191_vm15, %v3140_v6  ;;  %v3612_v6 = vld [vmem:[#allocation2 + $0x52] sm:$0xff] }
 0x552   : > { %3215 = vst.msk [vmem:[#allocation3 + $0xb8] sm:$0xff] %vm3191_vm15, %v3142_v8  ;;  %v10838_v8 = vld [vmem:[#allocation2 + $0x62] sm:$0xff] }
 0x555   : > { %3486 = vrot.lane.b32.xlu2 %v3420_v11, %s13460_s29 }
 0x556   : > { %3488 = vrot.lane.b32.xlu0 %v3421_v12, %s13460_s29 }
 0x557   : > { %3490 = vrot.lane.b32.xlu1 %v3422_v13, %s13460_s29  ;;  %v3292_v14 = vpop.permute.xlu2 %3291 }
 0x558   : > { %3387 = vst.msk [vmem:[#allocation3 + $0x8] sm:$0xff] %vm3385_vm0, %v3292_v14  ;;  %v3146_v19 = vpop.permute.xlu0 %3145  ;;  %v10847_v14 = vld [vmem:[#allocation2 + $0x6a] sm:$0xff] }
 0x559   : > { %v3148_v21 = vpop.permute.xlu1 %3147  ;;  %3217 = vst.msk [vmem:[#allocation3 + $0xc8] sm:$0xff] %vm3191_vm15, %v3146_v19  ;;  %v10849_v19 = vld [vmem:[#allocation2 + $0x7a] sm:$0xff] }
 0x55a   : > { %3218 = vst.msk [vmem:[#allocation3 + $0xd0] sm:$0xff] %vm3191_vm15, %v3148_v21  ;;  %v3616_v21 = vld [vmem:[#allocation2 + $0x82] sm:$0xff] }
 0x55d   : > { %3492 = vrot.lane.b32.xlu2 %v3423_v25, %s13460_s29 }
 0x55e   : > { %3494 = vrot.lane.b32.xlu0 %v3424_v26, %s13460_s29 }
 0x55f   : > { %3496 = vrot.lane.b32.xlu1 %v3425_v27, %s13460_s29  ;;  %v3298_v28 = vpop.permute.xlu2 %3297 }
 0x560   : > { %3390 = vst.msk [vmem:[#allocation3 + $0x20] sm:$0xff] %vm3385_vm0, %v3298_v28  ;;  %v3152_v30 = vpop.permute.xlu0 %3151  ;;  %v3617_v28 = vld [vmem:[#allocation2 + $0x92] sm:$0xff] }
 0x561   : > { %v3154_v35 = vpop.permute.xlu1 %3153  ;;  %3220 = vst.msk [vmem:[#allocation3 + $0xe0] sm:$0xff] %vm3191_vm15, %v3152_v30  ;;  %v3618_v30 = vld [vmem:[#allocation2 + $0x9a] sm:$0xff] }
 0x562   : > { %3221 = vst.msk [vmem:[#allocation3 + $0xe8] sm:$0xff] %vm3191_vm15, %v3154_v35  ;;  %v3619_v35 = vld [vmem:[#allocation2 + $0xaa] sm:$0xff] }
 0x565   : > { %3498 = vrot.lane.b32.xlu2 %v3426_v36, %s13460_s29 }
 0x566   : > { %3500 = vrot.lane.b32.xlu0 %v3427_v37, %s13460_s29 }
 0x567   : > { %3502 = vrot.lane.b32.xlu1 %v3428_v55, %s13460_s29  ;;  %v3304_v1 = vpop.permute.xlu2 %3303 }
 0x568   : > { %3393 = vst.msk [vmem:[#allocation3 + $0x38] sm:$0xff] %vm3385_vm0, %v3304_v1  ;;  %v3158_v10 = vpop.permute.xlu0 %3157  ;;  %v3620_v1 = vld [vmem:[#allocation2 + $0xb2] sm:$0xff] }
 0x569   : > { %v3290_v59 = vpop.permute.xlu1 %3289  ;;  %3223 = vst.msk [vmem:[#allocation3 + $0xf8] sm:$0xff] %vm3191_vm15, %v3158_v10  ;;  %v3621_v10 = vld [vmem:[#allocation2 + $0xc2] sm:$0xff]  ;;  %vm6851_vm15 = vcmask 1041409  }
 0x56a   : > { %3386 = vst.msk [vmem:[#allocation3] sm:$0xff] %vm3385_vm0, %v3290_v59  ;;  %v3622_v59 = vld [vmem:[#allocation2 + $0xca] sm:$0xff] }
 0x56d   : > { %3504 = vrot.lane.b32.xlu2 %v3429_v16, %s13460_s29 }
 0x56e   : > { %3506 = vrot.lane.b32.xlu0 %v3430_v17, %s13460_s29 }
 0x56f   : > { %3508 = vrot.lane.b32.xlu1 %v3431_v63, %s13460_s29  ;;  %v3310_v23 = vpop.permute.xlu2 %3309 }
 0x570   : > { %3396 = vst.msk [vmem:[#allocation3 + $0x50] sm:$0xff] %vm3385_vm0, %v3310_v23  ;;  %v3294_v24 = vpop.permute.xlu0 %3293  ;;  %v3623_v23 = vld [vmem:[#allocation2 + $0xda] sm:$0xff] }
 0x571   : > { %v3296_v9 = vpop.permute.xlu1 %3295  ;;  %3388 = vst.msk [vmem:[#allocation3 + $0x10] sm:$0xff] %vm3385_vm0, %v3294_v24  ;;  %v3624_v24 = vld [vmem:[#allocation2 + $0xe2] sm:$0xff] }
 0x572   : > { %3389 = vst.msk [vmem:[#allocation3 + $0x18] sm:$0xff] %vm3385_vm0, %v3296_v9  ;;  %v3625_v9 = vld [vmem:[#allocation2 + $0xf2] sm:$0xff] }
 0x575   : > { %3510 = vrot.lane.b32.xlu2 %v3432_v32, %s13460_s29 }
 0x576   : > { %3512 = vrot.lane.b32.xlu0 %v3433_v33, %s13460_s29 }
 0x577   : > { %3514 = vrot.lane.b32.xlu1 %v3434_v41, %s13460_s29  ;;  %v3316_v15 = vpop.permute.xlu2 %3315 }
 0x578   : > { %3399 = vst.msk [vmem:[#allocation3 + $0x68] sm:$0xff] %vm3385_vm0, %v3316_v15  ;;  %v3300_v39 = vpop.permute.xlu0 %3299  ;;  %v3626_v15 = vld [vmem:[#allocation2 + $0xfa] sm:$0xff] }
 0x579   : > { %v3302_v40 = vpop.permute.xlu1 %3301  ;;  %3391 = vst.msk [vmem:[#allocation3 + $0x28] sm:$0xff] %vm3385_vm0, %v3300_v39  ;;  %v3627_v39 = vld [vmem:[#allocation2 + $0x10a] sm:$0xff] }
 0x57a   : > { %3392 = vst.msk [vmem:[#allocation3 + $0x30] sm:$0xff] %vm3385_vm0, %v3302_v40  ;;  %v3628_v40 = vld [vmem:[#allocation2 + $0x112] sm:$0xff] }
 0x57d   : > { %3516 = vrot.lane.b32.xlu2 %v3435_v42, %s13460_s29 }
 0x57e   : > { %3518 = vrot.lane.b32.xlu0 %v3436_v22, %s13460_s29 }
 0x57f   : > { %3520 = vrot.lane.b32.xlu1 %v3437_v48, %s13460_s29  ;;  %v3322_v50 = vpop.permute.xlu2 %3321 }
 0x580   : > { %3402 = vst.msk [vmem:[#allocation3 + $0x80] sm:$0xff] %vm3385_vm0, %v3322_v50  ;;  %v3306_v31 = vpop.permute.xlu0 %3305  ;;  %v10883_v50 = vld [vmem:[#allocation2 + $0x122] sm:$0xff] }
 0x581   : > { %v3308_v58 = vpop.permute.xlu1 %3307  ;;  %3394 = vst.msk [vmem:[#allocation3 + $0x40] sm:$0xff] %vm3385_vm0, %v3306_v31  ;;  %v3630_v31 = vld [vmem:[#allocation2 + $0x12a] sm:$0xff] }
 0x582   : > { %3395 = vst.msk [vmem:[#allocation3 + $0x48] sm:$0xff] %vm3385_vm0, %v3308_v58  ;;  %v3631_v58 = vld [vmem:[#allocation2 + $0x13a] sm:$0xff] }
 0x585   : > { %3522 = vrot.lane.b32.xlu2 %v3438_v61, %s13460_s29 }
 0x586   : > { %3524 = vrot.lane.b32.xlu0 %v3439_v38, %s13460_s29 }
 0x587   : > { %3526 = vrot.lane.b32.xlu1 %v3440_v5, %s13460_s29  ;;  %v3328_v7 = vpop.permute.xlu2 %3327 }
 0x588   : > { %3405 = vst.msk [vmem:[#allocation3 + $0x98] sm:$0xff] %vm3385_vm0, %v3328_v7  ;;  %v3312_v46 = vpop.permute.xlu0 %3311  ;;  %v3632_v7 = vld [vmem:[#allocation2 + $0x142] sm:$0xff] }
 0x589   : > { %v3314_v18 = vpop.permute.xlu1 %3313  ;;  %3397 = vst.msk [vmem:[#allocation3 + $0x58] sm:$0xff] %vm3385_vm0, %v3312_v46  ;;  %v3633_v46 = vld [vmem:[#allocation2 + $0x152] sm:$0xff] }
 0x58a   : > { %3398 = vst.msk [vmem:[#allocation3 + $0x60] sm:$0xff] %vm3385_vm0, %v3314_v18  ;;  %v3634_v18 = vld [vmem:[#allocation2 + $0x15a] sm:$0xff] }
 0x58d   : > { %3528 = vrot.lane.b32.xlu2 %v3441_v20, %s13460_s29 }
 0x58e   : > { %3530 = vrot.lane.b32.xlu0 %v3442_v43, %s13460_s29 }
 0x58f   : > { %3532 = vrot.lane.b32.xlu1 %v3443_v44, %s13460_s29  ;;  %v3334_v45 = vpop.permute.xlu2 %3333 }
 0x590   : > { %3408 = vst.msk [vmem:[#allocation3 + $0xb0] sm:$0xff] %vm3385_vm0, %v3334_v45  ;;  %v3318_v56 = vpop.permute.xlu0 %3317  ;;  %v3635_v45 = vld [vmem:[#allocation2 + $0x16a] sm:$0xff] }
 0x591   : > { %v3320_v29 = vpop.permute.xlu1 %3319  ;;  %3400 = vst.msk [vmem:[#allocation3 + $0x70] sm:$0xff] %vm3385_vm0, %v3318_v56  ;;  %v3636_v56 = vld [vmem:[#allocation2 + $0x172] sm:$0xff] }
 0x592   : > { %3401 = vst.msk [vmem:[#allocation3 + $0x78] sm:$0xff] %vm3385_vm0, %v3320_v29  ;;  %v3637_v29 = vld [vmem:[#allocation2 + $0x182] sm:$0xff] }
 0x595   : > { %3534 = vrot.lane.b32.xlu2 %v3444_v34, %s13460_s29 }
 0x596   : > { %3536 = vrot.lane.b32.xlu0 %v3445_v47, %s13460_s29 }
 0x597   : > { %3538 = vrot.lane.b32.xlu1 %v3446_v49, %s13460_s29  ;;  %v3340_v51 = vpop.permute.xlu2 %3339 }
 0x598   : > { %3411 = vst.msk [vmem:[#allocation3 + $0xc8] sm:$0xff] %vm3385_vm0, %v3340_v51  ;;  %v3324_v52 = vpop.permute.xlu0 %3323  ;;  %v3638_v51 = vld [vmem:[#allocation2 + $0x18a] sm:$0xff] }
 0x599   : > { %v3326_v53 = vpop.permute.xlu1 %3325  ;;  %3403 = vst.msk [vmem:[#allocation3 + $0x88] sm:$0xff] %vm3385_vm0, %v3324_v52  ;;  %v3639_v52 = vld [vmem:[#allocation2 + $0x19a] sm:$0xff] }
 0x59a   : > { %3404 = vst.msk [vmem:[#allocation3 + $0x90] sm:$0xff] %vm3385_vm0, %v3326_v53  ;;  %v3640_v53 = vld [vmem:[#allocation2 + $0x1a2] sm:$0xff] }
 0x59d   : > { %3540 = vrot.lane.b32.xlu2 %v3447_v54, %s13460_s29 }
 0x59e   : > { %3542 = vrot.lane.b32.xlu0 %v3448_v57, %s13460_s29 }
 0x59f   : > { %3544 = vrot.lane.b32.xlu1 %v3449_v60, %s13460_s29  ;;  %v3346_v62 = vpop.permute.xlu2 %3345  ;;  %s13493_s29 = smov 80  }
 0x5a0   : > { %3414 = vst.msk [vmem:[#allocation3 + $0xe0] sm:$0xff] %vm3385_vm0, %v3346_v62  ;;  %v3330_v2 = vpop.permute.xlu0 %3329  ;;  %v3641_v62 = vld [vmem:[#allocation2 + $0x1b2] sm:$0xff] }
 0x5a1   : > { %v3332_v3 = vpop.permute.xlu1 %3331  ;;  %3406 = vst.msk [vmem:[#allocation3 + $0xa0] sm:$0xff] %vm3385_vm0, %v3330_v2  ;;  %v3642_v2 = vld [vmem:[#allocation2 + $0x1ba] sm:$0xff] }
 0x5a2   : > { %3407 = vst.msk [vmem:[#allocation3 + $0xa8] sm:$0xff] %vm3385_vm0, %v3332_v3  ;;  %v3804_v3 = vld [vmem:[#allocation2 + $0x4b] sm:$0xff] }
 0x5a5   : > { %3675 = vrot.lane.b32.xlu2 %v3611_v4, %s9392_s14 }
 0x5a6   : > { %3677 = vrot.lane.b32.xlu0 %v3612_v6, %s9392_s14 }
 0x5a7   : > { %3679 = vrot.lane.b32.xlu1 %v10838_v8, %s9392_s14  ;;  %v3352_v11 = vpop.permute.xlu2 %3351 }
 0x5a8   : > { %3417 = vst.msk [vmem:[#allocation3 + $0xf8] sm:$0xff] %vm3385_vm0, %v3352_v11  ;;  %v3336_v12 = vpop.permute.xlu0 %3335 }
 0x5a9   : > { %v3338_v13 = vpop.permute.xlu1 %3337  ;;  %3409 = vst.msk [vmem:[#allocation3 + $0xb8] sm:$0xff] %vm3385_vm0, %v3336_v12  ;;  %v3805_v12 = vld [vmem:[#allocation2 + $0x53] sm:$0xff] }
 0x5aa   : > { %3410 = vst.msk [vmem:[#allocation3 + $0xc0] sm:$0xff] %vm3385_vm0, %v3338_v13  ;;  %v10916_v13 = vld [vmem:[#allocation2 + $0x63] sm:$0xff] }
 0x5ad   : > { %3681 = vrot.lane.b32.xlu2 %v10847_v14, %s9392_s14 }
 0x5ae   : > { %3683 = vrot.lane.b32.xlu0 %v10849_v19, %s9392_s14 }
 0x5af   : > { %3685 = vrot.lane.b32.xlu1 %v3616_v21, %s9392_s14  ;;  %v3487_v25 = vpop.permute.xlu2 %3486  ;;  %v10918_v21 = vld [vmem:[#allocation2 + $0x6b] sm:$0xff] }
 0x5b0   : > { %3581 = vst.msk [vmem:[#allocation3 + $0x10] sm:$0xff] %vm3578_vm1, %v3487_v25  ;;  %v3342_v26 = vpop.permute.xlu0 %3341 }
 0x5b1   : > { %v3344_v27 = vpop.permute.xlu1 %3343  ;;  %3412 = vst.msk [vmem:[#allocation3 + $0xd0] sm:$0xff] %vm3385_vm0, %v3342_v26 }
 0x5b2   : > { %3413 = vst.msk [vmem:[#allocation3 + $0xd8] sm:$0xff] %vm3385_vm0, %v3344_v27 }
 0x5b5   : > { %3687 = vrot.lane.b32.xlu2 %v3617_v28, %s9392_s14  ;;  %v10928_v28 = vld [vmem:[#allocation2 + $0x7b] sm:$0xff] }
 0x5b6   : > { %3689 = vrot.lane.b32.xlu0 %v3618_v30, %s9392_s14  ;;  %v10930_v30 = vld [vmem:[#allocation2 + $0x83] sm:$0xff] }
 0x5b7   : > { %3691 = vrot.lane.b32.xlu1 %v3619_v35, %s9392_s14  ;;  %v3493_v36 = vpop.permute.xlu2 %3492  ;;  %v10932_v35 = vld [vmem:[#allocation2 + $0x93] sm:$0xff] }
 0x5b8   : > { %3584 = vst.msk [vmem:[#allocation3 + $0x28] sm:$0xff] %vm3578_vm1, %v3493_v36  ;;  %v3348_v37 = vpop.permute.xlu0 %3347 }
 0x5b9   : > { %v3350_v55 = vpop.permute.xlu1 %3349  ;;  %3415 = vst.msk [vmem:[#allocation3 + $0xe8] sm:$0xff] %vm3385_vm0, %v3348_v37 }
 0x5ba   : > { %3416 = vst.msk [vmem:[#allocation3 + $0xf0] sm:$0xff] %vm3385_vm0, %v3350_v55  ;;  %vm6853_vm0 = vcmask 1042434  }
 0x5bd   : > { %3693 = vrot.lane.b32.xlu2 %v3620_v1, %s9392_s14  ;;  %v10943_v1 = vld [vmem:[#allocation2 + $0x9b] sm:$0xff] }
 0x5be   : > { %3695 = vrot.lane.b32.xlu0 %v3621_v10, %s9392_s14  ;;  %v10945_v10 = vld [vmem:[#allocation2 + $0xab] sm:$0xff] }
 0x5bf   : > { %3697 = vrot.lane.b32.xlu1 %v3622_v59, %s9392_s14  ;;  %v3499_v16 = vpop.permute.xlu2 %3498  ;;  %v10947_v59 = vld [vmem:[#allocation2 + $0xb3] sm:$0xff] }
 0x5c0   : > { %3587 = vst.msk [vmem:[#allocation3 + $0x40] sm:$0xff] %vm3578_vm1, %v3499_v16  ;;  %v3483_v17 = vpop.permute.xlu0 %3482 }
 0x5c1   : > { %v3485_v63 = vpop.permute.xlu1 %3484  ;;  %3579 = vst.msk [vmem:[#allocation3] sm:$0xff] %vm3578_vm1, %v3483_v17 }
 0x5c2   : > { %3580 = vst.msk [vmem:[#allocation3 + $0x8] sm:$0xff] %vm3578_vm1, %v3485_v63 }
 0x5c5   : > { %3699 = vrot.lane.b32.xlu2 %v3623_v23, %s9392_s14  ;;  %v3814_v23 = vld [vmem:[#allocation2 + $0xc3] sm:$0xff] }
 0x5c6   : > { %3701 = vrot.lane.b32.xlu0 %v3624_v24, %s9392_s14  ;;  %v3815_v24 = vld [vmem:[#allocation2 + $0xcb] sm:$0xff] }
 0x5c7   : > { %3703 = vrot.lane.b32.xlu1 %v3625_v9, %s9392_s14  ;;  %v3505_v32 = vpop.permute.xlu2 %3504  ;;  %v3816_v9 = vld [vmem:[#allocation2 + $0xdb] sm:$0xff] }
 0x5c8   : > { %3590 = vst.msk [vmem:[#allocation3 + $0x58] sm:$0xff] %vm3578_vm1, %v3505_v32  ;;  %v3489_v33 = vpop.permute.xlu0 %3488 }
 0x5c9   : > { %v3491_v41 = vpop.permute.xlu1 %3490  ;;  %3582 = vst.msk [vmem:[#allocation3 + $0x18] sm:$0xff] %vm3578_vm1, %v3489_v33 }
 0x5ca   : > { %3583 = vst.msk [vmem:[#allocation3 + $0x20] sm:$0xff] %vm3578_vm1, %v3491_v41 }
 0x5cd   : > { %3705 = vrot.lane.b32.xlu2 %v3626_v15, %s9392_s14  ;;  %v3817_v15 = vld [vmem:[#allocation2 + $0xe3] sm:$0xff] }
 0x5ce   : > { %3707 = vrot.lane.b32.xlu0 %v3627_v39, %s9392_s14  ;;  %v3818_v39 = vld [vmem:[#allocation2 + $0xf3] sm:$0xff] }
 0x5cf   : > { %3709 = vrot.lane.b32.xlu1 %v3628_v40, %s9392_s14  ;;  %v3511_v42 = vpop.permute.xlu2 %3510  ;;  %v3819_v40 = vld [vmem:[#allocation2 + $0xfb] sm:$0xff] }
 0x5d0   : > { %3593 = vst.msk [vmem:[#allocation3 + $0x70] sm:$0xff] %vm3578_vm1, %v3511_v42  ;;  %v3495_v22 = vpop.permute.xlu0 %3494 }
 0x5d1   : > { %v3497_v48 = vpop.permute.xlu1 %3496  ;;  %3585 = vst.msk [vmem:[#allocation3 + $0x30] sm:$0xff] %vm3578_vm1, %v3495_v22 }
 0x5d2   : > { %3586 = vst.msk [vmem:[#allocation3 + $0x38] sm:$0xff] %vm3578_vm1, %v3497_v48 }
 0x5d5   : > { %3711 = vrot.lane.b32.xlu2 %v10883_v50, %s9392_s14 }
 0x5d6   : > { %3713 = vrot.lane.b32.xlu0 %v3630_v31, %s9392_s14  ;;  %v3820_v31 = vld [vmem:[#allocation2 + $0x10b] sm:$0xff] }
 0x5d7   : > { %3715 = vrot.lane.b32.xlu1 %v3631_v58, %s9392_s14  ;;  %v3517_v61 = vpop.permute.xlu2 %3516  ;;  %v3821_v58 = vld [vmem:[#allocation2 + $0x113] sm:$0xff] }
 0x5d8   : > { %3596 = vst.msk [vmem:[#allocation3 + $0x88] sm:$0xff] %vm3578_vm1, %v3517_v61  ;;  %v3501_v38 = vpop.permute.xlu0 %3500  ;;  %v10970_v61 = vld [vmem:[#allocation2 + $0x123] sm:$0xff] }
 0x5d9   : > { %v3503_v5 = vpop.permute.xlu1 %3502  ;;  %3588 = vst.msk [vmem:[#allocation3 + $0x48] sm:$0xff] %vm3578_vm1, %v3501_v38 }
 0x5da   : > { %3589 = vst.msk [vmem:[#allocation3 + $0x50] sm:$0xff] %vm3578_vm1, %v3503_v5 }
 0x5dd   : > { %3717 = vrot.lane.b32.xlu2 %v3632_v7, %s9392_s14 }
 0x5de   : > { %3719 = vrot.lane.b32.xlu0 %v3633_v46, %s9392_s14  ;;  %v10979_v46 = vld [vmem:[#allocation2 + $0x12b] sm:$0xff] }
 0x5df   : > { %3721 = vrot.lane.b32.xlu1 %v3634_v18, %s9392_s14  ;;  %v3523_v20 = vpop.permute.xlu2 %3522  ;;  %v10981_v18 = vld [vmem:[#allocation2 + $0x13b] sm:$0xff] }
 0x5e0   : > { %3599 = vst.msk [vmem:[#allocation3 + $0xa0] sm:$0xff] %vm3578_vm1, %v3523_v20  ;;  %v3507_v43 = vpop.permute.xlu0 %3506  ;;  %v10983_v20 = vld [vmem:[#allocation2 + $0x143] sm:$0xff] }
 0x5e1   : > { %v3509_v44 = vpop.permute.xlu1 %3508  ;;  %3591 = vst.msk [vmem:[#allocation3 + $0x60] sm:$0xff] %vm3578_vm1, %v3507_v43 }
 0x5e2   : > { %3592 = vst.msk [vmem:[#allocation3 + $0x68] sm:$0xff] %vm3578_vm1, %v3509_v44 }
 0x5e5   : > { %3723 = vrot.lane.b32.xlu2 %v3635_v45, %s9392_s14 }
 0x5e6   : > { %3725 = vrot.lane.b32.xlu0 %v3636_v56, %s9392_s14  ;;  %v10994_v56 = vld [vmem:[#allocation2 + $0x153] sm:$0xff] }
 0x5e7   : > { %3727 = vrot.lane.b32.xlu1 %v3637_v29, %s9392_s14  ;;  %v3529_v34 = vpop.permute.xlu2 %3528  ;;  %v3827_v29 = vld [vmem:[#allocation2 + $0x15b] sm:$0xff] }
 0x5e8   : > { %3602 = vst.msk [vmem:[#allocation3 + $0xb8] sm:$0xff] %vm3578_vm1, %v3529_v34  ;;  %v3513_v47 = vpop.permute.xlu0 %3512  ;;  %v3828_v34 = vld [vmem:[#allocation2 + $0x16b] sm:$0xff] }
 0x5e9   : > { %v3515_v49 = vpop.permute.xlu1 %3514  ;;  %3594 = vst.msk [vmem:[#allocation3 + $0x78] sm:$0xff] %vm3578_vm1, %v3513_v47 }
 0x5ea   : > { %3595 = vst.msk [vmem:[#allocation3 + $0x80] sm:$0xff] %vm3578_vm1, %v3515_v49 }
 0x5ed   : > { %3729 = vrot.lane.b32.xlu2 %v3638_v51, %s9392_s14 }
 0x5ee   : > { %3731 = vrot.lane.b32.xlu0 %v3639_v52, %s9392_s14  ;;  %v3829_v52 = vld [vmem:[#allocation2 + $0x173] sm:$0xff] }
 0x5ef   : > { %3733 = vrot.lane.b32.xlu1 %v3640_v53, %s9392_s14  ;;  %v3535_v54 = vpop.permute.xlu2 %3534  ;;  %v3830_v53 = vld [vmem:[#allocation2 + $0x183] sm:$0xff] }
 0x5f0   : > { %3605 = vst.msk [vmem:[#allocation3 + $0xd0] sm:$0xff] %vm3578_vm1, %v3535_v54  ;;  %v3519_v57 = vpop.permute.xlu0 %3518  ;;  %v3831_v54 = vld [vmem:[#allocation2 + $0x18b] sm:$0xff] }
 0x5f1   : > { %v3521_v60 = vpop.permute.xlu1 %3520  ;;  %3597 = vst.msk [vmem:[#allocation3 + $0x90] sm:$0xff] %vm3578_vm1, %v3519_v57 }
 0x5f2   : > { %3598 = vst.msk [vmem:[#allocation3 + $0x98] sm:$0xff] %vm3578_vm1, %v3521_v60 }
 0x5f5   : > { %3735 = vrot.lane.b32.xlu2 %v3641_v62, %s9392_s14 }
 0x5f6   : > { %3737 = vrot.lane.b32.xlu0 %v3642_v2, %s9392_s14  ;;  %v3832_v2 = vld [vmem:[#allocation2 + $0x19b] sm:$0xff]  ;;  %s13481_s14 = smov 64  }
 0x5f7   : > { %3868 = vrot.lane.b32.xlu1 %v3804_v3, %s9393_s16  ;;  %v3541_v4 = vpop.permute.xlu2 %3540  ;;  %v3833_v3 = vld [vmem:[#allocation2 + $0x1a3] sm:$0xff] }
 0x5f8   : > { %3608 = vst.msk [vmem:[#allocation3 + $0xe8] sm:$0xff] %vm3578_vm1, %v3541_v4  ;;  %v3525_v6 = vpop.permute.xlu0 %3524  ;;  %v3834_v4 = vld [vmem:[#allocation2 + $0x1b3] sm:$0xff] }
 0x5f9   : > { %v3527_v11 = vpop.permute.xlu1 %3526  ;;  %3600 = vst.msk [vmem:[#allocation3 + $0xa8] sm:$0xff] %vm3578_vm1, %v3525_v6 }
 0x5fa   : > { %3601 = vst.msk [vmem:[#allocation3 + $0xb0] sm:$0xff] %vm3578_vm1, %v3527_v11 }
 0x5fd   : > { %3870 = vrot.lane.b32.xlu2 %v3805_v12, %s9393_s16 }
 0x5fe   : > { %3872 = vrot.lane.b32.xlu0 %v10916_v13, %s9393_s16 }
 0x5ff   : > { %3874 = vrot.lane.b32.xlu1 %v10918_v21, %s9393_s16  ;;  %v3676_v25 = vpop.permute.xlu2 %3675 }
 0x600   : > { %3772 = vst.msk [vmem:[#allocation3] sm:$0xff] %vm3771_vm2, %v3676_v25  ;;  %v3531_v26 = vpop.permute.xlu0 %3530  ;;  %v3835_v25 = vld [vmem:[#allocation2 + $0x1bb] sm:$0xff] }
 0x601   : > { %v3533_v27 = vpop.permute.xlu1 %3532  ;;  %3603 = vst.msk [vmem:[#allocation3 + $0xc0] sm:$0xff] %vm3578_vm1, %v3531_v26  ;;  %v3997_v26 = vld [vmem:[#allocation2 + $0x4c] sm:$0xff] }
 0x602   : > { %3604 = vst.msk [vmem:[#allocation3 + $0xc8] sm:$0xff] %vm3578_vm1, %v3533_v27  ;;  %v3998_v27 = vld [vmem:[#allocation2 + $0x54] sm:$0xff] }
 0x605   : > { %3876 = vrot.lane.b32.xlu2 %v10928_v28, %s9393_s16 }
 0x606   : > { %3878 = vrot.lane.b32.xlu0 %v10930_v30, %s9393_s16 }
 0x607   : > { %3880 = vrot.lane.b32.xlu1 %v10932_v35, %s9393_s16  ;;  %v3682_v36 = vpop.permute.xlu2 %3681 }
 0x608   : > { %3775 = vst.msk [vmem:[#allocation3 + $0x18] sm:$0xff] %vm3771_vm2, %v3682_v36  ;;  %v3537_v37 = vpop.permute.xlu0 %3536 }
 0x609   : > { %v3539_v55 = vpop.permute.xlu1 %3538  ;;  %3606 = vst.msk [vmem:[#allocation3 + $0xd8] sm:$0xff] %vm3578_vm1, %v3537_v37 }
 0x60a   : > { %3607 = vst.msk [vmem:[#allocation3 + $0xe0] sm:$0xff] %vm3578_vm1, %v3539_v55 }
 0x60d   : > { %3882 = vrot.lane.b32.xlu2 %v10943_v1, %s9393_s16 }
 0x60e   : > { %3884 = vrot.lane.b32.xlu0 %v10945_v10, %s9393_s16 }
 0x60f   : > { %3886 = vrot.lane.b32.xlu1 %v10947_v59, %s9393_s16  ;;  %v3688_v16 = vpop.permute.xlu2 %3687 }
 0x610   : > { %3778 = vst.msk [vmem:[#allocation3 + $0x30] sm:$0xff] %vm3771_vm2, %v3688_v16  ;;  %v3543_v17 = vpop.permute.xlu0 %3542  ;;  %v11021_v16 = vld [vmem:[#allocation2 + $0x64] sm:$0xff] }
 0x611   : > { %v3545_v63 = vpop.permute.xlu1 %3544  ;;  %3609 = vst.msk [vmem:[#allocation3 + $0xf0] sm:$0xff] %vm3578_vm1, %v3543_v17  ;;  %v11023_v17 = vld [vmem:[#allocation2 + $0x6c] sm:$0xff] }
 0x612   : > { %3610 = vst.msk [vmem:[#allocation3 + $0xf8] sm:$0xff] %vm3578_vm1, %v3545_v63  ;;  %v11025_v63 = vld [vmem:[#allocation2 + $0x7c] sm:$0xff]  ;;  %vm13501_vm1 = vcmask 1043459  }
 0x615   : > { %3888 = vrot.lane.b32.xlu2 %v3814_v23, %s9393_s16 }
 0x616   : > { %3890 = vrot.lane.b32.xlu0 %v3815_v24, %s9393_s16 }
 0x617   : > { %3892 = vrot.lane.b32.xlu1 %v3816_v9, %s9393_s16  ;;  %v3694_v32 = vpop.permute.xlu2 %3693 }
 0x618   : > { %3781 = vst.msk [vmem:[#allocation3 + $0x48] sm:$0xff] %vm3771_vm2, %v3694_v32  ;;  %v3678_v33 = vpop.permute.xlu0 %3677  ;;  %v11036_v32 = vld [vmem:[#allocation2 + $0x84] sm:$0xff] }
 0x619   : > { %v3680_v41 = vpop.permute.xlu1 %3679  ;;  %3773 = vst.msk [vmem:[#allocation3 + $0x8] sm:$0xff] %vm3771_vm2, %v3678_v33  ;;  %v11038_v33 = vld [vmem:[#allocation2 + $0x94] sm:$0xff] }
 0x61a   : > { %3774 = vst.msk [vmem:[#allocation3 + $0x10] sm:$0xff] %vm3771_vm2, %v3680_v41  ;;  %v11040_v41 = vld [vmem:[#allocation2 + $0x9c] sm:$0xff] }
 0x61d   : > { %3894 = vrot.lane.b32.xlu2 %v3817_v15, %s9393_s16 }
 0x61e   : > { %3896 = vrot.lane.b32.xlu0 %v3818_v39, %s9393_s16 }
 0x61f   : > { %3898 = vrot.lane.b32.xlu1 %v3819_v40, %s9393_s16  ;;  %v3700_v42 = vpop.permute.xlu2 %3699 }
 0x620   : > { %3784 = vst.msk [vmem:[#allocation3 + $0x60] sm:$0xff] %vm3771_vm2, %v3700_v42  ;;  %v3684_v22 = vpop.permute.xlu0 %3683  ;;  %v11051_v42 = vld [vmem:[#allocation2 + $0xac] sm:$0xff] }
 0x621   : > { %v3686_v48 = vpop.permute.xlu1 %3685  ;;  %3776 = vst.msk [vmem:[#allocation3 + $0x20] sm:$0xff] %vm3771_vm2, %v3684_v22  ;;  %v11053_v22 = vld [vmem:[#allocation2 + $0xb4] sm:$0xff] }
 0x622   : > { %3777 = vst.msk [vmem:[#allocation3 + $0x28] sm:$0xff] %vm3771_vm2, %v3686_v48  ;;  %v11055_v48 = vld [vmem:[#allocation2 + $0xc4] sm:$0xff] }
 0x625   : > { %3900 = vrot.lane.b32.xlu2 %v3820_v31, %s9393_s16 }
 0x626   : > { %3902 = vrot.lane.b32.xlu0 %v3821_v58, %s9393_s16 }
 0x627   : > { %3904 = vrot.lane.b32.xlu1 %v10970_v61, %s9393_s16  ;;  %v3706_v38 = vpop.permute.xlu2 %3705 }
 0x628   : > { %3787 = vst.msk [vmem:[#allocation3 + $0x78] sm:$0xff] %vm3771_vm2, %v3706_v38  ;;  %v3690_v5 = vpop.permute.xlu0 %3689 }
 0x629   : > { %v3692_v7 = vpop.permute.xlu1 %3691  ;;  %3779 = vst.msk [vmem:[#allocation3 + $0x38] sm:$0xff] %vm3771_vm2, %v3690_v5  ;;  %v11066_v5 = vld [vmem:[#allocation2 + $0xcc] sm:$0xff] }
 0x62a   : > { %3780 = vst.msk [vmem:[#allocation3 + $0x40] sm:$0xff] %vm3771_vm2, %v3692_v7  ;;  %v11068_v7 = vld [vmem:[#allocation2 + $0xdc] sm:$0xff] }
 0x62d   : > { %3906 = vrot.lane.b32.xlu2 %v10979_v46, %s9393_s16 }
 0x62e   : > { %3908 = vrot.lane.b32.xlu0 %v10981_v18, %s9393_s16 }
 0x62f   : > { %3910 = vrot.lane.b32.xlu1 %v10983_v20, %s9393_s16  ;;  %v3712_v43 = vpop.permute.xlu2 %3711 }
 0x630   : > { %3790 = vst.msk [vmem:[#allocation3 + $0x90] sm:$0xff] %vm3771_vm2, %v3712_v43  ;;  %v3696_v44 = vpop.permute.xlu0 %3695  ;;  %v4010_v43 = vld [vmem:[#allocation2 + $0xe4] sm:$0xff] }
 0x631   : > { %v3698_v45 = vpop.permute.xlu1 %3697  ;;  %3782 = vst.msk [vmem:[#allocation3 + $0x50] sm:$0xff] %vm3771_vm2, %v3696_v44 }
 0x632   : > { %3783 = vst.msk [vmem:[#allocation3 + $0x58] sm:$0xff] %vm3771_vm2, %v3698_v45 }
 0x635   : > { %3912 = vrot.lane.b32.xlu2 %v10994_v56, %s9393_s16 }
 0x636   : > { %3914 = vrot.lane.b32.xlu0 %v3827_v29, %s9393_s16 }
 0x637   : > { %3916 = vrot.lane.b32.xlu1 %v3828_v34, %s9393_s16  ;;  %v3718_v47 = vpop.permute.xlu2 %3717  ;;  %v4011_v34 = vld [vmem:[#allocation2 + $0xf4] sm:$0xff] }
 0x638   : > { %3793 = vst.msk [vmem:[#allocation3 + $0xa8] sm:$0xff] %vm3771_vm2, %v3718_v47  ;;  %v3702_v49 = vpop.permute.xlu0 %3701  ;;  %v4012_v47 = vld [vmem:[#allocation2 + $0xfc] sm:$0xff] }
 0x639   : > { %v3704_v51 = vpop.permute.xlu1 %3703  ;;  %3785 = vst.msk [vmem:[#allocation3 + $0x68] sm:$0xff] %vm3771_vm2, %v3702_v49  ;;  %v4013_v49 = vld [vmem:[#allocation2 + $0x10c] sm:$0xff] }
 0x63a   : > { %3786 = vst.msk [vmem:[#allocation3 + $0x70] sm:$0xff] %vm3771_vm2, %v3704_v51 }
 0x63d   : > { %3918 = vrot.lane.b32.xlu2 %v3829_v52, %s9393_s16 }
 0x63e   : > { %3920 = vrot.lane.b32.xlu0 %v3830_v53, %s9393_s16 }
 0x63f   : > { %3922 = vrot.lane.b32.xlu1 %v3831_v54, %s9393_s16  ;;  %v3724_v57 = vpop.permute.xlu2 %3723  ;;  %v4014_v54 = vld [vmem:[#allocation2 + $0x114] sm:$0xff] }
 0x640   : > { %3796 = vst.msk [vmem:[#allocation3 + $0xc0] sm:$0xff] %vm3771_vm2, %v3724_v57  ;;  %v3708_v60 = vpop.permute.xlu0 %3707  ;;  %v11084_v57 = vld [vmem:[#allocation2 + $0x124] sm:$0xff] }
 0x641   : > { %v3710_v62 = vpop.permute.xlu1 %3709  ;;  %3788 = vst.msk [vmem:[#allocation3 + $0x80] sm:$0xff] %vm3771_vm2, %v3708_v60  ;;  %v11086_v60 = vld [vmem:[#allocation2 + $0x12c] sm:$0xff] }
 0x642   : > { %3789 = vst.msk [vmem:[#allocation3 + $0x88] sm:$0xff] %vm3771_vm2, %v3710_v62 }
 0x645   : > { %3924 = vrot.lane.b32.xlu2 %v3832_v2, %s9393_s16 }
 0x646   : > { %3926 = vrot.lane.b32.xlu0 %v3833_v3, %s9393_s16 }
 0x647   : > { %3928 = vrot.lane.b32.xlu1 %v3834_v4, %s9393_s16  ;;  %v3730_v6 = vpop.permute.xlu2 %3729  ;;  %v11096_v4 = vld [vmem:[#allocation2 + $0x13c] sm:$0xff] }
 0x648   : > { %3799 = vst.msk [vmem:[#allocation3 + $0xd8] sm:$0xff] %vm3771_vm2, %v3730_v6  ;;  %v3714_v11 = vpop.permute.xlu0 %3713  ;;  %v11098_v6 = vld [vmem:[#allocation2 + $0x144] sm:$0xff] }
 0x649   : > { %v3716_v12 = vpop.permute.xlu1 %3715  ;;  %3791 = vst.msk [vmem:[#allocation3 + $0x98] sm:$0xff] %vm3771_vm2, %v3714_v11  ;;  %v11100_v11 = vld [vmem:[#allocation2 + $0x154] sm:$0xff] }
 0x64a   : > { %3792 = vst.msk [vmem:[#allocation3 + $0xa0] sm:$0xff] %vm3771_vm2, %v3716_v12 }
 0x64d   : > { %3930 = vrot.lane.b32.xlu2 %v3835_v25, %s9393_s16  ;;  %s13495_s16 = smov 88  }
 0x64e   : > { %4061 = vrot.lane.b32.xlu0 %v3997_v26, %s9394_s17 }
 0x64f   : > { %4063 = vrot.lane.b32.xlu1 %v3998_v27, %s9394_s17  ;;  %v3736_v36 = vpop.permute.xlu2 %3735  ;;  %v11111_v27 = vld [vmem:[#allocation2 + $0x15c] sm:$0xff] }
 0x650   : > { %3802 = vst.msk [vmem:[#allocation3 + $0xf0] sm:$0xff] %vm3771_vm2, %v3736_v36  ;;  %v3720_v37 = vpop.permute.xlu0 %3719  ;;  %v11113_v36 = vld [vmem:[#allocation2 + $0x16c] sm:$0xff] }
 0x651   : > { %v3722_v55 = vpop.permute.xlu1 %3721  ;;  %3794 = vst.msk [vmem:[#allocation3 + $0xb0] sm:$0xff] %vm3771_vm2, %v3720_v37  ;;  %v11115_v37 = vld [vmem:[#allocation2 + $0x174] sm:$0xff] }
 0x652   : > { %3795 = vst.msk [vmem:[#allocation3 + $0xb8] sm:$0xff] %vm3771_vm2, %v3722_v55 }
 0x655   : > { %4065 = vrot.lane.b32.xlu2 %v11021_v16, %s9394_s17 }
 0x656   : > { %4067 = vrot.lane.b32.xlu0 %v11023_v17, %s9394_s17 }
 0x657   : > { %4069 = vrot.lane.b32.xlu1 %v11025_v63, %s9394_s17  ;;  %v3871_v23 = vpop.permute.xlu2 %3870 }
 0x658   : > { %3966 = vst.msk [vmem:[#allocation3 + $0x8] sm:$0xff] %vm3964_vm3, %v3871_v23  ;;  %v3726_v24 = vpop.permute.xlu0 %3725 }
 0x659   : > { %v3728_v9 = vpop.permute.xlu1 %3727  ;;  %3797 = vst.msk [vmem:[#allocation3 + $0xc8] sm:$0xff] %vm3771_vm2, %v3726_v24 }
 0x65a   : > { %3798 = vst.msk [vmem:[#allocation3 + $0xd0] sm:$0xff] %vm3771_vm2, %v3728_v9  ;;  %v4023_v9 = vld [vmem:[#allocation2 + $0x184] sm:$0xff] }
 0x65d   : > { %4071 = vrot.lane.b32.xlu2 %v11036_v32, %s9394_s17 }
 0x65e   : > { %4073 = vrot.lane.b32.xlu0 %v11038_v33, %s9394_s17 }
 0x65f   : > { %4075 = vrot.lane.b32.xlu1 %v11040_v41, %s9394_s17  ;;  %v3877_v15 = vpop.permute.xlu2 %3876 }
 0x660   : > { %3969 = vst.msk [vmem:[#allocation3 + $0x20] sm:$0xff] %vm3964_vm3, %v3877_v15  ;;  %v3732_v39 = vpop.permute.xlu0 %3731  ;;  %v4024_v15 = vld [vmem:[#allocation2 + $0x18c] sm:$0xff] }
 0x661   : > { %v3734_v40 = vpop.permute.xlu1 %3733  ;;  %3800 = vst.msk [vmem:[#allocation3 + $0xe0] sm:$0xff] %vm3771_vm2, %v3732_v39  ;;  %v4025_v39 = vld [vmem:[#allocation2 + $0x19c] sm:$0xff] }
 0x662   : > { %3801 = vst.msk [vmem:[#allocation3 + $0xe8] sm:$0xff] %vm3771_vm2, %v3734_v40 }
 0x665   : > { %4077 = vrot.lane.b32.xlu2 %v11051_v42, %s9394_s17 }
 0x666   : > { %4079 = vrot.lane.b32.xlu0 %v11053_v22, %s9394_s17 }
 0x667   : > { %4081 = vrot.lane.b32.xlu1 %v11055_v48, %s9394_s17  ;;  %v3883_v31 = vpop.permute.xlu2 %3882 }
 0x668   : > { %3972 = vst.msk [vmem:[#allocation3 + $0x38] sm:$0xff] %vm3964_vm3, %v3883_v31  ;;  %v3738_v58 = vpop.permute.xlu0 %3737 }
 0x669   : > { %v3869_v38 = vpop.permute.xlu1 %3868  ;;  %3803 = vst.msk [vmem:[#allocation3 + $0xf8] sm:$0xff] %vm3771_vm2, %v3738_v58  ;;  %vm13473_vm2 = vcmask 1044484  }
 0x66a   : > { %3965 = vst.msk [vmem:[#allocation3] sm:$0xff] %vm3964_vm3, %v3869_v38  ;;  %v4026_v38 = vld [vmem:[#allocation2 + $0x1a4] sm:$0xff] }
 0x66d   : > { %4083 = vrot.lane.b32.xlu2 %v11066_v5, %s9394_s17 }
 0x66e   : > { %4085 = vrot.lane.b32.xlu0 %v11068_v7, %s9394_s17 }
 0x66f   : > { %4087 = vrot.lane.b32.xlu1 %v4010_v43, %s9394_s17  ;;  %v3889_v44 = vpop.permute.xlu2 %3888  ;;  %v4027_v43 = vld [vmem:[#allocation2 + $0x1b4] sm:$0xff] }
 0x670   : > { %3975 = vst.msk [vmem:[#allocation3 + $0x50] sm:$0xff] %vm3964_vm3, %v3889_v44  ;;  %v3873_v45 = vpop.permute.xlu0 %3872  ;;  %v4028_v44 = vld [vmem:[#allocation2 + $0x1bc] sm:$0xff] }
 0x671   : > { %v3875_v29 = vpop.permute.xlu1 %3874  ;;  %3967 = vst.msk [vmem:[#allocation3 + $0x10] sm:$0xff] %vm3964_vm3, %v3873_v45 }
 0x672   : > { %3968 = vst.msk [vmem:[#allocation3 + $0x18] sm:$0xff] %vm3964_vm3, %v3875_v29 }
 0x675   : > { %4089 = vrot.lane.b32.xlu2 %v4011_v34, %s9394_s17 }
 0x676   : > { %4091 = vrot.lane.b32.xlu0 %v4012_v47, %s9394_s17  ;;  %v4191_v47 = vld [vmem:[#allocation2 + $0x60] sm:$0xff] }
 0x677   : > { %4093 = vrot.lane.b32.xlu1 %v4013_v49, %s9394_s17  ;;  %v3895_v51 = vpop.permute.xlu2 %3894  ;;  %v4192_v49 = vld [vmem:[#allocation2 + $0x68] sm:$0xff] }
 0x678   : > { %3978 = vst.msk [vmem:[#allocation3 + $0x68] sm:$0xff] %vm3964_vm3, %v3895_v51  ;;  %v3879_v52 = vpop.permute.xlu0 %3878  ;;  %v4193_v51 = vld [vmem:[#allocation2 + $0x78] sm:$0xff] }
 0x679   : > { %v3881_v53 = vpop.permute.xlu1 %3880  ;;  %3970 = vst.msk [vmem:[#allocation3 + $0x28] sm:$0xff] %vm3964_vm3, %v3879_v52 }
 0x67a   : > { %3971 = vst.msk [vmem:[#allocation3 + $0x30] sm:$0xff] %vm3964_vm3, %v3881_v53 }
 0x67d   : > { %4095 = vrot.lane.b32.xlu2 %v4014_v54, %s9394_s17 }
 0x67e   : > { %4097 = vrot.lane.b32.xlu0 %v11084_v57, %s9394_s17 }
 0x67f   : > { %4099 = vrot.lane.b32.xlu1 %v11086_v60, %s9394_s17  ;;  %v3901_v62 = vpop.permute.xlu2 %3900 }
 0x680   : > { %3981 = vst.msk [vmem:[#allocation3 + $0x80] sm:$0xff] %vm3964_vm3, %v3901_v62  ;;  %v3885_v2 = vpop.permute.xlu0 %3884  ;;  %v4194_v62 = vld [vmem:[#allocation2 + $0x80] sm:$0xff] }
 0x681   : > { %v3887_v3 = vpop.permute.xlu1 %3886  ;;  %3973 = vst.msk [vmem:[#allocation3 + $0x40] sm:$0xff] %vm3964_vm3, %v3885_v2  ;;  %v4195_v2 = vld [vmem:[#allocation2 + $0x90] sm:$0xff] }
 0x682   : > { %3974 = vst.msk [vmem:[#allocation3 + $0x48] sm:$0xff] %vm3964_vm3, %v3887_v3  ;;  %v4196_v3 = vld [vmem:[#allocation2 + $0x98] sm:$0xff] }
 0x685   : > { %4101 = vrot.lane.b32.xlu2 %v11096_v4, %s9394_s17 }
 0x686   : > { %4103 = vrot.lane.b32.xlu0 %v11098_v6, %s9394_s17 }
 0x687   : > { %4105 = vrot.lane.b32.xlu1 %v11100_v11, %s9394_s17  ;;  %v3907_v12 = vpop.permute.xlu2 %3906 }
 0x688   : > { %3984 = vst.msk [vmem:[#allocation3 + $0x98] sm:$0xff] %vm3964_vm3, %v3907_v12  ;;  %v3891_v25 = vpop.permute.xlu0 %3890 }
 0x689   : > { %v3893_v26 = vpop.permute.xlu1 %3892  ;;  %3976 = vst.msk [vmem:[#allocation3 + $0x58] sm:$0xff] %vm3964_vm3, %v3891_v25 }
 0x68a   : > { %3977 = vst.msk [vmem:[#allocation3 + $0x60] sm:$0xff] %vm3964_vm3, %v3893_v26 }
 0x68d   : > { %4107 = vrot.lane.b32.xlu2 %v11111_v27, %s9394_s17 }
 0x68e   : > { %4109 = vrot.lane.b32.xlu0 %v11113_v36, %s9394_s17 }
 0x68f   : > { %4111 = vrot.lane.b32.xlu1 %v11115_v37, %s9394_s17  ;;  %v3913_v55 = vpop.permute.xlu2 %3912 }
 0x690   : > { %3987 = vst.msk [vmem:[#allocation3 + $0xb0] sm:$0xff] %vm3964_vm3, %v3913_v55  ;;  %v3897_v23 = vpop.permute.xlu0 %3896  ;;  %v4197_v55 = vld [vmem:[#allocation2 + $0xa8] sm:$0xff] }
 0x691   : > { %v3899_v24 = vpop.permute.xlu1 %3898  ;;  %3979 = vst.msk [vmem:[#allocation3 + $0x70] sm:$0xff] %vm3964_vm3, %v3897_v23  ;;  %v4198_v23 = vld [vmem:[#allocation2 + $0xb0] sm:$0xff] }
 0x692   : > { %3980 = vst.msk [vmem:[#allocation3 + $0x78] sm:$0xff] %vm3964_vm3, %v3899_v24  ;;  %v4199_v24 = vld [vmem:[#allocation2 + $0xc0] sm:$0xff] }
 0x695   : > { %4113 = vrot.lane.b32.xlu2 %v4023_v9, %s9394_s17 }
 0x696   : > { %4115 = vrot.lane.b32.xlu0 %v4024_v15, %s9394_s17 }
 0x697   : > { %4117 = vrot.lane.b32.xlu1 %v4025_v39, %s9394_s17  ;;  %v3919_v40 = vpop.permute.xlu2 %3918 }
 0x698   : > { %3990 = vst.msk [vmem:[#allocation3 + $0xc8] sm:$0xff] %vm3964_vm3, %v3919_v40  ;;  %v3903_v31 = vpop.permute.xlu0 %3902  ;;  %v4200_v40 = vld [vmem:[#allocation2 + $0xc8] sm:$0xff] }
 0x699   : > { %v3905_v58 = vpop.permute.xlu1 %3904  ;;  %3982 = vst.msk [vmem:[#allocation3 + $0x88] sm:$0xff] %vm3964_vm3, %v3903_v31  ;;  %v4201_v31 = vld [vmem:[#allocation2 + $0xd8] sm:$0xff] }
 0x69a   : > { %3983 = vst.msk [vmem:[#allocation3 + $0x90] sm:$0xff] %vm3964_vm3, %v3905_v58  ;;  %v4202_v58 = vld [vmem:[#allocation2 + $0xe0] sm:$0xff] }
 0x69d   : > { %4119 = vrot.lane.b32.xlu2 %v4026_v38, %s9394_s17 }
 0x69e   : > { %4121 = vrot.lane.b32.xlu0 %v4027_v43, %s9394_s17 }
 0x69f   : > { %4123 = vrot.lane.b32.xlu1 %v4028_v44, %s9394_s17  ;;  %v3925_v45 = vpop.permute.xlu2 %3924  ;;  %s13462_s17 = smov 96  }
 0x6a0   : > { %3993 = vst.msk [vmem:[#allocation3 + $0xe0] sm:$0xff] %vm3964_vm3, %v3925_v45  ;;  %v3909_v29 = vpop.permute.xlu0 %3908  ;;  %v4203_v45 = vld [vmem:[#allocation2 + $0xf0] sm:$0xff] }
 0x6a1   : > { %v3911_v34 = vpop.permute.xlu1 %3910  ;;  %3985 = vst.msk [vmem:[#allocation3 + $0xa0] sm:$0xff] %vm3964_vm3, %v3909_v29  ;;  %v4204_v29 = vld [vmem:[#allocation2 + $0xf8] sm:$0xff] }
 0x6a2   : > { %3986 = vst.msk [vmem:[#allocation3 + $0xa8] sm:$0xff] %vm3964_vm3, %v3911_v34  ;;  %v4205_v34 = vld [vmem:[#allocation2 + $0x108] sm:$0xff] }
 0x6a5   : > { %4255 = vrot.lane.b32.xlu2 %v4191_v47, %s9395_s22 }
 0x6a6   : > { %4257 = vrot.lane.b32.xlu0 %v4192_v49, %s9395_s22 }
 0x6a7   : > { %4259 = vrot.lane.b32.xlu1 %v4193_v51, %s9395_s22  ;;  %v3931_v52 = vpop.permute.xlu2 %3930 }
 0x6a8   : > { %3996 = vst.msk [vmem:[#allocation3 + $0xf8] sm:$0xff] %vm3964_vm3, %v3931_v52  ;;  %v3915_v53 = vpop.permute.xlu0 %3914  ;;  %v4206_v52 = vld [vmem:[#allocation2 + $0x110] sm:$0xff] }
 0x6a9   : > { %v3917_v54 = vpop.permute.xlu1 %3916  ;;  %3988 = vst.msk [vmem:[#allocation3 + $0xb8] sm:$0xff] %vm3964_vm3, %v3915_v53  ;;  %v4207_v53 = vld [vmem:[#allocation2 + $0x120] sm:$0xff] }
 0x6aa   : > { %3989 = vst.msk [vmem:[#allocation3 + $0xc0] sm:$0xff] %vm3964_vm3, %v3917_v54  ;;  %v4208_v54 = vld [vmem:[#allocation2 + $0x128] sm:$0xff] }
 0x6ad   : > { %4261 = vrot.lane.b32.xlu2 %v4194_v62, %s9395_s22 }
 0x6ae   : > { %4263 = vrot.lane.b32.xlu0 %v4195_v2, %s9395_s22 }
 0x6af   : > { %4265 = vrot.lane.b32.xlu1 %v4196_v3, %s9395_s22  ;;  %v4066_v12 = vpop.permute.xlu2 %4065 }
 0x6b0   : > { %4160 = vst.msk [vmem:[#allocation3 + $0x10] sm:$0xff] %vm4157_vm4, %v4066_v12  ;;  %v3921_v25 = vpop.permute.xlu0 %3920  ;;  %v4209_v12 = vld [vmem:[#allocation2 + $0x138] sm:$0xff] }
 0x6b1   : > { %v3923_v26 = vpop.permute.xlu1 %3922  ;;  %3991 = vst.msk [vmem:[#allocation3 + $0xd0] sm:$0xff] %vm3964_vm3, %v3921_v25  ;;  %v4210_v25 = vld [vmem:[#allocation2 + $0x140] sm:$0xff] }
 0x6b2   : > { %3992 = vst.msk [vmem:[#allocation3 + $0xd8] sm:$0xff] %vm3964_vm3, %v3923_v26  ;;  %v4211_v26 = vld [vmem:[#allocation2 + $0x150] sm:$0xff] }
 0x6b5   : > { %4267 = vrot.lane.b32.xlu2 %v4197_v55, %s9395_s22 }
 0x6b6   : > { %4269 = vrot.lane.b32.xlu0 %v4198_v23, %s9395_s22 }
 0x6b7   : > { %4271 = vrot.lane.b32.xlu1 %v4199_v24, %s9395_s22  ;;  %v4072_v9 = vpop.permute.xlu2 %4071 }
 0x6b8   : > { %4163 = vst.msk [vmem:[#allocation3 + $0x28] sm:$0xff] %vm4157_vm4, %v4072_v9  ;;  %v3927_v15 = vpop.permute.xlu0 %3926  ;;  %v4212_v9 = vld [vmem:[#allocation2 + $0x158] sm:$0xff] }
 0x6b9   : > { %v3929_v39 = vpop.permute.xlu1 %3928  ;;  %3994 = vst.msk [vmem:[#allocation3 + $0xe8] sm:$0xff] %vm3964_vm3, %v3927_v15  ;;  %v4384_v15 = vld [vmem:[#allocation2 + $0x61] sm:$0xff] }
 0x6ba   : > { %3995 = vst.msk [vmem:[#allocation3 + $0xf0] sm:$0xff] %vm3964_vm3, %v3929_v39  ;;  %vm13472_vm3 = vcmask 1045509  }
 0x6bd   : > { %4273 = vrot.lane.b32.xlu2 %v4200_v40, %s9395_s22 }
 0x6be   : > { %4275 = vrot.lane.b32.xlu0 %v4201_v31, %s9395_s22 }
 0x6bf   : > { %4277 = vrot.lane.b32.xlu1 %v4202_v58, %s9395_s22  ;;  %v4078_v38 = vpop.permute.xlu2 %4077  ;;  %v4385_v58 = vld [vmem:[#allocation2 + $0x69] sm:$0xff] }
 0x6c0   : > { %4166 = vst.msk [vmem:[#allocation3 + $0x40] sm:$0xff] %vm4157_vm4, %v4078_v38  ;;  %v4062_v43 = vpop.permute.xlu0 %4061 }
 0x6c1   : > { %v4064_v44 = vpop.permute.xlu1 %4063  ;;  %4158 = vst.msk [vmem:[#allocation3] sm:$0xff] %vm4157_vm4, %v4062_v43 }
 0x6c2   : > { %4159 = vst.msk [vmem:[#allocation3 + $0x8] sm:$0xff] %vm4157_vm4, %v4064_v44 }
 0x6c5   : > { %4279 = vrot.lane.b32.xlu2 %v4203_v45, %s9395_s22  ;;  %v4386_v45 = vld [vmem:[#allocation2 + $0x79] sm:$0xff] }
 0x6c6   : > { %4281 = vrot.lane.b32.xlu0 %v4204_v29, %s9395_s22  ;;  %v4387_v29 = vld [vmem:[#allocation2 + $0x81] sm:$0xff] }
 0x6c7   : > { %4283 = vrot.lane.b32.xlu1 %v4205_v34, %s9395_s22  ;;  %v4084_v47 = vpop.permute.xlu2 %4083  ;;  %v4580_v34 = vld [vmem:[#allocation2 + $0x82] sm:$0xff] }
 0x6c8   : > { %4169 = vst.msk [vmem:[#allocation3 + $0x58] sm:$0xff] %vm4157_vm4, %v4084_v47  ;;  %v4068_v49 = vpop.permute.xlu0 %4067 }
 0x6c9   : > { %v4070_v51 = vpop.permute.xlu1 %4069  ;;  %4161 = vst.msk [vmem:[#allocation3 + $0x18] sm:$0xff] %vm4157_vm4, %v4068_v49  ;;  %v4388_v49 = vld [vmem:[#allocation2 + $0x91] sm:$0xff] }
 0x6ca   : > { %4162 = vst.msk [vmem:[#allocation3 + $0x20] sm:$0xff] %vm4157_vm4, %v4070_v51 }
 0x6cd   : > { %4285 = vrot.lane.b32.xlu2 %v4206_v52, %s9395_s22 }
 0x6ce   : > { %4287 = vrot.lane.b32.xlu0 %v4207_v53, %s9395_s22  ;;  %v4400_v53 = vld [vmem:[#allocation2 + $0x121] sm:$0xff] }
 0x6cf   : > { %4289 = vrot.lane.b32.xlu1 %v4208_v54, %s9395_s22  ;;  %v4090_v62 = vpop.permute.xlu2 %4089  ;;  %v4581_v54 = vld [vmem:[#allocation2 + $0x92] sm:$0xff] }
 0x6d0   : > { %4172 = vst.msk [vmem:[#allocation3 + $0x70] sm:$0xff] %vm4157_vm4, %v4090_v62  ;;  %v4074_v2 = vpop.permute.xlu0 %4073 }
 0x6d1   : > { %v4076_v3 = vpop.permute.xlu1 %4075  ;;  %4164 = vst.msk [vmem:[#allocation3 + $0x30] sm:$0xff] %vm4157_vm4, %v4074_v2 }
 0x6d2   : > { %4165 = vst.msk [vmem:[#allocation3 + $0x38] sm:$0xff] %vm4157_vm4, %v4076_v3 }
 0x6d5   : > { %4291 = vrot.lane.b32.xlu2 %v4209_v12, %s9395_s22  ;;  %v4389_v12 = vld [vmem:[#allocation2 + $0x99] sm:$0xff] }
 0x6d6   : > { %4293 = vrot.lane.b32.xlu0 %v4210_v25, %s9395_s22  ;;  %v4401_v25 = vld [vmem:[#allocation2 + $0x129] sm:$0xff] }
 0x6d7   : > { %4295 = vrot.lane.b32.xlu1 %v4211_v26, %s9395_s22  ;;  %v4096_v55 = vpop.permute.xlu2 %4095  ;;  %v4582_v26 = vld [vmem:[#allocation2 + $0x9a] sm:$0xff] }
 0x6d8   : > { %4175 = vst.msk [vmem:[#allocation3 + $0x88] sm:$0xff] %vm4157_vm4, %v4096_v55  ;;  %v4080_v23 = vpop.permute.xlu0 %4079  ;;  %v4594_v55 = vld [vmem:[#allocation2 + $0x12a] sm:$0xff] }
 0x6d9   : > { %v4082_v24 = vpop.permute.xlu1 %4081  ;;  %4167 = vst.msk [vmem:[#allocation3 + $0x48] sm:$0xff] %vm4157_vm4, %v4080_v23 }
 0x6da   : > { %4168 = vst.msk [vmem:[#allocation3 + $0x50] sm:$0xff] %vm4157_vm4, %v4082_v24 }
 0x6dd   : > { %4297 = vrot.lane.b32.xlu2 %v4212_v9, %s9395_s22  ;;  %v5197_v9 = vld [vmem:[%s13509_s1 + $0x48] sm:$0x7] }
 0x6de   : > { %4448 = vrot.lane.b32.xlu0 %v4384_v15, %s9396_s23  ;;  %9134 = vmatpush.msk.msra.mxu0 %vm5299_vm6, %v5197_v9 }
 0x6df   : > { %4641 = vrot.lane.b32.xlu1 %v10838_v8, %s9397_s24  ;;  %v4102_v39 = vpop.permute.xlu2 %4101  ;;  %9195 = vmatpush.msk.msra.mxu1 %vm5299_vm6, %v5197_v9  ;;  %vm13470_vm6 = vcmask 1047559  }
 0x6e0   : > { %4178 = vst.msk [vmem:[#allocation3 + $0xa0] sm:$0xff] %vm4157_vm4, %v4102_v39  ;;  %v4086_v40 = vpop.permute.xlu0 %4085 }
 0x6e1   : > { %v4088_v31 = vpop.permute.xlu1 %4087  ;;  %4170 = vst.msk [vmem:[#allocation3 + $0x60] sm:$0xff] %vm4157_vm4, %v4086_v40  ;;  %v5194_v40 = vld [vmem:[%s13509_s1 + $0x30] sm:$0xff] }
 0x6e2   : > { %4171 = vst.msk [vmem:[#allocation3 + $0x68] sm:$0xff] %vm4157_vm4, %v4088_v31  ;;  %v4402_v31 = vld [vmem:[#allocation2 + $0x139] sm:$0xff] }
 0x6e5   : > { %4834 = vrot.lane.b32.xlu2 %v10916_v13, %s9398_s25 }
 0x6e6   : > { %5027 = vrot.lane.b32.xlu0 %v11021_v16, %s13489_s26 }
 0x6e7   : > { %4450 = vrot.lane.b32.xlu1 %v4385_v58, %s9396_s23  ;;  %v4108_v8 = vpop.permute.xlu2 %4107  ;;  %v4583_v58 = vld [vmem:[#allocation2 + $0xaa] sm:$0xff] }
 0x6e8   : > { %4181 = vst.msk [vmem:[#allocation3 + $0xb8] sm:$0xff] %vm4157_vm4, %v4108_v8  ;;  %v4092_v38 = vpop.permute.xlu0 %4091  ;;  %v5193_v8 = vld [vmem:[%s13509_s1 + $0x28] sm:$0xff] }
 0x6e9   : > { %v4094_v43 = vpop.permute.xlu1 %4093  ;;  %4173 = vst.msk [vmem:[#allocation3 + $0x78] sm:$0xff] %vm4157_vm4, %v4092_v38 }
 0x6ea   : > { %4174 = vst.msk [vmem:[#allocation3 + $0x80] sm:$0xff] %vm4157_vm4, %v4094_v43  ;;  %v5192_v43 = vld [vmem:[%s13509_s1 + $0x20] sm:$0xff] }
 0x6ed   : > { %4643 = vrot.lane.b32.xlu2 %v10847_v14, %s9397_s24 }
 0x6ee   : > { %4836 = vrot.lane.b32.xlu0 %v10918_v21, %s9398_s25 }
 0x6ef   : > { %5029 = vrot.lane.b32.xlu1 %v11023_v17, %s13489_s26  ;;  %v4114_v13 = vpop.permute.xlu2 %4113 }
 0x6f0   : > { %4184 = vst.msk [vmem:[#allocation3 + $0xd0] sm:$0xff] %vm4157_vm4, %v4114_v13  ;;  %v4098_v16 = vpop.permute.xlu0 %4097 }
 0x6f1   : > { %v4100_v44 = vpop.permute.xlu1 %4099  ;;  %4176 = vst.msk [vmem:[#allocation3 + $0x90] sm:$0xff] %vm4157_vm4, %v4098_v16 }
 0x6f2   : > { %4177 = vst.msk [vmem:[#allocation3 + $0x98] sm:$0xff] %vm4157_vm4, %v4100_v44  ;;  %v4595_v44 = vld [vmem:[#allocation2 + $0x13a] sm:$0xff] }
 0x6f5   : > { %4452 = vrot.lane.b32.xlu2 %v4386_v45, %s9396_s23  ;;  %v5191_v45 = vld [vmem:[%s13509_s1 + $0x18] sm:$0xff] }
 0x6f6   : > { %4645 = vrot.lane.b32.xlu0 %v10849_v19, %s9397_s24 }
 0x6f7   : > { %4838 = vrot.lane.b32.xlu1 %v10928_v28, %s9398_s25  ;;  %v4120_v14 = vpop.permute.xlu2 %4119 }
 0x6f8   : > { %4187 = vst.msk [vmem:[#allocation3 + $0xe8] sm:$0xff] %vm4157_vm4, %v4120_v14  ;;  %v4104_v21 = vpop.permute.xlu0 %4103  ;;  %v5190_v14 = vld [vmem:[%s13509_s1 + $0x10] sm:$0xff] }
 0x6f9   : > { %v4106_v17 = vpop.permute.xlu1 %4105  ;;  %4179 = vst.msk [vmem:[#allocation3 + $0xa8] sm:$0xff] %vm4157_vm4, %v4104_v21  ;;  %v5189_v21 = vld [vmem:[%s13509_s1 + $0x8] sm:$0xff] }
 0x6fa   : > { %4180 = vst.msk [vmem:[#allocation3 + $0xb0] sm:$0xff] %vm4157_vm4, %v4106_v17 }
 0x6fd   : > { %5031 = vrot.lane.b32.xlu2 %v11025_v63, %s13489_s26 }
 0x6fe   : > { %4454 = vrot.lane.b32.xlu0 %v4387_v29, %s9396_s23  ;;  %v5188_v29 = vld [vmem:[%s13509_s1] sm:$0xff] }
 0x6ff   : > { %4647 = vrot.lane.b32.xlu1 %v4580_v34, %s9397_s24  ;;  %v4256_v19 = vpop.permute.xlu2 %4255 }
 0x700   : > { %4352 = vst.msk [vmem:[#allocation3] sm:$0xff] %vm4351_vm5, %v4256_v19  ;;  %v4110_v28 = vpop.permute.xlu0 %4109 }
 0x701   : > { %v4112_v47 = vpop.permute.xlu1 %4111  ;;  %4182 = vst.msk [vmem:[#allocation3 + $0xc0] sm:$0xff] %vm4157_vm4, %v4110_v28 }
 0x702   : > { %4183 = vst.msk [vmem:[#allocation3 + $0xc8] sm:$0xff] %vm4157_vm4, %v4112_v47 }
 0x705   : > { %4840 = vrot.lane.b32.xlu2 %v10930_v30, %s9398_s25 }
 0x706   : > { %5033 = vrot.lane.b32.xlu0 %v11036_v32, %s13489_s26 }
 0x707   : > { %4456 = vrot.lane.b32.xlu1 %v4388_v49, %s9396_s23  ;;  %v4262_v63 = vpop.permute.xlu2 %4261  ;;  %v4403_v49 = vld [vmem:[#allocation2 + $0x141] sm:$0xff] }
 0x708   : > { %4355 = vst.msk [vmem:[#allocation3 + $0x18] sm:$0xff] %vm4351_vm5, %v4262_v63  ;;  %v4116_v51 = vpop.permute.xlu0 %4115  ;;  %v4584_v63 = vld [vmem:[#allocation2 + $0xb2] sm:$0xff] }
 0x709   : > { %v4118_v52 = vpop.permute.xlu1 %4117  ;;  %4185 = vst.msk [vmem:[#allocation3 + $0xd8] sm:$0xff] %vm4157_vm4, %v4116_v51  ;;  %v4596_v51 = vld [vmem:[#allocation2 + $0x142] sm:$0xff] }
 0x70a   : > { %4186 = vst.msk [vmem:[#allocation3 + $0xe0] sm:$0xff] %vm4157_vm4, %v4118_v52 }
 0x70d   : > { %4480 = vrot.lane.b32.xlu2 %v4400_v53, %s9396_s23 }
 0x70e   : > { %4649 = vrot.lane.b32.xlu0 %v4581_v54, %s9397_s24 }
 0x70f   : > { %4673 = vrot.lane.b32.xlu1 %v10883_v50, %s9397_s24  ;;  %v4268_v30 = vpop.permute.xlu2 %4267 }
 0x710   : > { %4358 = vst.msk [vmem:[#allocation3 + $0x30] sm:$0xff] %vm4351_vm5, %v4268_v30  ;;  %v4122_v32 = vpop.permute.xlu0 %4121 }
 0x711   : > { %v4124_v62 = vpop.permute.xlu1 %4123  ;;  %4188 = vst.msk [vmem:[#allocation3 + $0xf0] sm:$0xff] %vm4157_vm4, %v4122_v32  ;;  %v4392_v32 = vld [vmem:[#allocation2 + $0xc1] sm:$0xff] }
 0x712   : > { %4189 = vst.msk [vmem:[#allocation3 + $0xf8] sm:$0xff] %vm4157_vm4, %v4124_v62  ;;  %v4404_v62 = vld [vmem:[#allocation2 + $0x151] sm:$0xff]  ;;  %vm13471_vm4 = vcmask 1046534  }
 0x715   : > { %4842 = vrot.lane.b32.xlu2 %v10932_v35, %s9398_s25 }
 0x716   : > { %4866 = vrot.lane.b32.xlu0 %v10970_v61, %s9398_s25 }
 0x717   : > { %5035 = vrot.lane.b32.xlu1 %v11038_v33, %s13489_s26  ;;  %v4274_v2 = vpop.permute.xlu2 %4273 }
 0x718   : > { %4361 = vst.msk [vmem:[#allocation3 + $0x48] sm:$0xff] %vm4351_vm5, %v4274_v2  ;;  %v4258_v50 = vpop.permute.xlu0 %4257 }
 0x719   : > { %v4260_v3 = vpop.permute.xlu1 %4259  ;;  %4353 = vst.msk [vmem:[#allocation3 + $0x8] sm:$0xff] %vm4351_vm5, %v4258_v50  ;;  %v4585_v50 = vld [vmem:[#allocation2 + $0xc2] sm:$0xff] }
 0x71a   : > { %4354 = vst.msk [vmem:[#allocation3 + $0x10] sm:$0xff] %vm4351_vm5, %v4260_v3  ;;  %v4597_v3 = vld [vmem:[#allocation2 + $0x152] sm:$0xff] }
 0x71d   : > { %5059 = vrot.lane.b32.xlu2 %v11084_v57, %s13489_s26 }
 0x71e   : > { %4458 = vrot.lane.b32.xlu0 %v4389_v12, %s9396_s23  ;;  %v4778_v12 = vld [vmem:[#allocation2 + $0xc3] sm:$0xff] }
 0x71f   : > { %4482 = vrot.lane.b32.xlu1 %v4401_v25, %s9396_s23  ;;  %v4280_v35 = vpop.permute.xlu2 %4279 }
 0x720   : > { %4364 = vst.msk [vmem:[#allocation3 + $0x60] sm:$0xff] %vm4351_vm5, %v4280_v35  ;;  %v4264_v61 = vpop.permute.xlu0 %4263 }
 0x721   : > { %v4266_v33 = vpop.permute.xlu1 %4265  ;;  %4356 = vst.msk [vmem:[#allocation3 + $0x20] sm:$0xff] %vm4351_vm5, %v4264_v61 }
 0x722   : > { %4357 = vst.msk [vmem:[#allocation3 + $0x28] sm:$0xff] %vm4351_vm5, %v4266_v33 }
 0x725   : > { %4651 = vrot.lane.b32.xlu2 %v4582_v26, %s9397_s24 }
 0x726   : > { %4675 = vrot.lane.b32.xlu0 %v4594_v55, %s9397_s24 }
 0x727   : > { %4844 = vrot.lane.b32.xlu1 %v10943_v1, %s9398_s25  ;;  %v4286_v57 = vpop.permute.xlu2 %4285 }
 0x728   : > { %4367 = vst.msk [vmem:[#allocation3 + $0x78] sm:$0xff] %vm4351_vm5, %v4286_v57  ;;  %v4270_v23 = vpop.permute.xlu0 %4269 }
 0x729   : > { %v4272_v24 = vpop.permute.xlu1 %4271  ;;  %4359 = vst.msk [vmem:[#allocation3 + $0x38] sm:$0xff] %vm4351_vm5, %v4270_v23  ;;  %v4393_v23 = vld [vmem:[#allocation2 + $0xc9] sm:$0xff] }
 0x72a   : > { %4360 = vst.msk [vmem:[#allocation3 + $0x40] sm:$0xff] %vm4351_vm5, %v4272_v24  ;;  %v4586_v24 = vld [vmem:[#allocation2 + $0xca] sm:$0xff] }
 0x72d   : > { %4868 = vrot.lane.b32.xlu2 %v10979_v46, %s9398_s25  ;;  %v5196_v46 = vld [vmem:[%s13509_s1 + $0x40] sm:$0xff] }
 0x72e   : > { %5037 = vrot.lane.b32.xlu0 %v11040_v41, %s13489_s26  ;;  %5310 = vmatpush.msra.mxu0 %v5196_v46  ;;  %v4390_v41 = vld [vmem:[#allocation2 + $0xa9] sm:$0xff] }
 0x72f   : > { %5061 = vrot.lane.b32.xlu1 %v11086_v60, %s13489_s26  ;;  %v4292_v1 = vpop.permute.xlu2 %4291  ;;  %9196 = vmatpush.msra.mxu1 %v5196_v46  ;;  %v5195_v60 = vld [vmem:[%s13509_s1 + $0x38] sm:$0xff] }
 0x730   : > { %4370 = vst.msk [vmem:[#allocation3 + $0x90] sm:$0xff] %vm4351_vm5, %v4292_v1  ;;  %v4276_v15 = vpop.permute.xlu0 %4275  ;;  %5311 = vmatpush.msra.mxu0 %v5195_v60  ;;  %v4598_v1 = vld [vmem:[#allocation2 + $0x15a] sm:$0xff] }
 0x731   : > { %v4278_v39 = vpop.permute.xlu1 %4277  ;;  %4362 = vst.msk [vmem:[#allocation3 + $0x50] sm:$0xff] %vm4351_vm5, %v4276_v15  ;;  %9197 = vmatpush.msra.mxu1 %v5195_v60  ;;  %v4779_v15 = vld [vmem:[#allocation2 + $0xcb] sm:$0xff]  ;;  %v4791_v46 = vld [vmem:[#allocation2 + $0x15b] sm:$0xff] }
 0x732   : > { %4363 = vst.msk [vmem:[#allocation3 + $0x58] sm:$0xff] %vm4351_vm5, %v4278_v39  ;;  %5312 = vmatpush.msra.mxu0 %v5194_v40 }
 0x733   : > { %9198 = vmatpush.msra.mxu1 %v5194_v40 }
 0x734   : > { %5313 = vmatpush.msra.mxu0 %v5193_v8 }
 0x735   : > { %4460 = vrot.lane.b32.xlu2 %v4390_v41, %s9396_s23  ;;  %9199 = vmatpush.msra.mxu1 %v5193_v8 }
 0x736   : > { %4484 = vrot.lane.b32.xlu0 %v4402_v31, %s9396_s23  ;;  %5314 = vmatpush.msra.mxu0 %v5192_v43  ;;  %v4213_v31 = vld [vmem:[#allocation2 + $0x168] sm:$0xff] }
 0x737   : > { %4653 = vrot.lane.b32.xlu1 %v4583_v58, %s9397_s24  ;;  %v4298_v38 = vpop.permute.xlu2 %4297  ;;  %9200 = vmatpush.msra.mxu1 %v5192_v43  ;;  %v4394_v43 = vld [vmem:[#allocation2 + $0xd9] sm:$0xff] }
 0x738   : > { %4373 = vst.msk [vmem:[#allocation3 + $0xa8] sm:$0xff] %vm4351_vm5, %v4298_v38  ;;  %v4282_v13 = vpop.permute.xlu0 %4281  ;;  %5315 = vmatpush.msra.mxu0 %v5191_v45 }
 0x739   : > { %v4284_v16 = vpop.permute.xlu1 %4283  ;;  %4365 = vst.msk [vmem:[#allocation3 + $0x68] sm:$0xff] %vm4351_vm5, %v4282_v13  ;;  %9201 = vmatpush.msra.mxu1 %v5191_v45  ;;  %v4406_v13 = vld [vmem:[#allocation2 + $0x169] sm:$0xff] }
 0x73a   : > { %4366 = vst.msk [vmem:[#allocation3 + $0x70] sm:$0xff] %vm4351_vm5, %v4284_v16  ;;  %5316 = vmatpush.msra.mxu0 %v5190_v14  ;;  %v4587_v16 = vld [vmem:[#allocation2 + $0xda] sm:$0xff] }
 0x73b   : > { %9202 = vmatpush.msra.mxu1 %v5190_v14 }
 0x73c   : > { %5317 = vmatpush.msra.mxu0 %v5189_v21 }
 0x73d   : > { %4677 = vrot.lane.b32.xlu2 %v4595_v44, %s9397_s24  ;;  %9203 = vmatpush.msra.mxu1 %v5189_v21  ;;  %v4599_v21 = vld [vmem:[#allocation2 + $0x16a] sm:$0xff] }
 0x73e   : > { %4846 = vrot.lane.b32.xlu0 %v10945_v10, %s9398_s25  ;;  %5318 = vmatpush.msra.mxu0 %v5188_v29  ;;  %v4391_v10 = vld [vmem:[#allocation2 + $0xb1] sm:$0xff] }
 0x73f   : > { %4870 = vrot.lane.b32.xlu1 %v10981_v18, %s9398_s25  ;;  %v4835_v17 = vpop.permute.xlu2 %4834  ;;  %9204 = vmatpush.msra.mxu1 %v5188_v29  ;;  %v4792_v29 = vld [vmem:[#allocation2 + $0x16b] sm:$0xff] }
 0x740   : > { %v4288_v34 = vpop.permute.xlu0 %4287 }
 0x741   : > { %v4290_v19 = vpop.permute.xlu1 %4289  ;;  %4368 = vst.msk [vmem:[#allocation3 + $0x80] sm:$0xff] %vm4351_vm5, %v4288_v34 }
 0x742   : > { %4369 = vst.msk [vmem:[#allocation3 + $0x88] sm:$0xff] %vm4351_vm5, %v4290_v19 }
 0x745   : > { %5039 = vrot.lane.b32.xlu2 %v11051_v42, %s13489_s26 }
 0x746   : > { %5063 = vrot.lane.b32.xlu0 %v11096_v4, %s13489_s26 }
 0x747   : > { %4462 = vrot.lane.b32.xlu1 %v4391_v10, %s9396_s23  ;;  %v4644_v18 = vpop.permute.xlu2 %4643 }
 0x748   : > { %v4294_v28 = vpop.permute.xlu0 %4293 }
 0x749   : > { %v4296_v47 = vpop.permute.xlu1 %4295  ;;  %4371 = vst.msk [vmem:[#allocation3 + $0x98] sm:$0xff] %vm4351_vm5, %v4294_v28 }
 0x74a   : > { %4372 = vst.msk [vmem:[#allocation3 + $0xa0] sm:$0xff] %vm4351_vm5, %v4296_v47 }
 0x74d   : > { %4486 = vrot.lane.b32.xlu2 %v4403_v49, %s9396_s23 }
 0x74e   : > { %4655 = vrot.lane.b32.xlu0 %v4584_v63, %s9397_s24  ;;  %v4395_v63 = vld [vmem:[#allocation2 + $0xe1] sm:$0xff] }
 0x74f   : > { %4679 = vrot.lane.b32.xlu1 %v4596_v51, %s9397_s24  ;;  %v4453_v42 = vpop.permute.xlu2 %4452  ;;  %v4407_v51 = vld [vmem:[#allocation2 + $0x171] sm:$0xff] }
 0x750   : > { %4547 = vst.msk [vmem:[#allocation3 + $0x10] sm:$0xff] %vm4544_vm7, %v4453_v42  ;;  %v4449_v4 = vpop.permute.xlu0 %4448  ;;  %v4588_v42 = vld [vmem:[#allocation2 + $0xe2] sm:$0xff] }
 0x751   : > { %v4642_v52 = vpop.permute.xlu1 %4641  ;;  %4545 = vst.msk [vmem:[#allocation3] sm:$0xff] %vm4544_vm7, %v4449_v4 }
 0x752   : > { %4738 = vst.msk [vmem:[#allocation3] sm:$0xff] %vm4737_vm8, %v4642_v52 }
 0x753   : > { %4931 = vst.msk [vmem:[#allocation3] sm:$0xff] %vm4930_vm9, %v4835_v17  ;;  %v4780_v17 = vld [vmem:[#allocation2 + $0xdb] sm:$0xff] }
 0x755   : > { %4848 = vrot.lane.b32.xlu2 %v10947_v59, %s9398_s25 }
 0x756   : > { %4872 = vrot.lane.b32.xlu0 %v10983_v20, %s9398_s25 }
 0x757   : > { %5041 = vrot.lane.b32.xlu1 %v11053_v22, %s13489_s26  ;;  %v5032_v53 = vpop.permute.xlu2 %5031 }
 0x758   : > { %v5028_v54 = vpop.permute.xlu0 %5027 }
 0x759   : > { %v4451_v30 = vpop.permute.xlu1 %4450  ;;  %5124 = vst.msk [vmem:[#allocation3] sm:$0xff] %vm5123_vm10, %v5028_v54  ;;  %v4600_v54 = vld [vmem:[#allocation2 + $0x172] sm:$0xff] }
 0x75a   : > { %4546 = vst.msk [vmem:[#allocation3 + $0x8] sm:$0xff] %vm4544_vm7, %v4451_v30  ;;  %v4781_v30 = vld [vmem:[#allocation2 + $0xe3] sm:$0xff] }
 0x75b   : > { %4739 = vst.msk [vmem:[#allocation3 + $0x8] sm:$0xff] %vm4737_vm8, %v4644_v18  ;;  %v4214_v18 = vld [vmem:[#allocation2 + $0x170] sm:$0xff] }
 0x75d   : > { %5065 = vrot.lane.b32.xlu2 %v11098_v6, %s13489_s26 }
 0x75e   : > { %4464 = vrot.lane.b32.xlu0 %v4392_v32, %s9396_s23  ;;  %v4793_v32 = vld [vmem:[#allocation2 + $0x173] sm:$0xff] }
 0x75f   : > { %4488 = vrot.lane.b32.xlu1 %v4404_v62, %s9396_s23  ;;  %v4841_v59 = vpop.permute.xlu2 %4840 }
 0x760   : > { %v4837_v20 = vpop.permute.xlu0 %4836  ;;  %v5156_v22 = vld [vmem:[#allocation3] sm:$0xff] }
 0x761   : > { %v5030_v2 = vpop.permute.xlu1 %5029  ;;  %4932 = vst.msk [vmem:[#allocation3 + $0x8] sm:$0xff] %vm4930_vm9, %v4837_v20  ;;  %9135 = vmatmul.msk.f32.vlgmr.msra.gmra.mxu0 %vm5202_vm11, %v5156_v22  ;;  %v4974_v22 = vld [vmem:[#allocation2 + $0xe4] sm:$0xff] }
 0x762   : > { %5125 = vst.msk [vmem:[#allocation3 + $0x8] sm:$0xff] %vm5123_vm10, %v5030_v2  ;;  %v4215_v2 = vld [vmem:[#allocation2 + $0x180] sm:$0xff] }
 0x765   : > { %4657 = vrot.lane.b32.xlu2 %v4585_v50, %s9397_s24 }
 0x766   : > { %4681 = vrot.lane.b32.xlu0 %v4597_v3, %s9397_s24 }
 0x767   : > { %4850 = vrot.lane.b32.xlu1 %v4778_v12, %s9398_s25  ;;  %v4481_v6 = vpop.permute.xlu2 %4480 }
 0x768   : > { %4561 = vst.msk [vmem:[#allocation3 + $0x80] sm:$0xff] %vm4544_vm7, %v4481_v6  ;;  %v4646_v25 = vpop.permute.xlu0 %4645 }
 0x769   : > { %v4839_v35 = vpop.permute.xlu1 %4838  ;;  %4740 = vst.msk [vmem:[#allocation3 + $0x10] sm:$0xff] %vm4737_vm8, %v4646_v25  ;;  %v5157_v61 = vld [vmem:[#allocation3 + $0x8] sm:$0xff]  ;;  %v4396_v25 = vld [vmem:[#allocation2 + $0xf1] sm:$0xff] }
 0x76a   : > { %4933 = vst.msk [vmem:[#allocation3 + $0x10] sm:$0xff] %vm4930_vm9, %v4839_v35  ;;  %9136 = vmatmul.msk.f32.gmra.mxu0 %vm5202_vm11, %v5157_v61  ;;  %v4408_v35 = vld [vmem:[#allocation2 + $0x181] sm:$0xff]  ;;  %v4589_v61 = vld [vmem:[#allocation2 + $0xf2] sm:$0xff] }
 0x76b   : > { %5126 = vst.msk [vmem:[#allocation3 + $0x10] sm:$0xff] %vm5123_vm10, %v5032_v53 }
 0x76d   : > { %4874 = vrot.lane.b32.xlu2 %v10994_v56, %s9398_s25  ;;  %v4405_v56 = vld [vmem:[#allocation2 + $0x159] sm:$0xff] }
 0x76e   : > { %5043 = vrot.lane.b32.xlu0 %v11055_v48, %s13489_s26 }
 0x76f   : > { %5067 = vrot.lane.b32.xlu1 %v11100_v11, %s13489_s26  ;;  %v4843_v33 = vpop.permute.xlu2 %4842 }
 0x770   : > { %v4455_v26 = vpop.permute.xlu0 %4454 }
 0x771   : > { %v4648_v55 = vpop.permute.xlu1 %4647  ;;  %4548 = vst.msk [vmem:[#allocation3 + $0x18] sm:$0xff] %vm4544_vm7, %v4455_v26 }
 0x772   : > { %4741 = vst.msk [vmem:[#allocation3 + $0x18] sm:$0xff] %vm4737_vm8, %v4648_v55  ;;  %v5158_v57 = vld [vmem:[#allocation3 + $0x10] sm:$0xff] }
 0x773   : > { %4934 = vst.msk [vmem:[#allocation3 + $0x18] sm:$0xff] %vm4930_vm9, %v4841_v59  ;;  %9137 = vmatmul.msk.f32.gmra.mxu0 %vm5202_vm11, %v5158_v57  ;;  %v4601_v57 = vld [vmem:[#allocation2 + $0x182] sm:$0xff] }
 0x775   : > { %4466 = vrot.lane.b32.xlu2 %v4393_v23, %s9396_s23  ;;  %v4782_v23 = vld [vmem:[#allocation2 + $0xf3] sm:$0xff] }
 0x776   : > { %4490 = vrot.lane.b32.xlu0 %v4405_v56, %s9396_s23  ;;  %v4794_v56 = vld [vmem:[#allocation2 + $0x183] sm:$0xff] }
 0x777   : > { %4659 = vrot.lane.b32.xlu1 %v4586_v24, %s9397_s24  ;;  %v5060_v48 = vpop.permute.xlu2 %5059 }
 0x778   : > { %v5034_v11 = vpop.permute.xlu0 %5033 }
 0x779   : > { %v4457_v9 = vpop.permute.xlu1 %4456  ;;  %5127 = vst.msk [vmem:[#allocation3 + $0x18] sm:$0xff] %vm5123_vm10, %v5034_v11 }
 0x77a   : > { %4549 = vst.msk [vmem:[#allocation3 + $0x20] sm:$0xff] %vm4544_vm7, %v4457_v9  ;;  %v4975_v9 = vld [vmem:[#allocation2 + $0xf4] sm:$0xff] }
 0x77d   : > { %4683 = vrot.lane.b32.xlu2 %v4598_v1, %s9397_s24  ;;  %v4987_v1 = vld [vmem:[#allocation2 + $0x184] sm:$0xff] }
 0x77e   : > { %4852 = vrot.lane.b32.xlu0 %v4779_v15, %s9398_s25  ;;  %v4216_v15 = vld [vmem:[#allocation2 + $0x188] sm:$0xff] }
 0x77f   : > { %4876 = vrot.lane.b32.xlu1 %v4791_v46, %s9398_s25  ;;  %v4652_v39 = vpop.permute.xlu2 %4651 }
 0x780   : > { %v4650_v41 = vpop.permute.xlu0 %4649  ;;  %v5159_v60 = vld [vmem:[#allocation3 + $0x18] sm:$0xff] }
 0x781   : > { %v4674_v40 = vpop.permute.xlu1 %4673  ;;  %4742 = vst.msk [vmem:[#allocation3 + $0x20] sm:$0xff] %vm4737_vm8, %v4650_v41  ;;  %9138 = vmatmul.msk.f32.gmra.mxu0 %vm5202_vm11, %v5159_v60 }
 0x782   : > { %4754 = vst.msk [vmem:[#allocation3 + $0x80] sm:$0xff] %vm4737_vm8, %v4674_v40 }
 0x783   : > { %4935 = vst.msk [vmem:[#allocation3 + $0x20] sm:$0xff] %vm4930_vm9, %v4843_v33 }
 0x785   : > { %5045 = vrot.lane.b32.xlu2 %v11066_v5, %s13489_s26 }
 0x786   : > { %5069 = vrot.lane.b32.xlu0 %v11111_v27, %s13489_s26 }
 0x787   : > { %4299 = vrot.lane.b32.xlu1 %v4213_v31, %s9395_s22  ;;  %v4869_v58 = vpop.permute.xlu2 %4868  ;;  %v4397_v31 = vld [vmem:[#allocation2 + $0xf9] sm:$0xff] }
 0x788   : > { %v4867_v8 = vpop.permute.xlu0 %4866 }
 0x789   : > { %v5036_v38 = vpop.permute.xlu1 %5035  ;;  %4947 = vst.msk [vmem:[#allocation3 + $0x80] sm:$0xff] %vm4930_vm9, %v4867_v8  ;;  %v4590_v8 = vld [vmem:[#allocation2 + $0xfa] sm:$0xff] }
 0x78a   : > { %5128 = vst.msk [vmem:[#allocation3 + $0x20] sm:$0xff] %vm5123_vm10, %v5036_v38 }
 0x78b   : > { %5140 = vst.msk [vmem:[#allocation3 + $0x80] sm:$0xff] %vm5123_vm10, %v5060_v48 }
 0x78d   : > { %4468 = vrot.lane.b32.xlu2 %v4394_v43, %s9396_s23 }
 0x78e   : > { %4492 = vrot.lane.b32.xlu0 %v4406_v13, %s9396_s23 }
 0x78f   : > { %4661 = vrot.lane.b32.xlu1 %v4587_v16, %s9397_s24  ;;  %v4461_v5 = vpop.permute.xlu2 %4460  ;;  %v4602_v16 = vld [vmem:[#allocation2 + $0x18a] sm:$0xff] }
 0x790   : > { %4551 = vst.msk [vmem:[#allocation3 + $0x30] sm:$0xff] %vm4544_vm7, %v4461_v5  ;;  %v4459_v27 = vpop.permute.xlu0 %4458  ;;  %v4783_v5 = vld [vmem:[#allocation2 + $0xfb] sm:$0xff] }
 0x791   : > { %v4483_v44 = vpop.permute.xlu1 %4482  ;;  %4550 = vst.msk [vmem:[#allocation3 + $0x28] sm:$0xff] %vm4544_vm7, %v4459_v27  ;;  %v5160_v45 = vld [vmem:[#allocation3 + $0x20] sm:$0xff] }
 0x792   : > { %4562 = vst.msk [vmem:[#allocation3 + $0x88] sm:$0xff] %vm4544_vm7, %v4483_v44  ;;  %9139 = vmatmul.msk.f32.gmra.mxu0 %vm5202_vm11, %v5160_v45  ;;  %v5172_v14 = vld [vmem:[#allocation3 + $0x80] sm:$0xff]  ;;  %v4795_v44 = vld [vmem:[#allocation2 + $0x18b] sm:$0xff] }
 0x793   : > { %4743 = vst.msk [vmem:[#allocation3 + $0x28] sm:$0xff] %vm4737_vm8, %v4652_v39  ;;  %9151 = vmatmul.msk.f32.vlgmr.msra.gmra.mxu1 %vm5202_vm11, %v5172_v14  ;;  %v11462_v27 = vld [vmem:[%s13452_s2] ss:$0 sm:$0xff] }
 0x795   : > { %4685 = vrot.lane.b32.xlu2 %v4599_v21, %s9397_s24 }
 0x796   : > { %4854 = vrot.lane.b32.xlu0 %v4780_v17, %s9398_s25 }
 0x797   : > { %4878 = vrot.lane.b32.xlu1 %v4792_v29, %s9398_s25  ;;  %v4678_v34 = vpop.permute.xlu2 %4677 }
 0x798   : > { %v4676_v19 = vpop.permute.xlu0 %4675 }
 0x799   : > { %v4845_v10 = vpop.permute.xlu1 %4844  ;;  %4755 = vst.msk [vmem:[#allocation3 + $0x88] sm:$0xff] %vm4737_vm8, %v4676_v19  ;;  %v4976_v19 = vld [vmem:[#allocation2 + $0xfc] sm:$0xff] }
 0x79a   : > { %4936 = vst.msk [vmem:[#allocation3 + $0x28] sm:$0xff] %vm4930_vm9, %v4845_v10 }
 0x79b   : > { %4948 = vst.msk [vmem:[#allocation3 + $0x88] sm:$0xff] %vm4930_vm9, %v4869_v58  ;;  %v4409_v58 = vld [vmem:[#allocation2 + $0x189] sm:$0xff] }
 0x79d   : > { %5047 = vrot.lane.b32.xlu2 %v11068_v7, %s13489_s26 }
 0x79e   : > { %5071 = vrot.lane.b32.xlu0 %v11113_v36, %s13489_s26 }
 0x79f   : > { %4301 = vrot.lane.b32.xlu1 %v4214_v18, %s9395_s22  ;;  %v5040_v28 = vpop.permute.xlu2 %5039 }
 0x7a0   : > { %v5038_v47 = vpop.permute.xlu0 %5037 }
 0x7a1   : > { %v5062_v49 = vpop.permute.xlu1 %5061  ;;  %5129 = vst.msk [vmem:[#allocation3 + $0x28] sm:$0xff] %vm5123_vm10, %v5038_v47 }
 0x7a2   : > { %5141 = vst.msk [vmem:[#allocation3 + $0x88] sm:$0xff] %vm5123_vm10, %v5062_v49  ;;  %v4988_v49 = vld [vmem:[#allocation2 + $0x18c] sm:$0xff] }
 0x7a5   : > { %4470 = vrot.lane.b32.xlu2 %v4395_v63, %s9396_s23 }
 0x7a6   : > { %4494 = vrot.lane.b32.xlu0 %v4407_v51, %s9396_s23  ;;  %v4217_v51 = vld [vmem:[#allocation2 + $0x198] sm:$0xff] }
 0x7a7   : > { %4663 = vrot.lane.b32.xlu1 %v4588_v42, %s9397_s24  ;;  %v4487_v7 = vpop.permute.xlu2 %4486 }
 0x7a8   : > { %4564 = vst.msk [vmem:[#allocation3 + $0x98] sm:$0xff] %vm4544_vm7, %v4487_v7  ;;  %v4485_v36 = vpop.permute.xlu0 %4484  ;;  %v5161_v4 = vld [vmem:[#allocation3 + $0x28] sm:$0xff] }
 0x7a9   : > { %v4654_v52 = vpop.permute.xlu1 %4653  ;;  %4563 = vst.msk [vmem:[#allocation3 + $0x90] sm:$0xff] %vm4544_vm7, %v4485_v36  ;;  %9140 = vmatmul.msk.f32.gmra.mxu0 %vm5202_vm11, %v5161_v4  ;;  %v5173_v53 = vld [vmem:[#allocation3 + $0x88] sm:$0xff] }
 0x7aa   : > { %4744 = vst.msk [vmem:[#allocation3 + $0x30] sm:$0xff] %vm4737_vm8, %v4654_v52  ;;  %9152 = vmatmul.msk.f32.gmra.mxu1 %vm5202_vm11, %v5173_v53 }
 0x7ab   : > { %4756 = vst.msk [vmem:[#allocation3 + $0x90] sm:$0xff] %vm4737_vm8, %v4678_v34 }
 0x7ad   : > { %4687 = vrot.lane.b32.xlu2 %v4600_v54, %s9397_s24 }
 0x7ae   : > { %4856 = vrot.lane.b32.xlu0 %v4781_v30, %s9398_s25 }
 0x7af   : > { %4880 = vrot.lane.b32.xlu1 %v4793_v32, %s9398_s25  ;;  %v4849_v62 = vpop.permute.xlu2 %4848 }
 0x7b0   : > { %v4847_v59 = vpop.permute.xlu0 %4846 }
 0x7b1   : > { %v4871_v20 = vpop.permute.xlu1 %4870  ;;  %4937 = vst.msk [vmem:[#allocation3 + $0x30] sm:$0xff] %vm4930_vm9, %v4847_v59 }
 0x7b2   : > { %4949 = vst.msk [vmem:[#allocation3 + $0x90] sm:$0xff] %vm4930_vm9, %v4871_v20 }
 0x7b3   : > { %5130 = vst.msk [vmem:[#allocation3 + $0x30] sm:$0xff] %vm5123_vm10, %v5040_v28 }
 0x7b5   : > { %5049 = vrot.lane.b32.xlu2 %v4974_v22, %s13489_s26 }
 0x7b6   : > { %5073 = vrot.lane.b32.xlu0 %v11115_v37, %s13489_s26 }
 0x7b7   : > { %4303 = vrot.lane.b32.xlu1 %v4215_v2, %s9395_s22  ;;  %v5066_v50 = vpop.permute.xlu2 %5065 }
 0x7b8   : > { %v5064_v3 = vpop.permute.xlu0 %5063 }
 0x7b9   : > { %v4463_v12 = vpop.permute.xlu1 %4462  ;;  %5142 = vst.msk [vmem:[#allocation3 + $0x90] sm:$0xff] %vm5123_vm10, %v5064_v3 }
 0x7ba   : > { %4552 = vst.msk [vmem:[#allocation3 + $0x38] sm:$0xff] %vm4544_vm7, %v4463_v12  ;;  %v5162_v6 = vld [vmem:[#allocation3 + $0x30] sm:$0xff] }
 0x7bb   : > { %9141 = vmatmul.msk.f32.gmra.mxu0 %vm5202_vm11, %v5162_v6 }
 0x7bd   : > { %4472 = vrot.lane.b32.xlu2 %v4396_v25, %s9396_s23  ;;  %v4410_v25 = vld [vmem:[#allocation2 + $0x199] sm:$0xff] }
 0x7be   : > { %4496 = vrot.lane.b32.xlu0 %v4408_v35, %s9396_s23 }
 0x7bf   : > { %4665 = vrot.lane.b32.xlu1 %v4589_v61, %s9397_s24  ;;  %v4658_v37 = vpop.permute.xlu2 %4657  ;;  %v4591_v61 = vld [vmem:[#allocation2 + $0x10a] sm:$0xff] }
 0x7c0   : > { %v4656_v33 = vpop.permute.xlu0 %4655  ;;  %v5174_v26 = vld [vmem:[#allocation3 + $0x90] sm:$0xff] }
 0x7c1   : > { %v4680_v55 = vpop.permute.xlu1 %4679  ;;  %4745 = vst.msk [vmem:[#allocation3 + $0x38] sm:$0xff] %vm4737_vm8, %v4656_v33  ;;  %9153 = vmatmul.msk.f32.gmra.mxu1 %vm5202_vm11, %v5174_v26 }
 0x7c2   : > { %4757 = vst.msk [vmem:[#allocation3 + $0x98] sm:$0xff] %vm4737_vm8, %v4680_v55 }
 0x7c3   : > { %4938 = vst.msk [vmem:[#allocation3 + $0x38] sm:$0xff] %vm4930_vm9, %v4849_v62 }
 0x7c5   : > { %4689 = vrot.lane.b32.xlu2 %v4601_v57, %s9397_s24 }
 0x7c6   : > { %4858 = vrot.lane.b32.xlu0 %v4782_v23, %s9398_s25 }
 0x7c7   : > { %4882 = vrot.lane.b32.xlu1 %v4794_v56, %s9398_s25  ;;  %v4875_v24 = vpop.permute.xlu2 %4874 }
 0x7c8   : > { %v4873_v48 = vpop.permute.xlu0 %4872 }
 0x7c9   : > { %v5042_v11 = vpop.permute.xlu1 %5041  ;;  %4950 = vst.msk [vmem:[#allocation3 + $0x98] sm:$0xff] %vm4930_vm9, %v4873_v48 }
 0x7ca   : > { %5131 = vst.msk [vmem:[#allocation3 + $0x38] sm:$0xff] %vm5123_vm10, %v5042_v11 }
 0x7cb   : > { %5143 = vst.msk [vmem:[#allocation3 + $0x98] sm:$0xff] %vm5123_vm10, %v5066_v50  ;;  %v4398_v50 = vld [vmem:[#allocation2 + $0x109] sm:$0xff] }
 0x7cd   : > { %5051 = vrot.lane.b32.xlu2 %v4975_v9, %s13489_s26 }
 0x7ce   : > { %5075 = vrot.lane.b32.xlu0 %v4987_v1, %s13489_s26 }
 0x7cf   : > { %4305 = vrot.lane.b32.xlu1 %v4216_v15, %s9395_s22  ;;  %v4467_v46 = vpop.permute.xlu2 %4466 }
 0x7d0   : > { %4554 = vst.msk [vmem:[#allocation3 + $0x48] sm:$0xff] %vm4544_vm7, %v4467_v46  ;;  %v4465_v39 = vpop.permute.xlu0 %4464 }
 0x7d1   : > { %v4489_v41 = vpop.permute.xlu1 %4488  ;;  %4553 = vst.msk [vmem:[#allocation3 + $0x40] sm:$0xff] %vm4544_vm7, %v4465_v39  ;;  %v5163_v60 = vld [vmem:[#allocation3 + $0x38] sm:$0xff] }
 0x7d2   : > { %4565 = vst.msk [vmem:[#allocation3 + $0xa0] sm:$0xff] %vm4544_vm7, %v4489_v41  ;;  %9142 = vmatmul.msk.f32.gmra.mxu0 %vm5202_vm11, %v5163_v60  ;;  %v5175_v40 = vld [vmem:[#allocation3 + $0x98] sm:$0xff] }
 0x7d3   : > { %4746 = vst.msk [vmem:[#allocation3 + $0x40] sm:$0xff] %vm4737_vm8, %v4658_v37  ;;  %9154 = vmatmul.msk.f32.gmra.mxu1 %vm5202_vm11, %v5175_v40 }
 0x7d5   : > { %4474 = vrot.lane.b32.xlu2 %v4397_v31, %s9396_s23 }
 0x7d6   : > { %4498 = vrot.lane.b32.xlu0 %v4409_v58, %s9396_s23 }
 0x7d7   : > { %4667 = vrot.lane.b32.xlu1 %v4590_v8, %s9397_s24  ;;  %v4684_v38 = vpop.permute.xlu2 %4683  ;;  %v4603_v8 = vld [vmem:[#allocation2 + $0x19a] sm:$0xff] }
 0x7d8   : > { %v4682_v43 = vpop.permute.xlu0 %4681 }
 0x7d9   : > { %v4851_v13 = vpop.permute.xlu1 %4850  ;;  %4758 = vst.msk [vmem:[#allocation3 + $0xa0] sm:$0xff] %vm4737_vm8, %v4682_v43 }
 0x7da   : > { %4939 = vst.msk [vmem:[#allocation3 + $0x40] sm:$0xff] %vm4930_vm9, %v4851_v13 }
 0x7db   : > { %4951 = vst.msk [vmem:[#allocation3 + $0xa0] sm:$0xff] %vm4930_vm9, %v4875_v24 }
 0x7dd   : > { %4691 = vrot.lane.b32.xlu2 %v4602_v16, %s9397_s24 }
 0x7de   : > { %4860 = vrot.lane.b32.xlu0 %v4783_v5, %s9398_s25  ;;  %v5320_v45 = vpop.f32.mrf.mxu0  ;;  %v4784_v5 = vld [vmem:[#allocation2 + $0x10b] sm:$0xff] }
 0x7df   : > { %4884 = vrot.lane.b32.xlu1 %v4795_v44, %s9398_s25  ;;  %v5321_v14 = vadd.f32 %v11462_v27, %v5320_v45  ;;  %v11476_v21 = vpop.permute.xlu2 %5045  ;;  %v4796_v45 = vld [vmem:[#allocation2 + $0x19b] sm:$0xff] }
 0x7e0   : > { %v5044_v17 = vpop.permute.xlu0 %5043 }
 0x7e1   : > { %v5416_v29 = vmax.f32 %v5321_v14, 0.0  ;;  %v5068_v34 = vpop.permute.xlu1 %5067  ;;  %5132 = vst.msk [vmem:[#allocation3 + $0x40] sm:$0xff] %vm5123_vm10, %v5044_v17 }
 0x7e2   : > { %5144 = vst.msk [vmem:[#allocation3 + $0xa0] sm:$0xff] %vm5123_vm10, %v5068_v34 }
 0x7e3   : > { %v5480_v10 = vrot.slane %v5416_v29, 2  ;;  %v5481_v18 = vrot.slane %v5416_v29, 4  ;;  %v5482_v28 = vrot.slane %v5416_v29, 6  ;;  %v5673_v47 = vsel %vm5672_vm13, %v5416_v29, -inf }
 0x7e4   : > { %v5674_v63 = vrot.slane %v5673_v47, 4 }
 0x7e5   : > { %v5680_v42 = vsel %vm5672_vm13, %v5480_v10, -inf  ;;  %v5687_v7 = vsel %vm5672_vm13, %v5481_v18, -inf  ;;  %5053 = vrot.lane.b32.xlu2 %v4976_v19, %s13489_s26  ;;  %v5694_v52 = vsel %vm5672_vm13, %v5482_v28, -inf }
 0x7e6   : > { %v5681_v36 = vrot.slane %v5680_v42, 4  ;;  %5077 = vrot.lane.b32.xlu0 %v4988_v49, %s13489_s26  ;;  %v5688_v4 = vrot.slane %v5687_v7, 4  ;;  %v5675_v30 = vmax.f32 %v5673_v47, %v5674_v63  ;;  %v5695_v22 = vrot.slane %v5694_v52, 4 }
 0x7e7   : > { %4307 = vrot.lane.b32.xlu1 %v4217_v51, %s9395_s22  ;;  %v4469_v53 = vpop.permute.xlu2 %4468  ;;  %v5323_v54 = vpop.f32.mrf.mxu0 }
 0x7e8   : > { %4555 = vst.msk [vmem:[#allocation3 + $0x50] sm:$0xff] %vm4544_vm7, %v4469_v53  ;;  %v4491_v32 = vpop.permute.xlu0 %4490  ;;  %v5324_v62 = vadd.f32 %v11462_v27, %v5323_v54  ;;  %v5682_v20 = vmax.f32 %v5680_v42, %v5681_v36  ;;  %v5689_v3 = vmax.f32 %v5687_v7, %v5688_v4  ;;  %v5164_v6 = vld [vmem:[#allocation3 + $0x40] sm:$0xff]  ;;  %v5676_v35 = vrot.slane %v5675_v30, 2 }
 0x7e9   : > { %v4660_v59 = vpop.permute.xlu1 %4659  ;;  %4566 = vst.msk [vmem:[#allocation3 + $0xa8] sm:$0xff] %vm4544_vm7, %v4491_v32  ;;  %v5176_v2 = vld [vmem:[#allocation3 + $0xa0] sm:$0xff]  ;;  %9143 = vmatmul.msk.f32.gmra.mxu0 %vm5202_vm11, %v5164_v6  ;;  %v5696_v23 = vmax.f32 %v5694_v52, %v5695_v22 }
 0x7ea   : > { %4747 = vst.msk [vmem:[#allocation3 + $0x48] sm:$0xff] %vm4737_vm8, %v4660_v59  ;;  %v5417_v12 = vmax.f32 %v5324_v62, 0.0  ;;  %9155 = vmatmul.msk.f32.gmra.mxu1 %vm5202_vm11, %v5176_v2  ;;  %v5683_v57 = vrot.slane %v5682_v20, 2  ;;  %v5690_v56 = vrot.slane %v5689_v3, 2  ;;  %v5677_v39 = vmax.f32 %v5675_v30, %v5676_v35 }
 0x7eb   : > { %4759 = vst.msk [vmem:[#allocation3 + $0xa8] sm:$0xff] %vm4737_vm8, %v4684_v38  ;;  %v5697_v13 = vrot.slane %v5696_v23, 2 }
 0x7ec   : > { %v5483_v37 = vrot.slane %v5417_v12, 2  ;;  %v5484_v33 = vrot.slane %v5417_v12, 4  ;;  %v5485_v26 = vrot.slane %v5417_v12, 6  ;;  %v5701_v55 = vsel %vm5672_vm13, %v5417_v12, -inf }
 0x7ed   : > { %4476 = vrot.lane.b32.xlu2 %v4398_v50, %s9396_s23  ;;  %v5702_v24 = vrot.slane %v5701_v55, 4  ;;  %v5684_v38 = vmax.f32 %v5682_v20, %v5683_v57  ;;  %v5691_v43 = vmax.f32 %v5689_v3, %v5690_v56  ;;  %v5678_v14 = vrot.slane %v5677_v39, 1  ;;  %v4977_v3 = vld [vmem:[#allocation2 + $0x10c] sm:$0xff]  ;;  %v4218_v57 = vld [vmem:[#allocation2 + $0x1a0] sm:$0xff] }
 0x7ee   : > { %4500 = vrot.lane.b32.xlu0 %v4410_v25, %s9396_s23  ;;  %v5708_v48 = vsel %vm5672_vm13, %v5483_v37, -inf  ;;  %v5715_v11 = vsel %vm5672_vm13, %v5484_v33, -inf  ;;  %v5722_v1 = vsel %vm5672_vm13, %v5485_v26, -inf  ;;  %v5698_v63 = vmax.f32 %v5696_v23, %v5697_v13 }
 0x7ef   : > { %4669 = vrot.lane.b32.xlu1 %v4591_v61, %s9397_s24  ;;  %v11506_v9 = vpop.permute.xlu2 %4685  ;;  %v5703_v41 = vmax.f32 %v5701_v55, %v5702_v24  ;;  %v5709_v60 = vrot.slane %v5708_v48, 4  ;;  %v5716_v40 = vrot.slane %v5715_v11, 4  ;;  %v5723_v16 = vrot.slane %v5722_v1, 4  ;;  %v4989_v61 = vld [vmem:[#allocation2 + $0x19c] sm:$0xff] }
 0x7f0   : > { %v4853_v15 = vpop.permute.xlu0 %4852  ;;  %v5326_v46 = vpop.f32.mrf.mxu0  ;;  %v5685_v47 = vrot.slane %v5684_v38, 1  ;;  %v5692_v49 = vrot.slane %v5691_v43, 1  ;;  %v5679_v53 = vmax.f32 %v5677_v39, %v5678_v14  ;;  %v5699_v25 = vrot.slane %v5698_v63, 1 }
 0x7f1   : > { %v4877_v31 = vpop.permute.xlu1 %4876  ;;  %4940 = vst.msk [vmem:[#allocation3 + $0x48] sm:$0xff] %vm4930_vm9, %v4853_v15  ;;  %v5327_v58 = vadd.f32 %v11462_v27, %v5326_v46  ;;  %v5704_v17 = vrot.slane %v5703_v41, 2  ;;  %v5710_v29 = vmax.f32 %v5708_v48, %v5709_v60  ;;  %v5717_v34 = vmax.f32 %v5715_v11, %v5716_v40 }
 0x7f2   : > { %4952 = vst.msk [vmem:[#allocation3 + $0xa8] sm:$0xff] %vm4930_vm9, %v4877_v31  ;;  %v5686_v12 = vmax.f32 %v5684_v38, %v5685_v47  ;;  %v5693_v6 = vmax.f32 %v5691_v43, %v5692_v49  ;;  %v5700_v39 = vmax.f32 %v5698_v63, %v5699_v25 }
 0x7f3   : > { %5133 = vst.msk [vmem:[#allocation3 + $0x48] sm:$0xff] %vm5123_vm10, %v11476_v21  ;;  %v5418_v44 = vmax.f32 %v5327_v58, 0.0  ;;  %v5724_v21 = vmax.f32 %v5722_v1, %v5723_v16  ;;  %v5705_v54 = vmax.f32 %v5703_v41, %v5704_v17  ;;  %v5711_v30 = vrot.slane %v5710_v29, 2 }
 0x7f4   : > { %v5718_v32 = vrot.slane %v5717_v34, 2  ;;  %v11533_v41 = vsel %vm6569_vm12, %v5679_v53, -inf  ;;  %v11542_v58 = vsel %vm6569_vm12, %v5686_v12, -inf }
 0x7f5   : > { %4693 = vrot.lane.b32.xlu2 %v4603_v8, %s9397_s24  ;;  %v5486_v19 = vrot.slane %v5418_v44, 2  ;;  %v5487_v10 = vrot.slane %v5418_v44, 4  ;;  %v5488_v18 = vrot.slane %v5418_v44, 6  ;;  %v5729_v28 = vsel %vm5672_vm13, %v5418_v44, -inf }
 0x7f6   : > { %4862 = vrot.lane.b32.xlu0 %v4784_v5, %s9398_s25  ;;  %v5730_v42 = vrot.slane %v5729_v28, 4  ;;  %v5725_v35 = vrot.slane %v5724_v21, 2  ;;  %v5706_v23 = vrot.slane %v5705_v54, 1  ;;  %v5712_v56 = vmax.f32 %v5710_v29, %v5711_v30  ;;  %v4399_v29 = vld [vmem:[#allocation2 + $0x111] sm:$0xff] }
 0x7f7   : > { %4886 = vrot.lane.b32.xlu1 %v4796_v45, %s9398_s25  ;;  %v11518_v51 = vpop.permute.xlu2 %5047  ;;  %v5736_v7 = vsel %vm5672_vm13, %v5486_v19, -inf  ;;  %v5743_v36 = vsel %vm5672_vm13, %v5487_v10, -inf  ;;  %v5750_v4 = vsel %vm5672_vm13, %v5488_v18, -inf  ;;  %v11526_v24 = vmax.f32 %v5717_v34, %v5718_v32  ;;  %v4592_v32 = vld [vmem:[#allocation2 + $0x112] sm:$0xff] }
 0x7f8   : > { %v5070_v52 = vpop.permute.xlu0 %5069  ;;  %v5731_v59 = vmax.f32 %v5729_v28, %v5730_v42  ;;  %v5737_v20 = vrot.slane %v5736_v7, 4  ;;  %v5744_v22 = vrot.slane %v5743_v36, 4  ;;  %v5751_v2 = vrot.slane %v5750_v4, 4  ;;  %v4411_v28 = vld [vmem:[#allocation2 + $0x1a1] sm:$0xff] }
 0x7f9   : > { %v4300_v62 = vpop.permute.xlu1 %4299  ;;  %5145 = vst.msk [vmem:[#allocation3 + $0xa8] sm:$0xff] %vm5123_vm10, %v5070_v52  ;;  %v5726_v60 = vmax.f32 %v5724_v21, %v5725_v35  ;;  %v11549_v5 = vsel %vm6569_vm12, %v5693_v6, -inf  ;;  %v5707_v44 = vmax.f32 %v5705_v54, %v5706_v23  ;;  %v5713_v45 = vrot.slane %v5712_v56, 1 }
 0x7fa   : > { %4374 = vst.msk [vmem:[#allocation3 + $0xb0] sm:$0xff] %vm4351_vm5, %v4300_v62  ;;  %v5165_v50 = vld [vmem:[#allocation3 + $0x48] sm:$0xff]  ;;  %v5732_v37 = vrot.slane %v5731_v59, 2  ;;  %v5738_v33 = vmax.f32 %v5736_v7, %v5737_v20  ;;  %v5745_v26 = vmax.f32 %v5743_v36, %v5744_v22  ;;  %v5752_v55 = vmax.f32 %v5750_v4, %v5751_v2 }
 0x7fb   : > { %9144 = vmatmul.msk.f32.gmra.mxu0 %vm5202_vm11, %v5165_v50  ;;  %v5720_v34 = vrot.slane %v11526_v24, 1  ;;  %v5727_v47 = vrot.slane %v5726_v60, 1  ;;  %v11563_v42 = vsel %vm6569_vm12, %v5700_v39, -inf  ;;  %v5714_v62 = vmax.f32 %v5712_v56, %v5713_v45 }
 0x7fc   : > { %v5733_v48 = vmax.f32 %v5731_v59, %v5732_v37  ;;  %v5739_v11 = vrot.slane %v5738_v33, 2  ;;  %v5746_v1 = vrot.slane %v5745_v26, 2  ;;  %v5753_v15 = vrot.slane %v5752_v55, 2 }
 0x7fd   : > { %5055 = vrot.lane.b32.xlu2 %v4977_v3, %s13489_s26  ;;  %v5721_v2 = vmax.f32 %v11526_v24, %v5720_v34  ;;  %v5728_v50 = vmax.f32 %v5726_v60, %v5727_v47  ;;  %v11578_v3 = vsel %vm6569_vm12, %v5707_v44, -inf  ;;  %v11594_v24 = vsel %vm6569_vm12, %v5714_v62, -inf  ;;  %v4797_v44 = vld [vmem:[#allocation2 + $0x1a3] sm:$0xff] }
 0x7fe   : > { %5079 = vrot.lane.b32.xlu0 %v4989_v61, %s13489_s26  ;;  %v5329_v46 = vpop.f32.mrf.mxu0  ;;  %v5734_v8 = vrot.slane %v5733_v48, 1  ;;  %v5740_v38 = vmax.f32 %v5738_v33, %v5739_v11  ;;  %v5747_v43 = vmax.f32 %v5745_v26, %v5746_v1  ;;  %v5754_v18 = vmax.f32 %v5752_v55, %v5753_v15  ;;  %v4604_v15 = vld [vmem:[#allocation2 + $0x1a2] sm:$0xff] }
 0x7ff   : > { %4309 = vrot.lane.b32.xlu1 %v4218_v57, %s9395_s22  ;;  %v5330_v40 = vadd.f32 %v11462_v27, %v5329_v46  ;;  %v11539_v31 = vpop.permute.xlu2 %4470  ;;  %v11599_v46 = vsel %vm6569_vm12, %v5721_v2, -inf }
 0x800   : > { %v11546_v13 = vpop.permute.xlu0 %4492  ;;  %v5177_v16 = vld [vmem:[#allocation3 + $0xa8] sm:$0xff]  ;;  %v5741_v19 = vrot.slane %v5740_v38, 1  ;;  %v5748_v10 = vrot.slane %v5747_v43, 1  ;;  %v5735_v7 = vmax.f32 %v5733_v48, %v5734_v8  ;;  %v5755_v59 = vrot.slane %v5754_v18, 1  ;;  %4556 = vst.msk [vmem:[#allocation3 + $0x58] sm:$0xff] %vm4544_vm7, %v11539_v31 }
 0x801   : > { %v5419_v14 = vmax.f32 %v5330_v40, 0.0  ;;  %v11553_v17 = vpop.permute.xlu1 %4661  ;;  %9156 = vmatmul.msk.f32.gmra.mxu1 %vm5202_vm11, %v5177_v16  ;;  %4567 = vst.msk [vmem:[#allocation3 + $0xb0] sm:$0xff] %vm4544_vm7, %v11546_v13 }
 0x802   : > { %v5742_v36 = vmax.f32 %v5740_v38, %v5741_v19  ;;  %v5749_v52 = vmax.f32 %v5747_v43, %v5748_v10  ;;  %v6571_v25 = vsel %vm6569_vm12, %v5735_v7, -inf  ;;  %v5756_v48 = vmax.f32 %v5754_v18, %v5755_v59  ;;  %4748 = vst.msk [vmem:[#allocation3 + $0x50] sm:$0xff] %vm4737_vm8, %v11553_v17  ;;  %v4990_v59 = vld [vmem:[#allocation2 + $0x1a4] sm:$0xff] }
 0x803   : > { %v5489_v49 = vrot.slane %v5419_v14, 2  ;;  %v5490_v63 = vrot.slane %v5419_v14, 4  ;;  %v5757_v21 = vsel %vm5672_vm13, %v5419_v14, -inf  ;;  %v5491_v4 = vrot.slane %v5419_v14, 6  ;;  %4760 = vst.msk [vmem:[#allocation3 + $0xb0] sm:$0xff] %vm4737_vm8, %v11506_v9 }
 0x804   : > { %v5758_v53 = vrot.slane %v5757_v21, 4  ;;  %v6574_v20 = vsel %vm6569_vm12, %v5742_v36, -inf  ;;  %v6577_v55 = vsel %vm6569_vm12, %v5749_v52, -inf  ;;  %v6572_v39 = vmax.f32 %v11533_v41, %v6571_v25 }
 0x805   : > { %v5764_v54 = vsel %vm5672_vm13, %v5489_v49, -inf  ;;  %v5771_v30 = vsel %vm5672_vm13, %v5490_v63, -inf  ;;  %4478 = vrot.lane.b32.xlu2 %v4399_v29, %s9396_s23  ;;  %v5778_v37 = vsel %vm5672_vm13, %v5491_v4, -inf  ;;  %v6575_v26 = vmax.f32 %v11542_v58, %v6574_v20 }
 0x806   : > { %v5765_v22 = vrot.slane %v5764_v54, 4  ;;  %4502 = vrot.lane.b32.xlu0 %v4411_v28, %s9396_s23  ;;  %v5759_v12 = vmax.f32 %v5757_v21, %v5758_v53  ;;  %v5772_v61 = vrot.slane %v5771_v30, 4  ;;  %v5779_v23 = vrot.slane %v5778_v37, 4 }
 0x807   : > { %v11582_v6 = vpop.permute.xlu2 %4687  ;;  %4671 = vrot.lane.b32.xlu1 %v4592_v32, %s9397_s24  ;;  %v11605_v58 = vsel %vm6569_vm12, %v5728_v50, -inf  ;;  %v6578_v8 = vmax.f32 %v11549_v5, %v6577_v55  ;;  %v6852_v31 = vsel %vm6851_vm15, %v6575_v26, %v6572_v39  ;;  %v6580_v45 = vsel %vm6569_vm12, %v5756_v48, -inf }
 0x808   : > { %v5766_v35 = vmax.f32 %v5764_v54, %v5765_v22  ;;  %v4855_v33 = vpop.permute.xlu0 %4854  ;;  %v5760_v57 = vrot.slane %v5759_v12, 2  ;;  %v5773_v1 = vmax.f32 %v5771_v30, %v5772_v61  ;;  %v5780_v40 = vmax.f32 %v5778_v37, %v5779_v23  ;;  %v4978_v54 = vld [vmem:[#allocation2 + $0x114] sm:$0xff] }
 0x809   : > { %v4879_v56 = vpop.permute.xlu1 %4878  ;;  %4941 = vst.msk [vmem:[#allocation3 + $0x50] sm:$0xff] %vm4930_vm9, %v4855_v33  ;;  %v6854_v34 = vsel %vm6853_vm0, %v6578_v8, %v6852_v31  ;;  %v6581_v49 = vmax.f32 %v11563_v42, %v6580_v45  ;;  %v4219_v61 = vld [vmem:[#allocation2 + $0x1b0] sm:$0xff] }
 0x80a   : > { %v5767_v11 = vrot.slane %v5766_v35, 2  ;;  %v5761_v60 = vmax.f32 %v5759_v12, %v5760_v57  ;;  %v5774_v43 = vrot.slane %v5773_v1, 2  ;;  %v5781_v41 = vrot.slane %v5780_v40, 2  ;;  %4953 = vst.msk [vmem:[#allocation3 + $0xb0] sm:$0xff] %vm4930_vm9, %v4879_v56  ;;  %v4605_v45 = vld [vmem:[#allocation2 + $0x1b2] sm:$0xff] }
 0x80b   : > { %5134 = vst.msk [vmem:[#allocation3 + $0x50] sm:$0xff] %vm5123_vm10, %v11518_v51  ;;  %v6856_v30 = vsel %vm13501_vm1, %v6581_v49, %v6854_v34 }
 0x80c   : > { %v5768_v38 = vmax.f32 %v5766_v35, %v5767_v11  ;;  %v5762_v16 = vrot.slane %v5761_v60, 1  ;;  %v5775_v5 = vmax.f32 %v5773_v1, %v5774_v43  ;;  %v5782_v17 = vmax.f32 %v5780_v40, %v5781_v41  ;;  %v4412_v41 = vld [vmem:[#allocation2 + $0x1b1] sm:$0xff] }
 0x80d   : > { %4695 = vrot.lane.b32.xlu2 %v4604_v15, %s9397_s24 }
 0x80e   : > { %v5769_v14 = vrot.slane %v5768_v38, 1  ;;  %4864 = vrot.lane.b32.xlu0 %v4785_v0, %s9398_s25  ;;  %v5763_v13 = vmax.f32 %v5761_v60, %v5762_v16  ;;  %v5776_v10 = vrot.slane %v5775_v5, 1  ;;  %v5783_v63 = vrot.slane %v5782_v17, 1 }
 0x80f   : > { %v11618_v29 = vpop.permute.xlu2 %5049  ;;  %v5332_v9 = vpop.f32.mrf.mxu0  ;;  %4888 = vrot.lane.b32.xlu1 %v4797_v44, %s9398_s25 }
 0x810   : > { %v5770_v19 = vmax.f32 %v5768_v38, %v5769_v14  ;;  %v5333_v18 = vadd.f32 %v11462_v27, %v5332_v9  ;;  %v5368_v28 = vpop.f32.mrf.mxu1  ;;  %v5072_v47 = vpop.permute.xlu0 %5071  ;;  %v6583_v21 = vsel %vm6569_vm12, %v5763_v13, -inf  ;;  %v5777_v4 = vmax.f32 %v5775_v5, %v5776_v10  ;;  %v4798_v9 = vld [vmem:[#allocation2 + $0x1b3] sm:$0xff] }
 0x811   : > { %v5369_v7 = vadd.f32 %v11462_v27, %v5368_v28  ;;  %v4302_v36 = vpop.permute.xlu1 %4301  ;;  %5146 = vst.msk [vmem:[#allocation3 + $0xb0] sm:$0xff] %vm5123_vm10, %v5072_v47  ;;  %v6584_v52 = vmax.f32 %v11578_v3, %v6583_v21  ;;  %v5784_v42 = vmax.f32 %v5782_v17, %v5783_v63 }
 0x812   : > { %v6586_v51 = vsel %vm6569_vm12, %v5770_v19, -inf  ;;  %v5420_v53 = vmax.f32 %v5333_v18, 0.0  ;;  %4375 = vst.msk [vmem:[#allocation3 + $0xb8] sm:$0xff] %vm4351_vm5, %v4302_v36  ;;  %v6589_v20 = vsel %vm6569_vm12, %v5777_v4, -inf }
 0x813   : > { %v6587_v32 = vmax.f32 %v11594_v24, %v6586_v51  ;;  %v5432_v62 = vmax.f32 %v5369_v7, 0.0  ;;  %v6858_v22 = vsel %vm13473_vm2, %v6584_v52, %v6856_v30  ;;  %v6590_v3 = vmax.f32 %v11599_v46, %v6589_v20  ;;  %v5166_v24 = vld [vmem:[#allocation3 + $0x50] sm:$0xff]  ;;  %v4220_v30 = vld [vmem:[#allocation2 + $0x1b8] sm:$0xff] }
 0x814   : > { %v5492_v2 = vrot.slane %v5420_v53, 2  ;;  %v5493_v50 = vrot.slane %v5420_v53, 4  ;;  %v6592_v12 = vsel %vm6569_vm12, %v5784_v42, -inf  ;;  %v5494_v35 = vrot.slane %v5420_v53, 6  ;;  %9145 = vmatmul.msk.f32.gmra.mxu0 %vm5202_vm11, %v5166_v24  ;;  %v4413_v20 = vld [vmem:[#allocation2 + $0x1b9] sm:$0xff] }
 0x815   : > { %v6860_v25 = vsel %vm13472_vm3, %v6587_v32, %v6858_v22  ;;  %5057 = vrot.lane.b32.xlu2 %v4978_v54, %s13489_s26  ;;  %v6593_v37 = vmax.f32 %v11605_v58, %v6592_v12  ;;  %v5785_v33 = vsel %vm5672_vm13, %v5420_v53, -inf  ;;  %v5528_v15 = vrot.slane %v5432_v62, 2  ;;  %v4991_v54 = vld [vmem:[#allocation2 + $0x1b4] sm:$0xff] }
 0x816   : > { %v5792_v26 = vsel %vm5672_vm13, %v5492_v2, -inf  ;;  %v5799_v55 = vsel %vm5672_vm13, %v5493_v50, -inf  ;;  %5081 = vrot.lane.b32.xlu0 %v4990_v59, %s13489_s26  ;;  %v6862_v57 = vsel %vm13471_vm4, %v6590_v3, %v6860_v25  ;;  %v5786_v23 = vrot.slane %v5785_v33, 4 }
 0x817   : > { %v5793_v56 = vrot.slane %v5792_v26, 4  ;;  %v4473_v48 = vpop.permute.xlu2 %4472  ;;  %v6864_v11 = vsel %vm13470_vm6, %v6593_v37, %v6862_v57  ;;  %v5806_v1 = vsel %vm5672_vm13, %v5494_v35, -inf  ;;  %v5529_v46 = vrot.slane %v5432_v62, 4  ;;  %4311 = vrot.lane.b32.xlu1 %v4219_v61, %s9395_s22 }
 0x818   : > { %4557 = vst.msk [vmem:[#allocation3 + $0x60] sm:$0xff] %vm4544_vm7, %v4473_v48  ;;  %v4495_v39 = vpop.permute.xlu0 %4494  ;;  %v5178_v60 = vld [vmem:[#allocation3 + $0xb0] sm:$0xff]  ;;  %v5787_v40 = vmax.f32 %v5785_v33, %v5786_v23  ;;  %v5800_v58 = vrot.slane %v5799_v55, 4  ;;  %v5807_v38 = vrot.slane %v5806_v1, 4  ;;  %v5530_v43 = vrot.slane %v5432_v62, 6 }
 0x819   : > { %6923 = vst.msk [vmem:[#allocation4 + $0x22] sm:$0xff] %vm6569_vm12, %v6864_v11  ;;  %v5794_v0 = vmax.f32 %v5792_v26, %v5793_v56  ;;  %v4664_v8 = vpop.permute.xlu1 %4663  ;;  %9157 = vmatmul.msk.f32.gmra.mxu1 %vm5202_vm11, %v5178_v60  ;;  %v6121_v31 = vsel %vm5672_vm13, %v5432_v62, -inf  ;;  %v6128_v16 = vsel %vm5672_vm13, %v5528_v15, -inf  ;;  %v6135_v44 = vsel %vm5672_vm13, %v5529_v46, -inf  ;;  %v4606_v46 = vld [vmem:[#allocation2 + $0x1ba] sm:$0xff] }
 0x81a   : > { %4749 = vst.msk [vmem:[#allocation3 + $0x58] sm:$0xff] %vm4737_vm8, %v4664_v8  ;;  %v6122_v14 = vrot.slane %v6121_v31, 4  ;;  %v6129_v5 = vrot.slane %v6128_v16, 4  ;;  %v5788_v13 = vrot.slane %v5787_v40, 2  ;;  %v5801_v17 = vmax.f32 %v5799_v55, %v5800_v58  ;;  %v4799_v58 = vld [vmem:[#allocation2 + $0x1bb] sm:$0xff] }
 0x81b   : > { %4568 = vst.msk [vmem:[#allocation3 + $0xb8] sm:$0xff] %vm4544_vm7, %v4495_v39  ;;  %v5795_v34 = vrot.slane %v5794_v0, 2  ;;  %v5808_v19 = vmax.f32 %v5806_v1, %v5807_v38  ;;  %v6136_v10 = vrot.slane %v6135_v44, 4  ;;  %v6142_v18 = vsel %vm5672_vm13, %v5530_v43, -inf }
 0x81c   : > { %4761 = vst.msk [vmem:[#allocation3 + $0xb8] sm:$0xff] %vm4737_vm8, %v11582_v6  ;;  %v6123_v47 = vmax.f32 %v6121_v31, %v6122_v14  ;;  %v6130_v49 = vmax.f32 %v6128_v16, %v6129_v5  ;;  %v5802_v6 = vrot.slane %v5801_v17, 2  ;;  %v6143_v21 = vrot.slane %v6142_v18, 4  ;;  %v4992_v14 = vld [vmem:[#allocation2 + $0x1bc] sm:$0xff] }
 0x81d   : > { %4504 = vrot.lane.b32.xlu2 %v4412_v41, %s9396_s23  ;;  %v5789_v4 = vmax.f32 %v5787_v40, %v5788_v13  ;;  %v5796_v52 = vmax.f32 %v5794_v0, %v5795_v34  ;;  %v5809_v51 = vrot.slane %v5808_v19, 2  ;;  %v6137_v53 = vmax.f32 %v6135_v44, %v6136_v10 }
 0x81e   : > { %4697 = vrot.lane.b32.xlu0 %v4605_v45, %s9397_s24  ;;  %v6124_v42 = vrot.slane %v6123_v47, 2  ;;  %v6131_v32 = vrot.slane %v6130_v49, 2  ;;  %v11674_v62 = vmax.f32 %v5801_v17, %v5802_v6  ;;  %v6144_v59 = vmax.f32 %v6142_v18, %v6143_v21 }
 0x81f   : > { %v11663_v28 = vpop.permute.xlu2 %4689  ;;  %4890 = vrot.lane.b32.xlu1 %v4798_v9, %s9398_s25  ;;  %v5790_v22 = vrot.slane %v5789_v4, 1  ;;  %v5797_v2 = vrot.slane %v5796_v52, 1  ;;  %v11677_v50 = vmax.f32 %v5808_v19, %v5809_v51  ;;  %v6138_v3 = vrot.slane %v6137_v53, 2 }
 0x820   : > { %v4857_v63 = vpop.permute.xlu0 %4856  ;;  %v11667_v36 = vld [vmem:[#allocation4 + $0x20] sm:$0xff]  ;;  %v11683_v61 = vmax.f32 %v6123_v47, %v6124_v42  ;;  %v11685_v37 = vmax.f32 %v6130_v49, %v6131_v32  ;;  %v5804_v26 = vrot.slane %v11674_v62, 1  ;;  %v6145_v55 = vrot.slane %v6144_v59, 2 }
 0x821   : > { %v4881_v7 = vpop.permute.xlu1 %4880  ;;  %4942 = vst.msk [vmem:[#allocation3 + $0x58] sm:$0xff] %vm4930_vm9, %v4857_v63  ;;  %v11691_v24 = vmax.f32 %v5789_v4, %v5790_v22  ;;  %v11693_v48 = vmax.f32 %v5796_v52, %v5797_v2  ;;  %v5811_v11 = vrot.slane %v11677_v50, 1  ;;  %v11696_v1 = vmax.f32 %v6137_v53, %v6138_v3  ;;  %v4221_v22 = vld [vmem:[#allocation2 + $0x1c8] sm:$0xff] }
 0x822   : > { %4954 = vst.msk [vmem:[#allocation3 + $0xb8] sm:$0xff] %vm4930_vm9, %v4881_v7  ;;  %v6126_v8 = vrot.slane %v11683_v61, 1  ;;  %v6133_v38 = vrot.slane %v11685_v37, 1  ;;  %v11703_v16 = vmax.f32 %v6144_v59, %v6145_v55 }
 0x823   : > { %5135 = vst.msk [vmem:[#allocation3 + $0x58] sm:$0xff] %vm5123_vm10, %v11618_v29 }
 0x824   : > { %6941 = vst.msk [vmem:[#allocation5 + $0x20] sm:$0xff] %vm6569_vm12, %v11667_v36  ;;  %v6147_v55 = vrot.slane %v11703_v16, 1 }
 0x825   : > { %5083 = vrot.lane.b32.xlu2 %v4991_v54, %s13489_s26 }
 0x826   : > { %4313 = vrot.lane.b32.xlu0 %v4220_v30, %s9395_s22  ;;  %v5335_v29 = vpop.f32.mrf.mxu0 }
 0x827   : > { %v11680_v12 = vpop.permute.xlu2 %5051  ;;  %v5336_v25 = vadd.f32 %v11462_v27, %v5335_v29  ;;  %v5371_v35 = vpop.f32.mrf.mxu1  ;;  %4506 = vrot.lane.b32.xlu1 %v4413_v20, %s9396_s23 }
 0x828   : > { %v5074_v33 = vpop.permute.xlu0 %5073  ;;  %v5372_v23 = vadd.f32 %v11462_v27, %v5371_v35  ;;  %v4414_v35 = vld [vmem:[#allocation2 + $0x1c9] sm:$0xff] }
 0x829   : > { %v5421_v57 = vmax.f32 %v5336_v25, 0.0  ;;  %v4304_v56 = vpop.permute.xlu1 %4303  ;;  %5147 = vst.msk [vmem:[#allocation3 + $0xb8] sm:$0xff] %vm5123_vm10, %v5074_v33  ;;  %v6140_v33 = vrot.slane %v11696_v1, 1 }
 0x82a   : > { %4376 = vst.msk [vmem:[#allocation3 + $0xc0] sm:$0xff] %vm4351_vm5, %v4304_v56  ;;  %v5167_v15 = vld [vmem:[#allocation3 + $0x58] sm:$0xff]  ;;  %v5433_v31 = vmax.f32 %v5372_v23, 0.0 }
 0x82b   : > { %v5495_v39 = vrot.slane %v5421_v57, 2  ;;  %v5496_v60 = vrot.slane %v5421_v57, 4  ;;  %v5497_v40 = vrot.slane %v5421_v57, 6  ;;  %v5813_v0 = vsel %vm5672_vm13, %v5421_v57, -inf  ;;  %9146 = vmatmul.msk.f32.gmra.mxu0 %vm5202_vm11, %v5167_v15 }
 0x82c   : > { %v5814_v43 = vrot.slane %v5813_v0, 4  ;;  %v5531_v34 = vrot.slane %v5433_v31, 2  ;;  %v5532_v19 = vrot.slane %v5433_v31, 4  ;;  %v5533_v10 = vrot.slane %v5433_v31, 6 }
 0x82d   : > { %v5820_v41 = vsel %vm5672_vm13, %v5495_v39, -inf  ;;  %v5827_v44 = vsel %vm5672_vm13, %v5496_v60, -inf  ;;  %v5834_v45 = vsel %vm5672_vm13, %v5497_v40, -inf  ;;  %4699 = vrot.lane.b32.xlu2 %v4606_v46, %s9397_s24  ;;  %v6149_v18 = vsel %vm5672_vm13, %v5433_v31, -inf  ;;  %v4607_v60 = vld [vmem:[#allocation2 + $0x1ca] sm:$0xff] }
 0x82e   : > { %v5815_v5 = vmax.f32 %v5813_v0, %v5814_v43  ;;  %v5821_v13 = vrot.slane %v5820_v41, 4  ;;  %v5828_v17 = vrot.slane %v5827_v44, 4  ;;  %v5835_v9 = vrot.slane %v5834_v45, 4  ;;  %4892 = vrot.lane.b32.xlu0 %v4799_v58, %s9398_s25 }
 0x82f   : > { %v4475_v47 = vpop.permute.xlu2 %4474  ;;  %5085 = vrot.lane.b32.xlu1 %v4992_v14, %s13489_s26  ;;  %v6150_v52 = vrot.slane %v6149_v18, 4  ;;  %v6156_v51 = vsel %vm5672_vm13, %v5531_v34, -inf  ;;  %v6163_v53 = vsel %vm5672_vm13, %v5532_v19, -inf  ;;  %v6170_v54 = vsel %vm5672_vm13, %v5533_v10, -inf }
 0x830   : > { %v5816_v49 = vrot.slane %v5815_v5, 2  ;;  %v5822_v63 = vmax.f32 %v5820_v41, %v5821_v13  ;;  %v5829_v6 = vmax.f32 %v5827_v44, %v5828_v17  ;;  %v5836_v21 = vmax.f32 %v5834_v45, %v5835_v9  ;;  %4558 = vst.msk [vmem:[#allocation3 + $0x68] sm:$0xff] %vm4544_vm7, %v4475_v47  ;;  %v4497_v7 = vpop.permute.xlu0 %4496  ;;  %v5179_v4 = vld [vmem:[#allocation3 + $0xb8] sm:$0xff]  ;;  %v4800_v17 = vld [vmem:[#allocation2 + $0x1cb] sm:$0xff] }
 0x831   : > { %v4666_v30 = vpop.permute.xlu1 %4665  ;;  %4569 = vst.msk [vmem:[#allocation3 + $0xc0] sm:$0xff] %vm4544_vm7, %v4497_v7  ;;  %9158 = vmatmul.msk.f32.gmra.mxu1 %vm5202_vm11, %v5179_v4  ;;  %v6151_v2 = vmax.f32 %v6149_v18, %v6150_v52  ;;  %v6157_v3 = vrot.slane %v6156_v51, 4  ;;  %v6164_v29 = vrot.slane %v6163_v53, 4  ;;  %v6171_v25 = vrot.slane %v6170_v54, 4  ;;  %v4993_v18 = vld [vmem:[#allocation2 + $0x1cc] sm:$0xff] }
 0x832   : > { %v5817_v42 = vmax.f32 %v5815_v5, %v5816_v49  ;;  %v5823_v32 = vrot.slane %v5822_v63, 2  ;;  %v5830_v59 = vrot.slane %v5829_v6, 2  ;;  %v5837_v20 = vrot.slane %v5836_v21, 2  ;;  %4750 = vst.msk [vmem:[#allocation3 + $0x60] sm:$0xff] %vm4737_vm8, %v4666_v30 }
 0x833   : > { %4762 = vst.msk [vmem:[#allocation3 + $0xc0] sm:$0xff] %vm4737_vm8, %v11663_v28  ;;  %v6152_v46 = vrot.slane %v6151_v2, 2  ;;  %v6158_v39 = vmax.f32 %v6156_v51, %v6157_v3  ;;  %v5805_v40 = vmax.f32 %v11674_v62, %v5804_v26  ;;  %v5812_v28 = vmax.f32 %v11677_v50, %v5811_v11 }
 0x834   : > { %v5824_v57 = vmax.f32 %v5822_v63, %v5823_v32  ;;  %v5831_v23 = vmax.f32 %v5829_v6, %v5830_v59  ;;  %v5818_v56 = vrot.slane %v5817_v42, 1  ;;  %v5838_v15 = vmax.f32 %v5836_v21, %v5837_v20 }
 0x835   : > { %4315 = vrot.lane.b32.xlu2 %v4221_v22, %s9395_s22  ;;  %v11732_v0 = vsel %vm6569_vm12, %v11691_v24, -inf  ;;  %v6127_v58 = vmax.f32 %v11683_v61, %v6126_v8  ;;  %v6134_v43 = vmax.f32 %v11685_v37, %v6133_v38  ;;  %v6165_v41 = vmax.f32 %v6163_v53, %v6164_v29 }
 0x836   : > { %4508 = vrot.lane.b32.xlu0 %v4414_v35, %s9396_s23  ;;  %v5825_v31 = vrot.slane %v5824_v57, 1  ;;  %v6172_v44 = vmax.f32 %v6170_v54, %v6171_v25  ;;  %v11741_v62 = vsel %vm6569_vm12, %v11693_v48, -inf  ;;  %v6141_v50 = vmax.f32 %v11696_v1, %v6140_v33  ;;  %v11796_v25 = vld [vmem:[%s13452_s2] ss:$0 sm:$0xff] }
 0x837   : > { %v11737_v45 = vpop.permute.xlu2 %4691  ;;  %v6148_v26 = vmax.f32 %v11703_v16, %v6147_v55  ;;  %v5832_v24 = vrot.slane %v5831_v23, 1  ;;  %4701 = vrot.lane.b32.xlu1 %v4607_v60, %s9397_s24  ;;  %v5819_v8 = vmax.f32 %v5817_v42, %v5818_v56  ;;  %v5839_v37 = vrot.slane %v5838_v15, 1 }
 0x838   : > { %v5338_v61 = vpop.f32.mrf.mxu0  ;;  %v4859_v11 = vpop.permute.xlu0 %4858  ;;  %v11746_v38 = vmax.f32 %v6151_v2, %v6152_v46  ;;  %v6159_v14 = vrot.slane %v6158_v39, 2  ;;  %v11750_v48 = vsel %vm6569_vm12, %v5805_v40, -inf  ;;  %v11753_v1 = vsel %vm6569_vm12, %v5812_v28, -inf  ;;  %v4415_v46 = vld [vmem:[#allocation2 + $0x1d1] sm:$0xff] }
 0x839   : > { %v4883_v5 = vpop.permute.xlu1 %4882  ;;  %4943 = vst.msk [vmem:[#allocation3 + $0x60] sm:$0xff] %vm4930_vm9, %v4859_v11  ;;  %v11756_v16 = vsel %vm6569_vm12, %v6127_v58, -inf  ;;  %v5339_v13 = vadd.f32 %v11462_v27, %v5338_v61  ;;  %v11761_v9 = vsel %vm6569_vm12, %v6134_v43, -inf  ;;  %v5826_v34 = vmax.f32 %v5824_v57, %v5825_v31 }
 0x83a   : > { %4955 = vst.msk [vmem:[#allocation3 + $0xc0] sm:$0xff] %vm4930_vm9, %v4883_v5  ;;  %v6166_v19 = vrot.slane %v6165_v41, 2  ;;  %v6173_v10 = vrot.slane %v6172_v44, 2  ;;  %v11766_v47 = vsel %vm6569_vm12, %v6141_v50, -inf  ;;  %v11769_v49 = vsel %vm6569_vm12, %v6148_v26, -inf  ;;  %v4608_v50 = vld [vmem:[#allocation2 + $0x1d2] sm:$0xff] }
 0x83b   : > { %5136 = vst.msk [vmem:[#allocation3 + $0x60] sm:$0xff] %vm5123_vm10, %v11680_v12  ;;  %v5833_v27 = vmax.f32 %v5831_v23, %v5832_v24  ;;  %v5422_v63 = vmax.f32 %v5339_v13, 0.0  ;;  %v5840_v6 = vmax.f32 %v5838_v15, %v5839_v37  ;;  %v11772_v21 = vsel %vm6569_vm12, %v5819_v8, -inf  ;;  %v4222_v12 = vld [vmem:[#allocation2 + $0x1d0] sm:$0xff] }
 0x83c   : > { %v6154_v7 = vrot.slane %v11746_v38, 1  ;;  %v11775_v4 = vmax.f32 %v6158_v39, %v6159_v14  ;;  %v11781_v42 = vsel %vm6569_vm12, %v5826_v34, -inf  ;;  %v11783_v32 = vmax.f32 %v6165_v41, %v6166_v19  ;;  %v4801_v13 = vld [vmem:[#allocation2 + $0x1d3] sm:$0xff] }
 0x83d   : > { %4894 = vrot.lane.b32.xlu2 %v4800_v17, %s9398_s25  ;;  %v5498_v52 = vrot.slane %v5422_v63, 2  ;;  %v5499_v51 = vrot.slane %v5422_v63, 4  ;;  %v5500_v53 = vrot.slane %v5422_v63, 6  ;;  %v5841_v54 = vsel %vm5672_vm13, %v5422_v63, -inf }
 0x83e   : > { %5087 = vrot.lane.b32.xlu0 %v4993_v18, %s13489_s26  ;;  %v5374_v30 = vpop.f32.mrf.mxu1  ;;  %v11785_v59 = vmax.f32 %v6172_v44, %v6173_v10  ;;  %v5842_v20 = vrot.slane %v5841_v54, 4  ;;  %v11801_v39 = vsel %vm6569_vm12, %v5833_v27, -inf  ;;  %v11804_v60 = vsel %vm6569_vm12, %v5840_v6, -inf }
 0x83f   : > { %v11787_v22 = vpop.permute.xlu2 %5053  ;;  %v5848_v2 = vsel %vm5672_vm13, %v5498_v52, -inf  ;;  %v5855_v3 = vsel %vm5672_vm13, %v5499_v51, -inf  ;;  %v5862_v29 = vsel %vm5672_vm13, %v5500_v53, -inf  ;;  %4317 = vrot.lane.b32.xlu1 %v4222_v12, %s9395_s22  ;;  %v5375_v35 = vadd.f32 %v11796_v25, %v5374_v30  ;;  %s13466_s22 = smov 8  }
 0x840   : > { %v5076_v33 = vpop.permute.xlu0 %5075  ;;  %v5843_v55 = vmax.f32 %v5841_v54, %v5842_v20  ;;  %v5849_v57 = vrot.slane %v5848_v2, 4  ;;  %v5856_v23 = vrot.slane %v5855_v3, 4  ;;  %v5863_v56 = vrot.slane %v5862_v29, 4 }
 0x841   : > { %v4306_v15 = vpop.permute.xlu1 %4305  ;;  %5148 = vst.msk [vmem:[#allocation3 + $0xc0] sm:$0xff] %vm5123_vm10, %v5076_v33  ;;  %v6161_v40 = vrot.slane %v11775_v4, 1  ;;  %v5434_v28 = vmax.f32 %v5375_v35, 0.0 }
 0x842   : > { %4377 = vst.msk [vmem:[#allocation3 + $0xc8] sm:$0xff] %vm4351_vm5, %v4306_v15  ;;  %v5168_v58 = vld [vmem:[#allocation3 + $0x60] sm:$0xff]  ;;  %v5844_v43 = vrot.slane %v5843_v55, 2  ;;  %v5850_v31 = vmax.f32 %v5848_v2, %v5849_v57  ;;  %v5857_v41 = vmax.f32 %v5855_v3, %v5856_v23  ;;  %v5864_v44 = vmax.f32 %v5862_v29, %v5863_v56  ;;  %v4994_v15 = vld [vmem:[#allocation2 + $0x1d4] sm:$0xff] }
 0x843   : > { %9147 = vmatmul.msk.f32.gmra.mxu0 %vm5202_vm11, %v5168_v58  ;;  %v5534_v26 = vrot.slane %v5434_v28, 2  ;;  %v5535_v24 = vrot.slane %v5434_v28, 4  ;;  %v5536_v61 = vrot.slane %v5434_v28, 6  ;;  %v6177_v11 = vsel %vm5672_vm13, %v5434_v28, -inf }
 0x844   : > { %v5845_v8 = vmax.f32 %v5843_v55, %v5844_v43  ;;  %v5851_v37 = vrot.slane %v5850_v31, 2  ;;  %v5858_v14 = vrot.slane %v5857_v41, 2  ;;  %v5865_v5 = vrot.slane %v5864_v44, 2 }
 0x845   : > { %4510 = vrot.lane.b32.xlu2 %v4415_v46, %s9396_s23  ;;  %v6178_v17 = vrot.slane %v6177_v11, 4  ;;  %v6184_v34 = vsel %vm5672_vm13, %v5534_v26, -inf  ;;  %v6191_v19 = vsel %vm5672_vm13, %v5535_v24, -inf  ;;  %v6198_v10 = vsel %vm5672_vm13, %v5536_v61, -inf  ;;  %s13468_s23 = smov 16  }
 0x846   : > { %4703 = vrot.lane.b32.xlu0 %v4608_v50, %s9397_s24  ;;  %v5846_v18 = vrot.slane %v5845_v8, 1  ;;  %v5852_v27 = vmax.f32 %v5850_v31, %v5851_v37  ;;  %v5859_v63 = vmax.f32 %v5857_v41, %v5858_v14  ;;  %v5866_v6 = vmax.f32 %v5864_v44, %v5865_v5  ;;  %v6948_v31 = vld [vmem:[#allocation4 + $0x11] sm:$0xff]  ;;  %s13485_s24 = smov 32  }
 0x847   : > { %v4477_v12 = vpop.permute.xlu2 %4476  ;;  %v6179_v52 = vmax.f32 %v6177_v11, %v6178_v17  ;;  %v6185_v51 = vrot.slane %v6184_v34, 4  ;;  %v6192_v53 = vrot.slane %v6191_v19, 4  ;;  %v6199_v54 = vrot.slane %v6198_v10, 4  ;;  %4896 = vrot.lane.b32.xlu1 %v4801_v13, %s9398_s25  ;;  %v6997_v37 = vld [vmem:[#allocation4 + $0x12] sm:$0xff]  ;;  %s13487_s25 = smov 40  }
 0x848   : > { %4559 = vst.msk [vmem:[#allocation3 + $0x70] sm:$0xff] %vm4544_vm7, %v4477_v12  ;;  %v4499_v30 = vpop.permute.xlu0 %4498  ;;  %v5180_v20 = vld [vmem:[#allocation3 + $0xc0] sm:$0xff]  ;;  %v5847_v2 = vmax.f32 %v5845_v8, %v5846_v18  ;;  %v5853_v3 = vrot.slane %v5852_v27, 1  ;;  %v5860_v29 = vrot.slane %v5859_v63, 1  ;;  %v5867_v35 = vrot.slane %v5866_v6, 1 }
 0x849   : > { %v4668_v33 = vpop.permute.xlu1 %4667  ;;  %4570 = vst.msk [vmem:[#allocation3 + $0xc8] sm:$0xff] %vm4544_vm7, %v4499_v30  ;;  %9159 = vmatmul.msk.f32.gmra.mxu1 %vm5202_vm11, %v5180_v20  ;;  %v6180_v55 = vrot.slane %v6179_v52, 2  ;;  %v6186_v57 = vmax.f32 %v6184_v34, %v6185_v51  ;;  %v6193_v23 = vmax.f32 %v6191_v19, %v6192_v53  ;;  %v6200_v56 = vmax.f32 %v6198_v10, %v6199_v54  ;;  %v7046_v20 = vld [vmem:[#allocation4 + $0x13] sm:$0xff] }
 0x84a   : > { %4751 = vst.msk [vmem:[#allocation3 + $0x68] sm:$0xff] %vm4737_vm8, %v4668_v33  ;;  %v5854_v46 = vmax.f32 %v5852_v27, %v5853_v3  ;;  %v5861_v28 = vmax.f32 %v5859_v63, %v5860_v29  ;;  %v5868_v58 = vmax.f32 %v5866_v6, %v5867_v35  ;;  %v6595_v43 = vsel %vm6569_vm12, %v5847_v2, -inf }
 0x84b   : > { %4763 = vst.msk [vmem:[#allocation3 + $0xc8] sm:$0xff] %vm4737_vm8, %v11737_v45  ;;  %v6168_v41 = vrot.slane %v11783_v32, 1  ;;  %v6181_v44 = vmax.f32 %v6179_v52, %v6180_v55  ;;  %v6187_v50 = vrot.slane %v6186_v57, 2  ;;  %v6194_v26 = vrot.slane %v6193_v23, 2 }
 0x84c   : > { %v6175_v24 = vrot.slane %v11785_v59, 1  ;;  %v6598_v61 = vsel %vm6569_vm12, %v5854_v46, -inf  ;;  %v6601_v11 = vsel %vm6569_vm12, %v5861_v28, -inf  ;;  %v6201_v8 = vrot.slane %v6200_v56, 2 }
 0x84d   : > { %5089 = vrot.lane.b32.xlu2 %v4994_v15, %s13489_s26  ;;  %v6596_v14 = vmax.f32 %v11732_v0, %v6595_v43  ;;  %v6599_v45 = vmax.f32 %v11741_v62, %v6598_v61  ;;  %v6604_v5 = vsel %vm6569_vm12, %v5868_v58, -inf  ;;  %v6182_v13 = vrot.slane %v6181_v44, 1 }
 0x84e   : > { %6965 = vrot.lane.b32.xlu0 %v6948_v31, %s13466_s22  ;;  %v6602_v17 = vmax.f32 %v11750_v48, %v6601_v11  ;;  %v6188_v34 = vmax.f32 %v6186_v57, %v6187_v50  ;;  %v6195_v19 = vmax.f32 %v6193_v23, %v6194_v26  ;;  %v6202_v10 = vmax.f32 %v6200_v56, %v6201_v8 }
 0x84f   : > { %v11833_v18 = vpop.permute.xlu2 %4693  ;;  %v5341_v27 = vpop.f32.mrf.mxu0  ;;  %v6155_v0 = vmax.f32 %v11746_v38, %v6154_v7  ;;  %v11841_v62 = vmax.f32 %v11775_v4, %v6161_v40  ;;  %v6865_v63 = vsel %vm6851_vm15, %v6599_v45, %v6596_v14  ;;  %7014 = vrot.lane.b32.xlu1 %v6997_v37, %s13468_s23  ;;  %v6183_v52 = vmax.f32 %v6181_v44, %v6182_v13 }
 0x850   : > { %v5342_v48 = vadd.f32 %v11796_v25, %v5341_v27  ;;  %v5377_v6 = vpop.f32.mrf.mxu1  ;;  %v4861_v12 = vpop.permute.xlu0 %4860  ;;  %v6189_v51 = vrot.slane %v6188_v34, 1  ;;  %v6196_v53 = vrot.slane %v6195_v19, 1  ;;  %v6203_v54 = vrot.slane %v6202_v10, 1 }
 0x851   : > { %v4885_v30 = vpop.permute.xlu1 %4884  ;;  %4944 = vst.msk [vmem:[#allocation3 + $0x68] sm:$0xff] %vm4930_vm9, %v4861_v12  ;;  %v11848_v38 = vmax.f32 %v11783_v32, %v6168_v41  ;;  %v11851_v7 = vmax.f32 %v11785_v59, %v6175_v24  ;;  %v6605_v4 = vmax.f32 %v11753_v1, %v6604_v5  ;;  %v6866_v2 = vsel %vm6853_vm0, %v6602_v17, %v6865_v63  ;;  %v7095_v32 = vld [vmem:[#allocation4 + $0x14] sm:$0xff] }
 0x852   : > { %v5423_v40 = vmax.f32 %v5342_v48, 0.0  ;;  %4956 = vst.msk [vmem:[#allocation3 + $0xc8] sm:$0xff] %vm4930_vm9, %v4885_v30  ;;  %v6190_v3 = vmax.f32 %v6188_v34, %v6189_v51  ;;  %v6197_v29 = vmax.f32 %v6195_v19, %v6196_v53  ;;  %v5378_v35 = vadd.f32 %v11796_v25, %v5377_v6  ;;  %v7194_v53 = vld [vmem:[#allocation4 + $0x21] sm:$0xff] }
 0x853   : > { %5137 = vst.msk [vmem:[#allocation3 + $0x68] sm:$0xff] %vm5123_vm10, %v11787_v22  ;;  %v11861_v1 = vsel %vm6569_vm12, %v6155_v0, -inf  ;;  %v6204_v23 = vmax.f32 %v6202_v10, %v6203_v54  ;;  %v11864_v56 = vsel %vm6569_vm12, %v6183_v52, -inf  ;;  %v11868_v46 = vsel %vm13501_vm1, %v6605_v4, %v6866_v2 }
 0x854   : > { %v5501_v33 = vrot.slane %v5423_v40, 2  ;;  %v5502_v55 = vrot.slane %v5423_v40, 4  ;;  %v5503_v59 = vrot.slane %v5423_v40, 6  ;;  %v5869_v57 = vsel %vm5672_vm13, %v5423_v40, -inf }
 0x855   : > { %v5870_v15 = vrot.slane %v5869_v57, 4  ;;  %7063 = vrot.lane.b32.xlu2 %v7046_v20, %s13464_s21  ;;  %v11871_v22 = vsel %vm6569_vm12, %v6190_v3, -inf  ;;  %v11874_v28 = vsel %vm6569_vm12, %v6197_v29, -inf  ;;  %v6668_v26 = vmax.f32 %v11756_v16, %v11864_v56  ;;  %v11899_v20 = vld [vmem:[#allocation4 + $0x22] sm:$0xff] }
 0x856   : > { %v5876_v58 = vsel %vm5672_vm13, %v5501_v33, -inf  ;;  %7112 = vrot.lane.b32.xlu0 %v7095_v32, %s13485_s24  ;;  %v5883_v41 = vsel %vm5672_vm13, %v5502_v55, -inf  ;;  %v5890_v44 = vsel %vm5672_vm13, %v5503_v59, -inf  ;;  %v5435_v11 = vmax.f32 %v5378_v35, 0.0 }
 0x857   : > { %v5871_v43 = vmax.f32 %v5869_v57, %v5870_v15  ;;  %v5877_v31 = vrot.slane %v5876_v58, 4  ;;  %v11880_v50 = vpop.permute.xlu2 %5055  ;;  %v5884_v24 = vrot.slane %v5883_v41, 4  ;;  %v5891_v61 = vrot.slane %v5890_v44, 4  ;;  %7162 = vrot.lane.b32.xlu1 %v11667_v36, %s13487_s25  ;;  %v11905_v57 = vld [vmem:[#allocation4 + $0x23] sm:$0xff] }
 0x858   : > { %v5078_v8 = vpop.permute.xlu0 %5077  ;;  %v6671_v37 = vmax.f32 %v11761_v9, %v11871_v22  ;;  %v11889_v14 = vsel %vm6569_vm12, %v6204_v23, -inf  ;;  %v6674_v17 = vmax.f32 %v11766_v47, %v11874_v28  ;;  %v5537_v10 = vrot.slane %v5435_v11, 2 }
 0x859   : > { %v5872_v45 = vrot.slane %v5871_v43, 2  ;;  %v5878_v5 = vmax.f32 %v5876_v58, %v5877_v31  ;;  %v4308_v13 = vpop.permute.xlu1 %4307  ;;  %5149 = vst.msk [vmem:[#allocation3 + $0xc8] sm:$0xff] %vm5123_vm10, %v5078_v8  ;;  %v5885_v34 = vmax.f32 %v5883_v41, %v5884_v24  ;;  %v5892_v19 = vmax.f32 %v5890_v44, %v5891_v61 }
 0x85a   : > { %4378 = vst.msk [vmem:[#allocation3 + $0xd0] sm:$0xff] %vm4351_vm5, %v4308_v13  ;;  %v5169_v36 = vld [vmem:[#allocation3 + $0x68] sm:$0xff]  ;;  %v5538_v63 = vrot.slane %v5435_v11, 4  ;;  %v5539_v48 = vrot.slane %v5435_v11, 6  ;;  %v6205_v52 = vsel %vm5672_vm13, %v5435_v11, -inf  ;;  %v6212_v51 = vsel %vm5672_vm13, %v5537_v10, -inf }
 0x85b   : > { %v5873_v27 = vmax.f32 %v5871_v43, %v5872_v45  ;;  %v5879_v0 = vrot.slane %v5878_v5, 2  ;;  %9148 = vmatmul.msk.f32.gmra.mxu0 %vm5202_vm11, %v5169_v36  ;;  %v5886_v6 = vrot.slane %v5885_v34, 2  ;;  %v5893_v12 = vrot.slane %v5892_v19, 2 }
 0x85c   : > { %v6206_v4 = vrot.slane %v6205_v52, 4  ;;  %v6213_v40 = vrot.slane %v6212_v51, 4  ;;  %v6219_v29 = vsel %vm5672_vm13, %v5538_v63, -inf  ;;  %v6226_v35 = vsel %vm5672_vm13, %v5539_v48, -inf }
 0x85d   : > { %v5874_v54 = vrot.slane %v5873_v27, 1  ;;  %v5880_v30 = vmax.f32 %v5878_v5, %v5879_v0  ;;  %7211 = vrot.lane.b32.xlu2 %v7194_v53, %s13510_s27  ;;  %v5887_v2 = vmax.f32 %v5885_v34, %v5886_v6  ;;  %v5894_v3 = vmax.f32 %v5892_v19, %v5893_v12 }
 0x85e   : > { %7260 = vrot.lane.b32.xlu0 %v11899_v20, %s13479_s28  ;;  %v6207_v55 = vmax.f32 %v6205_v52, %v6206_v4  ;;  %v6214_v59 = vmax.f32 %v6212_v51, %v6213_v40  ;;  %v6220_v43 = vrot.slane %v6219_v29, 4  ;;  %v6227_v31 = vrot.slane %v6226_v35, 4 }
 0x85f   : > { %v5875_v32 = vmax.f32 %v5873_v27, %v5874_v54  ;;  %v5881_v33 = vrot.slane %v5880_v30, 1  ;;  %v4479_v23 = vpop.permute.xlu2 %4478  ;;  %v5888_v15 = vrot.slane %v5887_v2, 1  ;;  %v5895_v58 = vrot.slane %v5894_v3, 1  ;;  %7309 = vrot.lane.b32.xlu1 %v11905_v57, %s13481_s14 }
 0x860   : > { %4560 = vst.msk [vmem:[#allocation3 + $0x78] sm:$0xff] %vm4544_vm7, %v4479_v23  ;;  %v4501_v41 = vpop.permute.xlu0 %4500  ;;  %v5181_v44 = vld [vmem:[#allocation3 + $0xc8] sm:$0xff]  ;;  %v6208_v11 = vrot.slane %v6207_v55, 2  ;;  %v6215_v8 = vrot.slane %v6214_v59, 2  ;;  %v6221_v19 = vmax.f32 %v6219_v29, %v6220_v43  ;;  %v6228_v0 = vmax.f32 %v6226_v35, %v6227_v31 }
 0x861   : > { %v5882_v24 = vmax.f32 %v5880_v30, %v5881_v33  ;;  %v6607_v61 = vsel %vm6569_vm12, %v5875_v32, -inf  ;;  %v4670_v45 = vpop.permute.xlu1 %4669  ;;  %4571 = vst.msk [vmem:[#allocation3 + $0xd0] sm:$0xff] %vm4544_vm7, %v4501_v41  ;;  %9160 = vmatmul.msk.f32.gmra.mxu1 %vm5202_vm11, %v5181_v44  ;;  %v5889_v5 = vmax.f32 %v5887_v2, %v5888_v15  ;;  %v5896_v13 = vmax.f32 %v5894_v3, %v5895_v58 }
 0x862   : > { %v6608_v34 = vmax.f32 %v11772_v21, %v6607_v61  ;;  %4752 = vst.msk [vmem:[#allocation3 + $0x70] sm:$0xff] %vm4737_vm8, %v4670_v45  ;;  %v6209_v36 = vmax.f32 %v6207_v55, %v6208_v11  ;;  %v6216_v27 = vmax.f32 %v6214_v59, %v6215_v8  ;;  %v6886_v12 = vsel %vm6851_vm15, %v6671_v37, %v6668_v26 }
 0x863   : > { %v6610_v10 = vsel %vm6569_vm12, %v5882_v24, -inf  ;;  %4764 = vst.msk [vmem:[#allocation3 + $0xd0] sm:$0xff] %vm4737_vm8, %v11833_v18  ;;  %v6613_v48 = vsel %vm6569_vm12, %v5889_v5, -inf  ;;  %v6616_v6 = vsel %vm6569_vm12, %v5896_v13, -inf  ;;  %v6222_v30 = vrot.slane %v6221_v19, 2 }
 0x864   : > { %v6611_v63 = vmax.f32 %v11781_v42, %v6610_v10  ;;  %v6868_v21 = vsel %vm13473_vm2, %v6608_v34, %v11868_v46  ;;  %v6614_v52 = vmax.f32 %v11801_v39, %v6613_v48  ;;  %v6210_v18 = vrot.slane %v6209_v36, 1  ;;  %v11932_v42 = vld [vmem:[#allocation4 + $0x24] sm:$0xff] }
 0x865   : > { %v6217_v51 = vrot.slane %v6216_v27, 1  ;;  %6967 = vrot.lane.b32.xlu2 %v7194_v53, %s13466_s22  ;;  %v6617_v54 = vmax.f32 %v11804_v60, %v6616_v6  ;;  %v6229_v4 = vrot.slane %v6228_v0, 2  ;;  %v6681_v16 = vsel %vm6569_vm12, %v11841_v62, -inf }
 0x866   : > { %v6869_v46 = vsel %vm13472_vm3, %v6611_v63, %v6868_v21  ;;  %7358 = vrot.lane.b32.xlu0 %v11932_v42, %s13489_s26  ;;  %v6211_v39 = vmax.f32 %v6209_v36, %v6210_v18  ;;  %v6887_v60 = vsel %vm6853_vm0, %v6674_v17, %v6886_v12  ;;  %v6223_v37 = vmax.f32 %v6221_v19, %v6222_v30  ;;  %v5344_v28 = vpop.f32.mrf.mxu0 }
 0x867   : > { %v6870_v9 = vsel %vm13471_vm4, %v6614_v52, %v6869_v46  ;;  %v6218_v56 = vmax.f32 %v6216_v27, %v6217_v51  ;;  %v11941_v22 = vpop.permute.xlu2 %4695  ;;  %v6230_v53 = vmax.f32 %v6228_v0, %v6229_v4  ;;  %7016 = vrot.lane.b32.xlu1 %v11899_v20, %s13468_s23  ;;  %v5380_v40 = vpop.f32.mrf.mxu1  ;;  %v6677_v2 = vmax.f32 %v11769_v49, %v11889_v14 }
 0x868   : > { %v6871_v26 = vsel %vm13470_vm6, %v6617_v54, %v6870_v9  ;;  %v4863_v62 = vpop.permute.xlu0 %4862  ;;  %v6679_v3 = vsel %vm6569_vm12, %v6211_v39, -inf  ;;  %v5381_v17 = vadd.f32 %v11796_v25, %v5380_v40  ;;  %v6224_v35 = vrot.slane %v6223_v37, 1 }
 0x869   : > { %6924 = vst.msk [vmem:[#allocation4 + $0x32] sm:$0xff] %vm6569_vm12, %v6871_v26  ;;  %v6682_v47 = vsel %vm6569_vm12, %v6218_v56, -inf  ;;  %v4887_v29 = vpop.permute.xlu1 %4886  ;;  %v6231_v32 = vrot.slane %v6230_v53, 1  ;;  %v6680_v33 = vmax.f32 %v11861_v1, %v6679_v3  ;;  %v6888_v55 = vsel %vm13501_vm1, %v6677_v2, %v6887_v60 }
 0x86a   : > { %v6683_v20 = vmax.f32 %v6681_v16, %v6682_v47  ;;  %4957 = vst.msk [vmem:[#allocation3 + $0xd0] sm:$0xff] %vm4930_vm9, %v4887_v29  ;;  %v5345_v49 = vadd.f32 %v11796_v25, %v5344_v28  ;;  %v5436_v14 = vmax.f32 %v5381_v17, 0.0  ;;  %v6225_v59 = vmax.f32 %v6223_v37, %v6224_v35 }
 0x86b   : > { %4945 = vst.msk [vmem:[#allocation3 + $0x70] sm:$0xff] %vm4930_vm9, %v4863_v62  ;;  %v6232_v23 = vmax.f32 %v6230_v53, %v6231_v32  ;;  %v6889_v15 = vsel %vm13473_vm2, %v6680_v33, %v6888_v55  ;;  %v6684_v1 = vsel %vm6569_vm12, %v11848_v38, -inf  ;;  %v6687_v43 = vsel %vm6569_vm12, %v11851_v7, -inf }
 0x86c   : > { %5138 = vst.msk [vmem:[#allocation3 + $0x70] sm:$0xff] %vm5123_vm10, %v11880_v50  ;;  %v5424_v58 = vmax.f32 %v5345_v49, 0.0  ;;  %v6685_v31 = vsel %vm6569_vm12, %v6225_v59, -inf  ;;  %v6890_v44 = vsel %vm13472_vm3, %v6683_v20, %v6889_v15  ;;  %v5540_v50 = vrot.slane %v5436_v14, 2 }
 0x86d   : > { %v6688_v41 = vsel %vm6569_vm12, %v6232_v23, -inf  ;;  %v6686_v24 = vmax.f32 %v6684_v1, %v6685_v31  ;;  %v5541_v21 = vrot.slane %v5436_v14, 4  ;;  %v5542_v12 = vrot.slane %v5436_v14, 6 }
 0x86e   : > { %7065 = vrot.lane.b32.xlu0 %v11905_v57, %s13464_s21  ;;  %v5504_v61 = vrot.slane %v5424_v58, 2  ;;  %v5505_v11 = vrot.slane %v5424_v58, 4  ;;  %v6689_v38 = vmax.f32 %v6687_v43, %v6688_v41  ;;  %v5506_v45 = vrot.slane %v5424_v58, 6  ;;  %s13483_s21 = smov 112  }
 0x86f   : > { %v11973_v8 = vpop.permute.xlu2 %5057  ;;  %v5897_v5 = vsel %vm5672_vm13, %v5424_v58, -inf  ;;  %v6891_v19 = vsel %vm13471_vm4, %v6686_v24, %v6890_v44  ;;  %v6233_v57 = vsel %vm5672_vm13, %v5436_v14, -inf  ;;  %v6240_v52 = vsel %vm5672_vm13, %v5540_v50, -inf }
 0x870   : > { %v5080_v7 = vpop.permute.xlu0 %5079  ;;  %v11976_v13 = vld [vmem:[#allocation4 + $0x31] sm:$0xff]  ;;  %v5898_v10 = vrot.slane %v5897_v5, 4  ;;  %v5904_v36 = vsel %vm5672_vm13, %v5504_v61, -inf  ;;  %v6892_v0 = vsel %vm13470_vm6, %v6689_v38, %v6891_v19  ;;  %v5911_v63 = vsel %vm5672_vm13, %v5505_v11, -inf }
 0x871   : > { %v7390_v34 = vld [vmem:[#allocation4 + $0x30] sm:$0xff]  ;;  %v4310_v27 = vpop.permute.xlu1 %4309  ;;  %5150 = vst.msk [vmem:[#allocation3 + $0xd0] sm:$0xff] %vm5123_vm10, %v5080_v7  ;;  %7456 = vrot.lane.b32.xlu1 %v11976_v13, %s13495_s16  ;;  %v5918_v6 = vsel %vm5672_vm13, %v5506_v45, -inf  ;;  %v5905_v51 = vrot.slane %v5904_v36, 4  ;;  %v6234_v54 = vrot.slane %v6233_v57, 4  ;;  %v5912_v4 = vrot.slane %v5911_v63, 4 }
 0x872   : > { %7407 = vrot.lane.b32.xlu2 %v7390_v34, %s13493_s29  ;;  %4379 = vst.msk [vmem:[#allocation3 + $0xd8] sm:$0xff] %vm4351_vm5, %v4310_v27  ;;  %v6934_v48 = vld [vmem:[#allocation4 + $0x30] sm:$0xff]  ;;  %v5899_v30 = vmax.f32 %v5897_v5, %v5898_v10  ;;  %v5919_v9 = vrot.slane %v5918_v6, 4  ;;  %v6241_v39 = vrot.slane %v6240_v52, 4  ;;  %v6247_v56 = vsel %vm5672_vm13, %v5541_v21, -inf }
 0x873   : > { %6927 = vst.msk [vmem:[#allocation4 + $0x62] sm:$0xff] %vm6569_vm12, %v6892_v0  ;;  %v5170_v18 = vld [vmem:[#allocation3 + $0x70] sm:$0xff]  ;;  %v6254_v60 = vsel %vm5672_vm13, %v5542_v12, -inf  ;;  %v5906_v37 = vmax.f32 %v5904_v36, %v5905_v51  ;;  %v6235_v53 = vmax.f32 %v6233_v57, %v6234_v54  ;;  %v5913_v3 = vmax.f32 %v5911_v63, %v5912_v4 }
 0x874   : > { %9149 = vmatmul.msk.f32.gmra.mxu0 %vm5202_vm11, %v5170_v18  ;;  %6942 = vst.msk [vmem:[#allocation5 + $0x30] sm:$0xff] %vm6569_vm12, %v6934_v48  ;;  %v7684_v46 = vld [vmem:[#allocation4 + $0x31] sm:$0xff]  ;;  %v5900_v2 = vrot.slane %v5899_v30, 2  ;;  %v5920_v47 = vmax.f32 %v5918_v6, %v5919_v9  ;;  %v6242_v28 = vmax.f32 %v6240_v52, %v6241_v39  ;;  %v6248_v17 = vrot.slane %v6247_v56, 4 }
 0x875   : > { %v11993_v16 = vld [vmem:[#allocation4 + $0x32] sm:$0xff]  ;;  %7692 = vst.msk [vmem:[#allocation5 + $0x8] sm:$0xff] %vm6569_vm12, %v7684_v46  ;;  %v6255_v29 = vrot.slane %v6254_v60, 4  ;;  %v5907_v33 = vrot.slane %v5906_v37, 2  ;;  %v6236_v20 = vrot.slane %v6235_v53, 2  ;;  %v5914_v14 = vrot.slane %v5913_v3, 2 }
 0x876   : > { %7505 = vrot.lane.b32.xlu0 %v11993_v16, %s13462_s17  ;;  %v12014_v49 = vmax.f32 %v5899_v30, %v5900_v2  ;;  %v5921_v59 = vrot.slane %v5920_v47, 2  ;;  %v6249_v23 = vmax.f32 %v6247_v56, %v6248_v17  ;;  %v12029_v61 = vld [vmem:[#allocation4 + $0x33] sm:$0xff]  ;;  %s13475_s17 = smov 104  }
 0x877   : > { %v12000_v26 = vpop.permute.xlu2 %4504  ;;  %v12017_v15 = vmax.f32 %v6254_v60, %v6255_v29  ;;  %v12025_v41 = vmax.f32 %v5906_v37, %v5907_v33  ;;  %v12027_v44 = vmax.f32 %v6235_v53, %v6236_v20  ;;  %v12031_v11 = vld [vmem:[#allocation4 + $0x34] sm:$0xff]  ;;  %v12034_v38 = vmax.f32 %v5913_v3, %v5914_v14 }
 0x878   : > { %v4503_v40 = vpop.permute.xlu0 %4502  ;;  %v5182_v62 = vld [vmem:[#allocation3 + $0xd0] sm:$0xff]  ;;  %v5347_v55 = vpop.f32.mrf.mxu0  ;;  %v5902_v50 = vrot.slane %v12014_v49, 1  ;;  %v12041_v7 = vmax.f32 %v5920_v47, %v5921_v59  ;;  %v6250_v19 = vrot.slane %v6249_v23, 2 }
 0x879   : > { %4572 = vst.msk [vmem:[#allocation3 + $0xd8] sm:$0xff] %vm4544_vm7, %v4503_v40  ;;  %7164 = vrot.lane.b32.xlu1 %v7390_v34, %s13487_s25  ;;  %v4672_v35 = vpop.permute.xlu1 %4671  ;;  %9161 = vmatmul.msk.f32.gmra.mxu1 %vm5202_vm11, %v5182_v62  ;;  %v5348_v58 = vadd.f32 %v11796_v25, %v5347_v55  ;;  %v6257_v10 = vrot.slane %v12017_v15, 2  ;;  %v6238_v59 = vrot.slane %v12027_v44, 1 }
 0x87a   : > { %7114 = vrot.lane.b32.xlu2 %v11932_v42, %s13485_s24  ;;  %4765 = vst.msk [vmem:[#allocation3 + $0xd8] sm:$0xff] %vm4737_vm8, %v11941_v22  ;;  %v12009_v32 = vld [vmem:[#allocation4 + $0x60] sm:$0xff]  ;;  %v6243_v22 = vrot.slane %v6242_v28, 2  ;;  %v6251_v33 = vmax.f32 %v6249_v23, %v6250_v19  ;;  %v5916_v23 = vrot.slane %v12034_v38, 1 }
 0x87b   : > { %4753 = vst.msk [vmem:[#allocation3 + $0x78] sm:$0xff] %vm4737_vm8, %v4672_v35  ;;  %v7687_v42 = vld [vmem:[#allocation4 + $0x61] sm:$0xff]  ;;  %v5425_v45 = vmax.f32 %v5348_v58, 0.0 }
 0x87c   : > { %6945 = vst.msk [vmem:[#allocation5 + $0x60] sm:$0xff] %vm6569_vm12, %v12009_v32  ;;  %v12043_v34 = vmax.f32 %v6242_v28, %v6243_v22  ;;  %v6258_v22 = vmax.f32 %v12017_v15, %v6257_v10  ;;  %v5903_v15 = vmax.f32 %v12014_v49, %v5902_v50  ;;  %v5923_v10 = vrot.slane %v12041_v7, 1 }
 0x87d   : > { %7695 = vst.msk [vmem:[#allocation5 + $0x38] sm:$0xff] %vm6569_vm12, %v7687_v42  ;;  %v5507_v57 = vrot.slane %v5425_v45, 2  ;;  %v5508_v27 = vrot.slane %v5425_v45, 4  ;;  %v5509_v0 = vrot.slane %v5425_v45, 6  ;;  %v5925_v63 = vsel %vm5672_vm13, %v5425_v45, -inf }
 0x87e   : > { %v5383_v1 = vpop.f32.mrf.mxu1  ;;  %7213 = vrot.lane.b32.xlu0 %v11976_v13, %s13510_s27  ;;  %v5926_v48 = vrot.slane %v5925_v63, 4  ;;  %v5917_v50 = vmax.f32 %v12034_v38, %v5916_v23 }
 0x87f   : > { %v5384_v43 = vadd.f32 %v11796_v25, %v5383_v1  ;;  %v12023_v31 = vpop.permute.xlu2 %5083  ;;  %v5932_v52 = vsel %vm5672_vm13, %v5507_v57, -inf  ;;  %v5939_v18 = vsel %vm5672_vm13, %v5508_v27, -inf  ;;  %v5946_v51 = vsel %vm5672_vm13, %v5509_v0, -inf }
 0x880   : > { %v4865_v24 = vpop.permute.xlu0 %4864  ;;  %v5933_v46 = vrot.slane %v5932_v52, 4  ;;  %v5940_v30 = vrot.slane %v5939_v18, 4  ;;  %v5947_v4 = vrot.slane %v5946_v51, 4  ;;  %v6245_v27 = vrot.slane %v12043_v34, 1 }
 0x881   : > { %v5437_v5 = vmax.f32 %v5384_v43, 0.0  ;;  %4946 = vst.msk [vmem:[#allocation3 + $0x78] sm:$0xff] %vm4930_vm9, %v4865_v24  ;;  %7603 = vrot.lane.b32.xlu1 %v12031_v11, %s13483_s21  ;;  %v4889_v36 = vpop.permute.xlu1 %4888  ;;  %v5909_v43 = vrot.slane %v12025_v41, 1  ;;  %v6252_v0 = vrot.slane %v6251_v33, 1 }
 0x882   : > { %7554 = vrot.lane.b32.xlu2 %v12029_v61, %s13475_s17  ;;  %5139 = vst.msk [vmem:[#allocation3 + $0x78] sm:$0xff] %vm5123_vm10, %v11973_v8  ;;  %v5927_v8 = vmax.f32 %v5925_v63, %v5926_v48  ;;  %v5934_v40 = vmax.f32 %v5932_v52, %v5933_v46  ;;  %v5941_v62 = vmax.f32 %v5939_v18, %v5940_v30  ;;  %v6259_v48 = vrot.slane %v6258_v22, 1 }
 0x883   : > { %4958 = vst.msk [vmem:[#allocation3 + $0xd8] sm:$0xff] %vm4930_vm9, %v4889_v36  ;;  %v5543_v6 = vrot.slane %v5437_v5, 2  ;;  %v5544_v21 = vrot.slane %v5437_v5, 4  ;;  %v5545_v12 = vrot.slane %v5437_v5, 6  ;;  %v6261_v54 = vsel %vm5672_vm13, %v5437_v5, -inf }
 0x884   : > { %v6262_v9 = vrot.slane %v6261_v54, 4  ;;  %v5928_v53 = vrot.slane %v5927_v8, 2  ;;  %v5948_v2 = vmax.f32 %v5946_v51, %v5947_v4  ;;  %v5935_v20 = vrot.slane %v5934_v40, 2 }
 0x885   : > { %v6268_v39 = vsel %vm5672_vm13, %v5543_v6, -inf  ;;  %v6275_v56 = vsel %vm5672_vm13, %v5544_v21, -inf  ;;  %v6282_v60 = vsel %vm5672_vm13, %v5545_v12, -inf  ;;  %v5942_v55 = vrot.slane %v5941_v62, 2 }
 0x886   : > { %v6263_v47 = vmax.f32 %v6261_v54, %v6262_v9  ;;  %v6269_v28 = vrot.slane %v6268_v39, 4  ;;  %v6276_v17 = vrot.slane %v6275_v56, 4  ;;  %v6283_v29 = vrot.slane %v6282_v60, 4 }
 0x887   : > { %v12057_v37 = vpop.permute.xlu2 %4699  ;;  %v5949_v42 = vrot.slane %v5948_v2, 2  ;;  %v5929_v1 = vmax.f32 %v5927_v8, %v5928_v53  ;;  %v5936_v19 = vmax.f32 %v5934_v40, %v5935_v20  ;;  %v5943_v36 = vmax.f32 %v5941_v62, %v5942_v55 }
 0x888   : > { %v5082_v3 = vpop.permute.xlu0 %5081  ;;  %v6264_v58 = vrot.slane %v6263_v47, 2  ;;  %v6270_v24 = vmax.f32 %v6268_v39, %v6269_v28  ;;  %v6277_v45 = vmax.f32 %v6275_v56, %v6276_v17  ;;  %v6284_v5 = vmax.f32 %v6282_v60, %v6283_v29 }
 0x889   : > { %5151 = vst.msk [vmem:[#allocation3 + $0xd8] sm:$0xff] %vm5123_vm10, %v5082_v3  ;;  %7311 = vrot.lane.b32.xlu1 %v12029_v61, %s13481_s14  ;;  %v5171_v35 = vld [vmem:[#allocation3 + $0x78] sm:$0xff]  ;;  %v4312_v14 = vpop.permute.xlu1 %4311  ;;  %v5950_v57 = vmax.f32 %v5948_v2, %v5949_v42  ;;  %v6239_v63 = vmax.f32 %v12027_v44, %v6238_v59  ;;  %v5930_v6 = vrot.slane %v5929_v1, 1  ;;  %v5910_v12 = vmax.f32 %v12025_v41, %v5909_v43 }
 0x88a   : > { %7262 = vrot.lane.b32.xlu2 %v11993_v16, %s13479_s28  ;;  %9150 = vmatmul.msk.f32.gmra.mxu0 %vm5202_vm11, %v5171_v35  ;;  %4380 = vst.msk [vmem:[#allocation3 + $0xe0] sm:$0xff] %vm4351_vm5, %v4312_v14  ;;  %v6265_v21 = vmax.f32 %v6263_v47, %v6264_v58  ;;  %v6271_v52 = vrot.slane %v6270_v24, 2  ;;  %v6278_v18 = vrot.slane %v6277_v45, 2  ;;  %v6285_v51 = vrot.slane %v6284_v5, 2 }
 0x88b   : > { %4573 = vst.msk [vmem:[#allocation3 + $0xe0] sm:$0xff] %vm4544_vm7, %v12000_v26  ;;  %v5937_v8 = vrot.slane %v5936_v19, 1  ;;  %v5944_v46 = vrot.slane %v5943_v36, 1  ;;  %v5951_v30 = vrot.slane %v5950_v57, 1  ;;  %v5924_v41 = vmax.f32 %v12041_v7, %v5923_v10 }
 0x88c   : > { %v12088_v44 = vsel %vm6569_vm12, %v5903_v15, -inf  ;;  %v6246_v4 = vmax.f32 %v12043_v34, %v6245_v27  ;;  %v6253_v9 = vmax.f32 %v6251_v33, %v6252_v0  ;;  %v6260_v39 = vmax.f32 %v6258_v22, %v6259_v48 }
 0x88d   : > { %v12093_v56 = vsel %vm6569_vm12, %v6239_v63, -inf  ;;  %v5931_v60 = vmax.f32 %v5929_v1, %v5930_v6  ;;  %v12099_v7 = vmax.f32 %v6270_v24, %v6271_v52  ;;  %v12101_v53 = vmax.f32 %v6277_v45, %v6278_v18 }
 0x88e   : > { %v12103_v34 = vmax.f32 %v6284_v5, %v6285_v51  ;;  %v12108_v40 = vsel %vm6569_vm12, %v5917_v50, -inf  ;;  %v5938_v62 = vmax.f32 %v5936_v19, %v5937_v8  ;;  %v5945_v2 = vmax.f32 %v5943_v36, %v5944_v46 }
 0x88f   : > { %v4316_v26 = vpop.permute.xlu2 %4315  ;;  %v5952_v3 = vmax.f32 %v5950_v57, %v5951_v30  ;;  %v12111_v28 = vsel %vm6569_vm12, %v5924_v41, -inf  ;;  %v12114_v17 = vsel %vm6569_vm12, %v6246_v4, -inf  ;;  %v12117_v29 = vsel %vm6569_vm12, %v6253_v9, -inf }
 0x890   : > { %4382 = vst.msk [vmem:[#allocation3 + $0xf0] sm:$0xff] %vm4351_vm5, %v4316_v26  ;;  %v4698_v54 = vpop.permute.xlu0 %4697  ;;  %v5183_v49 = vld [vmem:[#allocation3 + $0xd8] sm:$0xff]  ;;  %v12124_v20 = vsel %vm6569_vm12, %v5931_v60, -inf  ;;  %v6273_v59 = vrot.slane %v12099_v7, 1  ;;  %v6280_v22 = vrot.slane %v12101_v53, 1  ;;  %v6287_v1 = vrot.slane %v12103_v34, 1 }
 0x891   : > { %4766 = vst.msk [vmem:[#allocation3 + $0xe0] sm:$0xff] %vm4737_vm8, %v4698_v54  ;;  %7018 = vrot.lane.b32.xlu1 %v11993_v16, %s13468_s23  ;;  %v4891_v38 = vpop.permute.xlu1 %4890  ;;  %9162 = vmatmul.msk.f32.gmra.mxu1 %vm5202_vm11, %v5183_v49  ;;  %v6266_v16 = vrot.slane %v6265_v21, 1  ;;  %v5350_v47 = vpop.f32.mrf.mxu0  ;;  %v12135_v24 = vsel %vm6569_vm12, %v5938_v62, -inf  ;;  %v12138_v45 = vsel %vm6569_vm12, %v5945_v2, -inf  ;;  %v12141_v5 = vsel %vm6569_vm12, %v5952_v3, -inf  ;;  %s13511_s23 = smov 24  }
 0x892   : > { %6969 = vrot.lane.b32.xlu2 %v11976_v13, %s13466_s22  ;;  %4959 = vst.msk [vmem:[#allocation3 + $0xe0] sm:$0xff] %vm4930_vm9, %v4891_v38  ;;  %v12097_v13 = vsel %vm6569_vm12, %v5910_v12, -inf  ;;  %v5351_v35 = vadd.f32 %v11796_v25, %v5350_v47  ;;  %s13497_s22 = smov 120  }
 0x893   : > { %5152 = vst.msk [vmem:[#allocation3 + $0xe0] sm:$0xff] %vm5123_vm10, %v12023_v31  ;;  %v12121_v31 = vsel %vm6569_vm12, %v6260_v39, -inf  ;;  %v12126_v55 = vmax.f32 %v6265_v21, %v6266_v16 }
 0x894   : > { %v5426_v58 = vmax.f32 %v5351_v35, 0.0 }
 0x896   : > { %v5386_v33 = vpop.f32.mrf.mxu1  ;;  %v5510_v23 = vrot.slane %v5426_v58, 2  ;;  %v5511_v19 = vrot.slane %v5426_v58, 4  ;;  %v5512_v36 = vrot.slane %v5426_v58, 6  ;;  %v5953_v57 = vsel %vm5672_vm13, %v5426_v58, -inf }
 0x897   : > { %v5387_v42 = vadd.f32 %v11796_v25, %v5386_v33  ;;  %v12129_v14 = vpop.permute.xlu2 %4894  ;;  %v5954_v10 = vrot.slane %v5953_v57, 4 }
 0x898   : > { %v4314_v43 = vpop.permute.xlu0 %4313  ;;  %v5960_v48 = vsel %vm5672_vm13, %v5510_v23, -inf  ;;  %v5967_v6 = vsel %vm5672_vm13, %v5511_v19, -inf  ;;  %v5974_v21 = vsel %vm5672_vm13, %v5512_v36, -inf }
 0x899   : > { %v5438_v25 = vmax.f32 %v5387_v42, 0.0  ;;  %4381 = vst.msk [vmem:[#allocation3 + $0xe8] sm:$0xff] %vm4351_vm5, %v4314_v43  ;;  %v4507_v15 = vpop.permute.xlu1 %4506  ;;  %v5955_v12 = vmax.f32 %v5953_v57, %v5954_v10  ;;  %v5961_v52 = vrot.slane %v5960_v48, 4  ;;  %v5968_v18 = vrot.slane %v5967_v6, 4 }
 0x89a   : > { %4574 = vst.msk [vmem:[#allocation3 + $0xe8] sm:$0xff] %vm4544_vm7, %v4507_v15  ;;  %v5975_v51 = vrot.slane %v5974_v21, 4 }
 0x89b   : > { %v5546_v27 = vrot.slane %v5438_v25, 2  ;;  %v5547_v0 = vrot.slane %v5438_v25, 4  ;;  %v5548_v63 = vrot.slane %v5438_v25, 6  ;;  %v6289_v26 = vsel %vm5672_vm13, %v5438_v25, -inf  ;;  %4767 = vst.msk [vmem:[#allocation3 + $0xe8] sm:$0xff] %vm4737_vm8, %v12057_v37 }
 0x89c   : > { %v6290_v54 = vrot.slane %v6289_v26, 4  ;;  %v5956_v46 = vrot.slane %v5955_v12, 2  ;;  %v5962_v30 = vmax.f32 %v5960_v48, %v5961_v52  ;;  %v5969_v41 = vmax.f32 %v5967_v6, %v5968_v18 }
 0x89d   : > { %v6296_v49 = vsel %vm5672_vm13, %v5546_v27, -inf  ;;  %v6303_v50 = vsel %vm5672_vm13, %v5547_v0, -inf  ;;  %v6310_v8 = vsel %vm5672_vm13, %v5548_v63, -inf  ;;  %v5976_v4 = vmax.f32 %v5974_v21, %v5975_v51 }
 0x89e   : > { %v6291_v38 = vmax.f32 %v6289_v26, %v6290_v54  ;;  %v6297_v39 = vrot.slane %v6296_v49, 4  ;;  %v6304_v37 = vrot.slane %v6303_v50, 4  ;;  %v6311_v60 = vrot.slane %v6310_v8, 4 }
 0x89f   : > { %v12155_v9 = vpop.permute.xlu2 %4510  ;;  %v5957_v62 = vmax.f32 %v5955_v12, %v5956_v46  ;;  %v5963_v2 = vrot.slane %v5962_v30, 2  ;;  %v5970_v3 = vrot.slane %v5969_v41, 2  ;;  %v5977_v47 = vrot.slane %v5976_v4, 2 }
 0x8a0   : > { %v4893_v16 = vpop.permute.xlu0 %4892  ;;  %v6292_v35 = vrot.slane %v6291_v38, 2  ;;  %v6298_v33 = vmax.f32 %v6296_v49, %v6297_v39  ;;  %v6305_v42 = vmax.f32 %v6303_v50, %v6304_v37  ;;  %v6312_v58 = vmax.f32 %v6310_v8, %v6311_v60 }
 0x8a1   : > { %4960 = vst.msk [vmem:[#allocation3 + $0xe8] sm:$0xff] %vm4930_vm9, %v4893_v16  ;;  %v5086_v43 = vpop.permute.xlu1 %5085  ;;  %v5958_v25 = vrot.slane %v5957_v62, 1  ;;  %v5964_v23 = vmax.f32 %v5962_v30, %v5963_v2  ;;  %v5971_v19 = vmax.f32 %v5969_v41, %v5970_v3  ;;  %v5978_v36 = vmax.f32 %v5976_v4, %v5977_v47 }
 0x8a2   : > { %5153 = vst.msk [vmem:[#allocation3 + $0xe8] sm:$0xff] %vm5123_vm10, %v5086_v43  ;;  %v6293_v57 = vmax.f32 %v6291_v38, %v6292_v35  ;;  %v6299_v15 = vrot.slane %v6298_v33, 2  ;;  %v6306_v10 = vrot.slane %v6305_v42, 2  ;;  %v6313_v27 = vrot.slane %v6312_v58, 2 }
 0x8a3   : > { %v5959_v0 = vmax.f32 %v5957_v62, %v5958_v25  ;;  %v5965_v63 = vrot.slane %v5964_v23, 1  ;;  %v5972_v48 = vrot.slane %v5971_v19, 1  ;;  %v5979_v6 = vrot.slane %v5978_v36, 1 }
 0x8a4   : > { %v6294_v21 = vrot.slane %v6293_v57, 1  ;;  %v6300_v26 = vmax.f32 %v6298_v33, %v6299_v15  ;;  %v6307_v12 = vmax.f32 %v6305_v42, %v6306_v10  ;;  %v6314_v52 = vmax.f32 %v6312_v58, %v6313_v27 }
 0x8a5   : > { %v5966_v18 = vmax.f32 %v5964_v23, %v5965_v63  ;;  %v5973_v51 = vmax.f32 %v5971_v19, %v5972_v48  ;;  %v5980_v54 = vmax.f32 %v5978_v36, %v5979_v6  ;;  %v6619_v49 = vsel %vm6569_vm12, %v5959_v0, -inf }
 0x8a6   : > { %v6274_v8 = vmax.f32 %v12099_v7, %v6273_v59  ;;  %v6295_v46 = vmax.f32 %v6293_v57, %v6294_v21  ;;  %v6301_v30 = vrot.slane %v6300_v26, 1  ;;  %v6308_v41 = vrot.slane %v6307_v12, 1 }
 0x8a7   : > { %v12160_v50 = vpop.permute.xlu2 %5089  ;;  %v6620_v39 = vmax.f32 %v12088_v44, %v6619_v49  ;;  %v6622_v37 = vsel %vm6569_vm12, %v5966_v18, -inf  ;;  %v6625_v60 = vsel %vm6569_vm12, %v5973_v51, -inf  ;;  %v6315_v16 = vrot.slane %v6314_v52, 1  ;;  %v12176_v44 = vld [vmem:[%s13452_s2] ss:$0 sm:$0xff] }
 0x8a8   : > { %v5353_v4 = vpop.f32.mrf.mxu0  ;;  %v4509_v38 = vpop.permute.xlu0 %4508  ;;  %v6623_v62 = vmax.f32 %v12097_v13, %v6622_v37  ;;  %v6626_v2 = vmax.f32 %v12108_v40, %v6625_v60  ;;  %v6628_v7 = vsel %vm6569_vm12, %v5980_v54, -inf  ;;  %v6302_v59 = vmax.f32 %v6300_v26, %v6301_v30 }
 0x8a9   : > { %4575 = vst.msk [vmem:[#allocation3 + $0xf0] sm:$0xff] %vm4544_vm7, %v4509_v38  ;;  %v4702_v3 = vpop.permute.xlu1 %4701  ;;  %v6309_v47 = vmax.f32 %v6307_v12, %v6308_v41  ;;  %v6316_v35 = vmax.f32 %v6314_v52, %v6315_v16  ;;  %v6691_v33 = vsel %vm6569_vm12, %v6295_v46, -inf  ;;  %v5354_v42 = vadd.f32 %v12176_v44, %v5353_v4 }
 0x8aa   : > { %4768 = vst.msk [vmem:[#allocation3 + $0xf0] sm:$0xff] %vm4737_vm8, %v4702_v3  ;;  %v12183_v13 = vmax.f32 %v12101_v53, %v6280_v22  ;;  %v12188_v40 = vmax.f32 %v12103_v34, %v6287_v1  ;;  %v6872_v58 = vsel %vm6851_vm15, %v6623_v62, %v6620_v39  ;;  %v6694_v43 = vsel %vm6569_vm12, %v6302_v59, -inf }
 0x8ab   : > { %4961 = vst.msk [vmem:[#allocation3 + $0xf0] sm:$0xff] %vm4930_vm9, %v12129_v14  ;;  %v6873_v25 = vsel %vm6853_vm0, %v6626_v2, %v6872_v58  ;;  %v6692_v23 = vmax.f32 %v12093_v56, %v6691_v33  ;;  %v6695_v19 = vmax.f32 %v12114_v17, %v6694_v43  ;;  %v6697_v53 = vsel %vm6569_vm12, %v6309_v47, -inf }
 0x8ac   : > { %v6629_v22 = vmax.f32 %v12111_v28, %v6628_v7  ;;  %v6698_v34 = vmax.f32 %v12117_v29, %v6697_v53  ;;  %v12201_v1 = vsel %vm6569_vm12, %v6316_v35, -inf  ;;  %v5427_v36 = vmax.f32 %v5354_v42, 0.0  ;;  %v6932_v28 = vld [vmem:[#allocation4 + $0x10] sm:$0xff] }
 0x8ad   : > { %v12205_v14 = vsel %vm6569_vm12, %v12126_v55, -inf  ;;  %v12208_v15 = vsel %vm6569_vm12, %v6274_v8, -inf  ;;  %v6893_v56 = vsel %vm6851_vm15, %v6695_v19, %v6692_v23  ;;  %6940 = vst.msk [vmem:[#allocation5 + $0x10] sm:$0xff] %vm6569_vm12, %v6932_v28  ;;  %v6701_v55 = vmax.f32 %v12121_v31, %v12201_v1 }
 0x8ae   : > { %v5389_v57 = vpop.f32.mrf.mxu1  ;;  %v12215_v29 = vsel %vm13501_vm1, %v6629_v22, %v6873_v25  ;;  %v5513_v27 = vrot.slane %v5427_v36, 2  ;;  %v5514_v0 = vrot.slane %v5427_v36, 4  ;;  %v5515_v63 = vrot.slane %v5427_v36, 6 }
 0x8af   : > { %v5390_v17 = vadd.f32 %v12176_v44, %v5389_v57  ;;  %v12212_v10 = vpop.permute.xlu2 %7063  ;;  %v12221_v6 = vsel %vm6853_vm0, %v6698_v34, %v6893_v56  ;;  %v5981_v21 = vsel %vm5672_vm13, %v5427_v36, -inf }
 0x8b0   : > { %v5088_v48 = vpop.permute.xlu0 %5087  ;;  %v5982_v12 = vrot.slane %v5981_v21, 4  ;;  %v5988_v52 = vsel %vm5672_vm13, %v5513_v27, -inf  ;;  %v5995_v18 = vsel %vm5672_vm13, %v5514_v0, -inf  ;;  %v6002_v51 = vsel %vm5672_vm13, %v5515_v63, -inf }
 0x8b1   : > { %v5439_v26 = vmax.f32 %v5390_v17, 0.0  ;;  %5154 = vst.msk [vmem:[#allocation3 + $0xf0] sm:$0xff] %vm5123_vm10, %v5088_v48  ;;  %v4318_v54 = vpop.permute.xlu1 %4317  ;;  %v5989_v49 = vrot.slane %v5988_v52, 4  ;;  %v5996_v8 = vrot.slane %v5995_v18, 4  ;;  %v6003_v46 = vrot.slane %v6002_v51, 4 }
 0x8b2   : > { %4383 = vst.msk [vmem:[#allocation3 + $0xf8] sm:$0xff] %vm4351_vm5, %v4318_v54  ;;  %v5983_v41 = vmax.f32 %v5981_v21, %v5982_v12  ;;  %vm13491_vm5 = vcmask 195712  }
 0x8b3   : > { %v5549_v30 = vrot.slane %v5439_v26, 2  ;;  %v5550_v4 = vrot.slane %v5439_v26, 4  ;;  %v5551_v38 = vrot.slane %v5439_v26, 6  ;;  %v6317_v39 = vsel %vm5672_vm13, %v5439_v26, -inf  ;;  %4576 = vst.msk [vmem:[#allocation3 + $0xf8] sm:$0xff] %vm4544_vm7, %v12155_v9 }
 0x8b4   : > { %v5990_v37 = vmax.f32 %v5988_v52, %v5989_v49  ;;  %v5997_v60 = vmax.f32 %v5995_v18, %v5996_v8  ;;  %v6004_v16 = vmax.f32 %v6002_v51, %v6003_v46  ;;  %v6318_v62 = vrot.slane %v6317_v39, 4 }
 0x8b5   : > { %v5984_v2 = vrot.slane %v5983_v41, 2  ;;  %v6324_v7 = vsel %vm5672_vm13, %v5549_v30, -inf  ;;  %v6331_v59 = vsel %vm5672_vm13, %v5550_v4, -inf  ;;  %v6338_v3 = vsel %vm5672_vm13, %v5551_v38, -inf }
 0x8b6   : > { %v5991_v47 = vrot.slane %v5990_v37, 2  ;;  %v5998_v35 = vrot.slane %v5997_v60, 2  ;;  %v6005_v33 = vrot.slane %v6004_v16, 2  ;;  %v6319_v42 = vmax.f32 %v6317_v39, %v6318_v62 }
 0x8b7   : > { %v12235_v58 = vpop.permute.xlu2 %7211  ;;  %v5985_v43 = vmax.f32 %v5983_v41, %v5984_v2  ;;  %v6325_v9 = vrot.slane %v6324_v7, 4  ;;  %v6332_v25 = vrot.slane %v6331_v59, 4  ;;  %v6339_v23 = vrot.slane %v6338_v3, 4 }
 0x8b8   : > { %v4704_v19 = vpop.permute.xlu0 %4703  ;;  %v5992_v53 = vmax.f32 %v5990_v37, %v5991_v47  ;;  %v5999_v22 = vmax.f32 %v5997_v60, %v5998_v35  ;;  %v6006_v34 = vmax.f32 %v6004_v16, %v6005_v33  ;;  %v6320_v36 = vrot.slane %v6319_v42, 2 }
 0x8b9   : > { %4769 = vst.msk [vmem:[#allocation3 + $0xf8] sm:$0xff] %vm4737_vm8, %v4704_v19  ;;  %v5986_v57 = vrot.slane %v5985_v43, 1  ;;  %v6326_v56 = vmax.f32 %v6324_v7, %v6325_v9  ;;  %v6333_v17 = vmax.f32 %v6331_v59, %v6332_v25  ;;  %v6340_v28 = vmax.f32 %v6338_v3, %v6339_v23  ;;  %v4897_v27 = vpop.permute.xlu1 %4896 }
 0x8ba   : > { %v5993_v0 = vrot.slane %v5992_v53, 1  ;;  %v6000_v63 = vrot.slane %v5999_v22, 1  ;;  %v6007_v48 = vrot.slane %v6006_v34, 1  ;;  %v6321_v21 = vmax.f32 %v6319_v42, %v6320_v36  ;;  %4962 = vst.msk [vmem:[#allocation3 + $0xf8] sm:$0xff] %vm4930_vm9, %v4897_v27 }
 0x8bb   : > { %v5987_v26 = vmax.f32 %v5985_v43, %v5986_v57  ;;  %v6327_v12 = vrot.slane %v6326_v56, 2  ;;  %v6334_v52 = vrot.slane %v6333_v17, 2  ;;  %v6341_v18 = vrot.slane %v6340_v28, 2  ;;  %5155 = vst.msk [vmem:[#allocation3 + $0xf8] sm:$0xff] %vm5123_vm10, %v12160_v50 }
 0x8bc   : > { %v5994_v51 = vmax.f32 %v5992_v53, %v5993_v0  ;;  %v6001_v54 = vmax.f32 %v5999_v22, %v6000_v63  ;;  %v6008_v49 = vmax.f32 %v6006_v34, %v6007_v48  ;;  %v6322_v8 = vrot.slane %v6321_v21, 1 }
 0x8bd   : > { %v6631_v46 = vsel %vm6569_vm12, %v5987_v26, -inf  ;;  %v6328_v30 = vmax.f32 %v6326_v56, %v6327_v12  ;;  %v6335_v41 = vmax.f32 %v6333_v17, %v6334_v52  ;;  %v6342_v4 = vmax.f32 %v6340_v28, %v6341_v18 }
 0x8be   : > { %v6632_v38 = vmax.f32 %v12124_v20, %v6631_v46  ;;  %v6634_v39 = vsel %vm6569_vm12, %v5994_v51, -inf  ;;  %v6637_v37 = vsel %vm6569_vm12, %v6001_v54, -inf  ;;  %v6640_v60 = vsel %vm6569_vm12, %v6008_v49, -inf  ;;  %v5184_v49 = vld [vmem:[#allocation3 + $0xe0] sm:$0xff] }
 0x8bf   : > { %v6968_v16 = vpop.permute.xlu2 %6967  ;;  %v6635_v50 = vmax.f32 %v12135_v24, %v6634_v39  ;;  %v6638_v62 = vmax.f32 %v12138_v45, %v6637_v37  ;;  %v6323_v2 = vmax.f32 %v6321_v21, %v6322_v8  ;;  %v6329_v20 = vrot.slane %v6328_v30, 1  ;;  %9163 = vmatmul.msk.f32.gmra.mxu1 %vm5202_vm11, %v5184_v49 }
 0x8c0   : > { %6990 = vst.msk [vmem:[#allocation5 + $0x20] sm:$0xff] %vm6987_vm14, %v6968_v16  ;;  %v6966_v7 = vpop.permute.xlu0 %6965  ;;  %v6875_v59 = vsel %vm13473_vm2, %v6632_v38, %v12215_v29  ;;  %v6336_v3 = vrot.slane %v6335_v41, 1  ;;  %v6343_v47 = vrot.slane %v6342_v4, 1  ;;  %v6641_v35 = vmax.f32 %v12141_v5, %v6640_v60  ;;  %v5356_v45 = vpop.f32.mrf.mxu0 }
 0x8c1   : > { %6989 = vst.msk [vmem:[#allocation5 + $0x10] sm:$0xff] %vm6987_vm14, %v6966_v7  ;;  %v6876_v33 = vsel %vm13472_vm3, %v6635_v50, %v6875_v59  ;;  %v6703_v24 = vsel %vm6569_vm12, %v6323_v2, -inf  ;;  %v7015_v42 = vpop.permute.xlu1 %7014  ;;  %vm13478_vm7 = vcmask 261312   ;;  %v6330_v9 = vmax.f32 %v6328_v30, %v6329_v20  ;;  %v5185_v20 = vld [vmem:[#allocation3 + $0xe8] sm:$0xff] }
 0x8c2   : > { %v6877_v43 = vsel %vm13471_vm4, %v6638_v62, %v6876_v33  ;;  %v6337_v25 = vmax.f32 %v6335_v41, %v6336_v3  ;;  %v6344_v23 = vmax.f32 %v6342_v4, %v6343_v47  ;;  %7038 = vst.msk [vmem:[#allocation5 + $0x10] sm:$0xff] %vm13491_vm5, %v7015_v42  ;;  %v6708_v29 = vsel %vm6569_vm12, %v12183_v13, -inf }
 0x8c3   : > { %v6895_v5 = vsel %vm13501_vm1, %v6701_v55, %v12221_v6  ;;  %v6878_v19 = vsel %vm13470_vm6, %v6641_v35, %v6877_v43  ;;  %v6704_v53 = vmax.f32 %v12205_v14, %v6703_v24  ;;  %7087 = vst.msk [vmem:[#allocation5 + $0x10] sm:$0xff] %vm13478_vm7, %v12212_v10  ;;  %v6706_v22 = vsel %vm6569_vm12, %v6330_v9, -inf }
 0x8c4   : > { %6925 = vst.msk [vmem:[#allocation4 + $0x42] sm:$0xff] %vm6569_vm12, %v6878_v19  ;;  %v6709_v34 = vsel %vm6569_vm12, %v6337_v25, -inf  ;;  %v6712_v13 = vsel %vm6569_vm12, %v6344_v23, -inf  ;;  %v5357_v36 = vadd.f32 %v12176_v44, %v5356_v45  ;;  %v6707_v31 = vmax.f32 %v12208_v15, %v6706_v22 }
 0x8c5   : > { %v6710_v1 = vmax.f32 %v6708_v29, %v6709_v34  ;;  %v6896_v55 = vsel %vm13473_vm2, %v6704_v53, %v6895_v5  ;;  %vm13477_vm8 = vcmask 326912   ;;  %v6711_v14 = vsel %vm6569_vm12, %v12188_v40, -inf }
 0x8c6   : > { %v6713_v10 = vmax.f32 %v6711_v14, %v6712_v13  ;;  %v6897_v6 = vsel %vm13472_vm3, %v6707_v31, %v6896_v55  ;;  %v5392_v57 = vpop.f32.mrf.mxu1  ;;  %v5428_v28 = vmax.f32 %v5357_v36, 0.0  ;;  %vm7184_vm9 = vcmask 392512  }
 0x8c7   : > { %v6898_v17 = vsel %vm13471_vm4, %v6710_v1, %v6897_v6  ;;  %vm7233_vm10 = vcmask 458112   ;;  %v5393_v0 = vadd.f32 %v12176_v44, %v5392_v57  ;;  %vm13492_vm4 = vcmask 589312   ;;  %9164 = vmatmul.msk.f32.gmra.mxu1 %vm5202_vm11, %v5185_v20 }
 0x8c8   : > { %v7113_v56 = vpop.permute.xlu0 %7112  ;;  %v6899_v15 = vsel %vm13470_vm6, %v6713_v10, %v6898_v17  ;;  %v6009_v21 = vsel %vm5672_vm13, %v5428_v28, -inf  ;;  %v5516_v26 = vrot.slane %v5428_v28, 2  ;;  %v5517_v12 = vrot.slane %v5428_v28, 4 }
 0x8c9   : > { %7136 = vst.msk [vmem:[#allocation5 + $0x10] sm:$0xff] %vm13477_vm8, %v7113_v56  ;;  %v7163_v27 = vpop.permute.xlu1 %7162  ;;  %vm7282_vm6 = vcmask 523712   ;;  %v5440_v18 = vmax.f32 %v5393_v0, 0.0  ;;  %v6010_v51 = vrot.slane %v6009_v21, 4  ;;  %v5518_v8 = vrot.slane %v5428_v28, 6 }
 0x8ca   : > { %6928 = vst.msk [vmem:[#allocation4 + $0x72] sm:$0xff] %vm6569_vm12, %v6899_v15  ;;  %v6023_v46 = vsel %vm5672_vm13, %v5517_v12, -inf  ;;  %vm7380_vm3 = vcmask 654912   ;;  %vm13474_vm2 = vcmask 720512   ;;  %v5186_v12 = vld [vmem:[#allocation3 + $0xf0] sm:$0xff] }
 0x8cb   : > { %7186 = vst.msk [vmem:[#allocation5 + $0x10] sm:$0xff] %vm7184_vm9, %v7163_v27  ;;  %v7636_v63 = vld [vmem:[#allocation4 + $0x40] sm:$0xff]  ;;  %v5552_v4 = vrot.slane %v5440_v18, 2  ;;  %v6011_v39 = vmax.f32 %v6009_v21, %v6010_v51  ;;  %v5553_v37 = vrot.slane %v5440_v18, 4  ;;  %v6024_v50 = vrot.slane %v6023_v46, 4 }
 0x8cc   : > { %v7408_v40 = vpop.permute.xlu2 %7407  ;;  %v12284_v48 = vld [vmem:[#allocation4 + $0x41] sm:$0xff]  ;;  %7653 = vrot.lane.b32.xlu0 %v7636_v63, %s13497_s22  ;;  %7235 = vst.msk [vmem:[#allocation5 + $0x10] sm:$0xff] %vm7233_vm10, %v12235_v58  ;;  %7409 = vrot.lane.b32.xlu2 %v7636_v63, %s13493_s29  ;;  %v6016_v58 = vsel %vm5672_vm13, %v5516_v26, -inf  ;;  %v6030_v62 = vsel %vm5672_vm13, %v5518_v8, -inf  ;;  %v5554_v2 = vrot.slane %v5440_v18, 6  ;;  %v6345_v7 = vsel %vm5672_vm13, %v5440_v18, -inf }
 0x8cd   : > { %7458 = vrot.lane.b32.xlu1 %v12284_v48, %s13495_s16  ;;  %6943 = vst.msk [vmem:[#allocation5 + $0x40] sm:$0xff] %vm6569_vm12, %v7636_v63  ;;  %v12294_v52 = vld [vmem:[#allocation4 + $0x41] sm:$0xff]  ;;  %v6017_v16 = vrot.slane %v6016_v58, 4  ;;  %v6352_v59 = vsel %vm5672_vm13, %v5552_v4, -inf  ;;  %v6012_v3 = vrot.slane %v6011_v39, 2  ;;  %v6031_v47 = vrot.slane %v6030_v62, 4 }
 0x8ce   : > { %7693 = vst.msk [vmem:[#allocation5 + $0x18] sm:$0xff] %vm6569_vm12, %v12294_v52  ;;  %v6359_v35 = vsel %vm5672_vm13, %v5553_v37, -inf  ;;  %v6025_v42 = vmax.f32 %v6023_v46, %v6024_v50  ;;  %v6366_v43 = vsel %vm5672_vm13, %v5554_v2, -inf  ;;  %v6346_v9 = vrot.slane %v6345_v7, 4  ;;  %v12329_v13 = vld [vmem:[#allocation4 + $0x44] sm:$0xff] }
 0x8cf   : > { %v6018_v45 = vmax.f32 %v6016_v58, %v6017_v16  ;;  %v6353_v25 = vrot.slane %v6352_v59, 4  ;;  %v6360_v29 = vrot.slane %v6359_v35, 4  ;;  %v12327_v53 = vmax.f32 %v6011_v39, %v6012_v3  ;;  %v12335_v14 = vld [vmem:[#allocation4 + $0x43] sm:$0xff]  ;;  %9165 = vmatmul.msk.f32.gmra.mxu1 %vm5202_vm11, %v5186_v12 }
 0x8d0   : > { %v7261_v54 = vpop.permute.xlu0 %7260  ;;  %v6032_v22 = vmax.f32 %v6030_v62, %v6031_v47  ;;  %v6367_v34 = vrot.slane %v6366_v43, 4  ;;  %v6026_v31 = vrot.slane %v6025_v42, 2  ;;  %v6347_v10 = vmax.f32 %v6345_v7, %v6346_v9  ;;  %v7489_v62 = vld [vmem:[#allocation4 + $0x42] sm:$0xff] }
 0x8d1   : > { %7284 = vst.msk [vmem:[#allocation5 + $0x10] sm:$0xff] %vm7282_vm6, %v7261_v54  ;;  %v7310_v30 = vpop.permute.xlu1 %7309  ;;  %v12302_v41 = vld [vmem:[#allocation4 + $0x70] sm:$0xff]  ;;  %v6019_v36 = vrot.slane %v6018_v45, 2  ;;  %v6354_v6 = vmax.f32 %v6352_v59, %v6353_v25  ;;  %v6361_v28 = vmax.f32 %v6359_v35, %v6360_v29  ;;  %v6014_v2 = vrot.slane %v12327_v53, 1  ;;  %v5187_v25 = vld [vmem:[#allocation3 + $0xf8] sm:$0xff] }
 0x8d2   : > { %7333 = vst.msk [vmem:[#allocation5 + $0x10] sm:$0xff] %vm13492_vm4, %v7310_v30  ;;  %v7688_v60 = vld [vmem:[#allocation4 + $0x71] sm:$0xff]  ;;  %v6368_v0 = vmax.f32 %v6366_v43, %v6367_v34  ;;  %v6033_v51 = vrot.slane %v6032_v22, 2  ;;  %v6027_v49 = vmax.f32 %v6025_v42, %v6026_v31  ;;  %v6348_v8 = vrot.slane %v6347_v10, 2 }
 0x8d3   : > { %6946 = vst.msk [vmem:[#allocation5 + $0x70] sm:$0xff] %vm6569_vm12, %v12302_v41  ;;  %v6020_v18 = vmax.f32 %v6018_v45, %v6019_v36  ;;  %v6355_v46 = vrot.slane %v6354_v6, 2 }
 0x8d4   : > { %v12305_v38 = vpop.permute.xlu2 %7114  ;;  %7360 = vrot.lane.b32.xlu0 %v12031_v11, %s13489_s26  ;;  %7116 = vrot.lane.b32.xlu2 %v12031_v11, %s13485_s24  ;;  %7696 = vst.msk [vmem:[#allocation5 + $0x48] sm:$0xff] %vm6569_vm12, %v7688_v60  ;;  %v6362_v60 = vrot.slane %v6361_v28, 2  ;;  %v6369_v16 = vrot.slane %v6368_v0, 2  ;;  %v6034_v59 = vmax.f32 %v6032_v22, %v6033_v51  ;;  %v6349_v3 = vmax.f32 %v6347_v10, %v6348_v8  ;;  %s13524_s24 = smov 40   ;;  %s13525_s26 = smov 32  }
 0x8d5   : > { %7166 = vrot.lane.b32.xlu1 %v7636_v63, %s13487_s25  ;;  %v6021_v7 = vrot.slane %v6020_v18, 1  ;;  %v6356_v35 = vmax.f32 %v6354_v6, %v6355_v46  ;;  %s13526_s25 = smov 112  }
 0x8d6   : > { %v6363_v45 = vmax.f32 %v6361_v28, %v6362_v60  ;;  %v6370_v42 = vmax.f32 %v6368_v0, %v6369_v16  ;;  %v6035_v29 = vrot.slane %v6034_v59, 1  ;;  %v6350_v34 = vrot.slane %v6349_v3, 1 }
 0x8d7   : > { %9166 = vmatmul.msk.f32.gmra.mxu1 %vm5202_vm11, %v5187_v25  ;;  %v6022_v22 = vmax.f32 %v6020_v18, %v6021_v7  ;;  %vm7625_vm11 = vcmask 982912  }
 0x8d8   : > { %v5359_v33 = vpop.f32.mrf.mxu0  ;;  %v7359_v24 = vpop.permute.xlu0 %7358  ;;  %v6371_v28 = vrot.slane %v6370_v42, 1 }
 0x8d9   : > { %v5360_v11 = vadd.f32 %v12176_v44, %v5359_v33  ;;  %7382 = vst.msk [vmem:[#allocation5 + $0x10] sm:$0xff] %vm7380_vm3, %v7359_v24  ;;  %v7017_v23 = vpop.permute.xlu1 %7016 }
 0x8da   : > { %7431 = vst.msk [vmem:[#allocation5 + $0x10] sm:$0xff] %vm13474_vm2, %v7408_v40  ;;  %vm13499_vm2 = vcmask 786112   ;;  %v6372_v46 = vmax.f32 %v6370_v42, %v6371_v28 }
 0x8db   : > { %v5429_v5 = vmax.f32 %v5360_v11, 0.0  ;;  %7039 = vst.msk [vmem:[#allocation5 + $0x20] sm:$0xff] %vm13491_vm5, %v7017_v23  ;;  %v6015_v23 = vmax.f32 %v12327_v53, %v6014_v2 }
 0x8dc   : > { %v12325_v19 = vpop.permute.xlu2 %7554  ;;  %7067 = vrot.lane.b32.xlu0 %v12029_v61, %s13511_s23  ;;  %7556 = vrot.lane.b32.xlu2 %v12335_v14, %s13475_s17  ;;  %s13512_s17 = smov 96  }
 0x8dd   : > { %v5519_v1 = vrot.slane %v5429_v5, 2  ;;  %v5520_v55 = vrot.slane %v5429_v5, 4  ;;  %7605 = vrot.lane.b32.xlu1 %v12329_v13, %s13483_s21  ;;  %v5521_v57 = vrot.slane %v5429_v5, 6  ;;  %v6037_v56 = vsel %vm5672_vm13, %v5429_v5, -inf  ;;  %s13523_s21 = smov 72  }
 0x8de   : > { %v5395_v17 = vpop.f32.mrf.mxu1  ;;  %v6038_v15 = vrot.slane %v6037_v56, 4 }
 0x8df   : > { %v6044_v27 = vsel %vm5672_vm13, %v5519_v1, -inf  ;;  %v6051_v61 = vsel %vm5672_vm13, %v5520_v55, -inf  ;;  %v6058_v63 = vsel %vm5672_vm13, %v5521_v57, -inf  ;;  %v5396_v21 = vadd.f32 %v12176_v44, %v5395_v17 }
 0x8e0   : > { %v6045_v40 = vrot.slane %v6044_v27, 4  ;;  %v7066_v26 = vpop.permute.xlu0 %7065  ;;  %v6052_v54 = vrot.slane %v6051_v61, 4  ;;  %v6039_v30 = vmax.f32 %v6037_v56, %v6038_v15  ;;  %v6059_v4 = vrot.slane %v6058_v63, 4 }
 0x8e1   : > { %7088 = vst.msk [vmem:[#allocation5 + $0x20] sm:$0xff] %vm13478_vm7, %v7066_v26  ;;  %v12346_v58 = vmax.f32 %v5396_v21, 0.0  ;;  %vm7576_vm7 = vcmask 917312   ;;  %v6357_v1 = vrot.slane %v6356_v35, 1  ;;  %v6364_v17 = vrot.slane %v6363_v45, 1 }
 0x8e2   : > { %7137 = vst.msk [vmem:[#allocation5 + $0x20] sm:$0xff] %vm13477_vm8, %v12305_v38  ;;  %v6046_v50 = vmax.f32 %v6044_v27, %v6045_v40  ;;  %v6053_v20 = vmax.f32 %v6051_v61, %v6052_v54  ;;  %v6028_v38 = vrot.slane %v6027_v49, 1  ;;  %vm7527_vm8 = vcmask 851712  }
 0x8e3   : > { %v7457_v39 = vpop.permute.xlu1 %7456  ;;  %v5555_v47 = vrot.slane %v12346_v58, 2  ;;  %v6040_v33 = vrot.slane %v6039_v30, 2  ;;  %v6060_v24 = vmax.f32 %v6058_v63, %v6059_v4  ;;  %v6373_v11 = vsel %vm5672_vm13, %v12346_v58, -inf }
 0x8e4   : > { %v12350_v37 = vpop.permute.xlu2 %7262  ;;  %7480 = vst.msk [vmem:[#allocation5 + $0x10] sm:$0xff] %vm13499_vm2, %v7457_v39  ;;  %7507 = vrot.lane.b32.xlu0 %v7489_v62, %s13512_s17  ;;  %7264 = vrot.lane.b32.xlu2 %v7489_v62, %s13479_s28  ;;  %v6047_v43 = vrot.slane %v6046_v50, 2  ;;  %v6054_v5 = vrot.slane %v6053_v20, 2  ;;  %v5556_v36 = vrot.slane %v12346_v58, 4  ;;  %v6374_v6 = vrot.slane %v6373_v11, 4  ;;  %s13513_s28 = smov 16  }
 0x8e5   : > { %7313 = vrot.lane.b32.xlu1 %v12335_v14, %s13481_s14  ;;  %v6380_v31 = vsel %vm5672_vm13, %v5555_v47, -inf  ;;  %v6041_v55 = vmax.f32 %v6039_v30, %v6040_v33  ;;  %v6061_v10 = vrot.slane %v6060_v24, 2  ;;  %v6029_v56 = vmax.f32 %v6027_v49, %v6028_v38  ;;  %s13514_s14 = smov 8  }
 0x8e6   : > { %v6048_v15 = vmax.f32 %v6046_v50, %v6047_v43  ;;  %v6036_v27 = vmax.f32 %v6034_v59, %v6035_v29  ;;  %v12370_v61 = vsel %vm6569_vm12, %v6015_v23, -inf  ;;  %v6055_v0 = vmax.f32 %v6053_v20, %v6054_v5 }
 0x8e7   : > { %v6381_v40 = vrot.slane %v6380_v31, 4  ;;  %v6351_v63 = vmax.f32 %v6349_v3, %v6350_v34  ;;  %v5557_v21 = vrot.slane %v12346_v58, 6  ;;  %v6387_v26 = vsel %vm5672_vm13, %v5556_v36, -inf }
 0x8e8   : > { %v7506_v9 = vpop.permute.xlu0 %7505  ;;  %v6358_v12 = vmax.f32 %v6356_v35, %v6357_v1  ;;  %v6042_v18 = vrot.slane %v6041_v55, 1  ;;  %v6062_v51 = vmax.f32 %v6060_v24, %v6061_v10  ;;  %v6375_v54 = vmax.f32 %v6373_v11, %v6374_v6 }
 0x8e9   : > { %7529 = vst.msk [vmem:[#allocation5 + $0x10] sm:$0xff] %vm7527_vm8, %v7506_v9  ;;  %v12384_v49 = vsel %vm6569_vm12, %v6029_v56, -inf  ;;  %v6365_v8 = vmax.f32 %v6363_v45, %v6364_v17  ;;  %v6049_v30 = vrot.slane %v6048_v15, 1  ;;  %v6056_v39 = vrot.slane %v6055_v0, 1 }
 0x8ea   : > { %7578 = vst.msk [vmem:[#allocation5 + $0x10] sm:$0xff] %vm7576_vm7, %v12325_v19  ;;  %v12377_v19 = vsel %vm6569_vm12, %v6022_v22, -inf  ;;  %v6382_v60 = vmax.f32 %v6380_v31, %v6381_v40  ;;  %v6388_v16 = vrot.slane %v6387_v26, 4  ;;  %v12391_v50 = vsel %vm6569_vm12, %v6351_v63, -inf }
 0x8eb   : > { %v7165_v53 = vpop.permute.xlu1 %7164  ;;  %v12398_v7 = vsel %vm6569_vm12, %v6358_v12, -inf  ;;  %v6043_v59 = vmax.f32 %v6041_v55, %v6042_v18  ;;  %v6063_v20 = vrot.slane %v6062_v51, 1  ;;  %v6376_v38 = vrot.slane %v6375_v54, 2 }
 0x8ec   : > { %v6970_v57 = vpop.permute.xlu2 %6969  ;;  %7187 = vst.msk [vmem:[#allocation5 + $0x20] sm:$0xff] %vm7184_vm9, %v7165_v53  ;;  %7215 = vrot.lane.b32.xlu0 %v12284_v48, %s13510_s27  ;;  %6971 = vrot.lane.b32.xlu2 %v12284_v48, %s13514_s14  ;;  %v12388_v48 = vsel %vm6569_vm12, %v6036_v27, -inf  ;;  %v12401_v47 = vsel %vm6569_vm12, %v6365_v8, -inf  ;;  %v12404_v35 = vsel %vm6569_vm12, %v6372_v46, -inf  ;;  %v6050_v33 = vmax.f32 %v6048_v15, %v6049_v30 }
 0x8ed   : > { %7020 = vrot.lane.b32.xlu1 %v7489_v62, %s13513_s28  ;;  %6991 = vst.msk [vmem:[#allocation5 + $0x30] sm:$0xff] %vm6987_vm14, %v6970_v57  ;;  %v6394_v62 = vsel %vm5672_vm13, %v5557_v21, -inf  ;;  %v12407_v45 = vmax.f32 %v6055_v0, %v6056_v39  ;;  %v12409_v42 = vmax.f32 %v6387_v26, %v6388_v16  ;;  %v12412_v29 = vmax.f32 %v6062_v51, %v6063_v20 }
 0x8ee   : > { %v6395_v43 = vrot.slane %v6394_v62, 4  ;;  %v12415_v5 = vsel %vm6569_vm12, %v6043_v59, -inf  ;;  %v12417_v22 = vmax.f32 %v6375_v54, %v6376_v38 }
 0x8ef   : > { %v6390_v28 = vrot.slane %v12409_v42, 2 }
 0x8f0   : > { %v7214_v4 = vpop.permute.xlu0 %7213  ;;  %v6396_v15 = vmax.f32 %v6394_v62, %v6395_v43 }
 0x8f1   : > { %v5362_v58 = vpop.f32.mrf.mxu0  ;;  %7236 = vst.msk [vmem:[#allocation5 + $0x20] sm:$0xff] %vm7233_vm10, %v7214_v4 }
 0x8f2   : > { %v5363_v2 = vadd.f32 %v12176_v44, %v5362_v58  ;;  %7285 = vst.msk [vmem:[#allocation5 + $0x20] sm:$0xff] %vm7282_vm6, %v12350_v37  ;;  %v6383_v37 = vrot.slane %v6382_v60, 2 }
 0x8f3   : > { %v7604_v3 = vpop.permute.xlu1 %7603 }
 0x8f4   : > { %v5430_v24 = vmax.f32 %v5363_v2, 0.0  ;;  %7627 = vst.msk [vmem:[#allocation5 + $0x10] sm:$0xff] %vm7625_vm11, %v7604_v3  ;;  %v12423_v17 = vmax.f32 %v6382_v60, %v6383_v37 }
 0x8f6   : > { %v5522_v11 = vrot.slane %v5430_v24, 2  ;;  %v5523_v9 = vrot.slane %v5430_v24, 4  ;;  %v5524_v25 = vrot.slane %v5430_v24, 6  ;;  %v6065_v23 = vsel %vm5672_vm13, %v5430_v24, -inf  ;;  %v5398_v36 = vpop.f32.mrf.mxu1 }
 0x8f7   : > { %v6066_v34 = vrot.slane %v6065_v23, 4  ;;  %v5399_v10 = vadd.f32 %v12176_v44, %v5398_v36 }
 0x8f8   : > { %v6072_v31 = vsel %vm5672_vm13, %v5522_v11, -inf  ;;  %v6079_v1 = vsel %vm5672_vm13, %v5523_v9, -inf  ;;  %v6086_v55 = vsel %vm5672_vm13, %v5524_v25, -inf }
 0x8f9   : > { %v6067_v6 = vmax.f32 %v6065_v23, %v6066_v34  ;;  %v6073_v53 = vrot.slane %v6072_v31, 4  ;;  %v6080_v57 = vrot.slane %v6079_v1, 4  ;;  %v6087_v56 = vrot.slane %v6086_v55, 4 }
 0x8fa   : > { %v5442_v27 = vmax.f32 %v5399_v10, 0.0 }
 0x8fb   : > { %v6068_v0 = vrot.slane %v6067_v6, 2  ;;  %v6074_v40 = vmax.f32 %v6072_v31, %v6073_v53  ;;  %v6081_v63 = vmax.f32 %v6079_v1, %v6080_v57  ;;  %v6088_v21 = vmax.f32 %v6086_v55, %v6087_v56  ;;  %v7312_v26 = vpop.permute.xlu1 %7311 }
 0x8fc   : > { %v5558_v12 = vrot.slane %v5442_v27, 2  ;;  %v5559_v18 = vrot.slane %v5442_v27, 4  ;;  %v5560_v51 = vrot.slane %v5442_v27, 6  ;;  %v6401_v54 = vsel %vm5672_vm13, %v5442_v27, -inf  ;;  %7334 = vst.msk [vmem:[#allocation5 + $0x20] sm:$0xff] %vm13492_vm4, %v7312_v26 }
 0x8fd   : > { %v6069_v8 = vmax.f32 %v6067_v6, %v6068_v0  ;;  %v6075_v46 = vrot.slane %v6074_v40, 2  ;;  %v6082_v30 = vrot.slane %v6081_v63, 2  ;;  %v6089_v4 = vrot.slane %v6088_v21, 2 }
 0x8fe   : > { %v6402_v39 = vrot.slane %v6401_v54, 4  ;;  %v6408_v60 = vsel %vm5672_vm13, %v5558_v12, -inf  ;;  %v6415_v16 = vsel %vm5672_vm13, %v5559_v18, -inf  ;;  %v6422_v58 = vsel %vm5672_vm13, %v5560_v51, -inf }
 0x8ff   : > { %v6070_v62 = vrot.slane %v6069_v8, 1  ;;  %v6076_v2 = vmax.f32 %v6074_v40, %v6075_v46  ;;  %v6083_v59 = vmax.f32 %v6081_v63, %v6082_v30  ;;  %v6090_v20 = vmax.f32 %v6088_v21, %v6089_v4 }
 0x900   : > { %v6403_v38 = vmax.f32 %v6401_v54, %v6402_v39  ;;  %v6409_v3 = vrot.slane %v6408_v60, 4  ;;  %v6416_v24 = vrot.slane %v6415_v16, 4  ;;  %v6423_v37 = vrot.slane %v6422_v58, 4 }
 0x901   : > { %v6071_v43 = vmax.f32 %v6069_v8, %v6070_v62  ;;  %v6077_v11 = vrot.slane %v6076_v2, 1  ;;  %v6084_v9 = vrot.slane %v6083_v59, 1  ;;  %v6091_v25 = vrot.slane %v6090_v20, 1 }
 0x902   : > { %v6404_v23 = vrot.slane %v6403_v38, 2  ;;  %v6410_v34 = vmax.f32 %v6408_v60, %v6409_v3  ;;  %v6417_v36 = vmax.f32 %v6415_v16, %v6416_v24  ;;  %v6424_v31 = vmax.f32 %v6422_v58, %v6423_v37 }
 0x903   : > { %v12432_v1 = vsel %vm6569_vm12, %v6050_v33, -inf  ;;  %v6378_v55 = vrot.slane %v12417_v22, 1  ;;  %v6078_v10 = vmax.f32 %v6076_v2, %v6077_v11  ;;  %v6085_v6 = vmax.f32 %v6083_v59, %v6084_v9  ;;  %v7019_v53 = vpop.permute.xlu1 %7018 }
 0x904   : > { %v6397_v57 = vrot.slane %v6396_v15, 2  ;;  %v6405_v56 = vmax.f32 %v6403_v38, %v6404_v23  ;;  %v6411_v27 = vrot.slane %v6410_v34, 2  ;;  %v6418_v0 = vrot.slane %v6417_v36, 2  ;;  %7040 = vst.msk [vmem:[#allocation5 + $0x30] sm:$0xff] %vm13491_vm5, %v7019_v53 }
 0x905   : > { %v12438_v40 = vsel %vm6569_vm12, %v12407_v45, -inf  ;;  %v6092_v63 = vmax.f32 %v6090_v20, %v6091_v25  ;;  %v6646_v21 = vsel %vm6569_vm12, %v6078_v10, -inf  ;;  %v6425_v33 = vrot.slane %v6424_v31, 2 }
 0x906   : > { %v6385_v26 = vrot.slane %v12423_v17, 1  ;;  %v12443_v12 = vmax.f32 %v12409_v42, %v6390_v28  ;;  %v6643_v18 = vsel %vm6569_vm12, %v6071_v43, -inf  ;;  %v6406_v51 = vrot.slane %v6405_v56, 1  ;;  %v8115_v43 = vld [vmem:[%s13453_s3 + $0x70] sm:$0xff] }
 0x907   : > { %v6647_v54 = vmax.f32 %v12377_v19, %v6646_v21  ;;  %v6649_v8 = vsel %vm6569_vm12, %v6085_v6, -inf  ;;  %v6412_v46 = vmax.f32 %v6410_v34, %v6411_v27  ;;  %v6419_v30 = vmax.f32 %v6417_v36, %v6418_v0  ;;  %v5365_v45 = vpop.f32.mrf.mxu0  ;;  %v8113_v21 = vld [vmem:[%s13453_s3 + $0x60] sm:$0xff] }
 0x908   : > { %v12450_v4 = vsel %vm6569_vm12, %v12412_v29, -inf  ;;  %v12453_v39 = vmax.f32 %v12417_v22, %v6378_v55  ;;  %v12455_v60 = vmax.f32 %v6396_v15, %v6397_v57  ;;  %v5366_v42 = vadd.f32 %v12176_v44, %v5365_v45  ;;  %v8114_v55 = vld [vmem:[%s13453_s3 + $0x68] sm:$0xff] }
 0x909   : > { %v6644_v28 = vmax.f32 %v12370_v61, %v6643_v18  ;;  %v6652_v19 = vsel %vm6569_vm12, %v6092_v63, -inf  ;;  %v6413_v16 = vrot.slane %v6412_v46, 1  ;;  %v6426_v58 = vmax.f32 %v6424_v31, %v6425_v33 }
 0x90a   : > { %v6650_v62 = vmax.f32 %v12384_v49, %v6649_v8  ;;  %v6407_v2 = vmax.f32 %v6405_v56, %v6406_v51  ;;  %v6420_v59 = vrot.slane %v6419_v30, 1  ;;  %v5431_v20 = vmax.f32 %v5366_v42, 0.0  ;;  %v8116_v49 = vld [vmem:[%s13453_s3 + $0x78] sm:$0xff] }
 0x90b   : > { %v12462_v29 = vmax.f32 %v12423_v17, %v6385_v26  ;;  %v6392_v22 = vrot.slane %v12443_v12, 1  ;;  %v6879_v15 = vsel %vm6851_vm15, %v6647_v54, %v6644_v28  ;;  %v6414_v38 = vmax.f32 %v6412_v46, %v6413_v16  ;;  %9205 = vmatpush.msra.mxu2 %v8116_v49  ;;  %8155 = vmatpush.msrb.mxu1 %v8116_v49 }
 0x90c   : > { %v5525_v3 = vrot.slane %v5431_v20, 2  ;;  %v5526_v24 = vrot.slane %v5431_v20, 4  ;;  %v5527_v61 = vrot.slane %v5431_v20, 6  ;;  %v6093_v37 = vsel %vm5672_vm13, %v5431_v20, -inf }
 0x90d   : > { %v6399_v17 = vrot.slane %v12455_v60, 1  ;;  %v6653_v11 = vmax.f32 %v12388_v48, %v6652_v19  ;;  %v6427_v9 = vrot.slane %v6426_v58, 1  ;;  %v6094_v25 = vrot.slane %v6093_v37, 4  ;;  %9206 = vmatpush.msra.mxu2 %v8115_v43  ;;  %8156 = vmatpush.msrb.mxu1 %v8115_v43  ;;  %v8110_v43 = vld [vmem:[%s13453_s3 + $0x48] sm:$0xff] }
 0x90e   : > { %v6880_v23 = vsel %vm6853_vm0, %v6650_v62, %v6879_v15  ;;  %v6421_v34 = vmax.f32 %v6419_v30, %v6420_v59  ;;  %v12477_v36 = vsel %vm6569_vm12, %v6407_v2, -inf  ;;  %v6100_v31 = vsel %vm5672_vm13, %v5525_v3, -inf  ;;  %v5401_v57 = vpop.f32.mrf.mxu1  ;;  %v8111_v59 = vld [vmem:[%s13453_s3 + $0x50] sm:$0xff] }
 0x90f   : > { %v6095_v10 = vmax.f32 %v6093_v37, %v6094_v25  ;;  %v6101_v6 = vrot.slane %v6100_v31, 4  ;;  %v6107_v48 = vsel %vm5672_vm13, %v5526_v24, -inf  ;;  %v6114_v53 = vsel %vm5672_vm13, %v5527_v61, -inf  ;;  %9207 = vmatpush.msra.mxu2 %v8114_v55  ;;  %8157 = vmatpush.msrb.mxu1 %v8114_v55 }
 0x910   : > { %v12486_v56 = vsel %vm6569_vm12, %v6414_v38, -inf  ;;  %v6108_v27 = vrot.slane %v6107_v48, 4  ;;  %v6115_v0 = vrot.slane %v6114_v53, 4  ;;  %v5402_v63 = vadd.f32 %v12176_v44, %v5401_v57  ;;  %v8112_v44 = vld [vmem:[%s13453_s3 + $0x58] sm:$0xff] }
 0x911   : > { %v12493_v33 = vsel %vm13501_vm1, %v6653_v11, %v6880_v23  ;;  %v12495_v26 = vmax.f32 %v6426_v58, %v6427_v9  ;;  %v6096_v18 = vrot.slane %v6095_v10, 2  ;;  %v6102_v51 = vmax.f32 %v6100_v31, %v6101_v6  ;;  %9208 = vmatpush.msra.mxu2 %v8113_v21  ;;  %8158 = vmatpush.msrb.mxu1 %v8113_v21  ;;  %v8109_v6 = vld [vmem:[%s13453_s3 + $0x40] sm:$0xff] }
 0x912   : > { %v6716_v54 = vmax.f32 %v12391_v50, %v12477_v36  ;;  %v6109_v8 = vmax.f32 %v6107_v48, %v6108_v27  ;;  %v6116_v46 = vmax.f32 %v6114_v53, %v6115_v0  ;;  %v5443_v30 = vmax.f32 %v5402_v63, 0.0  ;;  %v8105_v50 = vld [vmem:[%s13453_s3 + $0x20] sm:$0xff] }
 0x913   : > { %v6719_v45 = vmax.f32 %v12398_v7, %v12486_v56  ;;  %v12505_v42 = vsel %vm6569_vm12, %v6421_v34, -inf  ;;  %v6097_v28 = vmax.f32 %v6095_v10, %v6096_v18  ;;  %v6103_v19 = vrot.slane %v6102_v51, 2  ;;  %9209 = vmatpush.msra.mxu2 %v8112_v44  ;;  %8159 = vmatpush.msrb.mxu1 %v8112_v44 }
 0x914   : > { %v6110_v16 = vrot.slane %v6109_v8, 2  ;;  %v6117_v58 = vrot.slane %v6116_v46, 2  ;;  %v5561_v62 = vrot.slane %v5443_v30, 2  ;;  %v5562_v2 = vrot.slane %v5443_v30, 4 }
 0x915   : > { %v6098_v20 = vrot.slane %v6097_v28, 1  ;;  %v6104_v15 = vmax.f32 %v6102_v51, %v6103_v19  ;;  %v5563_v38 = vrot.slane %v5443_v30, 6  ;;  %v6429_v3 = vsel %vm5672_vm13, %v5443_v30, -inf  ;;  %9210 = vmatpush.msra.mxu2 %v8111_v59  ;;  %8160 = vmatpush.msrb.mxu1 %v8111_v59  ;;  %v8108_v51 = vld [vmem:[%s13453_s3 + $0x38] sm:$0xff] }
 0x916   : > { %v6111_v24 = vmax.f32 %v6109_v8, %v6110_v16  ;;  %v6118_v61 = vmax.f32 %v6116_v46, %v6117_v58  ;;  %v6430_v37 = vrot.slane %v6429_v3, 4  ;;  %v6436_v49 = vsel %vm5672_vm13, %v5561_v62, -inf  ;;  %v8107_v58 = vld [vmem:[%s13453_s3 + $0x30] sm:$0xff] }
 0x917   : > { %v6099_v11 = vmax.f32 %v6097_v28, %v6098_v20  ;;  %v6105_v9 = vrot.slane %v6104_v15, 1  ;;  %v6437_v25 = vrot.slane %v6436_v49, 4  ;;  %v6443_v23 = vsel %vm5672_vm13, %v5562_v2, -inf  ;;  %9211 = vmatpush.msra.mxu2 %v8110_v43  ;;  %8161 = vmatpush.msrb.mxu1 %v8110_v43 }
 0x918   : > { %v6112_v34 = vrot.slane %v6111_v24, 1  ;;  %v6119_v31 = vrot.slane %v6118_v61, 1  ;;  %v6431_v55 = vmax.f32 %v6429_v3, %v6430_v37  ;;  %v6444_v10 = vrot.slane %v6443_v23, 4 }
 0x919   : > { %v6106_v48 = vmax.f32 %v6104_v15, %v6105_v9  ;;  %v6655_v53 = vsel %vm6569_vm12, %v6099_v11, -inf  ;;  %v6438_v57 = vmax.f32 %v6436_v49, %v6437_v25  ;;  %v6450_v27 = vsel %vm5672_vm13, %v5563_v38, -inf  ;;  %9212 = vmatpush.msra.mxu2 %v8109_v6  ;;  %8162 = vmatpush.msrb.mxu1 %v8109_v6  ;;  %v8104_v9 = vld [vmem:[%s13453_s3 + $0x18] sm:$0xff] }
 0x91a   : > { %v6113_v0 = vmax.f32 %v6111_v24, %v6112_v34  ;;  %v6120_v63 = vmax.f32 %v6118_v61, %v6119_v31  ;;  %v6656_v21 = vmax.f32 %v12415_v5, %v6655_v53  ;;  %v6432_v18 = vrot.slane %v6431_v55, 2 }
 0x91b   : > { %v6658_v8 = vsel %vm6569_vm12, %v6106_v48, -inf  ;;  %v6439_v46 = vrot.slane %v6438_v57, 2  ;;  %v6445_v30 = vmax.f32 %v6443_v23, %v6444_v10  ;;  %v6451_v44 = vrot.slane %v6450_v27, 4  ;;  %9213 = vmatpush.msra.mxu2 %v8108_v51  ;;  %8163 = vmatpush.msrb.mxu1 %v8108_v51 }
 0x91c   : > { %v6659_v28 = vmax.f32 %v12432_v1, %v6658_v8  ;;  %v6661_v19 = vsel %vm6569_vm12, %v6113_v0, -inf  ;;  %v6664_v16 = vsel %vm6569_vm12, %v6120_v63, -inf  ;;  %vm13515_vm5 = vcmask 1044484  }
 0x91d   : > { %v6882_v5 = vsel %vm13515_vm5, %v6656_v21, %v12493_v33  ;;  %v6722_v62 = vmax.f32 %v12401_v47, %v12505_v42  ;;  %v6662_v2 = vmax.f32 %v12438_v40, %v6661_v19  ;;  %v6433_v59 = vmax.f32 %v6431_v55, %v6432_v18  ;;  %v8106_v33 = vld [vmem:[%s13453_s3 + $0x28] sm:$0xff]  ;;  %9214 = vmatpush.msra.mxu2 %v8107_v58  ;;  %v8103_v55 = vld [vmem:[%s13453_s3 + $0x10] sm:$0xff] }
 0x91e   : > { %v6440_v20 = vmax.f32 %v6438_v57, %v6439_v46  ;;  %v6665_v1 = vmax.f32 %v12450_v4, %v6664_v16  ;;  %vm13516_vm4 = vcmask 1045509   ;;  %v6446_v38 = vrot.slane %v6445_v30, 2  ;;  %8164 = vmatpush.msrb.mxu1 %v8107_v58  ;;  %v8102_v57 = vld [vmem:[%s13453_s3 + $0x8] sm:$0xff]  ;;  %v8101_v46 = vld [vmem:[%s13453_s3] sm:$0xff] }
 0x91f   : > { %v6883_v15 = vsel %vm13516_vm4, %v6659_v28, %v6882_v5  ;;  %v6452_v3 = vmax.f32 %v6450_v27, %v6451_v44  ;;  %v6900_v47 = vsel %vm6851_vm15, %v6719_v45, %v6716_v54  ;;  %vm13517_vm5 = vcmask 1046534   ;;  %9215 = vmatpush.msra.mxu2 %v8106_v33 }
 0x920   : > { %v6884_v40 = vsel %vm13517_vm5, %v6662_v2, %v6883_v15  ;;  %v6434_v4 = vrot.slane %v6433_v59, 1  ;;  %v6441_v42 = vrot.slane %v6440_v20, 1  ;;  %v6724_v24 = vsel %vm6569_vm12, %v12495_v26, -inf  ;;  %8165 = vmatpush.msrb.mxu1 %v8106_v33 }
 0x921   : > { %vm13518_vm4 = vcmask 1047559   ;;  %v6447_v37 = vmax.f32 %v6445_v30, %v6446_v38  ;;  %v6453_v49 = vrot.slane %v6452_v3, 2  ;;  %v6393_v7 = vmax.f32 %v12443_v12, %v6392_v22  ;;  %9216 = vmatpush.msra.mxu2 %v8105_v50 }
 0x922   : > { %v6885_v61 = vsel %vm13518_vm4, %v6665_v1, %v6884_v40  ;;  %v6726_v36 = vsel %vm6569_vm12, %v12453_v39, -inf  ;;  %v6435_v56 = vmax.f32 %v6433_v59, %v6434_v4  ;;  %v6442_v26 = vmax.f32 %v6440_v20, %v6441_v42  ;;  %8166 = vmatpush.msrb.mxu1 %v8105_v50  ;;  %v12651_v4 = vld [vmem:[#allocation4 + $0x61] sm:$0xff] }
 0x923   : > { %6926 = vst.msk [vmem:[#allocation4 + $0x52] sm:$0xff] %vm6569_vm12, %v6885_v61  ;;  %v6729_v54 = vsel %vm6569_vm12, %v12462_v29, -inf  ;;  %v6901_v45 = vsel %vm6853_vm0, %v6722_v62, %v6900_v47  ;;  %v6448_v43 = vrot.slane %v6447_v37, 1  ;;  %v6454_v11 = vmax.f32 %v6452_v3, %v6453_v49  ;;  %9217 = vmatpush.msra.mxu2 %v8104_v9  ;;  %v12647_v47 = vld [vmem:[%s13452_s2] ss:$0 sm:$0xff] }
 0x924   : > { %v6400_v12 = vmax.f32 %v12455_v60, %v6399_v17  ;;  %v6725_v39 = vmax.f32 %v12404_v35, %v6724_v24  ;;  %v6727_v22 = vsel %vm6569_vm12, %v6435_v56, -inf  ;;  %v6730_v25 = vsel %vm6569_vm12, %v6442_v26, -inf  ;;  %8167 = vmatpush.msrb.mxu1 %v8104_v9 }
 0x925   : > { %v6449_v29 = vmax.f32 %v6447_v37, %v6448_v43  ;;  %v6455_v23 = vrot.slane %v6454_v11, 1  ;;  %v6728_v34 = vmax.f32 %v6726_v36, %v6727_v22  ;;  %v6731_v31 = vmax.f32 %v6729_v54, %v6730_v25  ;;  %9218 = vmatpush.msra.mxu2 %v8103_v55 }
 0x926   : > { %v6902_v10 = vsel %vm13501_vm1, %v6725_v39, %v6901_v45  ;;  %v6732_v60 = vsel %vm6569_vm12, %v6393_v7, -inf  ;;  %vm13519_vm5 = vcmask 1044484   ;;  %vm13520_vm4 = vcmask 1045509   ;;  %v7410_v63 = vpop.permute.xlu2 %7409  ;;  %8168 = vmatpush.msrb.mxu1 %v8103_v55 }
 0x927   : > { %v6456_v35 = vmax.f32 %v6454_v11, %v6455_v23  ;;  %v6733_v17 = vsel %vm6569_vm12, %v6449_v29, -inf  ;;  %v6903_v6 = vsel %vm13519_vm5, %v6728_v34, %v6902_v10  ;;  %v6735_v27 = vsel %vm6569_vm12, %v6400_v12, -inf  ;;  %9219 = vmatpush.msra.mxu2 %v8102_v57 }
 0x928   : > { %v6734_v48 = vmax.f32 %v6732_v60, %v6733_v17  ;;  %v6904_v53 = vsel %vm13520_vm4, %v6731_v31, %v6903_v6  ;;  %vm13521_vm5 = vcmask 1046534   ;;  %vm13522_vm4 = vcmask 1047559   ;;  %8169 = vmatpush.msrb.mxu1 %v8102_v57 }
 0x929   : > { %v6736_v0 = vsel %vm6569_vm12, %v6456_v35, -inf  ;;  %9220 = vmatpush.msra.mxu2 %v8101_v46 }
 0x92a   : > { %v12587_v21 = vld [vmem:[#allocation4 + $0x50] sm:$0xff]  ;;  %v6737_v51 = vmax.f32 %v6735_v27, %v6736_v0  ;;  %v6905_v8 = vsel %vm13521_vm5, %v6734_v48, %v6904_v53  ;;  %8170 = vmatpush.msrb.mxu1 %v8101_v46  ;;  %vm7675_vm5 = vcmask 1048512  }
 0x92b   : > { %v12589_v18 = vld [vmem:[#allocation4 + $0x51] sm:$0xff]  ;;  %7655 = vrot.lane.b32.xlu0 %v12587_v21, %s13497_s22  ;;  %6944 = vst.msk [vmem:[#allocation5 + $0x50] sm:$0xff] %vm6569_vm12, %v12587_v21  ;;  %7411 = vrot.lane.b32.xlu2 %v12587_v21, %s13493_s29  ;;  %s13527_s29 = smov 104   ;;  %s13529_s22 = smov 56  }
 0x92c   : > { %7460 = vrot.lane.b32.xlu1 %v12589_v18, %s13495_s16  ;;  %v7686_v30 = vld [vmem:[#allocation4 + $0x51] sm:$0xff]  ;;  %v6906_v44 = vsel %vm13522_vm4, %v6737_v51, %v6905_v8  ;;  %s13528_s16 = smov 64   ;;  %vm13530_vm4 = vcmask 720512  }
 0x92d   : > { %7694 = vst.msk [vmem:[#allocation5 + $0x28] sm:$0xff] %vm6569_vm12, %v7686_v30  ;;  %v12613_v5 = vld [vmem:[#allocation4 + $0x54] sm:$0xff] }
 0x92e   : > { %6929 = vst.msk [vmem:[#allocation4 + $0x82] sm:$0xff] %vm6569_vm12, %v6906_v44  ;;  %v7117_v28 = vpop.permute.xlu2 %7116  ;;  %v12619_v58 = vld [vmem:[#allocation4 + $0x53] sm:$0xff] }
 0x92f   : > { %v12626_v59 = vld [vmem:[#allocation4 + $0x52] sm:$0xff] }
 0x933   : > { %7362 = vrot.lane.b32.xlu0 %v12329_v13, %s13523_s21  ;;  %7118 = vrot.lane.b32.xlu2 %v12329_v13, %s13525_s26 }
 0x934   : > { %7168 = vrot.lane.b32.xlu1 %v12587_v21, %s13524_s24 }
 0x935   : > { %v7689_v19 = vld [vmem:[#allocation4 + $0x81] sm:$0xff] }
 0x936   : > { %7697 = vst.msk [vmem:[#allocation5 + $0x58] sm:$0xff] %vm6569_vm12, %v7689_v19  ;;  %v7557_v16 = vpop.permute.xlu2 %7556 }
 0x93b   : > { %7069 = vrot.lane.b32.xlu0 %v12335_v14, %s13511_s23  ;;  %7558 = vrot.lane.b32.xlu2 %v12619_v58, %s13527_s29 }
 0x93c   : > { %7607 = vrot.lane.b32.xlu1 %v12613_v5, %s13526_s25  ;;  %v5404_v38 = vpop.f32.mrf.mxu1 }
 0x93d   : > { %v5405_v40 = vadd.f32 %v12647_v47, %v5404_v38 }
 0x93e   : > { %v7654_v62 = vpop.permute.xlu0 %7653  ;;  %v12624_v2 = vpop.permute.xlu2 %7264 }
 0x93f   : > { %v7459_v13 = vpop.permute.xlu1 %7458  ;;  %7677 = vst.msk [vmem:[#allocation5 + $0x10] sm:$0xff] %vm7675_vm5, %v7654_v62  ;;  %v5444_v42 = vmax.f32 %v5405_v40, 0.0  ;;  %v12680_v62 = vld [vmem:[#allocation4 + $0x64] sm:$0xff] }
 0x941   : > { %v5564_v24 = vrot.slane %v5444_v42, 2  ;;  %v5565_v61 = vrot.slane %v5444_v42, 4  ;;  %v5566_v37 = vrot.slane %v5444_v42, 6  ;;  %v6457_v49 = vsel %vm5672_vm13, %v5444_v42, -inf }
 0x942   : > { %v6458_v50 = vrot.slane %v6457_v49, 4 }
 0x943   : > { %7509 = vrot.lane.b32.xlu0 %v12626_v59, %s13512_s17  ;;  %7266 = vrot.lane.b32.xlu2 %v12626_v59, %s13529_s22  ;;  %v6464_v7 = vsel %vm5672_vm13, %v5564_v24, -inf  ;;  %v6471_v36 = vsel %vm5672_vm13, %v5565_v61, -inf  ;;  %v6478_v56 = vsel %vm5672_vm13, %v5566_v37, -inf }
 0x944   : > { %7315 = vrot.lane.b32.xlu1 %v12619_v58, %s13528_s16  ;;  %v6459_v26 = vmax.f32 %v6457_v49, %v6458_v50  ;;  %v6465_v54 = vrot.slane %v6464_v7, 4  ;;  %v6472_v45 = vrot.slane %v6471_v36, 4  ;;  %v6479_v43 = vrot.slane %v6478_v56, 4  ;;  %v5407_v11 = vpop.f32.mrf.mxu1 }
 0x945   : > { %v5408_v39 = vadd.f32 %v12647_v47, %v5407_v11 }
 0x946   : > { %v7361_v14 = vpop.permute.xlu0 %7360  ;;  %v8087_v1 = vld [vmem:[#allocation5 + $0x10] sm:$0xff]  ;;  %v6972_v15 = vpop.permute.xlu2 %6971  ;;  %v6460_v22 = vrot.slane %v6459_v26, 2  ;;  %v6466_v25 = vmax.f32 %v6464_v7, %v6465_v54  ;;  %v6473_v29 = vmax.f32 %v6471_v36, %v6472_v45  ;;  %v6480_v23 = vmax.f32 %v6478_v56, %v6479_v43  ;;  %v12695_v45 = vld [vmem:[#allocation4 + $0x62] sm:$0xff] }
 0x947   : > { %v7167_v20 = vpop.permute.xlu1 %7166  ;;  %7383 = vst.msk [vmem:[#allocation5 + $0x20] sm:$0xff] %vm7380_vm3, %v7361_v14  ;;  %8174 = vmatmul.f32.vlgmr.msra.gmra.mxu2 %v8087_v1  ;;  %v5445_v34 = vmax.f32 %v5408_v39, 0.0  ;;  %v12688_v14 = vld [vmem:[#allocation4 + $0x63] sm:$0xff] }
 0x948   : > { %7432 = vst.msk [vmem:[#allocation5 + $0x20] sm:$0xff] %vm13530_vm4, %v7410_v63  ;;  %vm13531_vm4 = vcmask 261312   ;;  %v6467_v31 = vrot.slane %v6466_v25, 2  ;;  %v6474_v55 = vrot.slane %v6473_v29, 2  ;;  %v6461_v6 = vmax.f32 %v6459_v26, %v6460_v22 }
 0x949   : > { %7481 = vst.msk [vmem:[#allocation5 + $0x20] sm:$0xff] %vm13499_vm2, %v7459_v13  ;;  %vm13532_vm2 = vcmask 326912   ;;  %v5567_v10 = vrot.slane %v5445_v34, 2  ;;  %v5568_v60 = vrot.slane %v5445_v34, 4  ;;  %v5569_v35 = vrot.slane %v5445_v34, 6 }
 0x94a   : > { %6992 = vst.msk [vmem:[#allocation5 + $0x40] sm:$0xff] %vm6987_vm14, %v6972_v15  ;;  %v6485_v17 = vsel %vm5672_vm13, %v5445_v34, -inf  ;;  %v6468_v48 = vmax.f32 %v6466_v25, %v6467_v31  ;;  %v6481_v53 = vrot.slane %v6480_v23, 2  ;;  %v6475_v51 = vmax.f32 %v6473_v29, %v6474_v55 }
 0x94b   : > { %7217 = vrot.lane.b32.xlu0 %v12589_v18, %s13510_s27  ;;  %6973 = vrot.lane.b32.xlu2 %v12589_v18, %s13514_s14  ;;  %v6486_v57 = vrot.slane %v6485_v17, 4  ;;  %v6492_v27 = vsel %vm5672_vm13, %v5567_v10, -inf  ;;  %v6499_v0 = vsel %vm5672_vm13, %v5568_v60, -inf  ;;  %v6506_v63 = vsel %vm5672_vm13, %v5569_v35, -inf }
 0x94c   : > { %7022 = vrot.lane.b32.xlu1 %v12626_v59, %s13513_s28  ;;  %v6493_v30 = vrot.slane %v6492_v27, 4  ;;  %v6500_v44 = vrot.slane %v6499_v0, 4  ;;  %v5410_v19 = vpop.f32.mrf.mxu1  ;;  %v6482_v13 = vmax.f32 %v6480_v23, %v6481_v53  ;;  %v6469_v1 = vrot.slane %v6468_v48, 1 }
 0x94d   : > { %v6487_v46 = vmax.f32 %v6485_v17, %v6486_v57  ;;  %v5411_v40 = vadd.f32 %v12647_v47, %v5410_v19 }
 0x94e   : > { %v7068_v3 = vpop.permute.xlu0 %7067  ;;  %v6494_v38 = vmax.f32 %v6492_v27, %v6493_v30  ;;  %v6483_v42 = vrot.slane %v6482_v13, 1  ;;  %v6470_v61 = vmax.f32 %v6468_v48, %v6469_v1 }
 0x94f   : > { %v7606_v33 = vpop.permute.xlu1 %7605  ;;  %7089 = vst.msk [vmem:[#allocation5 + $0x30] sm:$0xff] %vm13531_vm4, %v7068_v3  ;;  %v6488_v15 = vrot.slane %v6487_v46, 2  ;;  %vm13537_vm4 = vcmask 195712   ;;  %v6501_v3 = vmax.f32 %v6499_v0, %v6500_v44  ;;  %v5446_v49 = vmax.f32 %v5411_v40, 0.0 }
 0x950   : > { %7138 = vst.msk [vmem:[#allocation5 + $0x30] sm:$0xff] %vm13532_vm2, %v7117_v28  ;;  %v6507_v28 = vrot.slane %v6506_v63, 4  ;;  %vm13536_vm2 = vcmask 589312   ;;  %v6495_v50 = vrot.slane %v6494_v38, 2  ;;  %v6484_v54 = vmax.f32 %v6482_v13, %v6483_v42 }
 0x951   : > { %7188 = vst.msk [vmem:[#allocation5 + $0x30] sm:$0xff] %vm7184_vm9, %v7167_v20  ;;  %v6462_v20 = vrot.slane %v6461_v6, 1  ;;  %v6489_v37 = vmax.f32 %v6487_v46, %v6488_v15  ;;  %v6502_v36 = vrot.slane %v6501_v3, 2  ;;  %v5570_v26 = vrot.slane %v5446_v49, 2 }
 0x952   : > { %v5571_v43 = vrot.slane %v5446_v49, 4  ;;  %v5572_v11 = vrot.slane %v5446_v49, 6  ;;  %v12702_v39 = vsel %vm6569_vm12, %v6470_v61, -inf  ;;  %v12710_v23 = vmax.f32 %v6494_v38, %v6495_v50 }
 0x953   : > { %7657 = vrot.lane.b32.xlu0 %v12009_v32, %s13533_s18  ;;  %7413 = vrot.lane.b32.xlu2 %v12009_v32, %s13535_s0  ;;  %v6463_v24 = vmax.f32 %v6461_v6, %v6462_v20  ;;  %v6490_v22 = vrot.slane %v6489_v37, 1  ;;  %v6520_v34 = vsel %vm5672_vm13, %v5570_v26, -inf  ;;  %v12715_v10 = vmax.f32 %v6501_v3, %v6502_v36 }
 0x954   : > { %7462 = vrot.lane.b32.xlu1 %v12651_v4, %s13534_s11  ;;  %v5413_v29 = vpop.f32.mrf.mxu1  ;;  %v6527_v31 = vsel %vm5672_vm13, %v5571_v43, -inf  ;;  %v6534_v55 = vsel %vm5672_vm13, %v5572_v11, -inf  ;;  %v6521_v17 = vrot.slane %v6520_v34, 4  ;;  %v12724_v27 = vsel %vm6569_vm12, %v6484_v54, -inf }
 0x955   : > { %v6528_v48 = vrot.slane %v6527_v31, 4  ;;  %v6535_v53 = vrot.slane %v6534_v55, 4  ;;  %v5414_v57 = vadd.f32 %v12647_v47, %v5413_v29  ;;  %v12726_v0 = vmax.f32 %v6489_v37, %v6490_v22 }
 0x956   : > { %v7508_v9 = vpop.permute.xlu0 %7507 }
 0x957   : > { %v7314_v12 = vpop.permute.xlu1 %7313  ;;  %7530 = vst.msk [vmem:[#allocation5 + $0x20] sm:$0xff] %vm7527_vm8, %v7508_v9  ;;  %v6513_v9 = vsel %vm5672_vm13, %v5446_v49, -inf  ;;  %v6529_v46 = vmax.f32 %v6527_v31, %v6528_v48  ;;  %v6536_v30 = vmax.f32 %v6534_v55, %v6535_v53  ;;  %v5447_v44 = vmax.f32 %v5414_v57, 0.0 }
 0x958   : > { %7579 = vst.msk [vmem:[#allocation5 + $0x20] sm:$0xff] %vm7576_vm7, %v7557_v16  ;;  %v6514_v25 = vrot.slane %v6513_v9, 4 }
 0x959   : > { %7628 = vst.msk [vmem:[#allocation5 + $0x20] sm:$0xff] %vm7625_vm11, %v7606_v33  ;;  %v6508_v33 = vmax.f32 %v6506_v63, %v6507_v28  ;;  %v6504_v28 = vrot.slane %v12715_v10, 1  ;;  %v6530_v20 = vrot.slane %v6529_v46, 2  ;;  %v6537_v47 = vrot.slane %v6536_v30, 2 }
 0x95a   : > { %v6515_v35 = vmax.f32 %v6513_v9, %v6514_v25  ;;  %v5573_v1 = vrot.slane %v5447_v44, 2  ;;  %v5574_v15 = vrot.slane %v5447_v44, 4  ;;  %v5575_v3 = vrot.slane %v5447_v44, 6 }
 0x95b   : > { %7364 = vrot.lane.b32.xlu0 %v12613_v5, %s13523_s21  ;;  %7120 = vrot.lane.b32.xlu2 %v12613_v5, %s13525_s26  ;;  %v6509_v56 = vrot.slane %v6508_v33, 2  ;;  %v6531_v40 = vmax.f32 %v6529_v46, %v6530_v20  ;;  %v6538_v42 = vmax.f32 %v6536_v30, %v6537_v47 }
 0x95c   : > { %7170 = vrot.lane.b32.xlu1 %v12009_v32, %s13524_s24  ;;  %v6516_v63 = vrot.slane %v6515_v35, 2  ;;  %v6548_v61 = vsel %vm5672_vm13, %v5573_v1, -inf  ;;  %v6562_v22 = vsel %vm5672_vm13, %v5575_v3, -inf }
 0x95d   : > { %v12717_v60 = vmax.f32 %v6508_v33, %v6509_v56  ;;  %v6541_v33 = vsel %vm5672_vm13, %v5447_v44, -inf  ;;  %v6549_v50 = vrot.slane %v6548_v61, 4  ;;  %v6532_v36 = vrot.slane %v6531_v40, 1 }
 0x95e   : > { %v7216_v8 = vpop.permute.xlu0 %7215  ;;  %v6539_v56 = vrot.slane %v6538_v42, 1  ;;  %v6563_v48 = vrot.slane %v6562_v22, 4 }
 0x95f   : > { %7237 = vst.msk [vmem:[#allocation5 + $0x30] sm:$0xff] %vm7233_vm10, %v7216_v8  ;;  %v7021_v16 = vpop.permute.xlu1 %7020  ;;  %v6497_v8 = vrot.slane %v12710_v23, 1  ;;  %v6511_v19 = vrot.slane %v12717_v60, 1  ;;  %v6550_v9 = vmax.f32 %v6548_v61, %v6549_v50  ;;  %v6533_v25 = vmax.f32 %v6531_v40, %v6532_v36 }
 0x960   : > { %7286 = vst.msk [vmem:[#allocation5 + $0x30] sm:$0xff] %vm7282_vm6, %v12624_v2  ;;  %v6476_v2 = vrot.slane %v6475_v51, 1  ;;  %v6540_v29 = vmax.f32 %v6538_v42, %v6539_v56  ;;  %v6564_v47 = vmax.f32 %v6562_v22, %v6563_v48 }
 0x961   : > { %7335 = vst.msk [vmem:[#allocation5 + $0x30] sm:$0xff] %vm13536_vm2, %v7314_v12  ;;  %v12699_v12 = vsel %vm6569_vm12, %v6463_v24, -inf  ;;  %v6542_v24 = vrot.slane %v6541_v33, 4  ;;  %v6745_v57 = vsel %vm6569_vm12, %v6533_v25, -inf  ;;  %v6498_v30 = vmax.f32 %v12710_v23, %v6497_v8  ;;  %v12785_v25 = vld [vmem:[#allocation4 + $0x74] sm:$0xff] }
 0x962   : > { %7041 = vst.msk [vmem:[#allocation5 + $0x40] sm:$0xff] %vm13537_vm4, %v7021_v16  ;;  %v6477_v7 = vmax.f32 %v6475_v51, %v6476_v2  ;;  %v6522_v51 = vmax.f32 %v6520_v34, %v6521_v17  ;;  %v6517_v16 = vmax.f32 %v6515_v35, %v6516_v63  ;;  %v6551_v35 = vrot.slane %v6550_v9, 2 }
 0x963   : > { %7071 = vrot.lane.b32.xlu0 %v12619_v58, %s13511_s23  ;;  %7560 = vrot.lane.b32.xlu2 %v12688_v14, %s13527_s29  ;;  %v6543_v26 = vmax.f32 %v6541_v33, %v6542_v24  ;;  %v6748_v63 = vsel %vm6569_vm12, %v6540_v29, -inf  ;;  %v6505_v23 = vmax.f32 %v12715_v10, %v6504_v28  ;;  %v6512_v40 = vmax.f32 %v12717_v60, %v6511_v19  ;;  %v12791_v29 = vld [vmem:[#allocation4 + $0x73] sm:$0xff] }
 0x964   : > { %7609 = vrot.lane.b32.xlu1 %v12680_v62, %s13526_s25  ;;  %v12720_v6 = vsel %vm6569_vm12, %v6477_v7, -inf  ;;  %v6523_v13 = vrot.slane %v6522_v51, 2  ;;  %v6518_v38 = vrot.slane %v6517_v16, 1  ;;  %v6555_v7 = vsel %vm5672_vm13, %v5574_v15, -inf }
 0x965   : > { %v6556_v54 = vrot.slane %v6555_v7, 4  ;;  %v6544_v31 = vrot.slane %v6543_v26, 2  ;;  %v6746_v44 = vmax.f32 %v12720_v6, %v6745_v57  ;;  %v6750_v15 = vsel %vm6569_vm12, %v12726_v0, -inf  ;;  %v12814_v57 = vld [vmem:[#allocation4 + $0x80] sm:$0xff] }
 0x966   : > { %v6524_v2 = vmax.f32 %v6522_v51, %v6523_v13  ;;  %v6519_v37 = vmax.f32 %v6517_v16, %v6518_v38  ;;  %v12747_v51 = vld [vmem:[#allocation4 + $0x71] sm:$0xff]  ;;  %v6756_v24 = vsel %vm6569_vm12, %v6505_v23, -inf  ;;  %vm13538_vm13 = vcmask 1044484  }
 0x967   : > { %v6557_v17 = vmax.f32 %v6555_v7, %v6556_v54  ;;  %v6545_v46 = vmax.f32 %v6543_v26, %v6544_v31  ;;  %v6759_v60 = vsel %vm6569_vm12, %v6512_v40, -inf  ;;  %vm13539_vm2 = vcmask 1045509  }
 0x968   : > { %v6525_v49 = vrot.slane %v6524_v2, 1  ;;  %v6739_v11 = vsel %vm6569_vm12, %v6519_v37, -inf  ;;  %vm13540_vm4 = vcmask 1046534  }
 0x969   : > { %v6740_v34 = vmax.f32 %v12699_v12, %v6739_v11  ;;  %v6552_v12 = vmax.f32 %v6550_v9, %v6551_v35  ;;  %v6558_v16 = vrot.slane %v6557_v17, 2  ;;  %v6546_v20 = vrot.slane %v6545_v46, 1 }
 0x96a   : > { %v6526_v43 = vmax.f32 %v6524_v2, %v6525_v49  ;;  %v6565_v2 = vrot.slane %v6564_v47, 2 }
 0x96b   : > { %7511 = vrot.lane.b32.xlu0 %v12695_v45, %s13512_s17  ;;  %7268 = vrot.lane.b32.xlu2 %v12695_v45, %s13529_s22  ;;  %v6553_v8 = vrot.slane %v6552_v12, 1  ;;  %v6559_v1 = vmax.f32 %v6557_v17, %v6558_v16  ;;  %v6547_v38 = vmax.f32 %v6545_v46, %v6546_v20  ;;  %v12837_v20 = vld [vmem:[#allocation4 + $0x84] sm:$0xff] }
 0x96c   : > { %7317 = vrot.lane.b32.xlu1 %v12688_v14, %s13528_s16  ;;  %v6742_v55 = vsel %vm6569_vm12, %v6526_v43, -inf  ;;  %v6566_v10 = vmax.f32 %v6564_v47, %v6565_v2  ;;  %v12843_v47 = vld [vmem:[#allocation4 + $0x83] sm:$0xff] }
 0x96d   : > { %v6743_v53 = vmax.f32 %v12702_v39, %v6742_v55  ;;  %v6749_v39 = vmax.f32 %v12724_v27, %v6748_v63  ;;  %v6753_v27 = vsel %vm6569_vm12, %v6498_v30, -inf  ;;  %v6554_v3 = vmax.f32 %v6552_v12, %v6553_v8  ;;  %v12797_v55 = vld [vmem:[#allocation4 + $0x72] sm:$0xff]  ;;  %v12816_v63 = vld [vmem:[#allocation4 + $0x81] sm:$0xff] }
 0x96e   : > { %v6560_v33 = vrot.slane %v6559_v1, 1  ;;  %v6751_v28 = vsel %vm6569_vm12, %v6547_v38, -inf  ;;  %v6567_v49 = vrot.slane %v6566_v10, 1 }
 0x96f   : > { %v6907_v13 = vsel %vm6851_vm15, %v6743_v53, %v6740_v34  ;;  %v6752_v37 = vmax.f32 %v6750_v15, %v6751_v28  ;;  %v6754_v0 = vsel %vm6569_vm12, %v6554_v3, -inf }
 0x970   : > { %v6908_v6 = vsel %vm6853_vm0, %v6746_v44, %v6907_v13  ;;  %v6561_v61 = vmax.f32 %v6559_v1, %v6560_v33  ;;  %v6755_v50 = vmax.f32 %v6753_v27, %v6754_v0  ;;  %v6568_v19 = vmax.f32 %v6566_v10, %v6567_v49  ;;  %v12850_v1 = vld [vmem:[#allocation4 + $0x82] sm:$0xff]  ;;  %v7748_v49 = vld [vmem:[#allocation4 + $0x33] sm:$0xff] }
 0x971   : > { %v6909_v42 = vsel %vm13501_vm1, %v6749_v39, %v6908_v6  ;;  %vm13545_vm1 = vcmask 326912   ;;  %v12885_v0 = vld [vmem:[#allocation4 + $0xa0] sm:$0xff] }
 0x972   : > { %v6757_v7 = vsel %vm6569_vm12, %v6561_v61, -inf  ;;  %v6910_v36 = vsel %vm13538_vm13, %v6752_v37, %v6909_v42  ;;  %v6760_v54 = vsel %vm6569_vm12, %v6568_v19, -inf  ;;  %vm13541_vm13 = vcmask 1047559   ;;  %v7796_v19 = vld [vmem:[#allocation4 + $0x34] sm:$0xff] }
 0x973   : > { %7219 = vrot.lane.b32.xlu0 %v12651_v4, %s13510_s27  ;;  %6975 = vrot.lane.b32.xlu2 %v12651_v4, %s13514_s14  ;;  %v6758_v56 = vmax.f32 %v6756_v24, %v6757_v7  ;;  %v6911_v26 = vsel %vm13539_vm2, %v6755_v50, %v6910_v36  ;;  %v6761_v9 = vmax.f32 %v6759_v60, %v6760_v54  ;;  %vm13542_vm2 = vcmask 720512  }
 0x974   : > { %7024 = vrot.lane.b32.xlu1 %v12695_v45, %s13513_s28 }
 0x975   : > { %v6912_v43 = vsel %vm13540_vm4, %v6758_v56, %v6911_v26  ;;  %vm13543_vm4 = vcmask 786112  }
 0x976   : > { %v6913_v22 = vsel %vm13541_vm13, %v6761_v9, %v6912_v43  ;;  %vm13544_vm13 = vcmask 261312   ;;  %v6996_v43 = vld [vmem:[#allocation4 + $0x2] sm:$0xff]  ;;  %v7700_v9 = vld [vmem:[#allocation4 + $0x32] sm:$0xff] }
 0x977   : > { %6930 = vst.msk [vmem:[#allocation4 + $0x92] sm:$0xff] %vm6569_vm12, %v6913_v22 }
 0x97b   : > { %7659 = vrot.lane.b32.xlu0 %v12302_v41, %s13533_s18  ;;  %7415 = vrot.lane.b32.xlu2 %v12302_v41, %s13535_s0 }
 0x97c   : > { %7464 = vrot.lane.b32.xlu1 %v12747_v51, %s13534_s11 }
 0x97e   : > { %v12795_v31 = vld [vmem:[#allocation4 + $0x91] sm:$0xff] }
 0x97f   : > { %7698 = vst.msk [vmem:[#allocation5 + $0x68] sm:$0xff] %vm6569_vm12, %v12795_v31  ;;  %v12869_v40 = vld [vmem:[#allocation4 + $0x90] sm:$0xff] }
 0x980   : > { %v12871_v42 = vld [vmem:[#allocation4 + $0x94] sm:$0xff] }
 0x981   : > { %v12877_v10 = vld [vmem:[#allocation4 + $0x92] sm:$0xff] }
 0x982   : > { %v12895_v60 = vld [vmem:[#allocation4 + $0x93] sm:$0xff] }
 0x983   : > { %7366 = vrot.lane.b32.xlu0 %v12680_v62, %s13523_s21  ;;  %7122 = vrot.lane.b32.xlu2 %v12680_v62, %s13525_s26 }
 0x984   : > { %7172 = vrot.lane.b32.xlu1 %v12302_v41, %s13524_s24 }
 0x985   : > { %v7412_v11 = vpop.permute.xlu2 %7411 }
 0x98b   : > { %7073 = vrot.lane.b32.xlu0 %v12688_v14, %s13511_s23  ;;  %7562 = vrot.lane.b32.xlu2 %v12791_v29, %s13527_s29 }
 0x98c   : > { %7611 = vrot.lane.b32.xlu1 %v12785_v25, %s13526_s25 }
 0x98d   : > { %v7119_v34 = vpop.permute.xlu2 %7118 }
 0x993   : > { %7513 = vrot.lane.b32.xlu0 %v12797_v55, %s13512_s17  ;;  %7270 = vrot.lane.b32.xlu2 %v12797_v55, %s13529_s22 }
 0x994   : > { %7319 = vrot.lane.b32.xlu1 %v12791_v29, %s13528_s16 }
 0x995   : > { %v7559_v35 = vpop.permute.xlu2 %7558 }
 0x99b   : > { %7221 = vrot.lane.b32.xlu0 %v12747_v51, %s13510_s27  ;;  %6977 = vrot.lane.b32.xlu2 %v12747_v51, %s13514_s14 }
 0x99c   : > { %7026 = vrot.lane.b32.xlu1 %v12797_v55, %s13513_s28 }
 0x99d   : > { %v7656_v17 = vpop.permute.xlu0 %7655  ;;  %v7267_v53 = vpop.permute.xlu2 %7266 }
 0x99e   : > { %v7461_v48 = vpop.permute.xlu1 %7460  ;;  %7678 = vst.msk [vmem:[#allocation5 + $0x20] sm:$0xff] %vm7675_vm5, %v7656_v17  ;;  %v8037_v17 = vld [vmem:[#allocation4 + $0x44] sm:$0xff] }
 0x9a3   : > { %7661 = vrot.lane.b32.xlu0 %v12814_v57, %s13533_s18  ;;  %7417 = vrot.lane.b32.xlu2 %v12814_v57, %s13535_s0 }
 0x9a4   : > { %7466 = vrot.lane.b32.xlu1 %v12816_v63, %s13534_s11 }
 0x9a5   : > { %v7363_v46 = vpop.permute.xlu0 %7362  ;;  %v8089_v44 = vld [vmem:[#allocation5 + $0x20] sm:$0xff]  ;;  %v6974_v12 = vpop.permute.xlu2 %6973 }
 0x9a6   : > { %v7169_v30 = vpop.permute.xlu1 %7168  ;;  %7384 = vst.msk [vmem:[#allocation5 + $0x30] sm:$0xff] %vm7380_vm3, %v7363_v46  ;;  %8177 = vmatmul.f32.gmra.mxu2 %v8089_v44  ;;  %v7144_v44 = vld [vmem:[#allocation4 + $0x10] sm:$0xff] }
 0x9a7   : > { %7433 = vst.msk [vmem:[#allocation5 + $0x30] sm:$0xff] %vm13542_vm2, %v7412_v11  ;;  %vm13547_vm2 = vcmask 195712   ;;  %v6947_v11 = vld [vmem:[#allocation4 + $0x1] sm:$0xff] }
 0x9a8   : > { %7482 = vst.msk [vmem:[#allocation5 + $0x30] sm:$0xff] %vm13543_vm4, %v7461_v48  ;;  %vm13548_vm4 = vcmask 720512   ;;  %v7989_v48 = vld [vmem:[#allocation4 + $0x43] sm:$0xff] }
 0x9a9   : > { %6993 = vst.msk [vmem:[#allocation5 + $0x50] sm:$0xff] %vm6987_vm14, %v6974_v12  ;;  %v7094_v12 = vld [vmem:[#allocation4 + $0x4] sm:$0xff] }
 0x9ab   : > { %7368 = vrot.lane.b32.xlu0 %v12785_v25, %s13523_s21  ;;  %7124 = vrot.lane.b32.xlu2 %v12785_v25, %s13525_s26 }
 0x9ac   : > { %7174 = vrot.lane.b32.xlu1 %v12814_v57, %s13524_s24 }
 0x9ad   : > { %v7070_v16 = vpop.permute.xlu0 %7069  ;;  %v7414_v13 = vpop.permute.xlu2 %7413 }
 0x9ae   : > { %v7608_v39 = vpop.permute.xlu1 %7607  ;;  %7090 = vst.msk [vmem:[#allocation5 + $0x40] sm:$0xff] %vm13544_vm13, %v7070_v16  ;;  %vm13549_vm13 = vcmask 786112   ;;  %v7941_v16 = vld [vmem:[#allocation4 + $0x42] sm:$0xff] }
 0x9af   : > { %7139 = vst.msk [vmem:[#allocation5 + $0x40] sm:$0xff] %vm13545_vm1, %v7119_v34  ;;  %vm13546_vm1 = vcmask 589312  }
 0x9b0   : > { %7189 = vst.msk [vmem:[#allocation5 + $0x40] sm:$0xff] %vm7184_vm9, %v7169_v30 }
 0x9b3   : > { %7075 = vrot.lane.b32.xlu0 %v12791_v29, %s13511_s23  ;;  %7564 = vrot.lane.b32.xlu2 %v12843_v47, %s13527_s29 }
 0x9b4   : > { %7613 = vrot.lane.b32.xlu1 %v12837_v20, %s13526_s25 }
 0x9b5   : > { %v7510_v23 = vpop.permute.xlu0 %7509  ;;  %v7121_v8 = vpop.permute.xlu2 %7120 }
 0x9b6   : > { %v7316_v6 = vpop.permute.xlu1 %7315  ;;  %7531 = vst.msk [vmem:[#allocation5 + $0x30] sm:$0xff] %vm7527_vm8, %v7510_v23 }
 0x9b7   : > { %7580 = vst.msk [vmem:[#allocation5 + $0x30] sm:$0xff] %vm7576_vm7, %v7559_v35  ;;  %v7845_v35 = vld [vmem:[#allocation4 + $0x40] sm:$0xff] }
 0x9b8   : > { %7629 = vst.msk [vmem:[#allocation5 + $0x30] sm:$0xff] %vm7625_vm11, %v7608_v39 }
 0x9bb   : > { %7515 = vrot.lane.b32.xlu0 %v12850_v1, %s13512_s17  ;;  %7272 = vrot.lane.b32.xlu2 %v12850_v1, %s13529_s22 }
 0x9bc   : > { %7321 = vrot.lane.b32.xlu1 %v12843_v47, %s13528_s16 }
 0x9bd   : > { %v7218_v15 = vpop.permute.xlu0 %7217  ;;  %v7561_v2 = vpop.permute.xlu2 %7560 }
 0x9be   : > { %v7023_v38 = vpop.permute.xlu1 %7022  ;;  %7238 = vst.msk [vmem:[#allocation5 + $0x40] sm:$0xff] %vm7233_vm10, %v7218_v15 }
 0x9bf   : > { %7287 = vst.msk [vmem:[#allocation5 + $0x40] sm:$0xff] %vm7282_vm6, %v7267_v53 }
 0x9c0   : > { %7336 = vst.msk [vmem:[#allocation5 + $0x40] sm:$0xff] %vm13546_vm1, %v7316_v6  ;;  %vm13550_vm1 = vcmask 261312  }
 0x9c1   : > { %7042 = vst.msk [vmem:[#allocation5 + $0x50] sm:$0xff] %vm13547_vm2, %v7023_v38  ;;  %vm13551_vm2 = vcmask 326912  }
 0x9c3   : > { %7223 = vrot.lane.b32.xlu0 %v12816_v63, %s13510_s27  ;;  %7370 = vrot.lane.b32.xlu2 %v12837_v20, %s13523_s21 }
 0x9c4   : > { %7468 = vrot.lane.b32.xlu1 %v12795_v31, %s13534_s11 }
 0x9c5   : > { %v7658_v27 = vpop.permute.xlu0 %7657  ;;  %v7269_v33 = vpop.permute.xlu2 %7268 }
 0x9c6   : > { %v7463_v3 = vpop.permute.xlu1 %7462  ;;  %7679 = vst.msk [vmem:[#allocation5 + $0x30] sm:$0xff] %vm7675_vm5, %v7658_v27  ;;  %v7291_v27 = vld [vmem:[#allocation4 + $0x13] sm:$0xff] }
 0x9cb   : > { %7663 = vrot.lane.b32.xlu0 %v12869_v40, %s13533_s18  ;;  %7517 = vrot.lane.b32.xlu2 %v12877_v10, %s13512_s17 }
 0x9cc   : > { %7615 = vrot.lane.b32.xlu1 %v12871_v42, %s13526_s25 }
 0x9cd   : > { %v7365_v28 = vpop.permute.xlu0 %7364  ;;  %v8091_v24 = vld [vmem:[#allocation5 + $0x30] sm:$0xff]  ;;  %v6976_v37 = vpop.permute.xlu2 %6975 }
 0x9ce   : > { %7385 = vst.msk [vmem:[#allocation5 + $0x40] sm:$0xff] %vm7380_vm3, %v7365_v28  ;;  %v7171_v61 = vpop.permute.xlu1 %7170  ;;  %8180 = vmatmul.f32.gmra.mxu2 %v8091_v24 }
 0x9cf   : > { %7434 = vst.msk [vmem:[#allocation5 + $0x40] sm:$0xff] %vm13548_vm4, %v7414_v13  ;;  %vm13552_vm4 = vcmask 589312  }
 0x9d0   : > { %7483 = vst.msk [vmem:[#allocation5 + $0x40] sm:$0xff] %vm13549_vm13, %v7463_v3  ;;  %vm13553_vm13 = vcmask 195712   ;;  %v7242_v3 = vld [vmem:[#allocation4 + $0x12] sm:$0xff] }
 0x9d1   : > { %6994 = vst.msk [vmem:[#allocation5 + $0x60] sm:$0xff] %vm6987_vm14, %v6976_v37 }
 0x9d3   : > { %7419 = vrot.lane.b32.xlu0 %v12869_v40, %s13535_s0  ;;  %7665 = vrot.lane.b32.xlu2 %v12885_v0, %s13533_s18 }
 0x9d4   : > { %7764 = vrot.lane.b32.xlu1 %v7748_v49, %s13513_s28 }
 0x9d5   : > { %v7072_v50 = vpop.permute.xlu0 %7071  ;;  %v7416_v36 = vpop.permute.xlu2 %7415 }
 0x9d6   : > { %7091 = vst.msk [vmem:[#allocation5 + $0x50] sm:$0xff] %vm13550_vm1, %v7072_v50  ;;  %v7610_v7 = vpop.permute.xlu1 %7609  ;;  %vm13554_vm1 = vcmask 720512  }
 0x9d7   : > { %7140 = vst.msk [vmem:[#allocation5 + $0x50] sm:$0xff] %vm13551_vm2, %v7121_v8  ;;  %vm13555_vm2 = vcmask 786112   ;;  %v7045_v8 = vld [vmem:[#allocation4 + $0x3] sm:$0xff] }
 0x9d8   : > { %7190 = vst.msk [vmem:[#allocation5 + $0x50] sm:$0xff] %vm7184_vm9, %v7171_v61  ;;  %v7193_v61 = vld [vmem:[#allocation4 + $0x11] sm:$0xff] }
 0x9db   : > { %7566 = vrot.lane.b32.xlu0 %v12895_v60, %s13527_s29  ;;  %7812 = vrot.lane.b32.xlu2 %v7796_v19, %s13511_s23 }
 0x9dc   : > { %7909 = vrot.lane.b32.xlu1 %v12294_v52, %s13524_s24 }
 0x9dd   : > { %v7512_v56 = vpop.permute.xlu0 %7511  ;;  %v7123_v54 = vpop.permute.xlu2 %7122 }
 0x9de   : > { %7532 = vst.msk [vmem:[#allocation5 + $0x40] sm:$0xff] %vm7527_vm8, %v7512_v56  ;;  %v7318_v26 = vpop.permute.xlu1 %7317 }
 0x9df   : > { %7581 = vst.msk [vmem:[#allocation5 + $0x40] sm:$0xff] %vm7576_vm7, %v7561_v2 }
 0x9e0   : > { %7630 = vst.msk [vmem:[#allocation5 + $0x40] sm:$0xff] %vm7625_vm11, %v7610_v7  ;;  %v7438_v7 = vld [vmem:[#allocation4 + $0x21] sm:$0xff] }
 0x9e3   : > { %7716 = vrot.lane.b32.xlu0 %v7700_v9, %s13514_s14  ;;  %6963 = vrot.lane.b32.xlu2 %v6947_v11, %s13514_s14 }
 0x9e4   : > { %7012 = vrot.lane.b32.xlu1 %v6996_v43, %s13513_s28 }
 0x9e5   : > { %v7220_v52 = vpop.permute.xlu0 %7219  ;;  %v7563_v34 = vpop.permute.xlu2 %7562 }
 0x9e6   : > { %7239 = vst.msk [vmem:[#allocation5 + $0x50] sm:$0xff] %vm7233_vm10, %v7220_v52  ;;  %v7025_v22 = vpop.permute.xlu1 %7024  ;;  %v6931_v52 = vld [vmem:[#allocation4] sm:$0xff] }
 0x9e7   : > { %7288 = vst.msk [vmem:[#allocation5 + $0x50] sm:$0xff] %vm7282_vm6, %v7269_v33 }
 0x9e8   : > { %7337 = vst.msk [vmem:[#allocation5 + $0x50] sm:$0xff] %vm13552_vm4, %v7318_v26  ;;  %vm13556_vm4 = vcmask 261312   ;;  %v7340_v26 = vld [vmem:[#allocation4 + $0x14] sm:$0xff] }
 0x9e9   : > { %7043 = vst.msk [vmem:[#allocation5 + $0x60] sm:$0xff] %vm13553_vm13, %v7025_v22  ;;  %vm13557_vm13 = vcmask 326912  }
 0x9ea   : > { %6939 = vst.msk [vmem:[#allocation5] sm:$0xff] %vm6569_vm12, %v6931_v52  ;;  %v7947_v52 = vld [vmem:[#allocation4 + $0xa2] sm:$0xff] }
 0x9eb   : > { %7861 = vrot.lane.b32.xlu0 %v7845_v35, %s13525_s26  ;;  %8005 = vrot.lane.b32.xlu2 %v7989_v48, %s13529_s22 }
 0x9ec   : > { %8053 = vrot.lane.b32.xlu1 %v8037_v17, %s13528_s16 }
 0x9ed   : > { %v7660_v53 = vpop.permute.xlu0 %7659  ;;  %v7271_v30 = vpop.permute.xlu2 %7270 }
 0x9ee   : > { %7680 = vst.msk [vmem:[#allocation5 + $0x40] sm:$0xff] %vm7675_vm5, %v7660_v53  ;;  %v7465_v46 = vpop.permute.xlu1 %7464 }
 0x9f3   : > { %7957 = vrot.lane.b32.xlu0 %v7941_v16, %s13510_s27  ;;  %7110 = vrot.lane.b32.xlu2 %v7094_v12, %s13525_s26  ;;  %v7798_v12 = vld [vmem:[#allocation4 + $0x54] sm:$0xff] }
 0x9f4   : > { %7160 = vrot.lane.b32.xlu1 %v7144_v44, %s13524_s24 }
 0x9f5   : > { %v7367_v39 = vpop.permute.xlu0 %7366  ;;  %v8093_v13 = vld [vmem:[#allocation5 + $0x40] sm:$0xff]  ;;  %v6978_v6 = vpop.permute.xlu2 %6977 }
 0x9f6   : > { %7386 = vst.msk [vmem:[#allocation5 + $0x50] sm:$0xff] %vm7380_vm3, %v7367_v39  ;;  %v7173_v23 = vpop.permute.xlu1 %7172  ;;  %8183 = vmatmul.f32.gmra.mxu2 %v8093_v13  ;;  %v8125_v13 = vld [vmem:[%s13453_s3 + $0xc0] sm:$0xff] }
 0x9f7   : > { %7435 = vst.msk [vmem:[#allocation5 + $0x50] sm:$0xff] %vm13554_vm1, %v7416_v36  ;;  %vm13558_vm1 = vcmask 589312   ;;  %v7389_v36 = vld [vmem:[#allocation4 + $0x20] sm:$0xff]  ;;  %8203 = vmatpush.msrb.mxu2 %v8125_v13  ;;  %9221 = vmatpush.msra.mxu3 %v8125_v13  ;;  %v8044_v13 = vld [vmem:[#allocation4 + $0xb4] sm:$0xff] }
 0x9f8   : > { %7484 = vst.msk [vmem:[#allocation5 + $0x50] sm:$0xff] %vm13555_vm2, %v7465_v46  ;;  %vm13559_vm2 = vcmask 195712   ;;  %v7635_v46 = vld [vmem:[#allocation4 + $0x30] sm:$0xff] }
 0x9f9   : > { %6995 = vst.msk [vmem:[#allocation5 + $0x70] sm:$0xff] %vm6987_vm14, %v6978_v6  ;;  %v8122_v6 = vld [vmem:[%s13453_s3 + $0xa8] sm:$0xff] }
 0x9fb   : > { %7061 = vrot.lane.b32.xlu0 %v7045_v8, %s13511_s23  ;;  %7766 = vrot.lane.b32.xlu2 %v7989_v48, %s13513_s28 }
 0x9fc   : > { %7814 = vrot.lane.b32.xlu1 %v8037_v17, %s13511_s23  ;;  %v7487_v17 = vld [vmem:[#allocation4 + $0x22] sm:$0xff] }
 0x9fd   : > { %v7074_v15 = vpop.permute.xlu0 %7073  ;;  %v7418_v2 = vpop.permute.xlu2 %7417 }
 0x9fe   : > { %7092 = vst.msk [vmem:[#allocation5 + $0x60] sm:$0xff] %vm13556_vm4, %v7074_v15  ;;  %v7612_v38 = vpop.permute.xlu1 %7611  ;;  %vm13560_vm4 = vcmask 720512  }
 0x9ff   : > { %7141 = vst.msk [vmem:[#allocation5 + $0x60] sm:$0xff] %vm13557_vm13, %v7123_v54  ;;  %v7536_v54 = vld [vmem:[#allocation4 + $0x23] sm:$0xff]  ;;  %vm13561_vm13 = vcmask 786112  }
 0xa00   : > { %7191 = vst.msk [vmem:[#allocation5 + $0x60] sm:$0xff] %vm7184_vm9, %v7173_v23  ;;  %v8124_v23 = vld [vmem:[%s13453_s3 + $0xb8] sm:$0xff] }
 0xa01   : > { %8204 = vmatpush.msrb.mxu2 %v8124_v23  ;;  %9222 = vmatpush.msra.mxu3 %v8124_v23 }
 0xa03   : > { %7718 = vrot.lane.b32.xlu0 %v7941_v16, %s13514_s14  ;;  %7258 = vrot.lane.b32.xlu2 %v7242_v3, %s13529_s22 }
 0xa04   : > { %7307 = vrot.lane.b32.xlu1 %v7291_v27, %s13528_s16  ;;  %v8119_v27 = vld [vmem:[%s13453_s3 + $0x90] sm:$0xff] }
 0xa05   : > { %v7514_v33 = vpop.permute.xlu0 %7513  ;;  %v7125_v24 = vpop.permute.xlu2 %7124 }
 0xa06   : > { %7533 = vst.msk [vmem:[#allocation5 + $0x50] sm:$0xff] %vm7527_vm8, %v7514_v33  ;;  %v7320_v28 = vpop.permute.xlu1 %7319  ;;  %v8118_v33 = vld [vmem:[%s13453_s3 + $0x88] sm:$0xff] }
 0xa07   : > { %7582 = vst.msk [vmem:[#allocation5 + $0x50] sm:$0xff] %vm7576_vm7, %v7563_v34 }
 0xa08   : > { %7631 = vst.msk [vmem:[#allocation5 + $0x50] sm:$0xff] %vm7625_vm11, %v7612_v38 }
 0xa0b   : > { %7209 = vrot.lane.b32.xlu0 %v7193_v61, %s13510_s27  ;;  %7911 = vrot.lane.b32.xlu2 %v12589_v18, %s13524_s24 }
 0xa0c   : > { %7959 = vrot.lane.b32.xlu1 %v12626_v59, %s13510_s27 }
 0xa0d   : > { %v7222_v37 = vpop.permute.xlu0 %7221  ;;  %v7565_v50 = vpop.permute.xlu2 %7564 }
 0xa0e   : > { %7240 = vst.msk [vmem:[#allocation5 + $0x60] sm:$0xff] %vm7233_vm10, %v7222_v37  ;;  %v7027_v49 = vpop.permute.xlu1 %7026 }
 0xa0f   : > { %7289 = vst.msk [vmem:[#allocation5 + $0x60] sm:$0xff] %vm7282_vm6, %v7271_v30 }
 0xa10   : > { %7338 = vst.msk [vmem:[#allocation5 + $0x60] sm:$0xff] %vm13558_vm1, %v7320_v28  ;;  %vm13562_vm1 = vcmask 261312  }
 0xa11   : > { %7044 = vst.msk [vmem:[#allocation5 + $0x70] sm:$0xff] %vm13559_vm2, %v7027_v49  ;;  %vm13563_vm2 = vcmask 326912  }
 0xa13   : > { %7863 = vrot.lane.b32.xlu0 %v12587_v21, %s13525_s26  ;;  %7405 = vrot.lane.b32.xlu2 %v7389_v36, %s13535_s0 }
 0xa14   : > { %7454 = vrot.lane.b32.xlu1 %v7438_v7, %s13534_s11 }
 0xa15   : > { %v7662_v18 = vpop.permute.xlu0 %7661  ;;  %v7273_v56 = vpop.permute.xlu2 %7272 }
 0xa16   : > { %7681 = vst.msk [vmem:[#allocation5 + $0x50] sm:$0xff] %vm7675_vm5, %v7662_v18  ;;  %v7467_v19 = vpop.permute.xlu1 %7466 }
 0xa1b   : > { %7356 = vrot.lane.b32.xlu0 %v7340_v26, %s13523_s21  ;;  %8055 = vrot.lane.b32.xlu2 %v12613_v5, %s13528_s16  ;;  %v7585_v5 = vld [vmem:[#allocation4 + $0x24] sm:$0xff]  ;;  %s9069_s21 = scalar_lea.hbm %s13459_s9, %s9483_s13 }
 0xa1c   : > { %7552 = vrot.lane.b32.xlu1 %v7536_v54, %s13527_s29 }
 0xa1d   : > { %v7369_v21 = vpop.permute.xlu0 %7368  ;;  %v8095_v43 = vld [vmem:[#allocation5 + $0x50] sm:$0xff]  ;;  %v7371_v9 = vpop.permute.xlu2 %7370 }
 0xa1e   : > { %7387 = vst.msk [vmem:[#allocation5 + $0x60] sm:$0xff] %vm7380_vm3, %v7369_v21  ;;  %v7175_v11 = vpop.permute.xlu1 %7174  ;;  %8186 = vmatmul.f32.gmra.mxu2 %v8095_v43 }
 0xa1f   : > { %7436 = vst.msk [vmem:[#allocation5 + $0x60] sm:$0xff] %vm13560_vm4, %v7418_v2  ;;  %vm13564_vm4 = vcmask 589312  }
 0xa20   : > { %7485 = vst.msk [vmem:[#allocation5 + $0x60] sm:$0xff] %vm13561_vm13, %v7467_v19  ;;  %vm13565_vm13 = vcmask 720512  }
 0xa23   : > { %8007 = vrot.lane.b32.xlu0 %v12619_v58, %s13529_s22  ;;  %7601 = vrot.lane.b32.xlu2 %v7585_v5, %s13526_s25  ;;  %v7750_v58 = vld [vmem:[#allocation4 + $0x53] sm:$0xff] }
 0xa24   : > { %7720 = vrot.lane.b32.xlu1 %v12626_v59, %s13514_s14 }
 0xa25   : > { %v7076_v22 = vpop.permute.xlu0 %7075  ;;  %v7518_v35 = vpop.permute.xlu2 %7517 }
 0xa26   : > { %7093 = vst.msk [vmem:[#allocation5 + $0x70] sm:$0xff] %vm13562_vm1, %v7076_v22  ;;  %v7614_v34 = vpop.permute.xlu1 %7613  ;;  %vm13566_vm1 = vcmask 786112  }
 0xa27   : > { %7142 = vst.msk [vmem:[#allocation5 + $0x70] sm:$0xff] %vm13563_vm2, %v7125_v24  ;;  %v8117_v24 = vld [vmem:[%s13453_s3 + $0x80] sm:$0xff]  ;;  %vm13567_vm2 = vcmask 195712  }
 0xa28   : > { %7192 = vst.msk [vmem:[#allocation5 + $0x70] sm:$0xff] %vm7184_vm9, %v7175_v11  ;;  %v8043_v11 = vld [vmem:[#allocation4 + $0xa4] sm:$0xff] }
 0xa2b   : > { %7503 = vrot.lane.b32.xlu0 %v7487_v17, %s13512_s17  ;;  %7768 = vrot.lane.b32.xlu2 %v7750_v58, %s13513_s28 }
 0xa2c   : > { %7865 = vrot.lane.b32.xlu1 %v12009_v32, %s13525_s26 }
 0xa2d   : > { %v7516_v59 = vpop.permute.xlu0 %7515  ;;  %v12970_v53 = vpop.permute.xlu2 %7665 }
 0xa2e   : > { %7534 = vst.msk [vmem:[#allocation5 + $0x60] sm:$0xff] %vm7527_vm8, %v7516_v59  ;;  %v7322_v48 = vpop.permute.xlu1 %7321 }
 0xa2f   : > { %7583 = vst.msk [vmem:[#allocation5 + $0x60] sm:$0xff] %vm7576_vm7, %v7565_v50 }
 0xa30   : > { %7632 = vst.msk [vmem:[#allocation5 + $0x60] sm:$0xff] %vm7625_vm11, %v7614_v34  ;;  %v7995_v34 = vld [vmem:[#allocation4 + $0xa3] sm:$0xff] }
 0xa33   : > { %7651 = vrot.lane.b32.xlu0 %v7635_v46, %s13533_s18  ;;  %7913 = vrot.lane.b32.xlu2 %v12651_v4, %s13524_s24  ;;  %s323_s18 = sand.u32 1, %s9365_s10  }
 0xa34   : > { %8009 = vrot.lane.b32.xlu1 %v12688_v14, %s13529_s22  ;;  %s324_s1 = scalar_lea.vmem [#allocation6], %s323_s18 }
 0xa35   : > { %v7224_v32 = vpop.permute.xlu0 %7223  ;;  %v12980_v44 = vpop.permute.xlu2 %7812  ;;  %s9071_s11 = sshll.u32 %s324_s1, 4  ;;  %s9072_s11 = int_to_ptr.vmem [resolvable:$true] %s9071_s11 }
 0xa36   : > { %7241 = vst.msk [vmem:[#allocation5 + $0x70] sm:$0xff] %vm7233_vm10, %v7224_v32  ;;  %v7469_v30 = vpop.permute.xlu1 %7468 }
 0xa37   : > { %7290 = vst.msk [vmem:[#allocation5 + $0x70] sm:$0xff] %vm7282_vm6, %v7273_v56 }
 0xa38   : > { %7339 = vst.msk [vmem:[#allocation5 + $0x70] sm:$0xff] %vm13564_vm4, %v7322_v48  ;;  %vm13568_vm4 = vcmask 261312   ;;  %v7852_v48 = vld [vmem:[#allocation4 + $0xb0] sm:$0xff] }
 0xa39   : > { %7388 = vst.msk [vmem:[#allocation5 + $0x70] sm:$0xff] %vm7380_vm3, %v7371_v9 }
 0xa3b   : > { %7816 = vrot.lane.b32.xlu0 %v7798_v12, %s13511_s23  ;;  %8057 = vrot.lane.b32.xlu2 %v12680_v62, %s13528_s16 }
 0xa3c   : > { %7770 = vrot.lane.b32.xlu1 %v12688_v14, %s13513_s28  ;;  %v8123_v14 = vld [vmem:[%s13453_s3 + $0xb0] sm:$0xff] }
 0xa3d   : > { %v7664_v4 = vpop.permute.xlu0 %7663  ;;  %v6964_v39 = vpop.permute.xlu2 %6963  ;;  %8205 = vmatpush.msrb.mxu2 %v8123_v14  ;;  %9223 = vmatpush.msra.mxu3 %v8123_v14 }
 0xa3e   : > { %7682 = vst.msk [vmem:[#allocation5 + $0x60] sm:$0xff] %vm7675_vm5, %v7664_v4  ;;  %v7616_v16 = vpop.permute.xlu1 %7615 }
 0xa3f   : > { %6988 = vst.msk [vmem:[#allocation5] sm:$0xff] %vm6987_vm14, %v6964_v39  ;;  %8206 = vmatpush.msrb.mxu2 %v8122_v6  ;;  %9224 = vmatpush.msra.mxu3 %v8122_v6 }
 0xa43   : > { %7961 = vrot.lane.b32.xlu0 %v12695_v45, %s13510_s27  ;;  %7818 = vrot.lane.b32.xlu2 %v12680_v62, %s13511_s23  ;;  %v8121_v62 = vld [vmem:[%s13453_s3 + $0xa0] sm:$0xff] }
 0xa44   : > { %7915 = vrot.lane.b32.xlu1 %v12747_v51, %s13524_s24  ;;  %8207 = vmatpush.msrb.mxu2 %v8121_v62  ;;  %v8120_v51 = vld [vmem:[%s13453_s3 + $0x98] sm:$0xff] }
 0xa45   : > { %v7420_v8 = vpop.permute.xlu0 %7419  ;;  %v8097_v15 = vld [vmem:[#allocation5 + $0x60] sm:$0xff]  ;;  %v8006_v2 = vpop.permute.xlu2 %8005  ;;  %9225 = vmatpush.msra.mxu3 %v8121_v62 }
 0xa46   : > { %7437 = vst.msk [vmem:[#allocation5 + $0x70] sm:$0xff] %vm13565_vm13, %v7420_v8  ;;  %v7765_v38 = vpop.permute.xlu1 %7764  ;;  %8189 = vmatmul.f32.gmra.mxu2 %v8097_v15  ;;  %vm13569_vm13 = vmmov %vm13567_vm2 }
 0xa47   : > { %7486 = vst.msk [vmem:[#allocation5 + $0x70] sm:$0xff] %vm13566_vm1, %v7469_v30  ;;  %8208 = vmatpush.msrb.mxu2 %v8120_v51  ;;  %9226 = vmatpush.msra.mxu3 %v8120_v51  ;;  %vm13570_vm1 = vcmask 326912   ;;  %v7900_v30 = vld [vmem:[#allocation4 + $0xb1] sm:$0xff] }
 0xa48   : > { %7535 = vst.msk [vmem:[#allocation5 + $0x70] sm:$0xff] %vm7527_vm8, %v7518_v35  ;;  %v7948_v35 = vld [vmem:[#allocation4 + $0xb2] sm:$0xff] }
 0xa49   : > { %8209 = vmatpush.msrb.mxu2 %v8119_v27  ;;  %9227 = vmatpush.msra.mxu3 %v8119_v27 }
 0xa4b   : > { %7722 = vrot.lane.b32.xlu0 %v12695_v45, %s13514_s14  ;;  %7963 = vrot.lane.b32.xlu2 %v12797_v55, %s13510_s27 }
 0xa4c   : > { %8059 = vrot.lane.b32.xlu1 %v12785_v25, %s13528_s16  ;;  %8210 = vmatpush.msrb.mxu2 %v8118_v33 }
 0xa4d   : > { %v7567_v3 = vpop.permute.xlu0 %7566  ;;  %v7111_v28 = vpop.permute.xlu2 %7110  ;;  %9228 = vmatpush.msra.mxu3 %v8118_v33 }
 0xa4e   : > { %7584 = vst.msk [vmem:[#allocation5 + $0x70] sm:$0xff] %vm7576_vm7, %v7567_v3  ;;  %v7910_v45 = vpop.permute.xlu1 %7909  ;;  %8211 = vmatpush.msrb.mxu2 %v8117_v24 }
 0xa4f   : > { %7633 = vst.msk [vmem:[#allocation5 + $0x70] sm:$0xff] %vm7625_vm11, %v7616_v16  ;;  %9229 = vmatpush.msra.mxu3 %v8117_v24 }
 0xa50   : > { %7683 = vst.msk [vmem:[#allocation5 + $0x70] sm:$0xff] %vm7675_vm5, %v12970_v53 }
 0xa53   : > { %7867 = vrot.lane.b32.xlu0 %v12302_v41, %s13525_s26  ;;  %7724 = vrot.lane.b32.xlu2 %v12797_v55, %s13514_s14 }
 0xa54   : > { %7772 = vrot.lane.b32.xlu1 %v12791_v29, %s13513_s28 }
 0xa55   : > { %v7717_v61 = vpop.permute.xlu0 %7716  ;;  %v7767_v49 = vpop.permute.xlu2 %7766 }
 0xa56   : > { %7740 = vst.msk [vmem:[#allocation5 + $0x8] sm:$0xff] %vm6987_vm14, %v7717_v61  ;;  %v7013_v37 = vpop.permute.xlu1 %7012 }
 0xa57   : > { %7788 = vst.msk [vmem:[#allocation5 + $0x8] sm:$0xff] %vm13567_vm2, %v7765_v38  ;;  %v8099_v50 = vld [vmem:[#allocation5 + $0x70] sm:$0xff]  ;;  %vm13571_vm2 = vcmask 589312  }
 0xa58   : > { %7836 = vst.msk [vmem:[#allocation5 + $0x8] sm:$0xff] %vm13568_vm4, %v12980_v44  ;;  %8192 = vmatmul.f32.gmra.mxu2 %v8099_v50  ;;  %vm8130_vm4 = vcmask 588800   ;;  %v7996_v44 = vld [vmem:[#allocation4 + $0xb3] sm:$0xff]  ;;  %v8175_v50 = vpop.f32.mrf.mxu2 }
 0xa59   : > { %7037 = vst.msk [vmem:[#allocation5] sm:$0xff] %vm13569_vm13, %v7013_v37  ;;  %vm13572_vm13 = vcmask 261312  }
 0xa5b   : > { %8011 = vrot.lane.b32.xlu0 %v12791_v29, %s13529_s22  ;;  %7774 = vrot.lane.b32.xlu2 %v12843_v47, %s13513_s28 }
 0xa5c   : > { %7822 = vrot.lane.b32.xlu1 %v12837_v20, %s13511_s23 }
 0xa5d   : > { %v7862_v41 = vpop.permute.xlu0 %7861  ;;  %v7259_v7 = vpop.permute.xlu2 %7258 }
 0xa5e   : > { %7885 = vst.msk [vmem:[#allocation5 + $0x8] sm:$0xff] %vm13570_vm1, %v7862_v41  ;;  %v8054_v55 = vpop.permute.xlu1 %8053 }
 0xa5f   : > { %7933 = vst.msk [vmem:[#allocation5 + $0x8] sm:$0xff] %vm7184_vm9, %v7910_v45 }
 0xa63   : > { %7726 = vrot.lane.b32.xlu0 %v12850_v1, %s13514_s14  ;;  %7869 = vrot.lane.b32.xlu2 %v12814_v57, %s13525_s26 }
 0xa64   : > { %7917 = vrot.lane.b32.xlu1 %v12816_v63, %s13524_s24 }
 0xa65   : > { %v7958_v29 = vpop.permute.xlu0 %7957  ;;  %v7912_v18 = vpop.permute.xlu2 %7911 }
 0xa66   : > { %7981 = vst.msk [vmem:[#allocation5 + $0x8] sm:$0xff] %vm7233_vm10, %v7958_v29  ;;  %v7161_v36 = vpop.permute.xlu1 %7160  ;;  %v13157_v29 = vpop.f32.mrf.mxu2 }
 0xa67   : > { %8029 = vst.msk [vmem:[#allocation5 + $0x8] sm:$0xff] %vm7282_vm6, %v8006_v2 }
 0xa68   : > { %8077 = vst.msk [vmem:[#allocation5 + $0x8] sm:$0xff] %vm13571_vm2, %v8054_v55  ;;  %vm13573_vm2 = vcmask 195712  }
 0xa6b   : > { %7820 = vrot.lane.b32.xlu0 %v12785_v25, %s13511_s23  ;;  %7919 = vrot.lane.b32.xlu2 %v12795_v31, %s13524_s24  ;;  %v7899_v25 = vld [vmem:[#allocation4 + $0xa1] sm:$0xff] }
 0xa6c   : > { %7967 = vrot.lane.b32.xlu1 %v12877_v10, %s13510_s27  ;;  %7699 = vst.msk [vmem:[#allocation5 + $0x78] sm:$0xff] %vm6569_vm12, %v7899_v25  ;;  %vm13574_vm12 = vcmask 589312  }
 0xa6d   : > { %v7062_v63 = vpop.permute.xlu0 %7061  ;;  %v7406_v19 = vpop.permute.xlu2 %7405 }
 0xa6e   : > { %7086 = vst.msk [vmem:[#allocation5] sm:$0xff] %vm13572_vm13, %v7062_v63  ;;  %v7815_v57 = vpop.permute.xlu1 %7814 }
 0xa6f   : > { %7135 = vst.msk [vmem:[#allocation5] sm:$0xff] %vm13570_vm1, %v7111_v28  ;;  %v8086_v56 = vld [vmem:[#allocation5 + $0x8] sm:$0xff] }
 0xa70   : > { %7185 = vst.msk [vmem:[#allocation5] sm:$0xff] %vm7184_vm9, %v7161_v36  ;;  %9167 = vmatmul.msk.f32.vlgmr.msrb.gmra.mxu2 %vm8130_vm4, %v8086_v56 }
 0xa73   : > { %7871 = vrot.lane.b32.xlu0 %v12869_v40, %s13525_s26  ;;  %8013 = vrot.lane.b32.xlu2 %v12843_v47, %s13529_s22 }
 0xa74   : > { %8061 = vrot.lane.b32.xlu1 %v12837_v20, %s13528_s16 }
 0xa75   : > { %v7719_v31 = vpop.permute.xlu0 %7718  ;;  %v8056_v54 = vpop.permute.xlu2 %8055 }
 0xa76   : > { %7741 = vst.msk [vmem:[#allocation5 + $0x18] sm:$0xff] %vm6987_vm14, %v7719_v31  ;;  %v7308_v26 = vpop.permute.xlu1 %7307 }
 0xa77   : > { %7789 = vst.msk [vmem:[#allocation5 + $0x18] sm:$0xff] %vm13573_vm2, %v7767_v49  ;;  %vm13575_vm2 = vcmask 720512  }
 0xa78   : > { %7837 = vst.msk [vmem:[#allocation5 + $0x18] sm:$0xff] %vm13572_vm13, %v7815_v57  ;;  %vm13576_vm13 = vcmask 786112   ;;  %v13162_v57 = vpop.f32.mrf.mxu2 }
 0xa7b   : > { %7965 = vrot.lane.b32.xlu0 %v12850_v1, %s13510_s27  ;;  %8063 = vrot.lane.b32.xlu2 %v12871_v42, %s13528_s16 }
 0xa7c   : > { %7776 = vrot.lane.b32.xlu1 %v12895_v60, %s13513_s28 }
 0xa7d   : > { %v7210_v20 = vpop.permute.xlu0 %7209  ;;  %v7602_v40 = vpop.permute.xlu2 %7601 }
 0xa7e   : > { %7234 = vst.msk [vmem:[#allocation5] sm:$0xff] %vm7233_vm10, %v7210_v20  ;;  %v7960_v47 = vpop.permute.xlu1 %7959 }
 0xa7f   : > { %7283 = vst.msk [vmem:[#allocation5] sm:$0xff] %vm7282_vm6, %v7259_v7 }
 0xa80   : > { %7332 = vst.msk [vmem:[#allocation5] sm:$0xff] %vm13574_vm12, %v7308_v26  ;;  %v13168_v26 = vpop.f32.mrf.mxu2 }
 0xa83   : > { %8015 = vrot.lane.b32.xlu0 %v12895_v60, %s13529_s22  ;;  %7824 = vrot.lane.b32.xlu2 %v12871_v42, %s13511_s23 }
 0xa84   : > { %7921 = vrot.lane.b32.xlu1 %v7899_v25, %s13524_s24 }
 0xa85   : > { %v7864_v1 = vpop.permute.xlu0 %7863  ;;  %v7769_v43 = vpop.permute.xlu2 %7768 }
 0xa86   : > { %7886 = vst.msk [vmem:[#allocation5 + $0x18] sm:$0xff] %vm13570_vm1, %v7864_v1  ;;  %v7455_v21 = vpop.permute.xlu1 %7454 }
 0xa87   : > { %7934 = vst.msk [vmem:[#allocation5 + $0x18] sm:$0xff] %vm7184_vm9, %v7912_v18 }
 0xa88   : > { %7982 = vst.msk [vmem:[#allocation5 + $0x18] sm:$0xff] %vm7233_vm10, %v7960_v47 }
 0xa8b   : > { %7728 = vrot.lane.b32.xlu0 %v12877_v10, %s13514_s14  ;;  %7969 = vrot.lane.b32.xlu2 %v7947_v52, %s13510_s27 }
 0xa8c   : > { %8065 = vrot.lane.b32.xlu1 %v8043_v11, %s13528_s16 }
 0xa8d   : > { %v7357_v60 = vpop.permute.xlu0 %7356  ;;  %v7914_v42 = vpop.permute.xlu2 %7913 }
 0xa8e   : > { %7381 = vst.msk [vmem:[#allocation5] sm:$0xff] %vm7380_vm3, %v7357_v60  ;;  %v7553_v9 = vpop.permute.xlu1 %7552  ;;  %vm13577_vm3 = vmmov %vm13574_vm12  ;;  %vm13578_vm12 = vcmask 195712  }
 0xa8f   : > { %7430 = vst.msk [vmem:[#allocation5] sm:$0xff] %vm13575_vm2, %v7406_v19 }
 0xa90   : > { %7479 = vst.msk [vmem:[#allocation5] sm:$0xff] %vm13576_vm13, %v7455_v21 }
 0xa93   : > { %7873 = vrot.lane.b32.xlu0 %v12885_v0, %s13525_s26  ;;  %7730 = vrot.lane.b32.xlu2 %v7947_v52, %s13514_s14 }
 0xa94   : > { %7826 = vrot.lane.b32.xlu1 %v8043_v11, %s13511_s23  ;;  %s9331_s23 = scalar_lea.hbm %s13459_s9, 2 }
 0xa95   : > { %v8008_v10 = vpop.permute.xlu0 %8007  ;;  %v8058_v22 = vpop.permute.xlu2 %8057 }
 0xa96   : > { %8030 = vst.msk [vmem:[#allocation5 + $0x18] sm:$0xff] %vm7282_vm6, %v8008_v10  ;;  %v7721_v5 = vpop.permute.xlu1 %7720 }
 0xa97   : > { %8078 = vst.msk [vmem:[#allocation5 + $0x18] sm:$0xff] %vm13577_vm3, %v8056_v54 }
 0xa98   : > { %7742 = vst.msk [vmem:[#allocation5 + $0x28] sm:$0xff] %vm6987_vm14, %v7721_v5 }
 0xa99   : > { %7790 = vst.msk [vmem:[#allocation5 + $0x28] sm:$0xff] %vm13578_vm12, %v7769_v43 }
 0xa9b   : > { %8017 = vrot.lane.b32.xlu0 %v7995_v34, %s13529_s22  ;;  %7875 = vrot.lane.b32.xlu2 %v7852_v48, %s13525_s26 }
 0xa9c   : > { %7971 = vrot.lane.b32.xlu1 %v7948_v35, %s13510_s27  ;;  %v8575_v35 = vld [vmem:[%s13455_s5] sm:$0xff]  ;;  %s9073_s27 = sshll.u32 %s9069_s21, 4  ;;  %s9074_s27 = int_to_ptr.hbm [resolvable:$true] %s9073_s27 }
 0xa9d   : > { %v7504_v0 = vpop.permute.xlu0 %7503  ;;  %v7819_v58 = vpop.permute.xlu2 %7818  ;;  %s9325_s14 = sshra.s32 %s9074_s27, 4  ;;  %s9326_s14 = int_to_ptr.hbm [resolvable:$true] %s9325_s14 }
 0xa9e   : > { %7528 = vst.msk [vmem:[#allocation5] sm:$0xff] %vm7527_vm8, %v7504_v0  ;;  %v7866_v17 = vpop.permute.xlu1 %7865  ;;  %v8088_v59 = vld [vmem:[#allocation5 + $0x18] sm:$0xff]  ;;  %vm13580_vm8 = vmmov %vm13570_vm1  ;;  %v13198_v0 = vld [vmem:[%s13454_s4] ss:$0 sm:$0xff]  ;;  %p9332_p0 = scmp.lt.s32.totalorder %s9326_s14, %s13459_s9 }
 0xa9f   : > { %7577 = vst.msk [vmem:[#allocation5] sm:$0xff] %vm7576_vm7, %v7553_v9  ;;  %9168 = vmatmul.msk.f32.gmra.mxu2 %vm8130_vm4, %v8088_v59  ;;  %vm13579_vm7 = vcmask 261312   ;;  %vm13584_vm2 = vmmov %vm13580_vm8  ;;  %v8176_v59 = vadd.f32 %v13198_v0, %v8175_v50 }
 0xaa0   : > { %7626 = vst.msk [vmem:[#allocation5] sm:$0xff] %vm7625_vm11, %v7602_v40  ;;  %vm13581_vm11 = vmmov %vm13577_vm3 }
 0xaa1   : > { %vm13583_vm1 = vmmov %vm13579_vm7  ;;  %v13174_v40 = vpop.f32.mrf.mxu2 }
 0xaa3   : > { %7778 = vrot.lane.b32.xlu0 %v7995_v34, %s13513_s28  ;;  %8019 = vrot.lane.b32.xlu2 %v7996_v44, %s13529_s22  ;;  %v8576_v34 = vld [vmem:[%s13455_s5 + $0x8] sm:$0xff]  ;;  %s9061_s28 = scalar_lea.sflag [#allocation7], %s323_s18 }
 0xaa4   : > { %8624 = vmatpush.msrb.mxu3 %v8576_v34 }
 0xaa5   : > { %v7652_v53 = vpop.permute.xlu0 %7651  ;;  %v7964_v32 = vpop.permute.xlu2 %7963 }
 0xaa6   : > { %7676 = vst.msk [vmem:[#allocation5] sm:$0xff] %vm7675_vm5, %v7652_v53  ;;  %v8010_v46 = vpop.permute.xlu1 %8009  ;;  %vm13582_vm5 = vmmov %vm13578_vm12  ;;  %8625 = vmatpush.msrb.mxu3 %v8575_v35 }
 0xaa7   : > { %vm13585_vm13 = vmmov %vm13582_vm5 }
 0xaa8   : > { %vm13586_vm12 = vmmov %vm13582_vm5 }
 0xaab   : > { %7923 = vrot.lane.b32.xlu0 %v7900_v30, %s13524_s24 }
 0xaad   : > { %v7817_v12 = vpop.permute.xlu0 %7816  ;;  %v8085_v4 = vld [vmem:[#allocation5] sm:$0xff]  ;;  %v7725_v39 = vpop.permute.xlu2 %7724 }
 0xaae   : > { %7838 = vst.msk [vmem:[#allocation5 + $0x28] sm:$0xff] %vm13579_vm7, %v7817_v12  ;;  %v7771_v16 = vpop.permute.xlu1 %7770  ;;  %8171 = vmatmul.f32.vlgmr.msrb.gmra.mxu1 %v8085_v4  ;;  %vm13587_vm7 = vmmov %vm13583_vm1 }
 0xaaf   : > { %7887 = vst.msk [vmem:[#allocation5 + $0x28] sm:$0xff] %vm13580_vm8, %v7866_v17  ;;  %vm13588_vm8 = vmmov %vm13583_vm1 }
 0xab0   : > { %7935 = vst.msk [vmem:[#allocation5 + $0x28] sm:$0xff] %vm7184_vm9, %v7914_v42 }
 0xab1   : > { %7744 = vst.msk [vmem:[#allocation5 + $0x48] sm:$0xff] %vm6987_vm14, %v7725_v39 }
 0xab3   : > { %8067 = vrot.lane.b32.xlu0 %v8044_v13, %s13528_s16  ;;  %s9327_s16 = scalar_lea.hbm %s9326_s14, 1 }
 0xab4   : > { %p9328_p11 = scmp.ne.s32.totalorder %s9326_s14, %s9327_s16  ;;  %p9333_p1 = scmp.lt.s32.totalorder %s9331_s23, %s9327_s16 }
 0xab5   : > { %v7962_v23 = vpop.permute.xlu0 %7961  ;;  %v7775_v6 = vpop.permute.xlu2 %7774 }
 0xab6   : > { %7983 = vst.msk [vmem:[#allocation5 + $0x28] sm:$0xff] %vm7233_vm10, %v7962_v23  ;;  %v7916_v14 = vpop.permute.xlu1 %7915  ;;  %p9329_p12 = pnand %p9328_p11, %p9500_p5  ;;  %p9334_p2 = por %p9333_p1, %p9332_p0 }
 0xab7   : > { %8031 = vst.msk [vmem:[#allocation5 + $0x28] sm:$0xff] %vm7282_vm6, %v8010_v46 }
 0xab8   : > { %8079 = vst.msk [vmem:[#allocation5 + $0x28] sm:$0xff] %vm13581_vm11, %v8058_v22  ;;  %vm13589_vm11 = vmmov %vm13584_vm2  ;;  %p9330_p13 = pneg %p9329_p12 }
 0xaba   : > { %p9335_p3 = pnand %p9334_p2, %p9330_p13 }
 0xabd   : > { %v7723_v8 = vpop.permute.xlu0 %7722  ;;  %v7870_v38 = vpop.permute.xlu2 %7869 }
 0xabe   : > { %7743 = vst.msk [vmem:[#allocation5 + $0x38] sm:$0xff] %vm6987_vm14, %v7723_v8  ;;  %v8060_v15 = vpop.permute.xlu1 %8059 }
 0xabf   : > { %7791 = vst.msk [vmem:[#allocation5 + $0x38] sm:$0xff] %vm13582_vm5, %v7771_v16  ;;  %v8090_v2 = vld [vmem:[#allocation5 + $0x28] sm:$0xff]  ;;  %vm13590_vm5 = vmmov %vm13584_vm2 }
 0xac0   : > { %7839 = vst.msk [vmem:[#allocation5 + $0x38] sm:$0xff] %vm13583_vm1, %v7819_v58  ;;  %9169 = vmatmul.msk.f32.gmra.mxu2 %vm8130_vm4, %v8090_v2  ;;  %vm13591_vm1 = vmmov %vm13577_vm3  ;;  %v8578_v2 = vld [vmem:[%s13455_s5 + $0x18] sm:$0xff] }
 0xac5   : > { %v7868_v62 = vpop.permute.xlu0 %7867  ;;  %v7920_v27 = vpop.permute.xlu2 %7919 }
 0xac6   : > { %7888 = vst.msk [vmem:[#allocation5 + $0x38] sm:$0xff] %vm13584_vm2, %v7868_v62  ;;  %v7773_v51 = vpop.permute.xlu1 %7772  ;;  %vm13592_vm2 = vmmov %vm13591_vm1 }
 0xac7   : > { %7936 = vst.msk [vmem:[#allocation5 + $0x38] sm:$0xff] %vm7184_vm9, %v7916_v14 }
 0xac8   : > { %7984 = vst.msk [vmem:[#allocation5 + $0x38] sm:$0xff] %vm7233_vm10, %v7964_v32 }
 0xac9   : > { %7792 = vst.msk [vmem:[#allocation5 + $0x48] sm:$0xff] %vm13585_vm13, %v7773_v51  ;;  %vm13593_vm13 = vmmov %vm13586_vm12  ;;  %v13179_v21 = vpop.f32.mrf.mxu2 }
 0xacd   : > { %v8012_v3 = vpop.permute.xlu0 %8011  ;;  %v8014_v45 = vpop.permute.xlu2 %8013 }
 0xace   : > { %8032 = vst.msk [vmem:[#allocation5 + $0x38] sm:$0xff] %vm7282_vm6, %v8012_v3  ;;  %v7823_v33 = vpop.permute.xlu1 %7822  ;;  %v8577_v3 = vld [vmem:[%s13455_s5 + $0x10] sm:$0xff] }
 0xacf   : > { %8080 = vst.msk [vmem:[#allocation5 + $0x38] sm:$0xff] %vm13577_vm3, %v8060_v15  ;;  %vm13594_vm3 = vmmov %vm13587_vm7 }
 0xad5   : > { %v7727_v28 = vpop.permute.xlu0 %7726  ;;  %v8064_v37 = vpop.permute.xlu2 %8063 }
 0xad6   : > { %7745 = vst.msk [vmem:[#allocation5 + $0x58] sm:$0xff] %vm6987_vm14, %v7727_v28  ;;  %v8092_v24 = vld [vmem:[#allocation5 + $0x38] sm:$0xff]  ;;  %v7918_v61 = vpop.permute.xlu1 %7917 }
 0xad7   : > { %7793 = vst.msk [vmem:[#allocation5 + $0x58] sm:$0xff] %vm13586_vm12, %v7775_v6  ;;  %9170 = vmatmul.msk.f32.gmra.mxu2 %vm8130_vm4, %v8092_v24  ;;  %vm13595_vm12 = vmmov %vm13590_vm5 }
 0xad8   : > { %7841 = vst.msk [vmem:[#allocation5 + $0x58] sm:$0xff] %vm13587_vm7, %v7823_v33  ;;  %vm13597_vm7 = vmmov %vm13593_vm13 }
 0xadb   : > { %v13183_v60 = vpop.f32.mrf.mxu2 }
 0xadd   : > { %v7821_v49 = vpop.permute.xlu0 %7820  ;;  %v7825_v55 = vpop.permute.xlu2 %7824 }
 0xade   : > { %7840 = vst.msk [vmem:[#allocation5 + $0x48] sm:$0xff] %vm13588_vm8, %v7821_v49  ;;  %v7968_v41 = vpop.permute.xlu1 %7967  ;;  %vm13598_vm8 = vmmov %vm13594_vm3 }
 0xadf   : > { %7889 = vst.msk [vmem:[#allocation5 + $0x48] sm:$0xff] %vm13589_vm11, %v7870_v38  ;;  %vm13599_vm11 = vmmov %vm13590_vm5 }
 0xae0   : > { %7937 = vst.msk [vmem:[#allocation5 + $0x48] sm:$0xff] %vm7184_vm9, %v7918_v61 }
 0xae5   : > { %v7872_v7 = vpop.permute.xlu0 %7871  ;;  %v7970_v36 = vpop.permute.xlu2 %7969 }
 0xae6   : > { %7890 = vst.msk [vmem:[#allocation5 + $0x58] sm:$0xff] %vm13590_vm5, %v7872_v7  ;;  %v8062_v63 = vpop.permute.xlu1 %8061  ;;  %vm8301_vm5 = vcmask 123904  }
 0xae7   : > { %7938 = vst.msk [vmem:[#allocation5 + $0x58] sm:$0xff] %vm7184_vm9, %v7920_v27 }
 0xae8   : > { %7986 = vst.msk [vmem:[#allocation5 + $0x58] sm:$0xff] %vm7233_vm10, %v7968_v41 }
 0xaed   : > { %v7966_v18 = vpop.permute.xlu0 %7965  ;;  %v7731_v19 = vpop.permute.xlu2 %7730 }
 0xaee   : > { %7985 = vst.msk [vmem:[#allocation5 + $0x48] sm:$0xff] %vm7233_vm10, %v7966_v18  ;;  %v7777_v31 = vpop.permute.xlu1 %7776 }
 0xaef   : > { %8033 = vst.msk [vmem:[#allocation5 + $0x48] sm:$0xff] %vm7282_vm6, %v8014_v45 }
 0xaf0   : > { %8081 = vst.msk [vmem:[#allocation5 + $0x48] sm:$0xff] %vm13591_vm1, %v8062_v63 }
 0xaf1   : > { %7747 = vst.msk [vmem:[#allocation5 + $0x78] sm:$0xff] %vm6987_vm14, %v7731_v19 }
 0xaf3   : > { %v8213_v5 = vpop.f32.mrf.mxu2 }
 0xaf5   : > { %v8016_v56 = vpop.permute.xlu0 %8015  ;;  %v7876_v42 = vpop.permute.xlu2 %7875 }
 0xaf6   : > { %8034 = vst.msk [vmem:[#allocation5 + $0x58] sm:$0xff] %vm7282_vm6, %v8016_v56  ;;  %v7922_v47 = vpop.permute.xlu1 %7921 }
 0xaf7   : > { %8082 = vst.msk [vmem:[#allocation5 + $0x58] sm:$0xff] %vm13592_vm2, %v8064_v37  ;;  %v8094_v25 = vld [vmem:[#allocation5 + $0x48] sm:$0xff] }
 0xaf8   : > { %9171 = vmatmul.msk.f32.gmra.mxu2 %vm8130_vm4, %v8094_v25 }
 0xafd   : > { %v7729_v54 = vpop.permute.xlu0 %7728  ;;  %v8020_v58 = vpop.permute.xlu2 %8019 }
 0xafe   : > { %7746 = vst.msk [vmem:[#allocation5 + $0x68] sm:$0xff] %vm6987_vm14, %v7729_v54  ;;  %v8096_v20 = vld [vmem:[#allocation5 + $0x58] sm:$0xff]  ;;  %v8066_v43 = vpop.permute.xlu1 %8065  ;;  %vm13596_vm14 = vmmov %vm13591_vm1 }
 0xaff   : > { %7794 = vst.msk [vmem:[#allocation5 + $0x68] sm:$0xff] %vm13593_vm13, %v7777_v31  ;;  %9172 = vmatmul.msk.f32.vlgmr.msra.gmra.mxu3 %vm8130_vm4, %v8096_v20  ;;  %vm13604_vm13 = vcmask 1045509  }
 0xb00   : > { %7842 = vst.msk [vmem:[#allocation5 + $0x68] sm:$0xff] %vm13594_vm3, %v7825_v55  ;;  %8647 = vmatpush.msra.mxu3 %v8578_v2  ;;  %vm13606_vm3 = vcmask 1047559  }
 0xb02   : > { %8648 = vmatpush.msra.mxu3 %v8577_v3 }
 0xb05   : > { %v7874_v1 = vpop.permute.xlu0 %7873 }
 0xb06   : > { %7891 = vst.msk [vmem:[#allocation5 + $0x68] sm:$0xff] %vm13595_vm12, %v7874_v1  ;;  %v7827_v9 = vpop.permute.xlu1 %7826  ;;  %vm13607_vm12 = vmmov %vm13604_vm13 }
 0xb07   : > { %7939 = vst.msk [vmem:[#allocation5 + $0x68] sm:$0xff] %vm7184_vm9, %v7922_v47 }
 0xb08   : > { %7987 = vst.msk [vmem:[#allocation5 + $0x68] sm:$0xff] %vm7233_vm10, %v7970_v36 }
 0xb0d   : > { %v8018_v11 = vpop.permute.xlu0 %8017 }
 0xb0e   : > { %8035 = vst.msk [vmem:[#allocation5 + $0x68] sm:$0xff] %vm7282_vm6, %v8018_v11  ;;  %v7972_v22 = vpop.permute.xlu1 %7971 }
 0xb0f   : > { %8083 = vst.msk [vmem:[#allocation5 + $0x68] sm:$0xff] %vm13596_vm14, %v8066_v43  ;;  %vm13609_vm14 = vmmov %vm13606_vm3 }
 0xb15   : > { %v7779_v52 = vpop.permute.xlu0 %7778 }
 0xb16   : > { %7795 = vst.msk [vmem:[#allocation5 + $0x78] sm:$0xff] %vm13597_vm7, %v7779_v52  ;;  %v8098_v10 = vld [vmem:[#allocation5 + $0x68] sm:$0xff]  ;;  %vm9058_vm7 = vcmask 73728  }
 0xb17   : > { %9173 = vmatmul.msk.f32.gmra.mxu3 %vm8130_vm4, %v8098_v10  ;;  %7843 = vst.msk [vmem:[#allocation5 + $0x78] sm:$0xff] %vm13598_vm8, %v7827_v9 }
 0xb18   : > { %7892 = vst.msk [vmem:[#allocation5 + $0x78] sm:$0xff] %vm13599_vm11, %v7876_v42 }
 0xb1d   : > { %v7924_v17 = vpop.permute.xlu0 %7923 }
 0xb1e   : > { %7940 = vst.msk [vmem:[#allocation5 + $0x78] sm:$0xff] %vm7184_vm9, %v7924_v17  ;;  %vm13600_vm9 = vcmask 1043459  }
 0xb1f   : > { %7988 = vst.msk [vmem:[#allocation5 + $0x78] sm:$0xff] %vm7233_vm10, %v7972_v22  ;;  %vm13601_vm10 = vmmov %vm13600_vm9 }
 0xb20   : > { %8036 = vst.msk [vmem:[#allocation5 + $0x78] sm:$0xff] %vm7282_vm6, %v8020_v58  ;;  %vm8526_vm6 = vcmask 130048  }
 0xb22   : > { %v8216_v48 = vpop.f32.mrf.mxu2 }
 0xb23   : > { %v8217_v53 = vadd.f32 %v8216_v48, %v8176_v59 }
 0xb25   : > { %v8238_v46 = vmax.f32 %v8217_v53, 0.0  ;;  %v8068_v32 = vpop.permute.xlu0 %8067  ;;  %v8580_v53 = vld [vmem:[%s13455_s5 + $0x28] sm:$0xff] }
 0xb26   : > { %8084 = vst.msk [vmem:[#allocation5 + $0x78] sm:$0xff] %vm13591_vm1, %v8068_v32 }
 0xb27   : > { %v8330_v30 = vsel %vm8301_vm5, %v8238_v46, -inf  ;;  %v8256_v12 = vrot.slane %v8238_v46, 2  ;;  %v8257_v6 = vrot.slane %v8238_v46, 4  ;;  %v8258_v55 = vrot.slane %v8238_v46, 6 }
 0xb28   : > { %v8331_v44 = vrot.slane %v8330_v30, 4 }
 0xb29   : > { %v8337_v39 = vsel %vm8301_vm5, %v8256_v12, -inf  ;;  %v8344_v28 = vsel %vm8301_vm5, %v8257_v6, -inf  ;;  %v8351_v47 = vsel %vm8301_vm5, %v8258_v55, -inf }
 0xb2a   : > { %v8332_v16 = vmax.f32 %v8330_v30, %v8331_v44  ;;  %v8338_v15 = vrot.slane %v8337_v39, 4  ;;  %v8345_v7 = vrot.slane %v8344_v28, 4  ;;  %v8352_v34 = vrot.slane %v8351_v47, 4 }
 0xb2b   : > { %v8172_v4 = vpop.f32.mrf.mxu1  ;;  %v8179_v44 = vadd.f32 %v13198_v0, %v13157_v29 }
 0xb2c   : > { %v8173_v13 = vadd.f32 %v13198_v0, %v8172_v4  ;;  %v8333_v8 = vrot.slane %v8332_v16, 2  ;;  %v8339_v45 = vmax.f32 %v8337_v39, %v8338_v15  ;;  %v8346_v20 = vmax.f32 %v8344_v28, %v8345_v7  ;;  %v8579_v4 = vld [vmem:[%s13455_s5 + $0x20] sm:$0xff] }
 0xb2d   : > { %v8100_v23 = vld [vmem:[#allocation5 + $0x78] sm:$0xff]  ;;  %v8353_v39 = vmax.f32 %v8351_v47, %v8352_v34 }
 0xb2e   : > { %9174 = vmatmul.msk.f32.gmra.mxu3 %vm8130_vm4, %v8100_v23  ;;  %v8214_v14 = vadd.f32 %v8213_v5, %v8173_v13  ;;  %v8334_v33 = vmax.f32 %v8332_v16, %v8333_v8  ;;  %v8340_v18 = vrot.slane %v8339_v45, 2  ;;  %v8347_v17 = vrot.slane %v8346_v20, 2 }
 0xb2f   : > { %vm13602_vm4 = vcmask 1044484  }
 0xb30   : > { %v8237_v38 = vmax.f32 %v8214_v14, 0.0  ;;  %v8335_v56 = vrot.slane %v8334_v33, 1  ;;  %v8341_v43 = vmax.f32 %v8339_v45, %v8340_v18  ;;  %v8348_v16 = vmax.f32 %v8346_v20, %v8347_v17  ;;  %vm13603_vm2 = vmmov %vm13602_vm4 }
 0xb32   : > { %v8253_v62 = vrot.slane %v8237_v38, 2  ;;  %v8254_v51 = vrot.slane %v8237_v38, 4  ;;  %v8302_v27 = vsel %vm8301_vm5, %v8237_v38, -inf  ;;  %v8255_v36 = vrot.slane %v8237_v38, 6 }
 0xb33   : > { %v8303_v24 = vrot.slane %v8302_v27, 4  ;;  %v8336_v42 = vmax.f32 %v8334_v33, %v8335_v56  ;;  %v8342_v35 = vrot.slane %v8341_v43, 1  ;;  %v8349_v15 = vrot.slane %v8348_v16, 1  ;;  %v8581_v33 = vld [vmem:[%s13455_s5 + $0x30] sm:$0xff] }
 0xb34   : > { %v8309_v61 = vsel %vm8301_vm5, %v8253_v62, -inf  ;;  %v8316_v37 = vsel %vm8301_vm5, %v8254_v51, -inf  ;;  %v8323_v1 = vsel %vm8301_vm5, %v8255_v36, -inf  ;;  %v8354_v38 = vrot.slane %v8353_v39, 2  ;;  %v8582_v51 = vld [vmem:[%s13455_s5 + $0x38] sm:$0xff] }
 0xb35   : > { %v8304_v49 = vmax.f32 %v8302_v27, %v8303_v24  ;;  %v8310_v50 = vrot.slane %v8309_v61, 4  ;;  %v8317_v41 = vrot.slane %v8316_v37, 4  ;;  %v8324_v10 = vrot.slane %v8323_v1, 4 }
 0xb36   : > { %v8528_v59 = vsel %vm8526_vm6, %v8336_v42, -inf  ;;  %v8343_v13 = vmax.f32 %v8341_v43, %v8342_v35  ;;  %v8355_v45 = vmax.f32 %v8353_v39, %v8354_v38  ;;  %v8350_v28 = vmax.f32 %v8348_v16, %v8349_v15  ;;  %v8586_v35 = vld [vmem:[%s13455_s5 + $0x58] sm:$0xff] }
 0xb37   : > { %v8305_v63 = vrot.slane %v8304_v49, 2  ;;  %v8311_v19 = vmax.f32 %v8309_v61, %v8310_v50  ;;  %v8318_v31 = vmax.f32 %v8316_v37, %v8317_v41  ;;  %v8325_v32 = vmax.f32 %v8323_v1, %v8324_v10 }
 0xb38   : > { %v8531_v29 = vsel %vm8526_vm6, %v8343_v13, -inf  ;;  %v8356_v55 = vrot.slane %v8355_v45, 1  ;;  %v8534_v7 = vsel %vm8526_vm6, %v8350_v28, -inf }
 0xb39   : > { %v8312_v25 = vrot.slane %v8311_v19, 2  ;;  %v8306_v54 = vmax.f32 %v8304_v49, %v8305_v63  ;;  %v8319_v52 = vrot.slane %v8318_v31, 2  ;;  %v8326_v14 = vrot.slane %v8325_v32, 2 }
 0xb3a   : > { %v8357_v1 = vmax.f32 %v8355_v45, %v8356_v55 }
 0xb3b   : > { %v8313_v11 = vmax.f32 %v8311_v19, %v8312_v25  ;;  %v8307_v9 = vrot.slane %v8306_v54, 1  ;;  %v8320_v46 = vmax.f32 %v8318_v31, %v8319_v52  ;;  %v8327_v27 = vmax.f32 %v8325_v32, %v8326_v14  ;;  %v8584_v19 = vld [vmem:[%s13455_s5 + $0x48] sm:$0xff] }
 0xb3c   : > { %v8537_v10 = vsel %vm8526_vm6, %v8357_v1, -inf }
 0xb3d   : > { %v8308_v5 = vmax.f32 %v8306_v54, %v8307_v9  ;;  %v8314_v22 = vrot.slane %v8313_v11, 1  ;;  %v8321_v8 = vrot.slane %v8320_v46, 1  ;;  %v8328_v50 = vrot.slane %v8327_v27, 1  ;;  %v8583_v54 = vld [vmem:[%s13455_s5 + $0x40] sm:$0xff] }
 0xb3f   : > { %v8527_v58 = vsel %vm8526_vm6, %v8308_v5, -inf  ;;  %v8315_v30 = vmax.f32 %v8313_v11, %v8314_v22  ;;  %v8322_v3 = vmax.f32 %v8320_v46, %v8321_v8  ;;  %v8329_v31 = vmax.f32 %v8327_v27, %v8328_v50 }
 0xb40   : > { %v8529_v48 = vmax.f32 %v8527_v58, %v8528_v59  ;;  %v8182_v5 = vadd.f32 %v13198_v0, %v13162_v57 }
 0xb41   : > { %v8530_v6 = vsel %vm8526_vm6, %v8315_v30, -inf  ;;  %v8533_v49 = vsel %vm8526_vm6, %v8322_v3, -inf  ;;  %v8536_v9 = vsel %vm8526_vm6, %v8329_v31, -inf }
 0xb42   : > { %9175 = vmatmul.msk.f32.vlgmr.msrb.gmra.mxu3 %vm8526_vm6, %v8529_v48  ;;  %v8532_v62 = vmax.f32 %v8530_v6, %v8531_v29  ;;  %v8535_v63 = vmax.f32 %v8533_v49, %v8534_v7  ;;  %v8538_v34 = vmax.f32 %v8536_v9, %v8537_v10  ;;  %v8585_v48 = vld [vmem:[%s13455_s5 + $0x50] sm:$0xff] }
 0xb43   : > { %v8219_v12 = vpop.f32.mrf.mxu2  ;;  %8670 = vmatpush.msrb.mxu3 %v8580_v53 }
 0xb44   : > { %v8220_v23 = vadd.f32 %v8219_v12, %v8179_v44 }
 0xb45   : > { %8671 = vmatpush.msrb.mxu3 %v8579_v4 }
 0xb46   : > { %v8239_v2 = vmax.f32 %v8220_v23, 0.0 }
 0xb48   : > { %v8259_v24 = vrot.slane %v8239_v2, 2  ;;  %v8260_v61 = vrot.slane %v8239_v2, 4  ;;  %v8261_v37 = vrot.slane %v8239_v2, 6  ;;  %v8358_v41 = vsel %vm8301_vm5, %v8239_v2, -inf }
 0xb49   : > { %v8359_v56 = vrot.slane %v8358_v41, 4 }
 0xb4a   : > { %9176 = vmatmul.msk.f32.vlgmr.msra.gmra.mxu3 %vm8526_vm6, %v8532_v62  ;;  %v8365_v36 = vsel %vm8301_vm5, %v8259_v24, -inf  ;;  %v8372_v18 = vsel %vm8301_vm5, %v8260_v61, -inf  ;;  %v8379_v25 = vsel %vm8301_vm5, %v8261_v37, -inf }
 0xb4b   : > { %8693 = vmatpush.msra.mxu3 %v8582_v51  ;;  %v8366_v20 = vrot.slane %v8365_v36, 4  ;;  %v8373_v47 = vrot.slane %v8372_v18, 4  ;;  %v8380_v43 = vrot.slane %v8379_v25, 4  ;;  %v8360_v11 = vmax.f32 %v8358_v41, %v8359_v56 }
 0xb4d   : > { %8694 = vmatpush.msra.mxu3 %v8581_v33  ;;  %v8367_v42 = vmax.f32 %v8365_v36, %v8366_v20  ;;  %v8374_v52 = vmax.f32 %v8372_v18, %v8373_v47  ;;  %v8381_v22 = vmax.f32 %v8379_v25, %v8380_v43  ;;  %v8361_v17 = vrot.slane %v8360_v11, 2 }
 0xb4f   : > { %v8368_v53 = vrot.slane %v8367_v42, 2  ;;  %v8375_v46 = vrot.slane %v8374_v52, 2  ;;  %v8382_v32 = vrot.slane %v8381_v22, 2  ;;  %v8362_v30 = vmax.f32 %v8360_v11, %v8361_v17 }
 0xb51   : > { %v8369_v39 = vmax.f32 %v8367_v42, %v8368_v53  ;;  %v8376_v13 = vmax.f32 %v8374_v52, %v8375_v46  ;;  %v8383_v14 = vmax.f32 %v8381_v22, %v8382_v32  ;;  %v8363_v51 = vrot.slane %v8362_v30, 1  ;;  %v8596_v32 = vld [vmem:[%s13455_s5 + $0xa8] sm:$0xff] }
 0xb52   : > { %9177 = vmatmul.msk.f32.vlgmr.msrb.gmra.mxu3 %vm8526_vm6, %v8535_v63  ;;  %8854 = vmatpush.msra.mxu2 %v8596_v32 }
 0xb53   : > { %8716 = vmatpush.msrb.mxu3 %v8584_v19  ;;  %v8370_v28 = vrot.slane %v8369_v39, 1  ;;  %v8377_v24 = vrot.slane %v8376_v13, 1  ;;  %v8384_v61 = vrot.slane %v8383_v14, 1  ;;  %v8364_v55 = vmax.f32 %v8362_v30, %v8363_v51  ;;  %v8589_v30 = vld [vmem:[%s13455_s5 + $0x70] sm:$0xff] }
 0xb55   : > { %8717 = vmatpush.msrb.mxu3 %v8583_v54  ;;  %v8371_v19 = vmax.f32 %v8369_v39, %v8370_v28  ;;  %v8378_v56 = vmax.f32 %v8376_v13, %v8377_v24  ;;  %v8385_v25 = vmax.f32 %v8383_v14, %v8384_v61  ;;  %v8539_v1 = vsel %vm8526_vm6, %v8364_v55, -inf  ;;  %v8592_v39 = vld [vmem:[%s13455_s5 + $0x88] sm:$0xff] }
 0xb57   : > { %v8542_v10 = vsel %vm8526_vm6, %v8371_v19, -inf  ;;  %v8545_v22 = vsel %vm8526_vm6, %v8378_v56, -inf  ;;  %v8548_v17 = vsel %vm8526_vm6, %v8385_v25, -inf  ;;  %v8593_v25 = vld [vmem:[%s13455_s5 + $0x90] sm:$0xff] }
 0xb5a   : > { %v8222_v58 = vpop.f32.mrf.mxu2  ;;  %9178 = vmatmul.msk.f32.vlgmr.msra.gmra.mxu3 %vm8526_vm6, %v8538_v34 }
 0xb5b   : > { %v8223_v59 = vadd.f32 %v8222_v58, %v8182_v5  ;;  %8739 = vmatpush.msra.mxu3 %v8586_v35  ;;  %v8588_v5 = vld [vmem:[%s13455_s5 + $0x68] sm:$0xff] }
 0xb5d   : > { %v8240_v57 = vmax.f32 %v8223_v59, 0.0  ;;  %8740 = vmatpush.msra.mxu3 %v8585_v48  ;;  %v8587_v48 = vld [vmem:[%s13455_s5 + $0x60] sm:$0xff] }
 0xb5f   : > { %v8262_v44 = vrot.slane %v8240_v57, 2  ;;  %v8263_v12 = vrot.slane %v8240_v57, 4  ;;  %v8264_v4 = vrot.slane %v8240_v57, 6  ;;  %v8386_v16 = vsel %vm8301_vm5, %v8240_v57, -inf  ;;  %v8590_v57 = vld [vmem:[%s13455_s5 + $0x78] sm:$0xff] }
 0xb60   : > { %v8387_v23 = vrot.slane %v8386_v16, 4 }
 0xb61   : > { %v8393_v6 = vsel %vm8301_vm5, %v8262_v44, -inf  ;;  %v8400_v8 = vsel %vm8301_vm5, %v8263_v12, -inf  ;;  %v8407_v15 = vsel %vm8301_vm5, %v8264_v4, -inf  ;;  %v8595_v44 = vld [vmem:[%s13455_s5 + $0xa0] sm:$0xff]  ;;  %v8185_v12 = vadd.f32 %v13198_v0, %v13168_v26 }
 0xb62   : > { %v8388_v38 = vmax.f32 %v8386_v16, %v8387_v23  ;;  %v8394_v29 = vrot.slane %v8393_v6, 4  ;;  %v8401_v2 = vrot.slane %v8400_v8, 4  ;;  %v8408_v62 = vrot.slane %v8407_v15, 4  ;;  %8855 = vmatpush.msra.mxu2 %v8595_v44  ;;  %v8591_v23 = vld [vmem:[%s13455_s5 + $0x80] sm:$0xff] }
 0xb64   : > { %v8389_v27 = vrot.slane %v8388_v38, 2  ;;  %v8395_v3 = vmax.f32 %v8393_v6, %v8394_v29  ;;  %v8402_v33 = vmax.f32 %v8400_v8, %v8401_v2  ;;  %v8409_v45 = vmax.f32 %v8407_v15, %v8408_v62 }
 0xb66   : > { %v8390_v37 = vmax.f32 %v8388_v38, %v8389_v27  ;;  %v8396_v49 = vrot.slane %v8395_v3, 2  ;;  %v8403_v50 = vrot.slane %v8402_v33, 2  ;;  %v8410_v41 = vrot.slane %v8409_v45, 2 }
 0xb67   : > { %v8188_v38 = vadd.f32 %v13198_v0, %v13174_v40 }
 0xb68   : > { %v8391_v7 = vrot.slane %v8390_v37, 1  ;;  %v8397_v36 = vmax.f32 %v8395_v3, %v8396_v49  ;;  %v8404_v18 = vmax.f32 %v8402_v33, %v8403_v50  ;;  %v8411_v63 = vmax.f32 %v8409_v45, %v8410_v41 }
 0xb6a   : > { %v8392_v31 = vmax.f32 %v8390_v37, %v8391_v7  ;;  %v8398_v54 = vrot.slane %v8397_v36, 1  ;;  %v8405_v20 = vrot.slane %v8404_v18, 1  ;;  %v8412_v47 = vrot.slane %v8411_v63, 1  ;;  %v8594_v7 = vld [vmem:[%s13455_s5 + $0x98] sm:$0xff] }
 0xb6c   : > { %v8540_v43 = vsel %vm8526_vm6, %v8392_v31, -inf  ;;  %v8399_v11 = vmax.f32 %v8397_v36, %v8398_v54  ;;  %v8406_v9 = vmax.f32 %v8404_v18, %v8405_v20  ;;  %v8413_v42 = vmax.f32 %v8411_v63, %v8412_v47 }
 0xb6d   : > { %v8541_v52 = vmax.f32 %v8539_v1, %v8540_v43 }
 0xb6e   : > { %v8543_v34 = vsel %vm8526_vm6, %v8399_v11, -inf  ;;  %v8546_v35 = vsel %vm8526_vm6, %v8406_v9, -inf  ;;  %v8549_v58 = vsel %vm8526_vm6, %v8413_v42, -inf }
 0xb6f   : > { %9179 = vmatmul.msk.f32.vlgmr.msrb.gmra.mxu3 %vm8526_vm6, %v8541_v52  ;;  %v8544_v59 = vmax.f32 %v8542_v10, %v8543_v34  ;;  %v8547_v53 = vmax.f32 %v8545_v22, %v8546_v35  ;;  %v8550_v46 = vmax.f32 %v8548_v17, %v8549_v58 }
 0xb70   : > { %8762 = vmatpush.msrb.mxu3 %v8588_v5 }
 0xb72   : > { %8763 = vmatpush.msrb.mxu3 %v8587_v48 }
 0xb77   : > { %9180 = vmatmul.msk.f32.vlgmr.msra.gmra.mxu3 %vm8526_vm6, %v8544_v59 }
 0xb78   : > { %8785 = vmatpush.msra.mxu3 %v8590_v57 }
 0xb7a   : > { %8786 = vmatpush.msra.mxu3 %v8589_v30 }
 0xb7b   : > { %v8225_v4 = vpop.f32.mrf.mxu2 }
 0xb7c   : > { %v8226_v16 = vadd.f32 %v8225_v4, %v8185_v12 }
 0xb7e   : > { %v8241_v13 = vmax.f32 %v8226_v16, 0.0 }
 0xb7f   : > { %9181 = vmatmul.msk.f32.vlgmr.msrb.gmra.mxu3 %vm8526_vm6, %v8547_v53 }
 0xb80   : > { %v8265_v14 = vrot.slane %v8241_v13, 2  ;;  %v8266_v6 = vrot.slane %v8241_v13, 4  ;;  %v8267_v8 = vrot.slane %v8241_v13, 6  ;;  %v8414_v26 = vsel %vm8301_vm5, %v8241_v13, -inf  ;;  %8808 = vmatpush.msrb.mxu3 %v8592_v39 }
 0xb81   : > { %v8415_v15 = vrot.slane %v8414_v26, 4 }
 0xb82   : > { %v8421_v29 = vsel %vm8301_vm5, %v8265_v14, -inf  ;;  %v8428_v2 = vsel %vm8301_vm5, %v8266_v6, -inf  ;;  %v8435_v62 = vsel %vm8301_vm5, %v8267_v8, -inf  ;;  %v8228_v51 = vpop.f32.mrf.mxu3  ;;  %8809 = vmatpush.msrb.mxu3 %v8591_v23 }
 0xb83   : > { %v8416_v27 = vmax.f32 %v8414_v26, %v8415_v15  ;;  %v8422_v3 = vrot.slane %v8421_v29, 4  ;;  %v8429_v33 = vrot.slane %v8428_v2, 4  ;;  %v8436_v45 = vrot.slane %v8435_v62, 4 }
 0xb84   : > { %v8229_v28 = vadd.f32 %v8228_v51, %v8188_v38 }
 0xb85   : > { %v8417_v24 = vrot.slane %v8416_v27, 2  ;;  %v8423_v61 = vmax.f32 %v8421_v29, %v8422_v3  ;;  %v8430_v37 = vmax.f32 %v8428_v2, %v8429_v33  ;;  %v8437_v49 = vmax.f32 %v8435_v62, %v8436_v45  ;;  %v8598_v33 = vld [vmem:[%s13455_s5 + $0xb8] sm:$0xff] }
 0xb86   : > { %v8242_v50 = vmax.f32 %v8229_v28, 0.0 }
 0xb87   : > { %v8424_v41 = vrot.slane %v8423_v61, 2  ;;  %v8431_v40 = vrot.slane %v8430_v37, 2  ;;  %v8438_v55 = vrot.slane %v8437_v49, 2  ;;  %9182 = vmatmul.msk.f32.vlgmr.msra.gmra.mxu3 %vm8526_vm6, %v8550_v46  ;;  %v8418_v56 = vmax.f32 %v8416_v27, %v8417_v24 }
 0xb88   : > { %v8268_v36 = vrot.slane %v8242_v50, 2  ;;  %v8269_v18 = vrot.slane %v8242_v50, 4  ;;  %v8270_v63 = vrot.slane %v8242_v50, 6  ;;  %v8442_v19 = vsel %vm8301_vm5, %v8242_v50, -inf  ;;  %8831 = vmatpush.msra.mxu3 %v8594_v7  ;;  %v8597_v50 = vld [vmem:[%s13455_s5 + $0xb0] sm:$0xff] }
 0xb89   : > { %v8443_v31 = vrot.slane %v8442_v19, 4  ;;  %v8425_v1 = vmax.f32 %v8423_v61, %v8424_v41  ;;  %v8432_v43 = vmax.f32 %v8430_v37, %v8431_v40  ;;  %v8439_v11 = vmax.f32 %v8437_v49, %v8438_v55 }
 0xb8a   : > { %v8449_v54 = vsel %vm8301_vm5, %v8268_v36, -inf  ;;  %v8456_v20 = vsel %vm8301_vm5, %v8269_v18, -inf  ;;  %v8463_v47 = vsel %vm8301_vm5, %v8270_v63, -inf  ;;  %8832 = vmatpush.msra.mxu3 %v8593_v25  ;;  %v8419_v5 = vrot.slane %v8418_v56, 1  ;;  %v8602_v18 = vld [vmem:[%s13455_s5 + $0xd8] sm:$0xff]  ;;  %v8600_v63 = vld [vmem:[%s13455_s5 + $0xc8] sm:$0xff] }
 0xb8b   : > { %v8444_v9 = vmax.f32 %v8442_v19, %v8443_v31  ;;  %v8450_v42 = vrot.slane %v8449_v54, 4  ;;  %v8457_v52 = vrot.slane %v8456_v20, 4  ;;  %v8464_v10 = vrot.slane %v8463_v47, 4  ;;  %8900 = vmatpush.msrb.mxu2 %v8600_v63 }
 0xb8c   : > { %v8426_v58 = vrot.slane %v8425_v1, 1  ;;  %v8433_v59 = vrot.slane %v8432_v43, 1  ;;  %v8440_v48 = vrot.slane %v8439_v11, 1  ;;  %v8420_v30 = vmax.f32 %v8418_v56, %v8419_v5 }
 0xb8d   : > { %v8445_v22 = vrot.slane %v8444_v9, 2  ;;  %v8451_v34 = vmax.f32 %v8449_v54, %v8450_v42  ;;  %v8458_v35 = vmax.f32 %v8456_v20, %v8457_v52  ;;  %v8465_v17 = vmax.f32 %v8463_v47, %v8464_v10  ;;  %v8599_v54 = vld [vmem:[%s13455_s5 + $0xc0] sm:$0xff] }
 0xb8e   : > { %v8434_v39 = vmax.f32 %v8432_v43, %v8433_v59  ;;  %v8427_v13 = vmax.f32 %v8425_v1, %v8426_v58  ;;  %v8441_v23 = vmax.f32 %v8439_v11, %v8440_v48  ;;  %v8551_v15 = vsel %vm8526_vm6, %v8420_v30, -inf  ;;  %8901 = vmatpush.msrb.mxu2 %v8599_v54  ;;  %v8604_v1 = vld [vmem:[%s13455_s5 + $0xe8] sm:$0xff]  ;;  %v8606_v43 = vld [vmem:[%s13455_s5 + $0xf8] sm:$0xff]  ;;  %v8603_v42 = vld [vmem:[%s13455_s5 + $0xe0] sm:$0xff] }
 0xb8f   : > { %v8446_v53 = vmax.f32 %v8444_v9, %v8445_v22  ;;  %v8452_v46 = vrot.slane %v8451_v34, 2  ;;  %v8459_v32 = vrot.slane %v8458_v35, 2  ;;  %v8466_v57 = vrot.slane %v8465_v17, 2 }
 0xb90   : > { %v8557_v27 = vsel %vm8526_vm6, %v8434_v39, -inf  ;;  %v8554_v3 = vsel %vm8526_vm6, %v8427_v13, -inf  ;;  %v8560_v24 = vsel %vm8526_vm6, %v8441_v23, -inf  ;;  %v8191_v40 = vadd.f32 %v13198_v0, %v13179_v21  ;;  %v8601_v21 = vld [vmem:[%s13455_s5 + $0xd0] sm:$0xff] }
 0xb91   : > { %v8447_v44 = vrot.slane %v8446_v53, 1  ;;  %v8453_v12 = vmax.f32 %v8451_v34, %v8452_v46  ;;  %v8460_v4 = vmax.f32 %v8458_v35, %v8459_v32  ;;  %v8467_v16 = vmax.f32 %v8465_v17, %v8466_v57 }
 0xb92   : > { %v8194_v17 = vadd.f32 %v13198_v0, %v13183_v60 }
 0xb93   : > { %v8448_v14 = vmax.f32 %v8446_v53, %v8447_v44  ;;  %v8454_v6 = vrot.slane %v8453_v12, 1  ;;  %v8461_v8 = vrot.slane %v8460_v4, 1  ;;  %v8468_v26 = vrot.slane %v8467_v16, 1  ;;  %v8605_v53 = vld [vmem:[%s13455_s5 + $0xf0] sm:$0xff] }
 0xb95   : > { %v8552_v38 = vsel %vm8526_vm6, %v8448_v14, -inf  ;;  %v8462_v29 = vmax.f32 %v8460_v4, %v8461_v8  ;;  %v8455_v2 = vmax.f32 %v8453_v12, %v8454_v6  ;;  %v8469_v62 = vmax.f32 %v8467_v16, %v8468_v26 }
 0xb96   : > { %v8553_v51 = vmax.f32 %v8551_v15, %v8552_v38 }
 0xb97   : > { %v8558_v45 = vsel %vm8526_vm6, %v8462_v29, -inf  ;;  %v8555_v28 = vsel %vm8526_vm6, %v8455_v2, -inf  ;;  %v8561_v61 = vsel %vm8526_vm6, %v8469_v62, -inf }
 0xb98   : > { %9183 = vmatmul.msk.f32.vlgmr.msrb.gmra.mxu3 %vm8526_vm6, %v8553_v51  ;;  %v8559_v37 = vmax.f32 %v8557_v27, %v8558_v45  ;;  %v8556_v49 = vmax.f32 %v8554_v3, %v8555_v28  ;;  %v8562_v41 = vmax.f32 %v8560_v24, %v8561_v61 }
 0xb99   : > { %8877 = vmatpush.msrb.mxu3 %v8598_v33 }
 0xb9a   : > { %v8231_v55 = vpop.f32.mrf.mxu3  ;;  %9185 = vmatmul.msk.f32.vlgmr.msra.gmra.mxu2 %vm8526_vm6, %v8559_v37 }
 0xb9b   : > { %v8232_v7 = vadd.f32 %v8231_v55, %v8191_v40  ;;  %8878 = vmatpush.msrb.mxu3 %v8597_v50  ;;  %8969 = vmatpush.msra.mxu2 %v8606_v43 }
 0xb9d   : > { %v8243_v36 = vmax.f32 %v8232_v7, 0.0  ;;  %8970 = vmatpush.msra.mxu2 %v8605_v53 }
 0xb9f   : > { %v8271_v19 = vrot.slane %v8243_v36, 2  ;;  %v8272_v56 = vrot.slane %v8243_v36, 4  ;;  %v8273_v25 = vrot.slane %v8243_v36, 6  ;;  %v8470_v31 = vsel %vm8301_vm5, %v8243_v36, -inf }
 0xba0   : > { %9184 = vmatmul.msk.f32.vlgmr.msra.gmra.mxu3 %vm8526_vm6, %v8556_v49  ;;  %v8471_v11 = vrot.slane %v8470_v31, 4 }
 0xba1   : > { %8923 = vmatpush.msra.mxu3 %v8602_v18  ;;  %v8477_v20 = vsel %vm8301_vm5, %v8271_v19, -inf  ;;  %v8484_v47 = vsel %vm8301_vm5, %v8272_v56, -inf  ;;  %v8491_v9 = vsel %vm8301_vm5, %v8273_v25, -inf }
 0xba2   : > { %v8478_v52 = vrot.slane %v8477_v20, 4  ;;  %v8485_v10 = vrot.slane %v8484_v47, 4  ;;  %v8492_v5 = vrot.slane %v8491_v9, 4  ;;  %v8472_v22 = vmax.f32 %v8470_v31, %v8471_v11 }
 0xba3   : > { %8924 = vmatpush.msra.mxu3 %v8601_v21 }
 0xba4   : > { %v8479_v34 = vmax.f32 %v8477_v20, %v8478_v52  ;;  %v8486_v35 = vmax.f32 %v8484_v47, %v8485_v10  ;;  %v8493_v58 = vmax.f32 %v8491_v9, %v8492_v5  ;;  %v8473_v59 = vrot.slane %v8472_v22, 2 }
 0xba6   : > { %v8480_v32 = vrot.slane %v8479_v34, 2  ;;  %v8487_v57 = vrot.slane %v8486_v35, 2  ;;  %v8494_v30 = vrot.slane %v8493_v58, 2  ;;  %v8474_v12 = vmax.f32 %v8472_v22, %v8473_v59 }
 0xba8   : > { %9186 = vmatmul.msk.f32.vlgmr.msrb.gmra.mxu3 %vm8526_vm6, %v8562_v41  ;;  %v8481_v60 = vmax.f32 %v8479_v34, %v8480_v32  ;;  %v8488_v0 = vmax.f32 %v8486_v35, %v8487_v57  ;;  %v8495_v14 = vmax.f32 %v8493_v58, %v8494_v30  ;;  %v8475_v62 = vrot.slane %v8474_v12, 1 }
 0xba9   : > { %8946 = vmatpush.msrb.mxu3 %v8604_v1 }
 0xbaa   : > { %v8482_v45 = vrot.slane %v8481_v60, 1  ;;  %v8489_v28 = vrot.slane %v8488_v0, 1  ;;  %v8496_v24 = vrot.slane %v8495_v14, 1  ;;  %v8476_v41 = vmax.f32 %v8474_v12, %v8475_v62 }
 0xbab   : > { %8947 = vmatpush.msrb.mxu3 %v8603_v42 }
 0xbac   : > { %v8483_v18 = vmax.f32 %v8481_v60, %v8482_v45  ;;  %v8497_v63 = vmax.f32 %v8495_v14, %v8496_v24  ;;  %v8490_v21 = vmax.f32 %v8488_v0, %v8489_v28  ;;  %v8563_v54 = vsel %vm8526_vm6, %v8476_v41, -inf }
 0xbae   : > { %v8566_v9 = vsel %vm8526_vm6, %v8483_v18, -inf  ;;  %v8572_v42 = vsel %vm8526_vm6, %v8497_v63, -inf  ;;  %v8569_v5 = vsel %vm8526_vm6, %v8490_v21, -inf }
 0xbb1   : > { %v8234_v48 = vpop.f32.mrf.mxu3 }
 0xbb2   : > { %v8235_v46 = vadd.f32 %v8234_v48, %v8194_v17 }
 0xbb4   : > { %v8244_v44 = vmax.f32 %v8235_v46, 0.0 }
 0xbb6   : > { %v8274_v4 = vrot.slane %v8244_v44, 2  ;;  %v8275_v16 = vrot.slane %v8244_v44, 4  ;;  %v8276_v39 = vrot.slane %v8244_v44, 6  ;;  %v8498_v13 = vsel %vm8301_vm5, %v8244_v44, -inf }
 0xbb7   : > { %v8499_v23 = vrot.slane %v8498_v13, 4 }
 0xbb8   : > { %v8505_v6 = vsel %vm8301_vm5, %v8274_v4, -inf  ;;  %v8512_v8 = vsel %vm8301_vm5, %v8275_v16, -inf  ;;  %v8519_v26 = vsel %vm8301_vm5, %v8276_v39, -inf }
 0xbb9   : > { %v8500_v15 = vmax.f32 %v8498_v13, %v8499_v23  ;;  %v8506_v38 = vrot.slane %v8505_v6, 4  ;;  %v8513_v29 = vrot.slane %v8512_v8, 4  ;;  %v8520_v2 = vrot.slane %v8519_v26, 4 }
 0xbbb   : > { %v8501_v51 = vrot.slane %v8500_v15, 2  ;;  %v8507_v27 = vmax.f32 %v8505_v6, %v8506_v38  ;;  %v8514_v3 = vmax.f32 %v8512_v8, %v8513_v29  ;;  %v8521_v33 = vmax.f32 %v8519_v26, %v8520_v2  ;;  %v9033_v6 = vld [vmem:[%s13457_s7 + $0x8] sm:$0xff]  ;;  %v9032_v8 = vld [vmem:[%s13457_s7] sm:$0xff] }
 0xbbd   : > { %v8502_v61 = vmax.f32 %v8500_v15, %v8501_v51  ;;  %v8508_v37 = vrot.slane %v8507_v27, 2  ;;  %v8515_v49 = vrot.slane %v8514_v3, 2  ;;  %v8522_v50 = vrot.slane %v8521_v33, 2 }
 0xbbf   : > { %v8503_v40 = vrot.slane %v8502_v61, 1  ;;  %v8509_v55 = vmax.f32 %v8507_v27, %v8508_v37  ;;  %v8516_v7 = vmax.f32 %v8514_v3, %v8515_v49  ;;  %v8523_v36 = vmax.f32 %v8521_v33, %v8522_v50 }
 0xbc1   : > { %v8504_v19 = vmax.f32 %v8502_v61, %v8503_v40  ;;  %v8510_v56 = vrot.slane %v8509_v55, 1  ;;  %v8517_v25 = vrot.slane %v8516_v7, 1  ;;  %v8524_v31 = vrot.slane %v8523_v36, 1 }
 0xbc3   : > { %v8564_v20 = vsel %vm8526_vm6, %v8504_v19, -inf  ;;  %v8511_v47 = vmax.f32 %v8509_v55, %v8510_v56  ;;  %v8525_v1 = vmax.f32 %v8523_v36, %v8524_v31  ;;  %v8518_v43 = vmax.f32 %v8516_v7, %v8517_v25 }
 0xbc4   : > { %v8565_v11 = vmax.f32 %v8563_v54, %v8564_v20 }
 0xbc5   : > { %v8567_v52 = vsel %vm8526_vm6, %v8511_v47, -inf  ;;  %v8573_v10 = vsel %vm8526_vm6, %v8525_v1, -inf  ;;  %v8570_v22 = vsel %vm8526_vm6, %v8518_v43, -inf  ;;  %v8627_v34 = vpop.f32.mrf.mxu3 }
 0xbc6   : > { %9187 = vmatmul.msk.f32.vlgmr.msrb.gmra.mxu2 %vm8526_vm6, %v8565_v11  ;;  %v8568_v35 = vmax.f32 %v8566_v9, %v8567_v52  ;;  %v8574_v17 = vmax.f32 %v8572_v42, %v8573_v10  ;;  %v8571_v58 = vmax.f32 %v8569_v5, %v8570_v22  ;;  %v9030_v11 = vld [vmem:[%s13456_s6] sm:$0x1] }
 0xbc7   : > { %v9034_v52 = vld [vmem:[%s13458_s8] sm:$0x1] }
 0xbc8   : > { %9188 = vmatmul.msk.f32.vlgmr.msra.gmra.mxu3 %vm8526_vm6, %v8568_v35 }
 0xbc9   : > { %9052 = vmatpush.msra.mxu3 %v9033_v6 }
 0xbcb   : > { %9053 = vmatpush.msra.mxu3 %v9032_v8 }
 0xbcd   : > { %v8650_v59 = vpop.f32.mrf.mxu3 }
 0xbce   : > { %9190 = vmatmul.msk.f32.vlgmr.msra.gmra.mxu2 %vm8526_vm6, %v8574_v17  ;;  %v8991_v48 = vrot.slane %v8650_v59, 7 }
 0xbd0   : > { %9189 = vmatmul.msk.f32.vlgmr.msrb.gmra.mxu3 %vm8526_vm6, %v8571_v58  ;;  %v8992_v53 = vsel %vm6851_vm15, %v8991_v48, %v8627_v34 }
 0xbd5   : > { %v8673_v46 = vpop.f32.mrf.mxu3 }
 0xbd6   : > { %v8993_v32 = vrot.slane %v8673_v46, 6 }
 0xbd8   : > { %v8994_v57 = vsel %vm6853_vm0, %v8993_v32, %v8992_v53 }
 0xbdd   : > { %v8696_v30 = vpop.f32.mrf.mxu3 }
 0xbde   : > { %v8995_v44 = vrot.slane %v8696_v30, 5 }
 0xbe0   : > { %v8996_v12 = vsel %vm13600_vm9, %v8995_v44, %v8994_v57 }
 0xbf2   : > { %v8719_v4 = vpop.f32.mrf.mxu3 }
 0xbf3   : > { %v8997_v62 = vrot.slane %v8719_v4, 4 }
 0xbf5   : > { %v8998_v37 = vsel %vm13602_vm4, %v8997_v62, %v8996_v12 }
 0xbfa   : > { %v8742_v16 = vpop.f32.mrf.mxu3 }
 0xbfb   : > { %v8999_v3 = vrot.slane %v8742_v16, 3 }
 0xbfd   : > { %v9000_v41 = vsel %vm13604_vm13, %v8999_v3, %v8998_v37 }
 0xc02   : > { %v8765_v39 = vpop.f32.mrf.mxu3 }
 0xc03   : > { %v9001_v33 = vrot.slane %v8765_v39, 2 }
 0xc0a   : > { %v8788_v13 = vpop.f32.mrf.mxu3 }
 0xc0b   : > { %v9003_v28 = vrot.slane %v8788_v13, 1 }
 0xc1b   : > { %v8811_v60 = vpop.f32.mrf.mxu3 }
 0xc1d   : > { %v8857_v23 = vpop.f32.mrf.mxu2 }
 0xc1e   : > { %v9007_v51 = vrot.slane %v8857_v23, 6 }
 0xc23   : > { %v8834_v0 = vpop.f32.mrf.mxu3 }
 0xc24   : > { %v9005_v26 = vrot.slane %v8834_v0, 7 }
 0xc26   : > { %v9006_v29 = vsel %vm6851_vm15, %v9005_v26, %v8811_v60  ;;  %vm13605_vm15 = vcmask 1046534  }
 0xc27   : > { %v9008_v45 = vsel %vm6853_vm0, %v9007_v51, %v9006_v29  ;;  %v9002_v55 = vsel %vm13605_vm15, %v9001_v33, %v9000_v41  ;;  %vm13608_vm0 = vmmov %vm13605_vm15 }
 0xc28   : > { %v9004_v36 = vsel %vm13606_vm3, %v9003_v28, %v9002_v55 }
 0xc29   : > { %v9021_v56 = vsel %vm8526_vm6, %v9004_v36, 0.0 }
 0xc2b   : > { %v8880_v14 = vpop.f32.mrf.mxu3 }
 0xc2c   : > { %v9009_v2 = vrot.slane %v8880_v14, 5 }
 0xc2e   : > { %v9010_v24 = vsel %vm13601_vm10, %v9009_v2, %v9008_v45 }
 0xc49   : > { %v8903_v15 = vpop.f32.mrf.mxu2 }
 0xc4a   : > { %v9011_v27 = vrot.slane %v8903_v15, 4 }
 0xc4b   : > { %v8926_v38 = vpop.f32.mrf.mxu3 }
 0xc4c   : > { %v9013_v61 = vrot.slane %v8926_v38, 3  ;;  %v9012_v49 = vsel %vm13603_vm2, %v9011_v27, %v9010_v24 }
 0xc4e   : > { %v9014_v18 = vsel %vm13607_vm12, %v9013_v61, %v9012_v49 }
 0xc51   : > { %v8972_v50 = vpop.f32.mrf.mxu2 }
 0xc52   : > { %v9017_v63 = vrot.slane %v8972_v50, 1 }
 0xc53   : > { %v8949_v40 = vpop.f32.mrf.mxu3 }
 0xc54   : > { %v9015_v7 = vrot.slane %v8949_v40, 2 }
 0xc56   : > { %v9016_v21 = vsel %vm13608_vm0, %v9015_v7, %v9014_v18 }
 0xc57   : > { %v9018_v19 = vsel %vm13609_vm14, %v9017_v63, %v9016_v21 }
 0xc58   : > { %v9022_v25 = vsel %vm8526_vm6, %v9018_v19, 0.0 }
 0xc59   : > { %v9023_v31 = vadd.f32 %v9022_v25, %v9021_v56 }
 0xc5b   : > { %v9024_v54 = vrot.slane %v9023_v31, 4 }
 0xc5d   : > { %v9025_v20 = vadd.f32 %v9024_v54, %v9023_v31 }
 0xc5f   : > { %v9026_v47 = vrot.slane %v9025_v20, 2 }
 0xc61   : > { %v9027_v1 = vadd.f32 %v9026_v47, %v9025_v20 }
 0xc63   : > { %v9028_v43 = vrot.slane %v9027_v1, 1 }
 0xc65   : > { %v9029_v9 = vadd.f32 %v9028_v43, %v9027_v1 }
 0xc67   : > { %v9031_v42 = vadd.f32 %v9030_v11, %v9029_v9 }
 0xc69   : > { %9191 = vmatmul.msk.f32.vlgmr.msra.gmra.mxu3 %vm8526_vm6, %v9031_v42 }
 0xcec   : > { %v9055_v10 = vpop.f32.mrf.mxu3 }
 0xced   : > { %v9056_v5 = vadd.f32 %v9055_v10, %v9034_v52 }
 0xcef   : > { %9059 = vst.msk [vmem:[%s324_s1] sm:$0x1] %vm9058_vm7, %v9056_v5 }
 0xcf0   : > { %9338 = shalt.err (!%p9335_p3)
}
 0xcf1   : > { %9230 = dma.vmem_to_hbm [thread:$0]  (%p9500_p5), %s9072_s11, 16, %s9074_s27, %s9061_s28  }
 0xcf2 PF: > { %p9236_p4 = scmp.ge.s32.totalorder %s9373_s12, 2  ;;  %s9085_s18 = sand.u32 1, %s9361_s30  }
 0xcf3   : > { %s9086_s29 = scalar_lea.sflag [#allocation7], %s9085_s18 }
 0xcf4   : > { %p9233_p7 = pnand %p9236_p4, %p9504_p6 }
 0xcf6   : > { %p9234_p8 = pneg %p9233_p7 }
 0xcf8   : > { %9356 = dma.done.wait (%p9234_p8), %s9086_s29, 16  }
 0xcf9   : > { %9358 = vsyncadd (%p9234_p8), %s9086_s29, 4294967280  ;;  %s13610_s17 = sld [smem:[#allocation9_spill]]  ;;  %p19_p9 = scmp.ge.s32.totalorder %s9487_s15, 4  }
 0xcfa   : > { %s13611_s11 = sld [smem:[#allocation10_spill]]  ;;  %s13612_s30 = smov %s9365_s10 }
 0xcfb   : > { %s13614_s12 = smov %s9487_s15  ;;  %21 = sbr.rel (!%p19_p9) target bundleno = 6 (0x6), region = 99 }
 0xcff   : > { %s13613_s10 = smov %s13610_s17 }
 0xd00   :  { %9091 = vsyncpa [#allocation7], 1 }
 0xd01   :  { %9093 = vsyncpa [#allocation7 + $0x1], 1 }

</bundles_post_ra>
